<compile_context>
chip_gen: v6e
topology: v6e:2x2x1
jax: 0.10.0
libtpu: 0.0.40
codegen_flags: <defaults>
</compile_context>

<pallas_src>
import functools

import jax
import jax.numpy as jnp
from jax import lax
from jax.experimental import pallas as pl
from jax.experimental.pallas import tpu as pltpu


def _pick_tile(total, want):
    """Largest power-of-2-shrunk tile <= want dividing `total`; prefer >= 2 grid
    steps (v7x megacore) when that still leaves a multiple-of-8 tile."""
    t = min(want, total)
    while total % t != 0:
        t //= 2
    if total // t < 2 and t % 2 == 0 and (t // 2) >= 8 and total % (t // 2) == 0:
        t //= 2
    return t


# ----------------------------------------------------------------------------
# 1x1 conv over channels == row-tiled matmul + bias
# ----------------------------------------------------------------------------
def _matmul_bias_kernel(x_ref, w_ref, b_ref, o_ref):
    o_ref[...] = (
        jnp.dot(x_ref[...], w_ref[...], preferred_element_type=jnp.float32)
        + b_ref[...]
    )


def matmul_bias(x, w, b, *, tile_m=512):
    M, K = x.shape
    Kw, N = w.shape
    assert K == Kw
    tm = _pick_tile(M, tile_m)
    assert M % tm == 0, (M, tm)
    return pl.pallas_call(
        _matmul_bias_kernel,
        out_shape=jax.ShapeDtypeStruct((M, N), jnp.float32),
        grid=(M // tm,),
        in_specs=[
            pl.BlockSpec((tm, K), lambda i: (i, 0)),
            pl.BlockSpec((K, N), lambda i: (0, 0)),
            pl.BlockSpec((1, N), lambda i: (0, 0)),
        ],
        out_specs=pl.BlockSpec((tm, N), lambda i: (i, 0)),
        compiler_params=pltpu.CompilerParams(
            dimension_semantics=("parallel",)),
    )(x, w, b.reshape(1, N))


# ----------------------------------------------------------------------------
# Flash-style attention over the flattened (batch*h*w*head) token axis.
# q is already scaled by 1/sqrt(dk) (folded into the projection weights).
# q/k/v carry the true (unpadded) per-head dim; block last dim == full dim.
# ----------------------------------------------------------------------------
def _attn_kernel(q_ref, k_ref, v_ref, o_ref, m_sc, l_sc, acc_sc):
    j = pl.program_id(1)

    @pl.when(j == 0)
    def _():
        m_sc[...] = jnp.full_like(m_sc, -jnp.inf)
        l_sc[...] = jnp.zeros_like(l_sc)
        acc_sc[...] = jnp.zeros_like(acc_sc)

    # scores: contract the head dim of q and k -> (TQ, TK)
    s = lax.dot_general(q_ref[...], k_ref[...], (((1,), (1,)), ((), ())),
                        preferred_element_type=jnp.float32)

    m_prev = m_sc[...]
    m_new = jnp.maximum(m_prev, s.max(axis=-1, keepdims=True))
    alpha = jnp.exp(m_prev - m_new)
    p = jnp.exp(s - m_new)
    l_sc[...] = alpha * l_sc[...] + p.sum(axis=-1, keepdims=True)
    acc_sc[...] = alpha * acc_sc[...] + jnp.dot(
        p, v_ref[...], preferred_element_type=jnp.float32)       # K = TK (MXU-fed)
    m_sc[...] = m_new

    @pl.when(j == pl.num_programs(1) - 1)
    def _():
        o_ref[...] = (acc_sc[...] *
                      pl.reciprocal(l_sc[...], approx=True)).astype(o_ref.dtype)


def flash_attention(q, k, v, *, tq=512, tk=256):
    L, dk = q.shape
    Lk, dkk = k.shape
    dv = v.shape[1]
    assert dk == dkk and Lk == v.shape[0]
    tq = _pick_tile(L, tq)
    tk = _pick_tile(Lk, tk)
    assert L % tq == 0 and Lk % tk == 0, (L, tq, Lk, tk)
    return pl.pallas_call(
        _attn_kernel,
        out_shape=jax.ShapeDtypeStruct((L, dv), jnp.float32),
        grid=(L // tq, Lk // tk),
        in_specs=[
            pl.BlockSpec((tq, dk), lambda i, j: (i, 0)),   # q: resident across j
            pl.BlockSpec((tk, dk), lambda i, j: (j, 0)),   # k
            pl.BlockSpec((tk, dv), lambda i, j: (j, 0)),   # v
        ],
        out_specs=pl.BlockSpec((tq, dv), lambda i, j: (i, 0)),
        scratch_shapes=[
            pltpu.VMEM((tq, 1), jnp.float32),    # running max
            pltpu.VMEM((tq, 1), jnp.float32),    # running denom
            pltpu.VMEM((tq, dv), jnp.float32),   # running numerator
        ],
        compiler_params=pltpu.CompilerParams(
            dimension_semantics=("parallel", "arbitrary")),
    )(q, k, v)


# ----------------------------------------------------------------------------
# Parameters (synthetic, deterministic init; matches the 1x1-conv transforms)
# ----------------------------------------------------------------------------
def init_params(key, in_channel, key_filters, value_filters, output_filters):
    ks = jax.random.split(key, 8)

    def lin(k, cin, cout):
        return (jnp.sqrt(1.0 / cin) *
                jax.random.normal(k, (cin, cout))).astype(jnp.float32)

    def bias(k, cout):
        return (0.1 * jax.random.normal(k, (cout,))).astype(jnp.float32)

    return {
        "wq": lin(ks[0], in_channel, key_filters),   "bq": bias(ks[1], key_filters),
        "wk": lin(ks[2], in_channel, key_filters),   "bk": bias(ks[3], key_filters),
        "wv": lin(ks[4], in_channel, value_filters), "bv": bias(ks[5], value_filters),
        "wo": lin(ks[6], value_filters, output_filters),
        "bo": bias(ks[7], output_filters),
    }


# ----------------------------------------------------------------------------
# Forward pass (layer_type='SAME')
# ----------------------------------------------------------------------------
def multi_head_attention_2d_forward(x_nchw, params, *, num_heads):
    B, C, H, W = x_nchw.shape
    x = jnp.transpose(x_nchw, (0, 2, 3, 1)).astype(jnp.float32)   # NHWC (glue)
    M = B * H * W
    x_flat = x.reshape(M, C)

    Kf = params["wq"].shape[1]
    Vf = params["wv"].shape[1]
    Co = params["wo"].shape[1]
    dk = Kf // num_heads
    dv = Vf // num_heads
    scale = float(dk) ** 0.5

    # Fused q/k/v projection: one (M, C) x (C, 2Kf+Vf) matmul in Pallas.
    # 1/scale is folded into the query weight+bias (trace-time, free), and the
    # output width is padded up to a multiple of 128 for unmasked lane-dense stores.
    w_qkv = jnp.concatenate(
        [params["wq"] / scale, params["wk"], params["wv"]], axis=1)
    b_qkv = jnp.concatenate(
        [params["bq"] / scale, params["bk"], params["bv"]], axis=0)
    n_qkv = 2 * Kf + Vf
    n_pad = (-n_qkv) % 128
    if n_pad:
        w_qkv = jnp.pad(w_qkv, ((0, 0), (0, n_pad)))
        b_qkv = jnp.pad(b_qkv, ((0, n_pad),))
    qkv = matmul_bias(x_flat, w_qkv, b_qkv)                       # (M, 256)
    q = qkv[:, :Kf]
    k = qkv[:, Kf:2 * Kf]
    v = qkv[:, 2 * Kf:2 * Kf + Vf]

    # Split heads: (M, nh*d) -> (M*nh, d). Same row order as torch
    # split_heads + flatten -> (b, y, x, head). No lane padding (unpadded head dim).
    qf = q.reshape(M * num_heads, dk)
    kf = k.reshape(M * num_heads, dk)
    vf = v.reshape(M * num_heads, dv)

    # Global attention over all B*H*W*num_heads tokens (matches the flattened
    # torch matmul + softmax(dim=1)); dropout is identity in eval mode.
    o = flash_attention(qf, kf, vf)                               # (M*nh, dv)

    # Merge heads back into channels: contiguous reshape, no copy round-trip.
    o = o.reshape(M, num_heads * dv)

    # Final 1x1 conv (output is tiny; kept unpadded to avoid an extra HBM pass).
    out = matmul_bias(o, params["wo"], params["bo"])              # (M, Co)

    out = out.reshape(B, H, W, Co)
    return jnp.transpose(out, (0, 3, 1, 2))                       # NCHW


if __name__ == "__main__":
    B, C, H, W = 2, 4, 16, 16
    key_filters, value_filters, output_filters, num_heads = 64, 64, 8, 4

    key = jax.random.PRNGKey(0)
    kx, kp = jax.random.split(key)
    x = jax.random.normal(kx, (B, C, H, W), dtype=jnp.float32)
    params = init_params(kp, C, key_filters, value_filters, output_filters)

    fwd = jax.jit(functools.partial(multi_head_attention_2d_forward,
                                    num_heads=num_heads))
    out = jax.block_until_ready(fwd(x, params))

    assert out.shape == (B, output_filters, H, W), out.shape
    assert bool(jnp.all(jnp.isfinite(out)))
    print("KERNEL_OK")
</pallas_src>

<mosaic_0001>
module attributes {stable_mosaic.version = 11 : i64} {
  func.func @_matmul_bias_kernel(%arg0: i32, %arg1: memref<256x4xf32, #tpu.memory_space<vmem>>, %arg2: memref<4x256xf32, #tpu.memory_space<vmem>>, %arg3: memref<1x256xf32, #tpu.memory_space<vmem>>, %arg4: memref<256x256xf32, #tpu.memory_space<vmem>>) attributes {dimension_semantics = [#tpu.dimension_semantics<parallel>], iteration_bounds = array<i64: 2>, scalar_prefetch = 0 : i64, scratch_operands = 0 : i64, tpu.core_type = #tpu.core_type<tc>, window_params = [{transform_indices = @transform_0, window_bounds = array<i64: 256, 4>}, {pipeline_mode = #tpu.pipeline_mode<synchronous>, transform_indices = @transform_1, window_bounds = array<i64: 4, 256>}, {pipeline_mode = #tpu.pipeline_mode<synchronous>, transform_indices = @transform_2, window_bounds = array<i64: 1, 256>}, {transform_indices = @transform_3, window_bounds = array<i64: 256, 256>}]} {
    %c0 = arith.constant 0 : index
    %c0_0 = arith.constant 0 : index
    %0 = vector.load %arg1[%c0, %c0_0] : memref<256x4xf32, #tpu.memory_space<vmem>>, vector<256x4xf32>
    %c0_1 = arith.constant 0 : index
    %c0_2 = arith.constant 0 : index
    %1 = vector.load %arg2[%c0_1, %c0_2] : memref<4x256xf32, #tpu.memory_space<vmem>>, vector<4x256xf32>
    %cst = arith.constant dense<0.000000e+00> : vector<256x256xf32>
    %2 = tpu.matmul %0, %1, %cst {dimension_numbers = #tpu.dot_dimension_numbers<[1], [0], [0], [1], [0, 0, 1, 1], [], []>} : vector<256x4xf32>, vector<4x256xf32>, vector<256x256xf32> -> vector<256x256xf32>
    %c0_3 = arith.constant 0 : index
    %c0_4 = arith.constant 0 : index
    %3 = vector.load %arg3[%c0_3, %c0_4] : memref<1x256xf32, #tpu.memory_space<vmem>>, vector<1x256xf32>
    %4 = vector.broadcast %3 : vector<1x256xf32> to vector<256x256xf32>
    %5 = arith.addf %2, %4 : vector<256x256xf32>
    %c0_5 = arith.constant 0 : index
    %c0_6 = arith.constant 0 : index
    %6 = vector.load %arg4[%c0_5, %c0_6] : memref<256x256xf32, #tpu.memory_space<vmem>>, vector<256x256xf32>
    tpu.vector_store %arg4[%c0_5, %c0_6], %5 {strides = array<i32>} : memref<256x256xf32, #tpu.memory_space<vmem>>, vector<256x256xf32>,
    return
  }
  func.func @transform_0(%arg0: i32) -> (i32, i32) {
    %c0_i32 = arith.constant 0 : i32
    %c0_i32_0 = arith.constant 0 : i32
    return %arg0, %c0_i32 : i32, i32
  }
  func.func @transform_1(%arg0: i32) -> (i32, i32) {
    %c0_i32 = arith.constant 0 : i32
    %c0_i32_0 = arith.constant 0 : i32
    %c0_i32_1 = arith.constant 0 : i32
    return %c0_i32, %c0_i32_0 : i32, i32
  }
  func.func @transform_2(%arg0: i32) -> (i32, i32) {
    %c0_i32 = arith.constant 0 : i32
    %c0_i32_0 = arith.constant 0 : i32
    %c0_i32_1 = arith.constant 0 : i32
    return %c0_i32, %c0_i32_0 : i32, i32
  }
  func.func @transform_3(%arg0: i32) -> (i32, i32) {
    %c0_i32 = arith.constant 0 : i32
    %c0_i32_0 = arith.constant 0 : i32
    return %arg0, %c0_i32 : i32, i32
  }
}

module attributes {stable_mosaic.version = 11 : i64} {
  func.func @_attn_kernel(%arg0: i32, %arg1: i32, %arg2: memref<512x16xf32, #tpu.memory_space<vmem>>, %arg3: memref<256x16xf32, #tpu.memory_space<vmem>>, %arg4: memref<256x16xf32, #tpu.memory_space<vmem>>, %arg5: memref<512x16xf32, #tpu.memory_space<vmem>>, %arg6: memref<512x1xf32, #tpu.memory_space<vmem>>, %arg7: memref<512x1xf32, #tpu.memory_space<vmem>>, %arg8: memref<512x16xf32, #tpu.memory_space<vmem>>) attributes {dimension_semantics = [#tpu.dimension_semantics<parallel>, #tpu.dimension_semantics<arbitrary>], iteration_bounds = array<i64: 4, 8>, scalar_prefetch = 0 : i64, scratch_operands = 3 : i64, tpu.core_type = #tpu.core_type<tc>, window_params = [{transform_indices = @transform_0, window_bounds = array<i64: 512, 16>}, {transform_indices = @transform_1, window_bounds = array<i64: 256, 16>}, {transform_indices = @transform_2, window_bounds = array<i64: 256, 16>}, {transform_indices = @transform_3, window_bounds = array<i64: 512, 16>}]} {
    %c0_i32 = arith.constant 0 : i32
    %0 = arith.cmpi eq, %arg1, %c0_i32 : i32
    %1 = arith.extui %0 : i1 to i32
    %c0_i32_0 = arith.constant 0 : i32
    %2 = arith.cmpi ne, %1, %c0_i32_0 : i32
    scf.if %2 {
      %cst_22 = arith.constant 0xFF800000 : f32
      %32 = vector.broadcast %cst_22 : f32 to vector<512x1xf32>
      %c0_23 = arith.constant 0 : index
      %c0_24 = arith.constant 0 : index
      %33 = vector.load %arg6[%c0_23, %c0_24] : memref<512x1xf32, #tpu.memory_space<vmem>>, vector<512x1xf32>
      tpu.vector_store %arg6[%c0_23, %c0_24], %32 {strides = array<i32>} : memref<512x1xf32, #tpu.memory_space<vmem>>, vector<512x1xf32>,
      %cst_25 = arith.constant 0.000000e+00 : f32
      %34 = vector.broadcast %cst_25 : f32 to vector<512x1xf32>
      %c0_26 = arith.constant 0 : index
      %c0_27 = arith.constant 0 : index
      %35 = vector.load %arg7[%c0_26, %c0_27] : memref<512x1xf32, #tpu.memory_space<vmem>>, vector<512x1xf32>
      tpu.vector_store %arg7[%c0_26, %c0_27], %34 {strides = array<i32>} : memref<512x1xf32, #tpu.memory_space<vmem>>, vector<512x1xf32>,
      %cst_28 = arith.constant 0.000000e+00 : f32
      %36 = vector.broadcast %cst_28 : f32 to vector<512x16xf32>
      %c0_29 = arith.constant 0 : index
      %c0_30 = arith.constant 0 : index
      %37 = vector.load %arg8[%c0_29, %c0_30] : memref<512x16xf32, #tpu.memory_space<vmem>>, vector<512x16xf32>
      tpu.vector_store %arg8[%c0_29, %c0_30], %36 {strides = array<i32>} : memref<512x16xf32, #tpu.memory_space<vmem>>, vector<512x16xf32>,
    } else {
    }
    %c0 = arith.constant 0 : index
    %c0_1 = arith.constant 0 : index
    %3 = vector.load %arg2[%c0, %c0_1] : memref<512x16xf32, #tpu.memory_space<vmem>>, vector<512x16xf32>
    %c0_2 = arith.constant 0 : index
    %c0_3 = arith.constant 0 : index
    %4 = vector.load %arg3[%c0_2, %c0_3] : memref<256x16xf32, #tpu.memory_space<vmem>>, vector<256x16xf32>
    %cst = arith.constant dense<0.000000e+00> : vector<512x256xf32>
    %5 = tpu.matmul %3, %4, %cst {dimension_numbers = #tpu.dot_dimension_numbers<[1], [1], [0], [0], [0, 0, 1, 0], [], []>} : vector<512x16xf32>, vector<256x16xf32>, vector<512x256xf32> -> vector<512x256xf32>
    %c0_4 = arith.constant 0 : index
    %c0_5 = arith.constant 0 : index
    %6 = vector.load %arg6[%c0_4, %c0_5] : memref<512x1xf32, #tpu.memory_space<vmem>>, vector<512x1xf32>
    %cst_6 = arith.constant dense<0xFF800000> : vector<512xf32>
    %7 = vector.multi_reduction <maximumf>, %5, %cst_6 [1] : vector<512x256xf32> to vector<512xf32>
    %8 = vector.shape_cast %7 : vector<512xf32> to vector<512x1xf32>
    %9 = arith.maximumf %6, %8 : vector<512x1xf32>
    %10 = arith.subf %6, %9 : vector<512x1xf32>
    %11 = math.exp %10 : vector<512x1xf32>
    %12 = vector.broadcast %9 : vector<512x1xf32> to vector<512x256xf32>
    %13 = arith.subf %5, %12 : vector<512x256xf32>
    %14 = math.exp %13 : vector<512x256xf32>
    %c0_7 = arith.constant 0 : index
    %c0_8 = arith.constant 0 : index
    %15 = vector.load %arg7[%c0_7, %c0_8] : memref<512x1xf32, #tpu.memory_space<vmem>>, vector<512x1xf32>
    %16 = arith.mulf %11, %15 : vector<512x1xf32>
    %cst_9 = arith.constant dense<0.000000e+00> : vector<512xf32>
    %17 = vector.multi_reduction <add>, %14, %cst_9 [1] : vector<512x256xf32> to vector<512xf32>
    %18 = vector.shape_cast %17 : vector<512xf32> to vector<512x1xf32>
    %19 = arith.addf %16, %18 : vector<512x1xf32>
    %c0_10 = arith.constant 0 : index
    %c0_11 = arith.constant 0 : index
    %20 = vector.load %arg7[%c0_10, %c0_11] : memref<512x1xf32, #tpu.memory_space<vmem>>, vector<512x1xf32>
    tpu.vector_store %arg7[%c0_10, %c0_11], %19 {strides = array<i32>} : memref<512x1xf32, #tpu.memory_space<vmem>>, vector<512x1xf32>,
    %c0_12 = arith.constant 0 : index
    %c0_13 = arith.constant 0 : index
    %21 = vector.load %arg8[%c0_12, %c0_13] : memref<512x16xf32, #tpu.memory_space<vmem>>, vector<512x16xf32>
    %22 = vector.broadcast %11 : vector<512x1xf32> to vector<512x16xf32>
    %23 = arith.mulf %22, %21 : vector<512x16xf32>
    %c0_14 = arith.constant 0 : index
    %c0_15 = arith.constant 0 : index
    %24 = vector.load %arg4[%c0_14, %c0_15] : memref<256x16xf32, #tpu.memory_space<vmem>>, vector<256x16xf32>
    %cst_16 = arith.constant dense<0.000000e+00> : vector<512x16xf32>
    %25 = tpu.matmul %14, %24, %cst_16 {dimension_numbers = #tpu.dot_dimension_numbers<[1], [0], [0], [1], [0, 0, 1, 1], [], []>} : vector<512x256xf32>, vector<256x16xf32>, vector<512x16xf32> -> vector<512x16xf32>
    %26 = arith.addf %23, %25 : vector<512x16xf32>
    %c0_17 = arith.constant 0 : index
    %c0_18 = arith.constant 0 : index
    %27 = vector.load %arg8[%c0_17, %c0_18] : memref<512x16xf32, #tpu.memory_space<vmem>>, vector<512x16xf32>
    tpu.vector_store %arg8[%c0_17, %c0_18], %26 {strides = array<i32>} : memref<512x16xf32, #tpu.memory_space<vmem>>, vector<512x16xf32>,
    %c0_19 = arith.constant 0 : index
    %c0_20 = arith.constant 0 : index
    %28 = vector.load %arg6[%c0_19, %c0_20] : memref<512x1xf32, #tpu.memory_space<vmem>>, vector<512x1xf32>
    tpu.vector_store %arg6[%c0_19, %c0_20], %9 {strides = array<i32>} : memref<512x1xf32, #tpu.memory_space<vmem>>, vector<512x1xf32>,
    %c7_i32 = arith.constant 7 : i32
    %29 = arith.cmpi eq, %arg1, %c7_i32 : i32
    %30 = arith.extui %29 : i1 to i32
    %c0_i32_21 = arith.constant 0 : i32
    %31 = arith.cmpi ne, %30, %c0_i32_21 : i32
    scf.if %31 {
      %c0_22 = arith.constant 0 : index
      %c0_23 = arith.constant 0 : index
      %32 = vector.load %arg8[%c0_22, %c0_23] : memref<512x16xf32, #tpu.memory_space<vmem>>, vector<512x16xf32>
      %c0_24 = arith.constant 0 : index
      %c0_25 = arith.constant 0 : index
      %33 = vector.load %arg7[%c0_24, %c0_25] : memref<512x1xf32, #tpu.memory_space<vmem>>, vector<512x1xf32>
      %34 = tpu.reciprocal %33 {approx = true} : vector<512x1xf32> -> vector<512x1xf32>
      %35 = vector.broadcast %34 : vector<512x1xf32> to vector<512x16xf32>
      %36 = arith.mulf %32, %35 : vector<512x16xf32>
      %c0_26 = arith.constant 0 : index
      %c0_27 = arith.constant 0 : index
      %37 = vector.load %arg5[%c0_26, %c0_27] : memref<512x16xf32, #tpu.memory_space<vmem>>, vector<512x16xf32>
      tpu.vector_store %arg5[%c0_26, %c0_27], %36 {strides = array<i32>} : memref<512x16xf32, #tpu.memory_space<vmem>>, vector<512x16xf32>,
    } else {
    }
    return
  }
  func.func @transform_0(%arg0: i32, %arg1: i32) -> (i32, i32) {
    %c0_i32 = arith.constant 0 : i32
    %c0_i32_0 = arith.constant 0 : i32
    return %arg0, %c0_i32 : i32, i32
  }
  func.func @transform_1(%arg0: i32, %arg1: i32) -> (i32, i32) {
    %c0_i32 = arith.constant 0 : i32
    %c0_i32_0 = arith.constant 0 : i32
    return %arg1, %c0_i32 : i32, i32
  }
  func.func @transform_2(%arg0: i32, %arg1: i32) -> (i32, i32) {
    %c0_i32 = arith.constant 0 : i32
    %c0_i32_0 = arith.constant 0 : i32
    return %arg1, %c0_i32 : i32, i32
  }
  func.func @transform_3(%arg0: i32, %arg1: i32) -> (i32, i32) {
    %c0_i32 = arith.constant 0 : i32
    %c0_i32_0 = arith.constant 0 : i32
    return %arg0, %c0_i32 : i32, i32
  }
}

module attributes {stable_mosaic.version = 11 : i64} {
  func.func @_matmul_bias_kernel(%arg0: i32, %arg1: memref<256x64xf32, #tpu.memory_space<vmem>>, %arg2: memref<64x8xf32, #tpu.memory_space<vmem>>, %arg3: memref<1x8xf32, #tpu.memory_space<vmem>>, %arg4: memref<256x8xf32, #tpu.memory_space<vmem>>) attributes {dimension_semantics = [#tpu.dimension_semantics<parallel>], iteration_bounds = array<i64: 2>, scalar_prefetch = 0 : i64, scratch_operands = 0 : i64, tpu.core_type = #tpu.core_type<tc>, window_params = [{transform_indices = @transform_0, window_bounds = array<i64: 256, 64>}, {pipeline_mode = #tpu.pipeline_mode<synchronous>, transform_indices = @transform_1, window_bounds = array<i64: 64, 8>}, {pipeline_mode = #tpu.pipeline_mode<synchronous>, transform_indices = @transform_2, window_bounds = array<i64: 1, 8>}, {transform_indices = @transform_3, window_bounds = array<i64: 256, 8>}]} {
    %c0 = arith.constant 0 : index
    %c0_0 = arith.constant 0 : index
    %0 = vector.load %arg1[%c0, %c0_0] : memref<256x64xf32, #tpu.memory_space<vmem>>, vector<256x64xf32>
    %c0_1 = arith.constant 0 : index
    %c0_2 = arith.constant 0 : index
    %1 = vector.load %arg2[%c0_1, %c0_2] : memref<64x8xf32, #tpu.memory_space<vmem>>, vector<64x8xf32>
    %cst = arith.constant dense<0.000000e+00> : vector<256x8xf32>
    %2 = tpu.matmul %0, %1, %cst {dimension_numbers = #tpu.dot_dimension_numbers<[1], [0], [0], [1], [0, 0, 1, 1], [], []>} : vector<256x64xf32>, vector<64x8xf32>, vector<256x8xf32> -> vector<256x8xf32>
    %c0_3 = arith.constant 0 : index
    %c0_4 = arith.constant 0 : index
    %3 = vector.load %arg3[%c0_3, %c0_4] : memref<1x8xf32, #tpu.memory_space<vmem>>, vector<1x8xf32>
    %4 = vector.broadcast %3 : vector<1x8xf32> to vector<256x8xf32>
    %5 = arith.addf %2, %4 : vector<256x8xf32>
    %c0_5 = arith.constant 0 : index
    %c0_6 = arith.constant 0 : index
    %6 = vector.load %arg4[%c0_5, %c0_6] : memref<256x8xf32, #tpu.memory_space<vmem>>, vector<256x8xf32>
    tpu.vector_store %arg4[%c0_5, %c0_6], %5 {strides = array<i32>} : memref<256x8xf32, #tpu.memory_space<vmem>>, vector<256x8xf32>,
    return
  }
  func.func @transform_0(%arg0: i32) -> (i32, i32) {
    %c0_i32 = arith.constant 0 : i32
    %c0_i32_0 = arith.constant 0 : i32
    return %arg0, %c0_i32 : i32, i32
  }
  func.func @transform_1(%arg0: i32) -> (i32, i32) {
    %c0_i32 = arith.constant 0 : i32
    %c0_i32_0 = arith.constant 0 : i32
    %c0_i32_1 = arith.constant 0 : i32
    return %c0_i32, %c0_i32_0 : i32, i32
  }
  func.func @transform_2(%arg0: i32) -> (i32, i32) {
    %c0_i32 = arith.constant 0 : i32
    %c0_i32_0 = arith.constant 0 : i32
    %c0_i32_1 = arith.constant 0 : i32
    return %c0_i32, %c0_i32_0 : i32, i32
  }
  func.func @transform_3(%arg0: i32) -> (i32, i32) {
    %c0_i32 = arith.constant 0 : i32
    %c0_i32_0 = arith.constant 0 : i32
    return %arg0, %c0_i32 : i32, i32
  }
}

</mosaic_0001>

<bundles_post_ra>
// kernel: multi_head_attention_2d_forward.3
= control target key start
LH: loop header
LB: loop body
LE: loop exit
PB: predicated region body
PF: predicated region fallthrough
CT: control target
= control target key end

     0   :  { %s792_s12 = smov 0   ;;  %s1051_s0 = inlined_call_operand.vmem [shape: f32[512,4], index: 0, kind: input, shape index: {}]   ;;  %s1052_s1 = inlined_call_operand.vmem [shape: f32[4,256], index: 1, kind: input, shape index: {}]   ;;  %s1053_s2 = inlined_call_operand.vmem [shape: f32[1,256], index: 2, kind: input, shape index: {}]   ;;  %s1054_s3 = inlined_call_operand.vmem [shape: f32[512,256], index: 3, kind: output, shape index: {}]  }
   0x1 LB: > { %s704_s13 = sadd.s32 4294967295, %s769_s12   ;;  %p708_p0 = scmp.ge.s32.totalorder %s769_s12, 1  ;;  %s769_s12 = sphi %s792_s12, %s13_s12  }
   0x2   : > { %p138_p1 = scmp.lt.s32.totalorder %s769_s12, 3 }
   0x4   : > { %p139_p2 = pnand %p708_p0, %p138_p1 }
   0x5   : > { %s709_s16 = sshll.u32 (!%p139_p2), %s704_s13, 5 }
   0x6   : > { %142 = sbr.rel (%p139_p2) target bundleno = 274 (0x112), region = 32  ;;  %p164_p3 = scmp.lt.s32.totalorder (!%p139_p2), %s709_s16, 63 }
   0xb   : > { %v208_v0 = vld [vmem:[%s1052_s1] sm:$0xff]  ;;  %vm320_vm0 = vcmask 1043456   ;;  %v771_v2 = vmov 0.0   ;;  %s1056_s16 = smov (!%p164_p3, %s709_s16), 63  ;;  %vm223_vm1 = vcmask 31744   ;;  %v211_v35 = vlaneseq }
   0xc   : > { %v222_v1 = vcombine.high %v208_v0, %v208_v0  ;;  %389 = vmatprep.mubr.f32.mxu0 %v771_v2  ;;  %485 = vmatprep.mubr.f32.mxu1 %v771_v2  ;;  %s710_s17 = sshll.u32 %s1056_s16, 3  ;;  %v209_v38 = vld [vmem:[%s1053_s2] sm:$0x3]  ;;  %s750_s23 = sshll.u32 %s1056_s16, 4 }
   0xd   : > { %s811_s20 = scalar_lea.vmem %s1051_s0, %s710_s17  ;;  %v212_v36 = vshrl.u32 %v211_v35, 7  ;;  %s918_s26 = scalar_lea.vmem %s1054_s3, %s750_s23 }
   0xe   : > { %714 = vmatprep.subr.msk.mxu0 %vm320_vm0, %v222_v1  ;;  %751 = vmatprep.subr.msk.mxu1 %vm320_vm0, %v222_v1  ;;  %v176_v3 = vld [vmem:[%s811_s20] sm:$0xff]  ;;  %v177_v5 = vld [vmem:[%s811_s20 + $0x8] sm:$0xff]  ;;  %v178_v7 = vld [vmem:[%s811_s20 + $0x10] sm:$0xff] }
   0xf   : > { %715 = vmatpush1.msk.msra.mxu0 %vm320_vm0, %v208_v0  ;;  %752 = vmatpush1.msk.msra.mxu1 %vm320_vm0, %v208_v0  ;;  %v192_v4 = vld [vmem:[%s811_s20 + $0x80] sm:$0xff]  ;;  %v193_v6 = vld [vmem:[%s811_s20 + $0x88] sm:$0xff]  ;;  %v194_v8 = vld [vmem:[%s811_s20 + $0x90] sm:$0xff]  ;;  %v213_v37 = vsub.s32 0, %v212_v36  ;;  %v217_v39 = vsub.s32 1, %v212_v36 }
  0x10   : > { %716 = vmatmul.mubr.msk.f32.vlgmr.msra.gmra.mxu0 %vm223_vm1, %v176_v3  ;;  %732 = vmatmul.mubr.msk.f32.vlgmr.msra.gmra.mxu1 %vm223_vm1, %v192_v4  ;;  %v179_v9 = vld [vmem:[%s811_s20 + $0x18] sm:$0xff]  ;;  %v180_v11 = vld [vmem:[%s811_s20 + $0x20] sm:$0xff]  ;;  %v181_v13 = vld [vmem:[%s811_s20 + $0x28] sm:$0xff] }
  0x11   : > { %395 = vmatprep.mubr.f32.mxu0 %v771_v2  ;;  %491 = vmatprep.mubr.f32.mxu1 %v771_v2  ;;  %v195_v10 = vld [vmem:[%s811_s20 + $0x98] sm:$0xff]  ;;  %v196_v12 = vld [vmem:[%s811_s20 + $0xa0] sm:$0xff]  ;;  %v197_v14 = vld [vmem:[%s811_s20 + $0xa8] sm:$0xff]  ;;  %v911_v40 = vrot.slane %v209_v38, %v213_v37  ;;  %v913_v41 = vrot.slane %v209_v38, %v217_v39 }
  0x12   : > { %v182_v15 = vld [vmem:[%s811_s20 + $0x30] sm:$0xff]  ;;  %v183_v17 = vld [vmem:[%s811_s20 + $0x38] sm:$0xff]  ;;  %v184_v19 = vld [vmem:[%s811_s20 + $0x40] sm:$0xff] }
  0x13   : > { %v198_v16 = vld [vmem:[%s811_s20 + $0xb0] sm:$0xff]  ;;  %v199_v18 = vld [vmem:[%s811_s20 + $0xb8] sm:$0xff]  ;;  %v200_v20 = vld [vmem:[%s811_s20 + $0xc0] sm:$0xff] }
  0x14   : > { %717 = vmatmul.mubr.msk.f32.gmra.mxu0 %vm223_vm1, %v177_v5  ;;  %733 = vmatmul.mubr.msk.f32.gmra.mxu1 %vm223_vm1, %v193_v6  ;;  %v185_v21 = vld [vmem:[%s811_s20 + $0x48] sm:$0xff]  ;;  %v186_v23 = vld [vmem:[%s811_s20 + $0x50] sm:$0xff]  ;;  %v187_v25 = vld [vmem:[%s811_s20 + $0x58] sm:$0xff] }
  0x15   : > { %401 = vmatprep.mubr.f32.mxu0 %v771_v2  ;;  %497 = vmatprep.mubr.f32.mxu1 %v771_v2  ;;  %v201_v22 = vld [vmem:[%s811_s20 + $0xc8] sm:$0xff]  ;;  %v202_v24 = vld [vmem:[%s811_s20 + $0xd0] sm:$0xff]  ;;  %v203_v26 = vld [vmem:[%s811_s20 + $0xd8] sm:$0xff] }
  0x16   : > { %v188_v27 = vld [vmem:[%s811_s20 + $0x60] sm:$0xff]  ;;  %v189_v29 = vld [vmem:[%s811_s20 + $0x68] sm:$0xff]  ;;  %v190_v31 = vld [vmem:[%s811_s20 + $0x70] sm:$0xff] }
  0x17   : > { %v204_v28 = vld [vmem:[%s811_s20 + $0xe0] sm:$0xff]  ;;  %v205_v30 = vld [vmem:[%s811_s20 + $0xe8] sm:$0xff]  ;;  %v206_v32 = vld [vmem:[%s811_s20 + $0xf0] sm:$0xff] }
  0x18   : > { %718 = vmatmul.mubr.msk.f32.gmra.mxu0 %vm223_vm1, %v178_v7  ;;  %734 = vmatmul.mubr.msk.f32.gmra.mxu1 %vm223_vm1, %v194_v8  ;;  %v191_v33 = vld [vmem:[%s811_s20 + $0x78] sm:$0xff] }
  0x19   : > { %407 = vmatprep.mubr.f32.mxu0 %v771_v2  ;;  %503 = vmatprep.mubr.f32.mxu1 %v771_v2  ;;  %v207_v34 = vld [vmem:[%s811_s20 + $0xf8] sm:$0xff] }
  0x1c   : > { %719 = vmatmul.mubr.msk.f32.gmra.mxu0 %vm223_vm1, %v179_v9  ;;  %735 = vmatmul.mubr.msk.f32.gmra.mxu1 %vm223_vm1, %v195_v10 }
  0x1d   : > { %413 = vmatprep.mubr.f32.mxu0 %v771_v2  ;;  %509 = vmatprep.mubr.f32.mxu1 %v771_v2 }
  0x20   : > { %720 = vmatmul.mubr.msk.f32.gmra.mxu0 %vm223_vm1, %v180_v11  ;;  %736 = vmatmul.mubr.msk.f32.gmra.mxu1 %vm223_vm1, %v196_v12 }
  0x21   : > { %419 = vmatprep.mubr.f32.mxu0 %v771_v2  ;;  %515 = vmatprep.mubr.f32.mxu1 %v771_v2 }
  0x24   : > { %721 = vmatmul.mubr.msk.f32.gmra.mxu0 %vm223_vm1, %v181_v13  ;;  %737 = vmatmul.mubr.msk.f32.gmra.mxu1 %vm223_vm1, %v197_v14 }
  0x25   : > { %425 = vmatprep.mubr.f32.mxu0 %v771_v2  ;;  %521 = vmatprep.mubr.f32.mxu1 %v771_v2 }
  0x28   : > { %722 = vmatmul.mubr.msk.f32.gmra.mxu0 %vm223_vm1, %v182_v15  ;;  %738 = vmatmul.mubr.msk.f32.gmra.mxu1 %vm223_vm1, %v198_v16 }
  0x29   : > { %431 = vmatprep.mubr.f32.mxu0 %v771_v2  ;;  %527 = vmatprep.mubr.f32.mxu1 %v771_v2 }
  0x2c   : > { %723 = vmatmul.mubr.msk.f32.gmra.mxu0 %vm223_vm1, %v183_v17  ;;  %739 = vmatmul.mubr.msk.f32.gmra.mxu1 %vm223_vm1, %v199_v18 }
  0x2d   : > { %437 = vmatprep.mubr.f32.mxu0 %v771_v2  ;;  %533 = vmatprep.mubr.f32.mxu1 %v771_v2 }
  0x30   : > { %724 = vmatmul.mubr.msk.f32.gmra.mxu0 %vm223_vm1, %v184_v19  ;;  %740 = vmatmul.mubr.msk.f32.gmra.mxu1 %vm223_vm1, %v200_v20 }
  0x31   : > { %443 = vmatprep.mubr.f32.mxu0 %v771_v2  ;;  %539 = vmatprep.mubr.f32.mxu1 %v771_v2 }
  0x34   : > { %725 = vmatmul.mubr.msk.f32.gmra.mxu0 %vm223_vm1, %v185_v21  ;;  %741 = vmatmul.mubr.msk.f32.gmra.mxu1 %vm223_vm1, %v201_v22 }
  0x35   : > { %449 = vmatprep.mubr.f32.mxu0 %v771_v2  ;;  %545 = vmatprep.mubr.f32.mxu1 %v771_v2 }
  0x38   : > { %726 = vmatmul.mubr.msk.f32.gmra.mxu0 %vm223_vm1, %v186_v23  ;;  %742 = vmatmul.mubr.msk.f32.gmra.mxu1 %vm223_vm1, %v202_v24 }
  0x39   : > { %455 = vmatprep.mubr.f32.mxu0 %v771_v2  ;;  %551 = vmatprep.mubr.f32.mxu1 %v771_v2 }
  0x3c   : > { %727 = vmatmul.mubr.msk.f32.gmra.mxu0 %vm223_vm1, %v187_v25  ;;  %743 = vmatmul.mubr.msk.f32.gmra.mxu1 %vm223_vm1, %v203_v26 }
  0x3d   : > { %461 = vmatprep.mubr.f32.mxu0 %v771_v2  ;;  %557 = vmatprep.mubr.f32.mxu1 %v771_v2 }
  0x40   : > { %728 = vmatmul.mubr.msk.f32.gmra.mxu0 %vm223_vm1, %v188_v27  ;;  %744 = vmatmul.mubr.msk.f32.gmra.mxu1 %vm223_vm1, %v204_v28 }
  0x41   : > { %467 = vmatprep.mubr.f32.mxu0 %v771_v2  ;;  %563 = vmatprep.mubr.f32.mxu1 %v771_v2 }
  0x44   : > { %729 = vmatmul.mubr.msk.f32.gmra.mxu0 %vm223_vm1, %v189_v29  ;;  %745 = vmatmul.mubr.msk.f32.gmra.mxu1 %vm223_vm1, %v205_v30 }
  0x45   : > { %473 = vmatprep.mubr.f32.mxu0 %v771_v2  ;;  %569 = vmatprep.mubr.f32.mxu1 %v771_v2 }
  0x48   : > { %730 = vmatmul.mubr.msk.f32.gmra.mxu0 %vm223_vm1, %v190_v31  ;;  %746 = vmatmul.mubr.msk.f32.gmra.mxu1 %vm223_vm1, %v206_v32 }
  0x49   : > { %479 = vmatprep.mubr.f32.mxu0 %v771_v2  ;;  %575 = vmatprep.mubr.f32.mxu1 %v771_v2 }
  0x4c   : > { %731 = vmatmul.mubr.msk.f32.gmra.mxu0 %vm223_vm1, %v191_v33  ;;  %747 = vmatmul.mubr.msk.f32.gmra.mxu1 %vm223_vm1, %v207_v34 }
  0xd0   : > { %v391_v42 = vpop.f32.mrf.mxu0  ;;  %v487_v43 = vpop.f32.mrf.mxu1 }
  0xd1   : > { %v392_v44 = vadd.f32 %v391_v42, %v911_v40  ;;  %v488_v45 = vadd.f32 %v487_v43, %v911_v40 }
  0xd2   : > { %v393_v46 = vpop.f32.mrf.mxu0  ;;  %v489_v47 = vpop.f32.mrf.mxu1 }
  0xd3   : > { %582 = vst [vmem:[%s918_s26] sm:$0xff] %v392_v44  ;;  %614 = vst [vmem:[%s918_s26 + $0x100] sm:$0xff] %v488_v45  ;;  %v394_v48 = vadd.f32 %v393_v46, %v913_v41  ;;  %v490_v49 = vadd.f32 %v489_v47, %v913_v41 }
  0xd4   : > { %v397_v50 = vpop.f32.mrf.mxu0  ;;  %v493_v51 = vpop.f32.mrf.mxu1 }
  0xd5   : > { %583 = vst [vmem:[%s918_s26 + $0x8] sm:$0xff] %v394_v48  ;;  %615 = vst [vmem:[%s918_s26 + $0x108] sm:$0xff] %v490_v49  ;;  %v398_v52 = vadd.f32 %v397_v50, %v911_v40  ;;  %v494_v53 = vadd.f32 %v493_v51, %v911_v40 }
  0xd6   : > { %v399_v54 = vpop.f32.mrf.mxu0  ;;  %v495_v55 = vpop.f32.mrf.mxu1 }
  0xd7   : > { %584 = vst [vmem:[%s918_s26 + $0x10] sm:$0xff] %v398_v52  ;;  %616 = vst [vmem:[%s918_s26 + $0x110] sm:$0xff] %v494_v53  ;;  %v400_v56 = vadd.f32 %v399_v54, %v913_v41  ;;  %v496_v57 = vadd.f32 %v495_v55, %v913_v41 }
  0xd8   : > { %v403_v58 = vpop.f32.mrf.mxu0  ;;  %v499_v59 = vpop.f32.mrf.mxu1 }
  0xd9   : > { %585 = vst [vmem:[%s918_s26 + $0x18] sm:$0xff] %v400_v56  ;;  %617 = vst [vmem:[%s918_s26 + $0x118] sm:$0xff] %v496_v57  ;;  %v404_v60 = vadd.f32 %v403_v58, %v911_v40  ;;  %v500_v61 = vadd.f32 %v499_v59, %v911_v40 }
  0xda   : > { %v405_v62 = vpop.f32.mrf.mxu0  ;;  %v501_v63 = vpop.f32.mrf.mxu1 }
  0xdb   : > { %586 = vst [vmem:[%s918_s26 + $0x20] sm:$0xff] %v404_v60  ;;  %618 = vst [vmem:[%s918_s26 + $0x120] sm:$0xff] %v500_v61  ;;  %v406_v0 = vadd.f32 %v405_v62, %v913_v41  ;;  %v502_v1 = vadd.f32 %v501_v63, %v913_v41 }
  0xdc   : > { %v409_v2 = vpop.f32.mrf.mxu0  ;;  %v505_v3 = vpop.f32.mrf.mxu1 }
  0xdd   : > { %587 = vst [vmem:[%s918_s26 + $0x28] sm:$0xff] %v406_v0  ;;  %619 = vst [vmem:[%s918_s26 + $0x128] sm:$0xff] %v502_v1  ;;  %v410_v4 = vadd.f32 %v409_v2, %v911_v40  ;;  %v506_v5 = vadd.f32 %v505_v3, %v911_v40 }
  0xde   : > { %v411_v6 = vpop.f32.mrf.mxu0  ;;  %v507_v7 = vpop.f32.mrf.mxu1 }
  0xdf   : > { %588 = vst [vmem:[%s918_s26 + $0x30] sm:$0xff] %v410_v4  ;;  %620 = vst [vmem:[%s918_s26 + $0x130] sm:$0xff] %v506_v5  ;;  %v412_v8 = vadd.f32 %v411_v6, %v913_v41  ;;  %v508_v9 = vadd.f32 %v507_v7, %v913_v41 }
  0xe0   : > { %v415_v10 = vpop.f32.mrf.mxu0  ;;  %v511_v11 = vpop.f32.mrf.mxu1 }
  0xe1   : > { %589 = vst [vmem:[%s918_s26 + $0x38] sm:$0xff] %v412_v8  ;;  %621 = vst [vmem:[%s918_s26 + $0x138] sm:$0xff] %v508_v9  ;;  %v416_v12 = vadd.f32 %v415_v10, %v911_v40  ;;  %v512_v13 = vadd.f32 %v511_v11, %v911_v40 }
  0xe2   : > { %v417_v14 = vpop.f32.mrf.mxu0  ;;  %v513_v15 = vpop.f32.mrf.mxu1 }
  0xe3   : > { %590 = vst [vmem:[%s918_s26 + $0x40] sm:$0xff] %v416_v12  ;;  %622 = vst [vmem:[%s918_s26 + $0x140] sm:$0xff] %v512_v13  ;;  %v418_v16 = vadd.f32 %v417_v14, %v913_v41  ;;  %v514_v17 = vadd.f32 %v513_v15, %v913_v41 }
  0xe4   : > { %v421_v18 = vpop.f32.mrf.mxu0  ;;  %v517_v19 = vpop.f32.mrf.mxu1 }
  0xe5   : > { %591 = vst [vmem:[%s918_s26 + $0x48] sm:$0xff] %v418_v16  ;;  %623 = vst [vmem:[%s918_s26 + $0x148] sm:$0xff] %v514_v17  ;;  %v422_v20 = vadd.f32 %v421_v18, %v911_v40  ;;  %v518_v21 = vadd.f32 %v517_v19, %v911_v40 }
  0xe6   : > { %v423_v22 = vpop.f32.mrf.mxu0  ;;  %v519_v23 = vpop.f32.mrf.mxu1 }
  0xe7   : > { %592 = vst [vmem:[%s918_s26 + $0x50] sm:$0xff] %v422_v20  ;;  %624 = vst [vmem:[%s918_s26 + $0x150] sm:$0xff] %v518_v21  ;;  %v424_v24 = vadd.f32 %v423_v22, %v913_v41  ;;  %v520_v25 = vadd.f32 %v519_v23, %v913_v41 }
  0xe8   : > { %v427_v26 = vpop.f32.mrf.mxu0  ;;  %v523_v27 = vpop.f32.mrf.mxu1 }
  0xe9   : > { %593 = vst [vmem:[%s918_s26 + $0x58] sm:$0xff] %v424_v24  ;;  %625 = vst [vmem:[%s918_s26 + $0x158] sm:$0xff] %v520_v25  ;;  %v428_v28 = vadd.f32 %v427_v26, %v911_v40  ;;  %v524_v29 = vadd.f32 %v523_v27, %v911_v40 }
  0xea   : > { %v429_v30 = vpop.f32.mrf.mxu0  ;;  %v525_v31 = vpop.f32.mrf.mxu1 }
  0xeb   : > { %594 = vst [vmem:[%s918_s26 + $0x60] sm:$0xff] %v428_v28  ;;  %626 = vst [vmem:[%s918_s26 + $0x160] sm:$0xff] %v524_v29  ;;  %v430_v32 = vadd.f32 %v429_v30, %v913_v41  ;;  %v526_v33 = vadd.f32 %v525_v31, %v913_v41 }
  0xec   : > { %v433_v34 = vpop.f32.mrf.mxu0  ;;  %v529_v35 = vpop.f32.mrf.mxu1 }
  0xed   : > { %595 = vst [vmem:[%s918_s26 + $0x68] sm:$0xff] %v430_v32  ;;  %627 = vst [vmem:[%s918_s26 + $0x168] sm:$0xff] %v526_v33  ;;  %v434_v36 = vadd.f32 %v433_v34, %v911_v40  ;;  %v530_v37 = vadd.f32 %v529_v35, %v911_v40 }
  0xee   : > { %v435_v38 = vpop.f32.mrf.mxu0  ;;  %v531_v39 = vpop.f32.mrf.mxu1 }
  0xef   : > { %596 = vst [vmem:[%s918_s26 + $0x70] sm:$0xff] %v434_v36  ;;  %628 = vst [vmem:[%s918_s26 + $0x170] sm:$0xff] %v530_v37  ;;  %v436_v42 = vadd.f32 %v435_v38, %v913_v41  ;;  %v532_v43 = vadd.f32 %v531_v39, %v913_v41 }
  0xf0   : > { %v439_v44 = vpop.f32.mrf.mxu0  ;;  %v535_v45 = vpop.f32.mrf.mxu1 }
  0xf1   : > { %597 = vst [vmem:[%s918_s26 + $0x78] sm:$0xff] %v436_v42  ;;  %629 = vst [vmem:[%s918_s26 + $0x178] sm:$0xff] %v532_v43  ;;  %v440_v46 = vadd.f32 %v439_v44, %v911_v40  ;;  %v536_v47 = vadd.f32 %v535_v45, %v911_v40 }
  0xf2   : > { %v441_v48 = vpop.f32.mrf.mxu0  ;;  %v537_v49 = vpop.f32.mrf.mxu1 }
  0xf3   : > { %598 = vst [vmem:[%s918_s26 + $0x80] sm:$0xff] %v440_v46  ;;  %630 = vst [vmem:[%s918_s26 + $0x180] sm:$0xff] %v536_v47  ;;  %v442_v50 = vadd.f32 %v441_v48, %v913_v41  ;;  %v538_v51 = vadd.f32 %v537_v49, %v913_v41 }
  0xf4   : > { %v445_v52 = vpop.f32.mrf.mxu0  ;;  %v541_v53 = vpop.f32.mrf.mxu1 }
  0xf5   : > { %599 = vst [vmem:[%s918_s26 + $0x88] sm:$0xff] %v442_v50  ;;  %631 = vst [vmem:[%s918_s26 + $0x188] sm:$0xff] %v538_v51  ;;  %v446_v54 = vadd.f32 %v445_v52, %v911_v40  ;;  %v542_v55 = vadd.f32 %v541_v53, %v911_v40 }
  0xf6   : > { %v447_v56 = vpop.f32.mrf.mxu0  ;;  %v543_v57 = vpop.f32.mrf.mxu1 }
  0xf7   : > { %600 = vst [vmem:[%s918_s26 + $0x90] sm:$0xff] %v446_v54  ;;  %632 = vst [vmem:[%s918_s26 + $0x190] sm:$0xff] %v542_v55  ;;  %v448_v58 = vadd.f32 %v447_v56, %v913_v41  ;;  %v544_v59 = vadd.f32 %v543_v57, %v913_v41 }
  0xf8   : > { %v451_v60 = vpop.f32.mrf.mxu0  ;;  %v547_v61 = vpop.f32.mrf.mxu1 }
  0xf9   : > { %601 = vst [vmem:[%s918_s26 + $0x98] sm:$0xff] %v448_v58  ;;  %633 = vst [vmem:[%s918_s26 + $0x198] sm:$0xff] %v544_v59  ;;  %v452_v62 = vadd.f32 %v451_v60, %v911_v40  ;;  %v548_v63 = vadd.f32 %v547_v61, %v911_v40 }
  0xfa   : > { %v453_v0 = vpop.f32.mrf.mxu0  ;;  %v549_v1 = vpop.f32.mrf.mxu1 }
  0xfb   : > { %602 = vst [vmem:[%s918_s26 + $0xa0] sm:$0xff] %v452_v62  ;;  %634 = vst [vmem:[%s918_s26 + $0x1a0] sm:$0xff] %v548_v63  ;;  %v454_v2 = vadd.f32 %v453_v0, %v913_v41  ;;  %v550_v3 = vadd.f32 %v549_v1, %v913_v41 }
  0xfc   : > { %v457_v4 = vpop.f32.mrf.mxu0  ;;  %v553_v5 = vpop.f32.mrf.mxu1 }
  0xfd   : > { %603 = vst [vmem:[%s918_s26 + $0xa8] sm:$0xff] %v454_v2  ;;  %635 = vst [vmem:[%s918_s26 + $0x1a8] sm:$0xff] %v550_v3  ;;  %v458_v6 = vadd.f32 %v457_v4, %v911_v40  ;;  %v554_v7 = vadd.f32 %v553_v5, %v911_v40 }
  0xfe   : > { %v459_v8 = vpop.f32.mrf.mxu0  ;;  %v555_v9 = vpop.f32.mrf.mxu1 }
  0xff   : > { %604 = vst [vmem:[%s918_s26 + $0xb0] sm:$0xff] %v458_v6  ;;  %636 = vst [vmem:[%s918_s26 + $0x1b0] sm:$0xff] %v554_v7  ;;  %v460_v10 = vadd.f32 %v459_v8, %v913_v41  ;;  %v556_v11 = vadd.f32 %v555_v9, %v913_v41 }
 0x100   : > { %v463_v12 = vpop.f32.mrf.mxu0  ;;  %v559_v13 = vpop.f32.mrf.mxu1 }
 0x101   : > { %605 = vst [vmem:[%s918_s26 + $0xb8] sm:$0xff] %v460_v10  ;;  %637 = vst [vmem:[%s918_s26 + $0x1b8] sm:$0xff] %v556_v11  ;;  %v464_v14 = vadd.f32 %v463_v12, %v911_v40  ;;  %v560_v15 = vadd.f32 %v559_v13, %v911_v40 }
 0x102   : > { %v465_v16 = vpop.f32.mrf.mxu0  ;;  %v561_v17 = vpop.f32.mrf.mxu1 }
 0x103   : > { %606 = vst [vmem:[%s918_s26 + $0xc0] sm:$0xff] %v464_v14  ;;  %638 = vst [vmem:[%s918_s26 + $0x1c0] sm:$0xff] %v560_v15  ;;  %v466_v18 = vadd.f32 %v465_v16, %v913_v41  ;;  %v562_v19 = vadd.f32 %v561_v17, %v913_v41 }
 0x104   : > { %v469_v20 = vpop.f32.mrf.mxu0  ;;  %v565_v21 = vpop.f32.mrf.mxu1 }
 0x105   : > { %607 = vst [vmem:[%s918_s26 + $0xc8] sm:$0xff] %v466_v18  ;;  %639 = vst [vmem:[%s918_s26 + $0x1c8] sm:$0xff] %v562_v19  ;;  %v470_v22 = vadd.f32 %v469_v20, %v911_v40  ;;  %v566_v23 = vadd.f32 %v565_v21, %v911_v40 }
 0x106   : > { %v471_v24 = vpop.f32.mrf.mxu0  ;;  %v567_v25 = vpop.f32.mrf.mxu1 }
 0x107   : > { %608 = vst [vmem:[%s918_s26 + $0xd0] sm:$0xff] %v470_v22  ;;  %640 = vst [vmem:[%s918_s26 + $0x1d0] sm:$0xff] %v566_v23  ;;  %v472_v26 = vadd.f32 %v471_v24, %v913_v41  ;;  %v568_v27 = vadd.f32 %v567_v25, %v913_v41 }
 0x108   : > { %v475_v28 = vpop.f32.mrf.mxu0  ;;  %v571_v29 = vpop.f32.mrf.mxu1 }
 0x109   : > { %609 = vst [vmem:[%s918_s26 + $0xd8] sm:$0xff] %v472_v26  ;;  %641 = vst [vmem:[%s918_s26 + $0x1d8] sm:$0xff] %v568_v27  ;;  %v476_v30 = vadd.f32 %v475_v28, %v911_v40  ;;  %v572_v31 = vadd.f32 %v571_v29, %v911_v40 }
 0x10a   : > { %v477_v32 = vpop.f32.mrf.mxu0  ;;  %v573_v33 = vpop.f32.mrf.mxu1 }
 0x10b   : > { %610 = vst [vmem:[%s918_s26 + $0xe0] sm:$0xff] %v476_v30  ;;  %642 = vst [vmem:[%s918_s26 + $0x1e0] sm:$0xff] %v572_v31  ;;  %v478_v34 = vadd.f32 %v477_v32, %v913_v41  ;;  %v574_v35 = vadd.f32 %v573_v33, %v913_v41 }
 0x10c   : > { %v481_v36 = vpop.f32.mrf.mxu0  ;;  %v577_v37 = vpop.f32.mrf.mxu1 }
 0x10d   : > { %611 = vst [vmem:[%s918_s26 + $0xe8] sm:$0xff] %v478_v34  ;;  %643 = vst [vmem:[%s918_s26 + $0x1e8] sm:$0xff] %v574_v35  ;;  %v482_v38 = vadd.f32 %v481_v36, %v911_v40  ;;  %v578_v39 = vadd.f32 %v577_v37, %v911_v40 }
 0x10e   : > { %v483_v42 = vpop.f32.mrf.mxu0  ;;  %v579_v43 = vpop.f32.mrf.mxu1 }
 0x10f   : > { %612 = vst [vmem:[%s918_s26 + $0xf0] sm:$0xff] %v482_v38  ;;  %644 = vst [vmem:[%s918_s26 + $0x1f0] sm:$0xff] %v578_v39  ;;  %v484_v44 = vadd.f32 %v483_v42, %v913_v41  ;;  %v580_v45 = vadd.f32 %v579_v43, %v913_v41 }
 0x111   : > { %613 = vst [vmem:[%s918_s26 + $0xf8] sm:$0xff] %v484_v44  ;;  %645 = vst [vmem:[%s918_s26 + $0x1f8] sm:$0xff] %v580_v45 }
 0x112 PF: > { %s13_s12 = sadd.s32 1, %s769_s12  }
 0x113   : > { %p10_p4 = scmp.ge.s32.totalorder %s13_s12, 4  }
 0x115   :  { %12 = sbr.rel (!%p10_p4) target bundleno = 1 (0x1), region = 62 }

// kernel: multi_head_attention_2d_forward.5
= control target key start
LH: loop header
LB: loop body
LE: loop exit
PB: predicated region body
PF: predicated region fallthrough
CT: control target
= control target key end

     0   :  { %s832_s12 = smov 0   ;;  %s1049_s0 = inlined_call_operand.vmem [shape: f32[512,64], index: 0, kind: input, shape index: {}]   ;;  %s1050_s1 = inlined_call_operand.vmem [shape: f32[64,8], index: 1, kind: input, shape index: {}]   ;;  %s1051_s2 = inlined_call_operand.vmem [shape: f32[1,8], index: 2, kind: input, shape index: {}]   ;;  %s1052_s3 = inlined_call_operand.vmem [shape: f32[512,8], index: 3, kind: output, shape index: {}]  }
   0x1 LB: > { %s632_s13 = sadd.s32 4294967295, %s810_s12   ;;  %p636_p0 = scmp.ge.s32.totalorder %s810_s12, 1  ;;  %s810_s12 = sphi %s832_s12, %s13_s12  }
   0x2   : > { %p138_p1 = scmp.lt.s32.totalorder %s810_s12, 3 }
   0x4   : > { %p139_p2 = pnand %p636_p0, %p138_p1 }
   0x5   : > { %s637_s18 = sshll.u32 (!%p139_p2), %s632_s13, 5 }
   0x6   : > { %142 = sbr.rel (%p139_p2) target bundleno = 255 (0xff), region = 32  ;;  %p163_p3 = scmp.lt.s32.totalorder (!%p139_p2), %s637_s18, 63 }
   0xb   : > { %v213_v0 = vld [vmem:[%s1050_s1 + $0x38] sm:$0xff]  ;;  %v212_v1 = vld [vmem:[%s1050_s1 + $0x30] sm:$0xff]  ;;  %v211_v2 = vld [vmem:[%s1050_s1 + $0x28] sm:$0xff]  ;;  %s1054_s18 = smov (!%p163_p3, %s637_s18), 63  ;;  %vm221_vm0 = vcmask 523264   ;;  %vm543_vm1 = vcmask 64512  }
   0xc   : > { %716 = vmatprep.subr.mxu0 %v213_v0  ;;  %780 = vmatprep.subr.mxu1 %v213_v0  ;;  %v210_v3 = vld [vmem:[%s1050_s1 + $0x20] sm:$0xff]  ;;  %v209_v4 = vld [vmem:[%s1050_s1 + $0x18] sm:$0xff]  ;;  %v208_v5 = vld [vmem:[%s1050_s1 + $0x10] sm:$0xff]  ;;  %s638_s27 = sshll.u32 %s1054_s18, 3 }
   0xd   : > { %717 = vmatpush3.msra.mxu0 %v213_v0  ;;  %788 = vmatpush3.msra.mxu1 %v213_v0  ;;  %v207_v6 = vld [vmem:[%s1050_s1 + $0x8] sm:$0xff]  ;;  %s869_s5 = scalar_lea.vmem %s1049_s0, %s638_s27  ;;  %v206_v7 = vld [vmem:[%s1050_s1] sm:$0xff]  ;;  %s948_s13 = scalar_lea.vmem %s1052_s3, %s638_s27 }
   0xe   : > { %718 = vmatprep.subr.mxu0 %v212_v1  ;;  %781 = vmatprep.subr.mxu1 %v212_v1  ;;  %v174_v8 = vld [vmem:[%s869_s5] sm:$0xff]  ;;  %v175_v10 = vld [vmem:[%s869_s5 + $0x8] sm:$0xff]  ;;  %v176_v12 = vld [vmem:[%s869_s5 + $0x10] sm:$0xff] }
   0xf   : > { %719 = vmatpush3.msra.mxu0 %v212_v1  ;;  %789 = vmatpush3.msra.mxu1 %v212_v1  ;;  %v190_v9 = vld [vmem:[%s869_s5 + $0x80] sm:$0xff]  ;;  %v191_v11 = vld [vmem:[%s869_s5 + $0x88] sm:$0xff]  ;;  %v192_v13 = vld [vmem:[%s869_s5 + $0x90] sm:$0xff] }
  0x10   : > { %720 = vmatprep.subr.mxu0 %v211_v2  ;;  %782 = vmatprep.subr.mxu1 %v211_v2  ;;  %v177_v14 = vld [vmem:[%s869_s5 + $0x18] sm:$0xff]  ;;  %v178_v16 = vld [vmem:[%s869_s5 + $0x20] sm:$0xff]  ;;  %v179_v18 = vld [vmem:[%s869_s5 + $0x28] sm:$0xff] }
  0x11   : > { %721 = vmatpush3.msra.mxu0 %v211_v2  ;;  %790 = vmatpush3.msra.mxu1 %v211_v2  ;;  %v193_v15 = vld [vmem:[%s869_s5 + $0x98] sm:$0xff]  ;;  %v194_v17 = vld [vmem:[%s869_s5 + $0xa0] sm:$0xff]  ;;  %v195_v19 = vld [vmem:[%s869_s5 + $0xa8] sm:$0xff] }
  0x12   : > { %722 = vmatprep.subr.mxu0 %v210_v3  ;;  %783 = vmatprep.subr.mxu1 %v210_v3  ;;  %v180_v20 = vld [vmem:[%s869_s5 + $0x30] sm:$0xff]  ;;  %v181_v22 = vld [vmem:[%s869_s5 + $0x38] sm:$0xff]  ;;  %v182_v24 = vld [vmem:[%s869_s5 + $0x40] sm:$0xff] }
  0x13   : > { %723 = vmatpush3.msra.mxu0 %v210_v3  ;;  %791 = vmatpush3.msra.mxu1 %v210_v3  ;;  %v196_v21 = vld [vmem:[%s869_s5 + $0xb0] sm:$0xff]  ;;  %v197_v23 = vld [vmem:[%s869_s5 + $0xb8] sm:$0xff]  ;;  %v198_v25 = vld [vmem:[%s869_s5 + $0xc0] sm:$0xff] }
  0x14   : > { %724 = vmatprep.subr.mxu0 %v209_v4  ;;  %784 = vmatprep.subr.mxu1 %v209_v4  ;;  %v183_v26 = vld [vmem:[%s869_s5 + $0x48] sm:$0xff]  ;;  %v184_v28 = vld [vmem:[%s869_s5 + $0x50] sm:$0xff]  ;;  %v185_v30 = vld [vmem:[%s869_s5 + $0x58] sm:$0xff] }
  0x15   : > { %725 = vmatpush3.msra.mxu0 %v209_v4  ;;  %792 = vmatpush3.msra.mxu1 %v209_v4  ;;  %v199_v27 = vld [vmem:[%s869_s5 + $0xc8] sm:$0xff]  ;;  %v200_v29 = vld [vmem:[%s869_s5 + $0xd0] sm:$0xff]  ;;  %v201_v31 = vld [vmem:[%s869_s5 + $0xd8] sm:$0xff] }
  0x16   : > { %726 = vmatprep.subr.mxu0 %v208_v5  ;;  %785 = vmatprep.subr.mxu1 %v208_v5  ;;  %v186_v32 = vld [vmem:[%s869_s5 + $0x60] sm:$0xff]  ;;  %v187_v34 = vld [vmem:[%s869_s5 + $0x68] sm:$0xff]  ;;  %v188_v36 = vld [vmem:[%s869_s5 + $0x70] sm:$0xff] }
  0x17   : > { %727 = vmatpush3.msra.mxu0 %v208_v5  ;;  %793 = vmatpush3.msra.mxu1 %v208_v5  ;;  %v202_v33 = vld [vmem:[%s869_s5 + $0xe0] sm:$0xff]  ;;  %v203_v35 = vld [vmem:[%s869_s5 + $0xe8] sm:$0xff]  ;;  %v204_v37 = vld [vmem:[%s869_s5 + $0xf0] sm:$0xff] }
  0x18   : > { %728 = vmatprep.subr.mxu0 %v207_v6  ;;  %786 = vmatprep.subr.mxu1 %v207_v6  ;;  %v189_v38 = vld [vmem:[%s869_s5 + $0x78] sm:$0xff]  ;;  %v941_v40 = vld [vmem:[%s1051_s2] ss:$0 sm:$0xff] }
  0x19   : > { %729 = vmatpush3.msra.mxu0 %v207_v6  ;;  %794 = vmatpush3.msra.mxu1 %v207_v6  ;;  %v205_v39 = vld [vmem:[%s869_s5 + $0xf8] sm:$0xff] }
  0x1a   : > { %730 = vmatprep.subr.mxu0 %v206_v7  ;;  %787 = vmatprep.subr.mxu1 %v206_v7 }
  0x1b   : > { %731 = vmatpush3.msra.mxu0 %v206_v7  ;;  %795 = vmatpush3.msra.mxu1 %v206_v7 }
  0x1c   : > { %732 = vmatprep.mubr.msk.f32.mxu0 %vm221_vm0, %v174_v8  ;;  %756 = vmatprep.mubr.msk.f32.mxu1 %vm221_vm0, %v190_v9 }
  0x1d   : > { %733 = vmatmul.mubr.msk.f32.vlgmr.msra.gmra.mxu0 %vm221_vm0, %v175_v10  ;;  %757 = vmatmul.mubr.msk.f32.vlgmr.msra.gmra.mxu1 %vm221_vm0, %v191_v11 }
  0x1e   : > { %735 = vmatprep.mubr.msk.f32.mxu0 %vm221_vm0, %v176_v12  ;;  %759 = vmatprep.mubr.msk.f32.mxu1 %vm221_vm0, %v192_v13 }
  0x21   : > { %736 = vmatmul.mubr.msk.f32.gmra.mxu0 %vm221_vm0, %v177_v14  ;;  %760 = vmatmul.mubr.msk.f32.gmra.mxu1 %vm221_vm0, %v193_v15 }
  0x22   : > { %738 = vmatprep.mubr.msk.f32.mxu0 %vm221_vm0, %v178_v16  ;;  %762 = vmatprep.mubr.msk.f32.mxu1 %vm221_vm0, %v194_v17 }
  0x25   : > { %739 = vmatmul.mubr.msk.f32.gmra.mxu0 %vm221_vm0, %v179_v18  ;;  %763 = vmatmul.mubr.msk.f32.gmra.mxu1 %vm221_vm0, %v195_v19 }
  0x26   : > { %741 = vmatprep.mubr.msk.f32.mxu0 %vm221_vm0, %v180_v20  ;;  %765 = vmatprep.mubr.msk.f32.mxu1 %vm221_vm0, %v196_v21 }
  0x29   : > { %742 = vmatmul.mubr.msk.f32.gmra.mxu0 %vm221_vm0, %v181_v22  ;;  %766 = vmatmul.mubr.msk.f32.gmra.mxu1 %vm221_vm0, %v197_v23 }
  0x2a   : > { %744 = vmatprep.mubr.msk.f32.mxu0 %vm221_vm0, %v182_v24  ;;  %768 = vmatprep.mubr.msk.f32.mxu1 %vm221_vm0, %v198_v25 }
  0x2d   : > { %745 = vmatmul.mubr.msk.f32.gmra.mxu0 %vm221_vm0, %v183_v26  ;;  %769 = vmatmul.mubr.msk.f32.gmra.mxu1 %vm221_vm0, %v199_v27 }
  0x2e   : > { %747 = vmatprep.mubr.msk.f32.mxu0 %vm221_vm0, %v184_v28  ;;  %771 = vmatprep.mubr.msk.f32.mxu1 %vm221_vm0, %v200_v29 }
  0x31   : > { %748 = vmatmul.mubr.msk.f32.gmra.mxu0 %vm221_vm0, %v185_v30  ;;  %772 = vmatmul.mubr.msk.f32.gmra.mxu1 %vm221_vm0, %v201_v31 }
  0x32   : > { %750 = vmatprep.mubr.msk.f32.mxu0 %vm221_vm0, %v186_v32  ;;  %774 = vmatprep.mubr.msk.f32.mxu1 %vm221_vm0, %v202_v33 }
  0x35   : > { %751 = vmatmul.mubr.msk.f32.gmra.mxu0 %vm221_vm0, %v187_v34  ;;  %775 = vmatmul.mubr.msk.f32.gmra.mxu1 %vm221_vm0, %v203_v35 }
  0x36   : > { %753 = vmatprep.mubr.msk.f32.mxu0 %vm221_vm0, %v188_v36  ;;  %777 = vmatprep.mubr.msk.f32.mxu1 %vm221_vm0, %v204_v37 }
  0x39   : > { %754 = vmatmul.mubr.msk.f32.gmra.mxu0 %vm221_vm0, %v189_v38  ;;  %778 = vmatmul.mubr.msk.f32.gmra.mxu1 %vm221_vm0, %v205_v39 }
  0xdd   : > { %v734_v41 = vpop.f32.mrf.mxu0  ;;  %v758_v42 = vpop.f32.mrf.mxu1 }
  0xde   : > { %v390_v43 = vadd.f32 %v734_v41, %v941_v40  ;;  %v470_v44 = vadd.f32 %v758_v42, %v941_v40 }
  0xdf   : > { %v384_v45 = vpop.f32.mrf.mxu0  ;;  %v464_v46 = vpop.f32.mrf.mxu1 }
  0xe0   : > { %545 = vst.msk [vmem:[%s948_s13 + $0x8] sm:$0xff] %vm543_vm1, %v390_v43  ;;  %561 = vst.msk [vmem:[%s948_s13 + $0x88] sm:$0xff] %vm543_vm1, %v470_v44  ;;  %v385_v47 = vadd.f32 %v941_v40, %v384_v45  ;;  %v465_v48 = vadd.f32 %v941_v40, %v464_v46 }
  0xe1   : > { %v737_v49 = vpop.f32.mrf.mxu0  ;;  %v761_v50 = vpop.f32.mrf.mxu1 }
  0xe2   : > { %544 = vst.msk [vmem:[%s948_s13] sm:$0xff] %vm543_vm1, %v385_v47  ;;  %560 = vst.msk [vmem:[%s948_s13 + $0x80] sm:$0xff] %vm543_vm1, %v465_v48  ;;  %v400_v51 = vadd.f32 %v737_v49, %v941_v40  ;;  %v480_v52 = vadd.f32 %v761_v50, %v941_v40 }
  0xe3   : > { %v394_v53 = vpop.f32.mrf.mxu0  ;;  %v474_v54 = vpop.f32.mrf.mxu1 }
  0xe4   : > { %547 = vst.msk [vmem:[%s948_s13 + $0x18] sm:$0xff] %vm543_vm1, %v400_v51  ;;  %563 = vst.msk [vmem:[%s948_s13 + $0x98] sm:$0xff] %vm543_vm1, %v480_v52  ;;  %v395_v55 = vadd.f32 %v941_v40, %v394_v53  ;;  %v475_v56 = vadd.f32 %v941_v40, %v474_v54 }
  0xe5   : > { %v740_v57 = vpop.f32.mrf.mxu0  ;;  %v764_v58 = vpop.f32.mrf.mxu1 }
  0xe6   : > { %546 = vst.msk [vmem:[%s948_s13 + $0x10] sm:$0xff] %vm543_vm1, %v395_v55  ;;  %562 = vst.msk [vmem:[%s948_s13 + $0x90] sm:$0xff] %vm543_vm1, %v475_v56  ;;  %v410_v59 = vadd.f32 %v740_v57, %v941_v40  ;;  %v490_v60 = vadd.f32 %v764_v58, %v941_v40 }
  0xe7   : > { %v404_v61 = vpop.f32.mrf.mxu0  ;;  %v484_v62 = vpop.f32.mrf.mxu1 }
  0xe8   : > { %549 = vst.msk [vmem:[%s948_s13 + $0x28] sm:$0xff] %vm543_vm1, %v410_v59  ;;  %565 = vst.msk [vmem:[%s948_s13 + $0xa8] sm:$0xff] %vm543_vm1, %v490_v60  ;;  %v405_v63 = vadd.f32 %v941_v40, %v404_v61  ;;  %v485_v0 = vadd.f32 %v941_v40, %v484_v62 }
  0xe9   : > { %v743_v1 = vpop.f32.mrf.mxu0  ;;  %v767_v2 = vpop.f32.mrf.mxu1 }
  0xea   : > { %548 = vst.msk [vmem:[%s948_s13 + $0x20] sm:$0xff] %vm543_vm1, %v405_v63  ;;  %564 = vst.msk [vmem:[%s948_s13 + $0xa0] sm:$0xff] %vm543_vm1, %v485_v0  ;;  %v420_v3 = vadd.f32 %v743_v1, %v941_v40  ;;  %v500_v4 = vadd.f32 %v767_v2, %v941_v40 }
  0xeb   : > { %v414_v5 = vpop.f32.mrf.mxu0  ;;  %v494_v6 = vpop.f32.mrf.mxu1 }
  0xec   : > { %551 = vst.msk [vmem:[%s948_s13 + $0x38] sm:$0xff] %vm543_vm1, %v420_v3  ;;  %567 = vst.msk [vmem:[%s948_s13 + $0xb8] sm:$0xff] %vm543_vm1, %v500_v4  ;;  %v415_v7 = vadd.f32 %v941_v40, %v414_v5  ;;  %v495_v8 = vadd.f32 %v941_v40, %v494_v6 }
  0xed   : > { %v746_v9 = vpop.f32.mrf.mxu0  ;;  %v770_v10 = vpop.f32.mrf.mxu1 }
  0xee   : > { %550 = vst.msk [vmem:[%s948_s13 + $0x30] sm:$0xff] %vm543_vm1, %v415_v7  ;;  %566 = vst.msk [vmem:[%s948_s13 + $0xb0] sm:$0xff] %vm543_vm1, %v495_v8  ;;  %v430_v11 = vadd.f32 %v746_v9, %v941_v40  ;;  %v510_v12 = vadd.f32 %v770_v10, %v941_v40 }
  0xef   : > { %v424_v13 = vpop.f32.mrf.mxu0  ;;  %v504_v14 = vpop.f32.mrf.mxu1 }
  0xf0   : > { %553 = vst.msk [vmem:[%s948_s13 + $0x48] sm:$0xff] %vm543_vm1, %v430_v11  ;;  %569 = vst.msk [vmem:[%s948_s13 + $0xc8] sm:$0xff] %vm543_vm1, %v510_v12  ;;  %v425_v15 = vadd.f32 %v941_v40, %v424_v13  ;;  %v505_v16 = vadd.f32 %v941_v40, %v504_v14 }
  0xf1   : > { %v749_v17 = vpop.f32.mrf.mxu0  ;;  %v773_v18 = vpop.f32.mrf.mxu1 }
  0xf2   : > { %552 = vst.msk [vmem:[%s948_s13 + $0x40] sm:$0xff] %vm543_vm1, %v425_v15  ;;  %568 = vst.msk [vmem:[%s948_s13 + $0xc0] sm:$0xff] %vm543_vm1, %v505_v16  ;;  %v440_v19 = vadd.f32 %v749_v17, %v941_v40  ;;  %v520_v20 = vadd.f32 %v773_v18, %v941_v40 }
  0xf3   : > { %v434_v21 = vpop.f32.mrf.mxu0  ;;  %v514_v22 = vpop.f32.mrf.mxu1 }
  0xf4   : > { %555 = vst.msk [vmem:[%s948_s13 + $0x58] sm:$0xff] %vm543_vm1, %v440_v19  ;;  %571 = vst.msk [vmem:[%s948_s13 + $0xd8] sm:$0xff] %vm543_vm1, %v520_v20  ;;  %v435_v23 = vadd.f32 %v941_v40, %v434_v21  ;;  %v515_v24 = vadd.f32 %v941_v40, %v514_v22 }
  0xf5   : > { %v752_v25 = vpop.f32.mrf.mxu0  ;;  %v776_v26 = vpop.f32.mrf.mxu1 }
  0xf6   : > { %554 = vst.msk [vmem:[%s948_s13 + $0x50] sm:$0xff] %vm543_vm1, %v435_v23  ;;  %570 = vst.msk [vmem:[%s948_s13 + $0xd0] sm:$0xff] %vm543_vm1, %v515_v24  ;;  %v450_v27 = vadd.f32 %v752_v25, %v941_v40  ;;  %v530_v28 = vadd.f32 %v776_v26, %v941_v40 }
  0xf7   : > { %v444_v29 = vpop.f32.mrf.mxu0  ;;  %v524_v30 = vpop.f32.mrf.mxu1 }
  0xf8   : > { %557 = vst.msk [vmem:[%s948_s13 + $0x68] sm:$0xff] %vm543_vm1, %v450_v27  ;;  %573 = vst.msk [vmem:[%s948_s13 + $0xe8] sm:$0xff] %vm543_vm1, %v530_v28  ;;  %v445_v31 = vadd.f32 %v941_v40, %v444_v29  ;;  %v525_v32 = vadd.f32 %v941_v40, %v524_v30 }
  0xf9   : > { %v755_v33 = vpop.f32.mrf.mxu0  ;;  %v779_v34 = vpop.f32.mrf.mxu1 }
  0xfa   : > { %556 = vst.msk [vmem:[%s948_s13 + $0x60] sm:$0xff] %vm543_vm1, %v445_v31  ;;  %572 = vst.msk [vmem:[%s948_s13 + $0xe0] sm:$0xff] %vm543_vm1, %v525_v32  ;;  %v460_v35 = vadd.f32 %v755_v33, %v941_v40  ;;  %v540_v36 = vadd.f32 %v779_v34, %v941_v40 }
  0xfb   : > { %v454_v37 = vpop.f32.mrf.mxu0  ;;  %v534_v38 = vpop.f32.mrf.mxu1 }
  0xfc   : > { %559 = vst.msk [vmem:[%s948_s13 + $0x78] sm:$0xff] %vm543_vm1, %v460_v35  ;;  %575 = vst.msk [vmem:[%s948_s13 + $0xf8] sm:$0xff] %vm543_vm1, %v540_v36  ;;  %v455_v39 = vadd.f32 %v941_v40, %v454_v37  ;;  %v535_v41 = vadd.f32 %v941_v40, %v534_v38 }
  0xfe   : > { %558 = vst.msk [vmem:[%s948_s13 + $0x70] sm:$0xff] %vm543_vm1, %v455_v39  ;;  %574 = vst.msk [vmem:[%s948_s13 + $0xf0] sm:$0xff] %vm543_vm1, %v535_v41 }
  0xff PF: > { %s13_s12 = sadd.s32 1, %s810_s12  }
 0x100   : > { %p10_p4 = scmp.ge.s32.totalorder %s13_s12, 4  }
 0x102   :  { %12 = sbr.rel (!%p10_p4) target bundleno = 1 (0x1), region = 62 }

// kernel: multi_head_attention_2d_forward.4
= control target key start
LH: loop header
LB: loop body
LE: loop exit
PB: predicated region body
PF: predicated region fallthrough
CT: control target
= control target key end

     0   :  { %s5619_s12 = smov 0   ;;  %s5621_s13 = smov 0   ;;  %s8553_s0 = inlined_call_operand.vmem [shape: f32[2048,16], index: 0, kind: input, shape index: {}]   ;;  %s8554_s1 = inlined_call_operand.vmem [shape: f32[2048,16], index: 1, kind: input, shape index: {}]   ;;  %s8555_s2 = inlined_call_operand.vmem [shape: f32[2048,16], index: 2, kind: input, shape index: {}]   ;;  %s8556_s3 = inlined_call_operand.vmem [shape: f32[2048,16], index: 3, kind: output, shape index: {}]  }
   0x1   :  { %s5623_s14 = smov 0   ;;  %s5625_s15 = smov 0  }
   0x2   :  { %s5627_s16 = smov 0  }
   0x3 LB: > { %s22_s17 = sadd.s32 1, %s5584_s14  ;;  %s25_s18 = sadd.s32 1, %s5588_s15  ;;  %s5592_s16 = sphi %s5627_s16, %s13_s16   ;;  %s5588_s15 = sphi %s5625_s15, %s9401_s15   ;;  %s5584_s14 = sphi %s5623_s14, %s9400_s14   ;;  %s5580_s13 = sphi %s5621_s13, %s9399_s13   ;;  %s5576_s12 = sphi %s5619_s12, %s9398_s12  }
   0x4   : > { %p23_p0 = scmp.ge.s32.totalorder %s22_s17, 8  ;;  %p4724_p1 = scmp.ge.s32.totalorder %s5592_s16, 1 }
   0x5   : > { %p172_p2 = scmp.lt.s32.totalorder %s5592_s16, 33 }
   0x6   : > { %s9403_s17 = smov (%p23_p0, %s22_s17), 0  ;;  %s9405_s18 = smov (!%p23_p0, %s25_s18), %s5588_s15 }
   0x7   : > { %p173_p3 = pnand %p4724_p1, %p172_p2  ;;  %p27_p4 = scmp.ge.s32.totalorder %s9405_s18, 4 }
   0x9   : > { %s9407_s18 = smov (%p27_p4, %s9405_s18), 0  ;;  %176 = sbr.rel (%p173_p3) target bundleno = 2693 (0xa85), region = 32 }
   0xe   : > { %s4725_s19 = sshll.u32 %s5580_s13, 6  ;;  %s4727_s20 = sshll.u32 %s5576_s12, 5 }
   0xf   : > { %p207_p5 = scmp.lt.s32.totalorder %s4725_s19, 255  ;;  %p213_p6 = scmp.lt.s32.totalorder %s4727_s20, 255 }
  0x10   : > { %p4733_p7 = scmp.ne.s32.totalorder %s5576_s12, 0 }
  0x11   : > { %s9409_s19 = smov (!%p207_p5, %s4725_s19), 255  ;;  %s9411_s20 = smov (!%p213_p6, %s4727_s20), 255 }
  0x12   : > { %s4726_s21 = sshll.u32 %s9409_s19, 3  ;;  %s4728_s25 = sshll.u32 %s9411_s20, 3 }
  0x13   : > { %s5655_s24 = scalar_lea.vmem %s8553_s0, %s4726_s21  ;;  %s5660_s28 = scalar_lea.vmem %s8554_s1, %s4728_s25 }
  0x14   : > { %s5665_s4 = scalar_lea.vmem %s8555_s2, %s4728_s25  ;;  %s5670_s7 = scalar_lea.vmem %s8556_s3, %s4726_s21 }
  0x15   : > { %233 = sbr.rel (%p4733_p7) target bundleno = 123 (0x7b), region = 36 }
  0x1a   : > { %vm234_vm0 = vcmask 7168   ;;  %vm363_vm1 = vcmask 130048   ;;  %v5594_v0 = vmov -inf   ;;  %v5595_v1 = vmov 0.0  }
  0x1b   : > { %235 = vst.msk [vmem:[#allocation2] sm:$0xff] %vm234_vm0, %v5594_v0  ;;  %236 = vst.msk [vmem:[#allocation2 + $0x8] sm:$0xff] %vm234_vm0, %v5594_v0 }
  0x1c   : > { %237 = vst.msk [vmem:[#allocation2 + $0x10] sm:$0xff] %vm234_vm0, %v5594_v0  ;;  %238 = vst.msk [vmem:[#allocation2 + $0x18] sm:$0xff] %vm234_vm0, %v5594_v0 }
  0x1d   : > { %239 = vst.msk [vmem:[#allocation2 + $0x20] sm:$0xff] %vm234_vm0, %v5594_v0  ;;  %240 = vst.msk [vmem:[#allocation2 + $0x28] sm:$0xff] %vm234_vm0, %v5594_v0 }
  0x1e   : > { %241 = vst.msk [vmem:[#allocation2 + $0x30] sm:$0xff] %vm234_vm0, %v5594_v0  ;;  %242 = vst.msk [vmem:[#allocation2 + $0x38] sm:$0xff] %vm234_vm0, %v5594_v0 }
  0x1f   : > { %243 = vst.msk [vmem:[#allocation2 + $0x40] sm:$0xff] %vm234_vm0, %v5594_v0  ;;  %244 = vst.msk [vmem:[#allocation2 + $0x48] sm:$0xff] %vm234_vm0, %v5594_v0 }
  0x20   : > { %245 = vst.msk [vmem:[#allocation2 + $0x50] sm:$0xff] %vm234_vm0, %v5594_v0  ;;  %246 = vst.msk [vmem:[#allocation2 + $0x58] sm:$0xff] %vm234_vm0, %v5594_v0 }
  0x21   : > { %247 = vst.msk [vmem:[#allocation2 + $0x60] sm:$0xff] %vm234_vm0, %v5594_v0  ;;  %248 = vst.msk [vmem:[#allocation2 + $0x68] sm:$0xff] %vm234_vm0, %v5594_v0 }
  0x22   : > { %249 = vst.msk [vmem:[#allocation2 + $0x70] sm:$0xff] %vm234_vm0, %v5594_v0  ;;  %250 = vst.msk [vmem:[#allocation2 + $0x78] sm:$0xff] %vm234_vm0, %v5594_v0 }
  0x23   : > { %251 = vst.msk [vmem:[#allocation2 + $0x80] sm:$0xff] %vm234_vm0, %v5594_v0  ;;  %252 = vst.msk [vmem:[#allocation2 + $0x88] sm:$0xff] %vm234_vm0, %v5594_v0 }
  0x24   : > { %253 = vst.msk [vmem:[#allocation2 + $0x90] sm:$0xff] %vm234_vm0, %v5594_v0  ;;  %254 = vst.msk [vmem:[#allocation2 + $0x98] sm:$0xff] %vm234_vm0, %v5594_v0 }
  0x25   : > { %255 = vst.msk [vmem:[#allocation2 + $0xa0] sm:$0xff] %vm234_vm0, %v5594_v0  ;;  %256 = vst.msk [vmem:[#allocation2 + $0xa8] sm:$0xff] %vm234_vm0, %v5594_v0 }
  0x26   : > { %257 = vst.msk [vmem:[#allocation2 + $0xb0] sm:$0xff] %vm234_vm0, %v5594_v0  ;;  %258 = vst.msk [vmem:[#allocation2 + $0xb8] sm:$0xff] %vm234_vm0, %v5594_v0 }
  0x27   : > { %259 = vst.msk [vmem:[#allocation2 + $0xc0] sm:$0xff] %vm234_vm0, %v5594_v0  ;;  %260 = vst.msk [vmem:[#allocation2 + $0xc8] sm:$0xff] %vm234_vm0, %v5594_v0 }
  0x28   : > { %261 = vst.msk [vmem:[#allocation2 + $0xd0] sm:$0xff] %vm234_vm0, %v5594_v0  ;;  %262 = vst.msk [vmem:[#allocation2 + $0xd8] sm:$0xff] %vm234_vm0, %v5594_v0 }
  0x29   : > { %263 = vst.msk [vmem:[#allocation2 + $0xe0] sm:$0xff] %vm234_vm0, %v5594_v0  ;;  %264 = vst.msk [vmem:[#allocation2 + $0xe8] sm:$0xff] %vm234_vm0, %v5594_v0 }
  0x2a   : > { %265 = vst.msk [vmem:[#allocation2 + $0xf0] sm:$0xff] %vm234_vm0, %v5594_v0  ;;  %266 = vst.msk [vmem:[#allocation2 + $0xf8] sm:$0xff] %vm234_vm0, %v5594_v0 }
  0x2b   : > { %267 = vst.msk [vmem:[#allocation2 + $0x100] sm:$0xff] %vm234_vm0, %v5594_v0  ;;  %268 = vst.msk [vmem:[#allocation2 + $0x108] sm:$0xff] %vm234_vm0, %v5594_v0 }
  0x2c   : > { %269 = vst.msk [vmem:[#allocation2 + $0x110] sm:$0xff] %vm234_vm0, %v5594_v0  ;;  %270 = vst.msk [vmem:[#allocation2 + $0x118] sm:$0xff] %vm234_vm0, %v5594_v0 }
  0x2d   : > { %271 = vst.msk [vmem:[#allocation2 + $0x120] sm:$0xff] %vm234_vm0, %v5594_v0  ;;  %272 = vst.msk [vmem:[#allocation2 + $0x128] sm:$0xff] %vm234_vm0, %v5594_v0 }
  0x2e   : > { %273 = vst.msk [vmem:[#allocation2 + $0x130] sm:$0xff] %vm234_vm0, %v5594_v0  ;;  %274 = vst.msk [vmem:[#allocation2 + $0x138] sm:$0xff] %vm234_vm0, %v5594_v0 }
  0x2f   : > { %275 = vst.msk [vmem:[#allocation2 + $0x140] sm:$0xff] %vm234_vm0, %v5594_v0  ;;  %276 = vst.msk [vmem:[#allocation2 + $0x148] sm:$0xff] %vm234_vm0, %v5594_v0 }
  0x30   : > { %277 = vst.msk [vmem:[#allocation2 + $0x150] sm:$0xff] %vm234_vm0, %v5594_v0  ;;  %278 = vst.msk [vmem:[#allocation2 + $0x158] sm:$0xff] %vm234_vm0, %v5594_v0 }
  0x31   : > { %279 = vst.msk [vmem:[#allocation2 + $0x160] sm:$0xff] %vm234_vm0, %v5594_v0  ;;  %280 = vst.msk [vmem:[#allocation2 + $0x168] sm:$0xff] %vm234_vm0, %v5594_v0 }
  0x32   : > { %281 = vst.msk [vmem:[#allocation2 + $0x170] sm:$0xff] %vm234_vm0, %v5594_v0  ;;  %282 = vst.msk [vmem:[#allocation2 + $0x178] sm:$0xff] %vm234_vm0, %v5594_v0 }
  0x33   : > { %283 = vst.msk [vmem:[#allocation2 + $0x180] sm:$0xff] %vm234_vm0, %v5594_v0  ;;  %284 = vst.msk [vmem:[#allocation2 + $0x188] sm:$0xff] %vm234_vm0, %v5594_v0 }
  0x34   : > { %285 = vst.msk [vmem:[#allocation2 + $0x190] sm:$0xff] %vm234_vm0, %v5594_v0  ;;  %286 = vst.msk [vmem:[#allocation2 + $0x198] sm:$0xff] %vm234_vm0, %v5594_v0 }
  0x35   : > { %287 = vst.msk [vmem:[#allocation2 + $0x1a0] sm:$0xff] %vm234_vm0, %v5594_v0  ;;  %288 = vst.msk [vmem:[#allocation2 + $0x1a8] sm:$0xff] %vm234_vm0, %v5594_v0 }
  0x36   : > { %289 = vst.msk [vmem:[#allocation2 + $0x1b0] sm:$0xff] %vm234_vm0, %v5594_v0  ;;  %290 = vst.msk [vmem:[#allocation2 + $0x1b8] sm:$0xff] %vm234_vm0, %v5594_v0 }
  0x37   : > { %291 = vst.msk [vmem:[#allocation2 + $0x1c0] sm:$0xff] %vm234_vm0, %v5594_v0  ;;  %292 = vst.msk [vmem:[#allocation2 + $0x1c8] sm:$0xff] %vm234_vm0, %v5594_v0 }
  0x38   : > { %293 = vst.msk [vmem:[#allocation2 + $0x1d0] sm:$0xff] %vm234_vm0, %v5594_v0  ;;  %294 = vst.msk [vmem:[#allocation2 + $0x1d8] sm:$0xff] %vm234_vm0, %v5594_v0 }
  0x39   : > { %295 = vst.msk [vmem:[#allocation2 + $0x1e0] sm:$0xff] %vm234_vm0, %v5594_v0  ;;  %296 = vst.msk [vmem:[#allocation2 + $0x1e8] sm:$0xff] %vm234_vm0, %v5594_v0 }
  0x3a   : > { %297 = vst.msk [vmem:[#allocation2 + $0x1f0] sm:$0xff] %vm234_vm0, %v5594_v0  ;;  %298 = vst.msk [vmem:[#allocation2 + $0x1f8] sm:$0xff] %vm234_vm0, %v5594_v0 }
  0x3b   : > { %299 = vst.msk [vmem:[#allocation3] sm:$0xff] %vm234_vm0, %v5595_v1  ;;  %300 = vst.msk [vmem:[#allocation3 + $0x8] sm:$0xff] %vm234_vm0, %v5595_v1 }
  0x3c   : > { %301 = vst.msk [vmem:[#allocation3 + $0x10] sm:$0xff] %vm234_vm0, %v5595_v1  ;;  %302 = vst.msk [vmem:[#allocation3 + $0x18] sm:$0xff] %vm234_vm0, %v5595_v1 }
  0x3d   : > { %303 = vst.msk [vmem:[#allocation3 + $0x20] sm:$0xff] %vm234_vm0, %v5595_v1  ;;  %304 = vst.msk [vmem:[#allocation3 + $0x28] sm:$0xff] %vm234_vm0, %v5595_v1 }
  0x3e   : > { %305 = vst.msk [vmem:[#allocation3 + $0x30] sm:$0xff] %vm234_vm0, %v5595_v1  ;;  %306 = vst.msk [vmem:[#allocation3 + $0x38] sm:$0xff] %vm234_vm0, %v5595_v1 }
  0x3f   : > { %307 = vst.msk [vmem:[#allocation3 + $0x40] sm:$0xff] %vm234_vm0, %v5595_v1  ;;  %308 = vst.msk [vmem:[#allocation3 + $0x48] sm:$0xff] %vm234_vm0, %v5595_v1 }
  0x40   : > { %309 = vst.msk [vmem:[#allocation3 + $0x50] sm:$0xff] %vm234_vm0, %v5595_v1  ;;  %310 = vst.msk [vmem:[#allocation3 + $0x58] sm:$0xff] %vm234_vm0, %v5595_v1 }
  0x41   : > { %311 = vst.msk [vmem:[#allocation3 + $0x60] sm:$0xff] %vm234_vm0, %v5595_v1  ;;  %312 = vst.msk [vmem:[#allocation3 + $0x68] sm:$0xff] %vm234_vm0, %v5595_v1 }
  0x42   : > { %313 = vst.msk [vmem:[#allocation3 + $0x70] sm:$0xff] %vm234_vm0, %v5595_v1  ;;  %314 = vst.msk [vmem:[#allocation3 + $0x78] sm:$0xff] %vm234_vm0, %v5595_v1 }
  0x43   : > { %315 = vst.msk [vmem:[#allocation3 + $0x80] sm:$0xff] %vm234_vm0, %v5595_v1  ;;  %316 = vst.msk [vmem:[#allocation3 + $0x88] sm:$0xff] %vm234_vm0, %v5595_v1 }
  0x44   : > { %317 = vst.msk [vmem:[#allocation3 + $0x90] sm:$0xff] %vm234_vm0, %v5595_v1  ;;  %318 = vst.msk [vmem:[#allocation3 + $0x98] sm:$0xff] %vm234_vm0, %v5595_v1 }
  0x45   : > { %319 = vst.msk [vmem:[#allocation3 + $0xa0] sm:$0xff] %vm234_vm0, %v5595_v1  ;;  %320 = vst.msk [vmem:[#allocation3 + $0xa8] sm:$0xff] %vm234_vm0, %v5595_v1 }
  0x46   : > { %321 = vst.msk [vmem:[#allocation3 + $0xb0] sm:$0xff] %vm234_vm0, %v5595_v1  ;;  %322 = vst.msk [vmem:[#allocation3 + $0xb8] sm:$0xff] %vm234_vm0, %v5595_v1 }
  0x47   : > { %323 = vst.msk [vmem:[#allocation3 + $0xc0] sm:$0xff] %vm234_vm0, %v5595_v1  ;;  %324 = vst.msk [vmem:[#allocation3 + $0xc8] sm:$0xff] %vm234_vm0, %v5595_v1 }
  0x48   : > { %325 = vst.msk [vmem:[#allocation3 + $0xd0] sm:$0xff] %vm234_vm0, %v5595_v1  ;;  %326 = vst.msk [vmem:[#allocation3 + $0xd8] sm:$0xff] %vm234_vm0, %v5595_v1 }
  0x49   : > { %327 = vst.msk [vmem:[#allocation3 + $0xe0] sm:$0xff] %vm234_vm0, %v5595_v1  ;;  %328 = vst.msk [vmem:[#allocation3 + $0xe8] sm:$0xff] %vm234_vm0, %v5595_v1 }
  0x4a   : > { %329 = vst.msk [vmem:[#allocation3 + $0xf0] sm:$0xff] %vm234_vm0, %v5595_v1  ;;  %330 = vst.msk [vmem:[#allocation3 + $0xf8] sm:$0xff] %vm234_vm0, %v5595_v1 }
  0x4b   : > { %331 = vst.msk [vmem:[#allocation3 + $0x100] sm:$0xff] %vm234_vm0, %v5595_v1  ;;  %332 = vst.msk [vmem:[#allocation3 + $0x108] sm:$0xff] %vm234_vm0, %v5595_v1 }
  0x4c   : > { %333 = vst.msk [vmem:[#allocation3 + $0x110] sm:$0xff] %vm234_vm0, %v5595_v1  ;;  %334 = vst.msk [vmem:[#allocation3 + $0x118] sm:$0xff] %vm234_vm0, %v5595_v1 }
  0x4d   : > { %335 = vst.msk [vmem:[#allocation3 + $0x120] sm:$0xff] %vm234_vm0, %v5595_v1  ;;  %336 = vst.msk [vmem:[#allocation3 + $0x128] sm:$0xff] %vm234_vm0, %v5595_v1 }
  0x4e   : > { %337 = vst.msk [vmem:[#allocation3 + $0x130] sm:$0xff] %vm234_vm0, %v5595_v1  ;;  %338 = vst.msk [vmem:[#allocation3 + $0x138] sm:$0xff] %vm234_vm0, %v5595_v1 }
  0x4f   : > { %339 = vst.msk [vmem:[#allocation3 + $0x140] sm:$0xff] %vm234_vm0, %v5595_v1  ;;  %340 = vst.msk [vmem:[#allocation3 + $0x148] sm:$0xff] %vm234_vm0, %v5595_v1 }
  0x50   : > { %341 = vst.msk [vmem:[#allocation3 + $0x150] sm:$0xff] %vm234_vm0, %v5595_v1  ;;  %342 = vst.msk [vmem:[#allocation3 + $0x158] sm:$0xff] %vm234_vm0, %v5595_v1 }
  0x51   : > { %343 = vst.msk [vmem:[#allocation3 + $0x160] sm:$0xff] %vm234_vm0, %v5595_v1  ;;  %344 = vst.msk [vmem:[#allocation3 + $0x168] sm:$0xff] %vm234_vm0, %v5595_v1 }
  0x52   : > { %345 = vst.msk [vmem:[#allocation3 + $0x170] sm:$0xff] %vm234_vm0, %v5595_v1  ;;  %346 = vst.msk [vmem:[#allocation3 + $0x178] sm:$0xff] %vm234_vm0, %v5595_v1 }
  0x53   : > { %347 = vst.msk [vmem:[#allocation3 + $0x180] sm:$0xff] %vm234_vm0, %v5595_v1  ;;  %348 = vst.msk [vmem:[#allocation3 + $0x188] sm:$0xff] %vm234_vm0, %v5595_v1 }
  0x54   : > { %349 = vst.msk [vmem:[#allocation3 + $0x190] sm:$0xff] %vm234_vm0, %v5595_v1  ;;  %350 = vst.msk [vmem:[#allocation3 + $0x198] sm:$0xff] %vm234_vm0, %v5595_v1 }
  0x55   : > { %351 = vst.msk [vmem:[#allocation3 + $0x1a0] sm:$0xff] %vm234_vm0, %v5595_v1  ;;  %352 = vst.msk [vmem:[#allocation3 + $0x1a8] sm:$0xff] %vm234_vm0, %v5595_v1 }
  0x56   : > { %353 = vst.msk [vmem:[#allocation3 + $0x1b0] sm:$0xff] %vm234_vm0, %v5595_v1  ;;  %354 = vst.msk [vmem:[#allocation3 + $0x1b8] sm:$0xff] %vm234_vm0, %v5595_v1 }
  0x57   : > { %355 = vst.msk [vmem:[#allocation3 + $0x1c0] sm:$0xff] %vm234_vm0, %v5595_v1  ;;  %356 = vst.msk [vmem:[#allocation3 + $0x1c8] sm:$0xff] %vm234_vm0, %v5595_v1 }
  0x58   : > { %357 = vst.msk [vmem:[#allocation3 + $0x1d0] sm:$0xff] %vm234_vm0, %v5595_v1  ;;  %358 = vst.msk [vmem:[#allocation3 + $0x1d8] sm:$0xff] %vm234_vm0, %v5595_v1 }
  0x59   : > { %359 = vst.msk [vmem:[#allocation3 + $0x1e0] sm:$0xff] %vm234_vm0, %v5595_v1  ;;  %360 = vst.msk [vmem:[#allocation3 + $0x1e8] sm:$0xff] %vm234_vm0, %v5595_v1 }
  0x5a   : > { %361 = vst.msk [vmem:[#allocation3 + $0x1f0] sm:$0xff] %vm234_vm0, %v5595_v1  ;;  %362 = vst.msk [vmem:[#allocation3 + $0x1f8] sm:$0xff] %vm234_vm0, %v5595_v1 }
  0x5b   : > { %364 = vst.msk [vmem:[#allocation4] sm:$0xff] %vm363_vm1, %v5595_v1  ;;  %365 = vst.msk [vmem:[#allocation4 + $0x8] sm:$0xff] %vm363_vm1, %v5595_v1 }
  0x5c   : > { %366 = vst.msk [vmem:[#allocation4 + $0x10] sm:$0xff] %vm363_vm1, %v5595_v1  ;;  %367 = vst.msk [vmem:[#allocation4 + $0x18] sm:$0xff] %vm363_vm1, %v5595_v1 }
  0x5d   : > { %368 = vst.msk [vmem:[#allocation4 + $0x20] sm:$0xff] %vm363_vm1, %v5595_v1  ;;  %369 = vst.msk [vmem:[#allocation4 + $0x28] sm:$0xff] %vm363_vm1, %v5595_v1 }
  0x5e   : > { %370 = vst.msk [vmem:[#allocation4 + $0x30] sm:$0xff] %vm363_vm1, %v5595_v1  ;;  %371 = vst.msk [vmem:[#allocation4 + $0x38] sm:$0xff] %vm363_vm1, %v5595_v1 }
  0x5f   : > { %372 = vst.msk [vmem:[#allocation4 + $0x40] sm:$0xff] %vm363_vm1, %v5595_v1  ;;  %373 = vst.msk [vmem:[#allocation4 + $0x48] sm:$0xff] %vm363_vm1, %v5595_v1 }
  0x60   : > { %374 = vst.msk [vmem:[#allocation4 + $0x50] sm:$0xff] %vm363_vm1, %v5595_v1  ;;  %375 = vst.msk [vmem:[#allocation4 + $0x58] sm:$0xff] %vm363_vm1, %v5595_v1 }
  0x61   : > { %376 = vst.msk [vmem:[#allocation4 + $0x60] sm:$0xff] %vm363_vm1, %v5595_v1  ;;  %377 = vst.msk [vmem:[#allocation4 + $0x68] sm:$0xff] %vm363_vm1, %v5595_v1 }
  0x62   : > { %378 = vst.msk [vmem:[#allocation4 + $0x70] sm:$0xff] %vm363_vm1, %v5595_v1  ;;  %379 = vst.msk [vmem:[#allocation4 + $0x78] sm:$0xff] %vm363_vm1, %v5595_v1 }
  0x63   : > { %380 = vst.msk [vmem:[#allocation4 + $0x80] sm:$0xff] %vm363_vm1, %v5595_v1  ;;  %381 = vst.msk [vmem:[#allocation4 + $0x88] sm:$0xff] %vm363_vm1, %v5595_v1 }
  0x64   : > { %382 = vst.msk [vmem:[#allocation4 + $0x90] sm:$0xff] %vm363_vm1, %v5595_v1  ;;  %383 = vst.msk [vmem:[#allocation4 + $0x98] sm:$0xff] %vm363_vm1, %v5595_v1 }
  0x65   : > { %384 = vst.msk [vmem:[#allocation4 + $0xa0] sm:$0xff] %vm363_vm1, %v5595_v1  ;;  %385 = vst.msk [vmem:[#allocation4 + $0xa8] sm:$0xff] %vm363_vm1, %v5595_v1 }
  0x66   : > { %386 = vst.msk [vmem:[#allocation4 + $0xb0] sm:$0xff] %vm363_vm1, %v5595_v1  ;;  %387 = vst.msk [vmem:[#allocation4 + $0xb8] sm:$0xff] %vm363_vm1, %v5595_v1 }
  0x67   : > { %388 = vst.msk [vmem:[#allocation4 + $0xc0] sm:$0xff] %vm363_vm1, %v5595_v1  ;;  %389 = vst.msk [vmem:[#allocation4 + $0xc8] sm:$0xff] %vm363_vm1, %v5595_v1 }
  0x68   : > { %390 = vst.msk [vmem:[#allocation4 + $0xd0] sm:$0xff] %vm363_vm1, %v5595_v1  ;;  %391 = vst.msk [vmem:[#allocation4 + $0xd8] sm:$0xff] %vm363_vm1, %v5595_v1 }
  0x69   : > { %392 = vst.msk [vmem:[#allocation4 + $0xe0] sm:$0xff] %vm363_vm1, %v5595_v1  ;;  %393 = vst.msk [vmem:[#allocation4 + $0xe8] sm:$0xff] %vm363_vm1, %v5595_v1 }
  0x6a   : > { %394 = vst.msk [vmem:[#allocation4 + $0xf0] sm:$0xff] %vm363_vm1, %v5595_v1  ;;  %395 = vst.msk [vmem:[#allocation4 + $0xf8] sm:$0xff] %vm363_vm1, %v5595_v1 }
  0x6b   : > { %396 = vst.msk [vmem:[#allocation4 + $0x100] sm:$0xff] %vm363_vm1, %v5595_v1  ;;  %397 = vst.msk [vmem:[#allocation4 + $0x108] sm:$0xff] %vm363_vm1, %v5595_v1 }
  0x6c   : > { %398 = vst.msk [vmem:[#allocation4 + $0x110] sm:$0xff] %vm363_vm1, %v5595_v1  ;;  %399 = vst.msk [vmem:[#allocation4 + $0x118] sm:$0xff] %vm363_vm1, %v5595_v1 }
  0x6d   : > { %400 = vst.msk [vmem:[#allocation4 + $0x120] sm:$0xff] %vm363_vm1, %v5595_v1  ;;  %401 = vst.msk [vmem:[#allocation4 + $0x128] sm:$0xff] %vm363_vm1, %v5595_v1 }
  0x6e   : > { %402 = vst.msk [vmem:[#allocation4 + $0x130] sm:$0xff] %vm363_vm1, %v5595_v1  ;;  %403 = vst.msk [vmem:[#allocation4 + $0x138] sm:$0xff] %vm363_vm1, %v5595_v1 }
  0x6f   : > { %404 = vst.msk [vmem:[#allocation4 + $0x140] sm:$0xff] %vm363_vm1, %v5595_v1  ;;  %405 = vst.msk [vmem:[#allocation4 + $0x148] sm:$0xff] %vm363_vm1, %v5595_v1 }
  0x70   : > { %406 = vst.msk [vmem:[#allocation4 + $0x150] sm:$0xff] %vm363_vm1, %v5595_v1  ;;  %407 = vst.msk [vmem:[#allocation4 + $0x158] sm:$0xff] %vm363_vm1, %v5595_v1 }
  0x71   : > { %408 = vst.msk [vmem:[#allocation4 + $0x160] sm:$0xff] %vm363_vm1, %v5595_v1  ;;  %409 = vst.msk [vmem:[#allocation4 + $0x168] sm:$0xff] %vm363_vm1, %v5595_v1 }
  0x72   : > { %410 = vst.msk [vmem:[#allocation4 + $0x170] sm:$0xff] %vm363_vm1, %v5595_v1  ;;  %411 = vst.msk [vmem:[#allocation4 + $0x178] sm:$0xff] %vm363_vm1, %v5595_v1 }
  0x73   : > { %412 = vst.msk [vmem:[#allocation4 + $0x180] sm:$0xff] %vm363_vm1, %v5595_v1  ;;  %413 = vst.msk [vmem:[#allocation4 + $0x188] sm:$0xff] %vm363_vm1, %v5595_v1 }
  0x74   : > { %414 = vst.msk [vmem:[#allocation4 + $0x190] sm:$0xff] %vm363_vm1, %v5595_v1  ;;  %415 = vst.msk [vmem:[#allocation4 + $0x198] sm:$0xff] %vm363_vm1, %v5595_v1 }
  0x75   : > { %416 = vst.msk [vmem:[#allocation4 + $0x1a0] sm:$0xff] %vm363_vm1, %v5595_v1  ;;  %417 = vst.msk [vmem:[#allocation4 + $0x1a8] sm:$0xff] %vm363_vm1, %v5595_v1 }
  0x76   : > { %418 = vst.msk [vmem:[#allocation4 + $0x1b0] sm:$0xff] %vm363_vm1, %v5595_v1  ;;  %419 = vst.msk [vmem:[#allocation4 + $0x1b8] sm:$0xff] %vm363_vm1, %v5595_v1 }
  0x77   : > { %420 = vst.msk [vmem:[#allocation4 + $0x1c0] sm:$0xff] %vm363_vm1, %v5595_v1  ;;  %421 = vst.msk [vmem:[#allocation4 + $0x1c8] sm:$0xff] %vm363_vm1, %v5595_v1 }
  0x78   : > { %422 = vst.msk [vmem:[#allocation4 + $0x1d0] sm:$0xff] %vm363_vm1, %v5595_v1  ;;  %423 = vst.msk [vmem:[#allocation4 + $0x1d8] sm:$0xff] %vm363_vm1, %v5595_v1 }
  0x79   : > { %424 = vst.msk [vmem:[#allocation4 + $0x1e0] sm:$0xff] %vm363_vm1, %v5595_v1  ;;  %425 = vst.msk [vmem:[#allocation4 + $0x1e8] sm:$0xff] %vm363_vm1, %v5595_v1 }
  0x7a   : > { %426 = vst.msk [vmem:[#allocation4 + $0x1f0] sm:$0xff] %vm363_vm1, %v5595_v1  ;;  %427 = vst.msk [vmem:[#allocation4 + $0x1f8] sm:$0xff] %vm363_vm1, %v5595_v1 }
  0x7b PF: > { %v523_v2 = vld [vmem:[%s5660_s28 + $0xf8] sm:$0xff]  ;;  %vm524_vm2 = vcmask 130048   ;;  %v522_v4 = vld [vmem:[%s5660_s28 + $0xf0] sm:$0xff]  ;;  %v521_v6 = vld [vmem:[%s5660_s28 + $0xe8] sm:$0xff]  ;;  %vm2862_vm3 = vcmask 7168   ;;  %p4830_p8 = scmp.ne.s32.totalorder %s5576_s12, 7 }
  0x7c   : > { %v507_v3 = vld [vmem:[%s5660_s28 + $0x78] sm:$0xff]  ;;  %4833 = vmatprep.subr.msk.mxu0 %vm524_vm2, %v523_v2  ;;  %v506_v5 = vld [vmem:[%s5660_s28 + $0x70] sm:$0xff]  ;;  %v505_v7 = vld [vmem:[%s5660_s28 + $0x68] sm:$0xff] }
  0x7d   : > { %4834 = vmatpush3.xpose.msk.msra.mxu0 %vm524_vm2, %v507_v3  ;;  %v520_v8 = vld [vmem:[%s5660_s28 + $0xe0] sm:$0xff]  ;;  %v519_v11 = vld [vmem:[%s5660_s28 + $0xd8] sm:$0xff]  ;;  %v518_v13 = vld [vmem:[%s5660_s28 + $0xd0] sm:$0xff] }
  0x7e   : > { %4835 = vmatprep.subr.msk.mxu0 %vm524_vm2, %v522_v4  ;;  %v428_v9 = vld [vmem:[%s5655_s24] sm:$0xff]  ;;  %v503_v12 = vld [vmem:[%s5660_s28 + $0x58] sm:$0xff]  ;;  %v502_v14 = vld [vmem:[%s5660_s28 + $0x50] sm:$0xff] }
  0x7f   : > { %v504_v10 = vld [vmem:[%s5660_s28 + $0x60] sm:$0xff]  ;;  %4865 = vmatprep.mubr.msk.f32.mxu0 %vm524_vm2, %v428_v9  ;;  %v517_v15 = vld [vmem:[%s5660_s28 + $0xc8] sm:$0xff]  ;;  %v515_v19 = vld [vmem:[%s5660_s28 + $0xb8] sm:$0xff] }
  0x80   : > { %v501_v16 = vld [vmem:[%s5660_s28 + $0x48] sm:$0xff]  ;;  %v516_v17 = vld [vmem:[%s5660_s28 + $0xc0] sm:$0xff]  ;;  %v499_v20 = vld [vmem:[%s5660_s28 + $0x38] sm:$0xff] }
  0x81   : > { %4836 = vmatpush3.xpose.msk.msra.mxu0 %vm524_vm2, %v506_v5  ;;  %v500_v18 = vld [vmem:[%s5660_s28 + $0x40] sm:$0xff]  ;;  %v514_v21 = vld [vmem:[%s5660_s28 + $0xb0] sm:$0xff]  ;;  %v513_v23 = vld [vmem:[%s5660_s28 + $0xa8] sm:$0xff] }
  0x82   : > { %4837 = vmatprep.subr.msk.mxu0 %vm524_vm2, %v521_v6  ;;  %v498_v22 = vld [vmem:[%s5660_s28 + $0x30] sm:$0xff]  ;;  %v497_v24 = vld [vmem:[%s5660_s28 + $0x28] sm:$0xff]  ;;  %v512_v25 = vld [vmem:[%s5660_s28 + $0xa0] sm:$0xff] }
  0x83   : > { %v496_v26 = vld [vmem:[%s5660_s28 + $0x20] sm:$0xff]  ;;  %v511_v27 = vld [vmem:[%s5660_s28 + $0x98] sm:$0xff]  ;;  %v510_v29 = vld [vmem:[%s5660_s28 + $0x90] sm:$0xff] }
  0x84   : > { %v495_v28 = vld [vmem:[%s5660_s28 + $0x18] sm:$0xff]  ;;  %v494_v30 = vld [vmem:[%s5660_s28 + $0x10] sm:$0xff]  ;;  %v509_v31 = vld [vmem:[%s5660_s28 + $0x88] sm:$0xff] }
  0x85   : > { %4838 = vmatpush3.xpose.msk.msra.mxu0 %vm524_vm2, %v505_v7  ;;  %v493_v32 = vld [vmem:[%s5660_s28 + $0x8] sm:$0xff]  ;;  %v508_v33 = vld [vmem:[%s5660_s28 + $0x80] sm:$0xff]  ;;  %v430_v36 = vld [vmem:[%s5655_s24 + $0x10] sm:$0xff] }
  0x86   : > { %4839 = vmatprep.subr.msk.mxu0 %vm524_vm2, %v520_v8  ;;  %v492_v34 = vld [vmem:[%s5660_s28] sm:$0xff]  ;;  %v429_v35 = vld [vmem:[%s5655_s24 + $0x8] sm:$0xff]  ;;  %v431_v37 = vld [vmem:[%s5655_s24 + $0x18] sm:$0xff] }
  0x87   : > { %v432_v38 = vld [vmem:[%s5655_s24 + $0x20] sm:$0xff]  ;;  %v433_v39 = vld [vmem:[%s5655_s24 + $0x28] sm:$0xff]  ;;  %v434_v40 = vld [vmem:[%s5655_s24 + $0x30] sm:$0xff] }
  0x88   : > { %v435_v41 = vld [vmem:[%s5655_s24 + $0x38] sm:$0xff]  ;;  %v436_v42 = vld [vmem:[%s5655_s24 + $0x40] sm:$0xff]  ;;  %v437_v43 = vld [vmem:[%s5655_s24 + $0x48] sm:$0xff] }
  0x89   : > { %4840 = vmatpush3.xpose.msk.msra.mxu0 %vm524_vm2, %v504_v10  ;;  %v438_v44 = vld [vmem:[%s5655_s24 + $0x50] sm:$0xff]  ;;  %v439_v45 = vld [vmem:[%s5655_s24 + $0x58] sm:$0xff]  ;;  %v440_v46 = vld [vmem:[%s5655_s24 + $0x60] sm:$0xff] }
  0x8a   : > { %4841 = vmatprep.subr.msk.mxu0 %vm524_vm2, %v519_v11  ;;  %v441_v47 = vld [vmem:[%s5655_s24 + $0x68] sm:$0xff]  ;;  %v442_v48 = vld [vmem:[%s5655_s24 + $0x70] sm:$0xff]  ;;  %v443_v49 = vld [vmem:[%s5655_s24 + $0x78] sm:$0xff] }
  0x8b   : > { %v444_v50 = vld [vmem:[%s5655_s24 + $0x80] sm:$0xff]  ;;  %v445_v51 = vld [vmem:[%s5655_s24 + $0x88] sm:$0xff]  ;;  %v446_v52 = vld [vmem:[%s5655_s24 + $0x90] sm:$0xff] }
  0x8c   : > { %v447_v53 = vld [vmem:[%s5655_s24 + $0x98] sm:$0xff]  ;;  %v448_v54 = vld [vmem:[%s5655_s24 + $0xa0] sm:$0xff]  ;;  %v449_v55 = vld [vmem:[%s5655_s24 + $0xa8] sm:$0xff] }
  0x8d   : > { %4842 = vmatpush3.xpose.msk.msra.mxu0 %vm524_vm2, %v503_v12  ;;  %v450_v56 = vld [vmem:[%s5655_s24 + $0xb0] sm:$0xff]  ;;  %v451_v57 = vld [vmem:[%s5655_s24 + $0xb8] sm:$0xff]  ;;  %v452_v58 = vld [vmem:[%s5655_s24 + $0xc0] sm:$0xff] }
  0x8e   : > { %4843 = vmatprep.subr.msk.mxu0 %vm524_vm2, %v518_v13  ;;  %v453_v59 = vld [vmem:[%s5655_s24 + $0xc8] sm:$0xff]  ;;  %v454_v60 = vld [vmem:[%s5655_s24 + $0xd0] sm:$0xff]  ;;  %v455_v61 = vld [vmem:[%s5655_s24 + $0xd8] sm:$0xff] }
  0x8f   : > { %v456_v62 = vld [vmem:[%s5655_s24 + $0xe0] sm:$0xff]  ;;  %v457_v63 = vld [vmem:[%s5655_s24 + $0xe8] sm:$0xff]  ;;  %v458_v0 = vld [vmem:[%s5655_s24 + $0xf0] sm:$0xff] }
  0x90   : > { %v459_v1 = vld [vmem:[%s5655_s24 + $0xf8] sm:$0xff]  ;;  %v460_v2 = vld [vmem:[%s5655_s24 + $0x100] sm:$0xff]  ;;  %v461_v3 = vld [vmem:[%s5655_s24 + $0x108] sm:$0xff] }
  0x91   : > { %4844 = vmatpush3.xpose.msk.msra.mxu0 %vm524_vm2, %v502_v14  ;;  %v462_v4 = vld [vmem:[%s5655_s24 + $0x110] sm:$0xff]  ;;  %v463_v5 = vld [vmem:[%s5655_s24 + $0x118] sm:$0xff]  ;;  %v464_v6 = vld [vmem:[%s5655_s24 + $0x120] sm:$0xff] }
  0x92   : > { %4845 = vmatprep.subr.msk.mxu0 %vm524_vm2, %v517_v15  ;;  %v465_v7 = vld [vmem:[%s5655_s24 + $0x128] sm:$0xff]  ;;  %v466_v8 = vld [vmem:[%s5655_s24 + $0x130] sm:$0xff]  ;;  %v468_v10 = vld [vmem:[%s5655_s24 + $0x140] sm:$0xff] }
  0x93   : > { %v469_v11 = vld [vmem:[%s5655_s24 + $0x148] sm:$0xff]  ;;  %v470_v12 = vld [vmem:[%s5655_s24 + $0x150] sm:$0xff]  ;;  %v471_v13 = vld [vmem:[%s5655_s24 + $0x158] sm:$0xff] }
  0x94   : > { %v472_v14 = vld [vmem:[%s5655_s24 + $0x160] sm:$0xff] }
  0x95   : > { %4846 = vmatpush3.xpose.msk.msra.mxu0 %vm524_vm2, %v501_v16 }
  0x96   : > { %4847 = vmatprep.subr.msk.mxu0 %vm524_vm2, %v516_v17 }
  0x99   : > { %4848 = vmatpush3.xpose.msk.msra.mxu0 %vm524_vm2, %v500_v18 }
  0x9a   : > { %4849 = vmatprep.subr.msk.mxu0 %vm524_vm2, %v515_v19 }
  0x9d   : > { %4850 = vmatpush3.xpose.msk.msra.mxu0 %vm524_vm2, %v499_v20 }
  0x9e   : > { %4851 = vmatprep.subr.msk.mxu0 %vm524_vm2, %v514_v21 }
  0xa1   : > { %4852 = vmatpush3.xpose.msk.msra.mxu0 %vm524_vm2, %v498_v22 }
  0xa2   : > { %4853 = vmatprep.subr.msk.mxu0 %vm524_vm2, %v513_v23 }
  0xa5   : > { %4854 = vmatpush3.xpose.msk.msra.mxu0 %vm524_vm2, %v497_v24 }
  0xa6   : > { %4855 = vmatprep.subr.msk.mxu0 %vm524_vm2, %v512_v25 }
  0xa9   : > { %4856 = vmatpush3.xpose.msk.msra.mxu0 %vm524_vm2, %v496_v26 }
  0xaa   : > { %4857 = vmatprep.subr.msk.mxu0 %vm524_vm2, %v511_v27 }
  0xad   : > { %4858 = vmatpush3.xpose.msk.msra.mxu0 %vm524_vm2, %v495_v28 }
  0xae   : > { %4859 = vmatprep.subr.msk.mxu0 %vm524_vm2, %v510_v29 }
  0xb1   : > { %4860 = vmatpush3.xpose.msk.msra.mxu0 %vm524_vm2, %v494_v30 }
  0xb2   : > { %4861 = vmatprep.subr.msk.mxu0 %vm524_vm2, %v509_v31 }
  0xb5   : > { %4862 = vmatpush3.xpose.msk.msra.mxu0 %vm524_vm2, %v493_v32 }
  0xb6   : > { %4863 = vmatprep.subr.msk.mxu0 %vm524_vm2, %v508_v33 }
  0xb9   : > { %4864 = vmatpush3.xpose.msk.msra.mxu0 %vm524_vm2, %v492_v34 }
  0xbc   : > { %4866 = vmatmul.mubr.msk.f32.vlgmr.msra.gmra.mxu0 %vm524_vm2, %v428_v9  ;;  %v467_v9 = vld [vmem:[%s5655_s24 + $0x138] sm:$0xff] }
  0xbd   : > { %4867 = vmatprep.mubr.msk.f32.mxu0 %vm524_vm2, %v429_v35 }
  0xc0   : > { %4868 = vmatmul.mubr.msk.f32.gmra.mxu0 %vm524_vm2, %v429_v35 }
  0xc1   : > { %4869 = vmatprep.mubr.msk.f32.mxu0 %vm524_vm2, %v430_v36 }
  0xc4   : > { %4870 = vmatmul.mubr.msk.f32.gmra.mxu0 %vm524_vm2, %v430_v36 }
  0xc5   : > { %4871 = vmatprep.mubr.msk.f32.mxu0 %vm524_vm2, %v431_v37 }
  0xc8   : > { %4872 = vmatmul.mubr.msk.f32.gmra.mxu0 %vm524_vm2, %v431_v37 }
  0xc9   : > { %4873 = vmatprep.mubr.msk.f32.mxu0 %vm524_vm2, %v432_v38 }
  0xcc   : > { %4874 = vmatmul.mubr.msk.f32.gmra.mxu0 %vm524_vm2, %v432_v38 }
  0xcd   : > { %4875 = vmatprep.mubr.msk.f32.mxu0 %vm524_vm2, %v433_v39 }
  0xd0   : > { %4876 = vmatmul.mubr.msk.f32.gmra.mxu0 %vm524_vm2, %v433_v39 }
  0xd1   : > { %4877 = vmatprep.mubr.msk.f32.mxu0 %vm524_vm2, %v434_v40 }
  0xd4   : > { %4878 = vmatmul.mubr.msk.f32.gmra.mxu0 %vm524_vm2, %v434_v40  ;;  %v5596_v40 = vmov 0  }
  0xd5   : > { %4879 = vmatprep.mubr.msk.f32.mxu0 %vm524_vm2, %v435_v41  ;;  %5038 = vset.pattern.permute.xlu0 %v5596_v40 }
  0xd6   : > { %5039 = vset.pattern.permute.xlu1 %v5596_v40  ;;  %v475_v40 = vld [vmem:[%s5655_s24 + $0x178] sm:$0xff] }
  0xd8   : > { %4880 = vmatmul.mubr.msk.f32.gmra.mxu0 %vm524_vm2, %v435_v41 }
  0xd9   : > { %4881 = vmatprep.mubr.msk.f32.mxu0 %vm524_vm2, %v436_v42 }
  0xdc   : > { %4882 = vmatmul.mubr.msk.f32.gmra.mxu0 %vm524_vm2, %v436_v42  ;;  %v473_v42 = vld [vmem:[%s5655_s24 + $0x168] sm:$0xff] }
  0xdd   : > { %4883 = vmatprep.mubr.msk.f32.mxu0 %vm524_vm2, %v437_v43 }
  0xe0   : > { %4884 = vmatmul.mubr.msk.f32.gmra.mxu0 %vm524_vm2, %v437_v43 }
  0xe1   : > { %4885 = vmatprep.mubr.msk.f32.mxu0 %vm524_vm2, %v438_v44 }
  0xe4   : > { %4886 = vmatmul.mubr.msk.f32.gmra.mxu0 %vm524_vm2, %v438_v44 }
  0xe5   : > { %4887 = vmatprep.mubr.msk.f32.mxu0 %vm524_vm2, %v439_v45 }
  0xe8   : > { %4888 = vmatmul.mubr.msk.f32.gmra.mxu0 %vm524_vm2, %v439_v45 }
  0xe9   : > { %4889 = vmatprep.mubr.msk.f32.mxu0 %vm524_vm2, %v440_v46 }
  0xec   : > { %4890 = vmatmul.mubr.msk.f32.gmra.mxu0 %vm524_vm2, %v440_v46  ;;  %v474_v46 = vld [vmem:[%s5655_s24 + $0x170] sm:$0xff] }
  0xed   : > { %4891 = vmatprep.mubr.msk.f32.mxu0 %vm524_vm2, %v441_v47 }
  0xf0   : > { %4892 = vmatmul.mubr.msk.f32.gmra.mxu0 %vm524_vm2, %v441_v47 }
  0xf1   : > { %4893 = vmatprep.mubr.msk.f32.mxu0 %vm524_vm2, %v442_v48 }
  0xf4   : > { %4894 = vmatmul.mubr.msk.f32.gmra.mxu0 %vm524_vm2, %v442_v48 }
  0xf5   : > { %4895 = vmatprep.mubr.msk.f32.mxu0 %vm524_vm2, %v443_v49 }
  0xf8   : > { %4896 = vmatmul.mubr.msk.f32.gmra.mxu0 %vm524_vm2, %v443_v49 }
  0xf9   : > { %4897 = vmatprep.mubr.msk.f32.mxu0 %vm524_vm2, %v444_v50 }
  0xfc   : > { %4898 = vmatmul.mubr.msk.f32.gmra.mxu0 %vm524_vm2, %v444_v50 }
  0xfd   : > { %4899 = vmatprep.mubr.msk.f32.mxu0 %vm524_vm2, %v445_v51 }
 0x100   : > { %4900 = vmatmul.mubr.msk.f32.gmra.mxu0 %vm524_vm2, %v445_v51 }
 0x101   : > { %4901 = vmatprep.mubr.msk.f32.mxu0 %vm524_vm2, %v446_v52 }
 0x104   : > { %4902 = vmatmul.mubr.msk.f32.gmra.mxu0 %vm524_vm2, %v446_v52 }
 0x105   : > { %4903 = vmatprep.mubr.msk.f32.mxu0 %vm524_vm2, %v447_v53 }
 0x108   : > { %4904 = vmatmul.mubr.msk.f32.gmra.mxu0 %vm524_vm2, %v447_v53 }
 0x109   : > { %4905 = vmatprep.mubr.msk.f32.mxu0 %vm524_vm2, %v448_v54 }
 0x10c   : > { %4906 = vmatmul.mubr.msk.f32.gmra.mxu0 %vm524_vm2, %v448_v54 }
 0x10d   : > { %4907 = vmatprep.mubr.msk.f32.mxu0 %vm524_vm2, %v449_v55 }
 0x110   : > { %4908 = vmatmul.mubr.msk.f32.gmra.mxu0 %vm524_vm2, %v449_v55 }
 0x111   : > { %4909 = vmatprep.mubr.msk.f32.mxu0 %vm524_vm2, %v450_v56 }
 0x114   : > { %4910 = vmatmul.mubr.msk.f32.gmra.mxu0 %vm524_vm2, %v450_v56 }
 0x115   : > { %4911 = vmatprep.mubr.msk.f32.mxu0 %vm524_vm2, %v451_v57 }
 0x118   : > { %4912 = vmatmul.mubr.msk.f32.gmra.mxu0 %vm524_vm2, %v451_v57 }
 0x119   : > { %4913 = vmatprep.mubr.msk.f32.mxu0 %vm524_vm2, %v452_v58 }
 0x11c   : > { %4914 = vmatmul.mubr.msk.f32.gmra.mxu0 %vm524_vm2, %v452_v58 }
 0x11d   : > { %4915 = vmatprep.mubr.msk.f32.mxu0 %vm524_vm2, %v453_v59 }
 0x120   : > { %4916 = vmatmul.mubr.msk.f32.gmra.mxu0 %vm524_vm2, %v453_v59 }
 0x121   : > { %4917 = vmatprep.mubr.msk.f32.mxu0 %vm524_vm2, %v454_v60 }
 0x124   : > { %4918 = vmatmul.mubr.msk.f32.gmra.mxu0 %vm524_vm2, %v454_v60 }
 0x125   : > { %4919 = vmatprep.mubr.msk.f32.mxu0 %vm524_vm2, %v455_v61 }
 0x128   : > { %4920 = vmatmul.mubr.msk.f32.gmra.mxu0 %vm524_vm2, %v455_v61 }
 0x129   : > { %4921 = vmatprep.mubr.msk.f32.mxu0 %vm524_vm2, %v456_v62 }
 0x12c   : > { %4922 = vmatmul.mubr.msk.f32.gmra.mxu0 %vm524_vm2, %v456_v62 }
 0x12d   : > { %4923 = vmatprep.mubr.msk.f32.mxu0 %vm524_vm2, %v457_v63 }
 0x130   : > { %4924 = vmatmul.mubr.msk.f32.gmra.mxu0 %vm524_vm2, %v457_v63 }
 0x131   : > { %4925 = vmatprep.mubr.msk.f32.mxu0 %vm524_vm2, %v458_v0 }
 0x134   : > { %4926 = vmatmul.mubr.msk.f32.gmra.mxu0 %vm524_vm2, %v458_v0 }
 0x135   : > { %4927 = vmatprep.mubr.msk.f32.mxu0 %vm524_vm2, %v459_v1 }
 0x138   : > { %4928 = vmatmul.mubr.msk.f32.gmra.mxu0 %vm524_vm2, %v459_v1 }
 0x139   : > { %4929 = vmatprep.mubr.msk.f32.mxu0 %vm524_vm2, %v460_v2 }
 0x13c   : > { %4930 = vmatmul.mubr.msk.f32.gmra.mxu0 %vm524_vm2, %v460_v2 }
 0x13d   : > { %4931 = vmatprep.mubr.msk.f32.mxu0 %vm524_vm2, %v461_v3 }
 0x140   : > { %4932 = vmatmul.mubr.msk.f32.gmra.mxu0 %vm524_vm2, %v461_v3 }
 0x141   : > { %4933 = vmatprep.mubr.msk.f32.mxu0 %vm524_vm2, %v462_v4 }
 0x144   : > { %4934 = vmatmul.mubr.msk.f32.gmra.mxu0 %vm524_vm2, %v462_v4 }
 0x145   : > { %4935 = vmatprep.mubr.msk.f32.mxu0 %vm524_vm2, %v463_v5 }
 0x148   : > { %4936 = vmatmul.mubr.msk.f32.gmra.mxu0 %vm524_vm2, %v463_v5 }
 0x149   : > { %4937 = vmatprep.mubr.msk.f32.mxu0 %vm524_vm2, %v464_v6 }
 0x14c   : > { %4938 = vmatmul.mubr.msk.f32.gmra.mxu0 %vm524_vm2, %v464_v6 }
 0x14d   : > { %4939 = vmatprep.mubr.msk.f32.mxu0 %vm524_vm2, %v465_v7 }
 0x150   : > { %4940 = vmatmul.mubr.msk.f32.gmra.mxu0 %vm524_vm2, %v465_v7 }
 0x151   : > { %4941 = vmatprep.mubr.msk.f32.mxu0 %vm524_vm2, %v466_v8 }
 0x154   : > { %4942 = vmatmul.mubr.msk.f32.gmra.mxu0 %vm524_vm2, %v466_v8 }
 0x155   : > { %4943 = vmatprep.mubr.msk.f32.mxu0 %vm524_vm2, %v467_v9 }
 0x158   : > { %4944 = vmatmul.mubr.msk.f32.gmra.mxu0 %vm524_vm2, %v467_v9 }
 0x159   : > { %4945 = vmatprep.mubr.msk.f32.mxu0 %vm524_vm2, %v468_v10 }
 0x15c   : > { %4946 = vmatmul.mubr.msk.f32.gmra.mxu0 %vm524_vm2, %v468_v10 }
 0x15d   : > { %4947 = vmatprep.mubr.msk.f32.mxu0 %vm524_vm2, %v469_v11 }
 0x160   : > { %4948 = vmatmul.mubr.msk.f32.gmra.mxu0 %vm524_vm2, %v469_v11 }
 0x161   : > { %4949 = vmatprep.mubr.msk.f32.mxu0 %vm524_vm2, %v470_v12 }
 0x164   : > { %4950 = vmatmul.mubr.msk.f32.gmra.mxu0 %vm524_vm2, %v470_v12 }
 0x165   : > { %4951 = vmatprep.mubr.msk.f32.mxu0 %vm524_vm2, %v471_v13 }
 0x168   : > { %4952 = vmatmul.mubr.msk.f32.gmra.mxu0 %vm524_vm2, %v471_v13 }
 0x169   : > { %4953 = vmatprep.mubr.msk.f32.mxu0 %vm524_vm2, %v472_v14 }
 0x16c   : > { %4954 = vmatmul.mubr.msk.f32.gmra.mxu0 %vm524_vm2, %v472_v14 }
 0x16d   : > { %4955 = vmatprep.mubr.msk.f32.mxu0 %vm524_vm2, %v473_v42 }
 0x170   : > { %4956 = vmatmul.mubr.msk.f32.gmra.mxu0 %vm524_vm2, %v473_v42 }
 0x171   : > { %4957 = vmatprep.mubr.msk.f32.mxu0 %vm524_vm2, %v474_v46 }
 0x174   : > { %4958 = vmatmul.mubr.msk.f32.gmra.mxu0 %vm524_vm2, %v474_v46 }
 0x175   : > { %4959 = vmatprep.mubr.msk.f32.mxu0 %vm524_vm2, %v475_v40 }
 0x178   : > { %4960 = vmatmul.mubr.msk.f32.gmra.mxu0 %vm524_vm2, %v475_v40 }
 0x17c   : > { %v6256_v15 = vpop.f32.mrf.mxu0 }
 0x17e   : > { %v6258_v16 = vpop.f32.mrf.mxu0 }
 0x17f   : > { %v1326_v17 = vmax.f32 %v6256_v15, %v6258_v16 }
 0x180   : > { %v6262_v18 = vpop.f32.mrf.mxu0 }
 0x181   : > { %1327 = vmax.xlane.f32.xlu0 %v1326_v17 }
 0x182   : > { %v6264_v19 = vpop.f32.mrf.mxu0 }
 0x183   : > { %v1329_v20 = vmax.f32 %v6262_v18, %v6264_v19 }
 0x184   : > { %v6268_v21 = vpop.f32.mrf.mxu0 }
 0x185   : > { %1330 = vmax.xlane.f32.xlu0 %v1329_v20 }
 0x186   : > { %v6270_v22 = vpop.f32.mrf.mxu0 }
 0x187   : > { %v1332_v23 = vmax.f32 %v6268_v21, %v6270_v22 }
 0x188   : > { %v6274_v24 = vpop.f32.mrf.mxu0 }
 0x189   : > { %1333 = vmax.xlane.f32.xlu1 %v1332_v23 }
 0x18a   : > { %v6276_v25 = vpop.f32.mrf.mxu0 }
 0x18b   : > { %v1335_v26 = vmax.f32 %v6274_v24, %v6276_v25 }
 0x18c   : > { %v6280_v27 = vpop.f32.mrf.mxu0 }
 0x18d   : > { %1336 = vmax.xlane.f32.xlu1 %v1335_v26 }
 0x18e   : > { %v6282_v28 = vpop.f32.mrf.mxu0 }
 0x18f   : > { %v1338_v29 = vmax.f32 %v6280_v27, %v6282_v28 }
 0x190   : > { %v6286_v30 = vpop.f32.mrf.mxu0 }
 0x191   : > { %1339 = vmax.xlane.f32.xlu0 %v1338_v29 }
 0x192   : > { %v6288_v31 = vpop.f32.mrf.mxu0 }
 0x193   : > { %v1341_v32 = vmax.f32 %v6286_v30, %v6288_v31 }
 0x194   : > { %v6292_v33 = vpop.f32.mrf.mxu0 }
 0x195   : > { %1342 = vmax.xlane.f32.xlu1 %v1341_v32 }
 0x196   : > { %v6294_v34 = vpop.f32.mrf.mxu0 }
 0x197   : > { %v1344_v35 = vmax.f32 %v6292_v33, %v6294_v34 }
 0x198   : > { %v6298_v36 = vpop.f32.mrf.mxu0 }
 0x199   : > { %1345 = vmax.xlane.f32.xlu0 %v1344_v35 }
 0x19a   : > { %v6300_v37 = vpop.f32.mrf.mxu0 }
 0x19b   : > { %v1347_v38 = vmax.f32 %v6298_v36, %v6300_v37 }
 0x19c   : > { %v6304_v39 = vpop.f32.mrf.mxu0 }
 0x19d   : > { %1348 = vmax.xlane.f32.xlu1 %v1347_v38 }
 0x19e   : > { %v6306_v41 = vpop.f32.mrf.mxu0 }
 0x19f   : > { %v1350_v43 = vmax.f32 %v6304_v39, %v6306_v41 }
 0x1a0   : > { %v6312_v44 = vpop.f32.mrf.mxu0 }
 0x1a1   : > { %1351 = vmax.xlane.f32.xlu0 %v1350_v43 }
 0x1a2   : > { %v6315_v45 = vpop.f32.mrf.mxu0 }
 0x1a3   : > { %v1353_v47 = vmax.f32 %v6312_v44, %v6315_v45 }
 0x1a4   : > { %v6321_v48 = vpop.f32.mrf.mxu0 }
 0x1a5   : > { %8853 = vst [vmem:[#allocation5_spill] sm:$0xff] %v6321_v48  ;;  %1354 = vmax.xlane.f32.xlu1 %v1353_v47  ;;  %v476_v47 = vld [vmem:[%s5655_s24 + $0x180] sm:$0xff] }
 0x1a6   : > { %v6324_v49 = vpop.f32.mrf.mxu0  ;;  %4961 = vmatprep.mubr.msk.f32.mxu0 %vm524_vm2, %v476_v47 }
 0x1a7   : > { %8854 = vst [vmem:[#allocation6_spill] sm:$0xff] %v6324_v49  ;;  %v1356_v50 = vmax.f32 %v6321_v48, %v6324_v49  ;;  %4962 = vmatmul.mubr.msk.f32.gmra.mxu0 %vm524_vm2, %v476_v47  ;;  %v3390_v47 = vld [vmem:[%s5665_s4 + $0x78] sm:$0xff] }
 0x1a8   : > { %v6328_v51 = vpop.f32.mrf.mxu0 }
 0x1a9   : > { %8855 = vst [vmem:[#allocation7_spill] sm:$0xff] %v6328_v51  ;;  %1357 = vmax.xlane.f32.xlu0 %v1356_v50 }
 0x1aa   : > { %v6330_v52 = vpop.f32.mrf.mxu0 }
 0x1ab   : > { %8856 = vst [vmem:[#allocation8_spill] sm:$0xff] %v6330_v52  ;;  %v1359_v53 = vmax.f32 %v6328_v51, %v6330_v52  ;;  %v6796_v52 = vld [vmem:[#allocation2 + $0xd8] sm:$0xff] }
 0x1ac   : > { %v6334_v54 = vpop.f32.mrf.mxu0  ;;  %8942 = vst [vmem:[#allocation94_spill] sm:$0xff] %v6796_v52 }
 0x1ad   : > { %8857 = vst [vmem:[#allocation9_spill] sm:$0xff] %v6334_v54  ;;  %1360 = vmax.xlane.f32.xlu1 %v1359_v53 }
 0x1ae   : > { %v6336_v55 = vpop.f32.mrf.mxu0 }
 0x1af   : > { %8858 = vst [vmem:[#allocation10_spill] sm:$0xff] %v6336_v55  ;;  %v1362_v56 = vmax.f32 %v6334_v54, %v6336_v55 }
 0x1b0   : > { %v6340_v57 = vpop.f32.mrf.mxu0 }
 0x1b1   : > { %8859 = vst [vmem:[#allocation11_spill] sm:$0xff] %v6340_v57  ;;  %1363 = vmax.xlane.f32.xlu0 %v1362_v56 }
 0x1b2   : > { %v6342_v58 = vpop.f32.mrf.mxu0 }
 0x1b3   : > { %8860 = vst [vmem:[#allocation12_spill] sm:$0xff] %v6342_v58  ;;  %v1365_v59 = vmax.f32 %v6340_v57, %v6342_v58  ;;  %v6740_v58 = vld [vmem:[#allocation2 + $0xa8] sm:$0xff] }
 0x1b4   : > { %v6346_v60 = vpop.f32.mrf.mxu0  ;;  %8925 = vst [vmem:[#allocation77_spill] sm:$0xff] %v6740_v58 }
 0x1b5   : > { %8861 = vst [vmem:[#allocation13_spill] sm:$0xff] %v6346_v60  ;;  %1366 = vmax.xlane.f32.xlu1 %v1365_v59 }
 0x1b6   : > { %v6348_v61 = vpop.f32.mrf.mxu0 }
 0x1b7   : > { %8862 = vst [vmem:[#allocation14_spill] sm:$0xff] %v6348_v61  ;;  %v1368_v62 = vmax.f32 %v6346_v60, %v6348_v61  ;;  %v6663_v60 = vld [vmem:[#allocation2 + $0x68] sm:$0xff] }
 0x1b8   : > { %v6352_v63 = vpop.f32.mrf.mxu0 }
 0x1b9   : > { %8863 = vst [vmem:[#allocation15_spill] sm:$0xff] %v6352_v63  ;;  %1369 = vmax.xlane.f32.xlu0 %v1368_v62 }
 0x1ba   : > { %v6354_v0 = vpop.f32.mrf.mxu0 }
 0x1bb   : > { %8864 = vst [vmem:[#allocation16_spill] sm:$0xff] %v6354_v0  ;;  %v1371_v1 = vmax.f32 %v6352_v63, %v6354_v0 }
 0x1bc   : > { %v6358_v2 = vpop.f32.mrf.mxu0 }
 0x1bd   : > { %8865 = vst [vmem:[#allocation17_spill] sm:$0xff] %v6358_v2  ;;  %1372 = vmax.xlane.f32.xlu1 %v1371_v1 }
 0x1be   : > { %v6360_v3 = vpop.f32.mrf.mxu0 }
 0x1bf   : > { %8866 = vst [vmem:[#allocation18_spill] sm:$0xff] %v6360_v3  ;;  %v1374_v4 = vmax.f32 %v6358_v2, %v6360_v3 }
 0x1c0   : > { %v6364_v5 = vpop.f32.mrf.mxu0 }
 0x1c1   : > { %8867 = vst [vmem:[#allocation19_spill] sm:$0xff] %v6364_v5  ;;  %1375 = vmax.xlane.f32.xlu0 %v1374_v4 }
 0x1c2   : > { %v6366_v6 = vpop.f32.mrf.mxu0 }
 0x1c3   : > { %8868 = vst [vmem:[#allocation20_spill] sm:$0xff] %v6366_v6  ;;  %v1377_v7 = vmax.f32 %v6364_v5, %v6366_v6  ;;  %v6636_v5 = vld [vmem:[#allocation2 + $0x50] sm:$0xff] }
 0x1c4   : > { %v6370_v8 = vpop.f32.mrf.mxu0 }
 0x1c5   : > { %8869 = vst [vmem:[#allocation21_spill] sm:$0xff] %v6370_v8  ;;  %1378 = vmax.xlane.f32.xlu1 %v1377_v7 }
 0x1c6   : > { %v6372_v9 = vpop.f32.mrf.mxu0 }
 0x1c7   : > { %8870 = vst [vmem:[#allocation22_spill] sm:$0xff] %v6372_v9  ;;  %v1380_v10 = vmax.f32 %v6370_v8, %v6372_v9  ;;  %v3392_v9 = vld [vmem:[%s5665_s4 + $0x88] sm:$0xff] }
 0x1c8   : > { %v6376_v11 = vpop.f32.mrf.mxu0  ;;  %v6624_v8 = vld [vmem:[#allocation2 + $0x48] sm:$0xff] }
 0x1c9   : > { %8871 = vst [vmem:[#allocation23_spill] sm:$0xff] %v6376_v11  ;;  %1381 = vmax.xlane.f32.xlu0 %v1380_v10 }
 0x1ca   : > { %v6378_v12 = vpop.f32.mrf.mxu0 }
 0x1cb   : > { %8872 = vst [vmem:[#allocation24_spill] sm:$0xff] %v6378_v12  ;;  %v1383_v13 = vmax.f32 %v6376_v11, %v6378_v12 }
 0x1cc   : > { %v6382_v14 = vpop.f32.mrf.mxu0 }
 0x1cd   : > { %8873 = vst [vmem:[#allocation25_spill] sm:$0xff] %v6382_v14  ;;  %1384 = vmax.xlane.f32.xlu1 %v1383_v13 }
 0x1ce   : > { %v6384_v17 = vpop.f32.mrf.mxu0 }
 0x1cf   : > { %8874 = vst [vmem:[#allocation26_spill] sm:$0xff] %v6384_v17  ;;  %v1386_v20 = vmax.f32 %v6382_v14, %v6384_v17  ;;  %v3394_v14 = vld [vmem:[%s5665_s4 + $0x98] sm:$0xff] }
 0x1d0   : > { %v6388_v23 = vpop.f32.mrf.mxu0 }
 0x1d1   : > { %8875 = vst [vmem:[#allocation27_spill] sm:$0xff] %v6388_v23  ;;  %1387 = vmax.xlane.f32.xlu0 %v1386_v20 }
 0x1d2   : > { %v6390_v26 = vpop.f32.mrf.mxu0 }
 0x1d3   : > { %8876 = vst [vmem:[#allocation28_spill] sm:$0xff] %v6390_v26  ;;  %v1389_v29 = vmax.f32 %v6388_v23, %v6390_v26  ;;  %v6598_v23 = vld [vmem:[#allocation2 + $0x38] sm:$0xff]  ;;  %v6611_v26 = vld [vmem:[#allocation2 + $0x40] sm:$0xff] }
 0x1d4   : > { %v6394_v32 = vpop.f32.mrf.mxu0 }
 0x1d5   : > { %8877 = vst [vmem:[#allocation29_spill] sm:$0xff] %v6394_v32  ;;  %1390 = vmax.xlane.f32.xlu1 %v1389_v29 }
 0x1d6   : > { %v6396_v35 = vpop.f32.mrf.mxu0 }
 0x1d7   : > { %8878 = vst [vmem:[#allocation30_spill] sm:$0xff] %v6396_v35  ;;  %v1392_v38 = vmax.f32 %v6394_v32, %v6396_v35  ;;  %v3398_v35 = vld [vmem:[%s5665_s4 + $0xb8] sm:$0xff] }
 0x1d8   : > { %v6401_v42 = vpop.f32.mrf.mxu0 }
 0x1d9   : > { %8879 = vst [vmem:[#allocation31_spill] sm:$0xff] %v6401_v42  ;;  %1393 = vmax.xlane.f32.xlu0 %v1392_v38 }
 0x1da   : > { %v6405_v43 = vpop.f32.mrf.mxu0 }
 0x1db   : > { %8880 = vst [vmem:[#allocation32_spill] sm:$0xff] %v6405_v43  ;;  %v1395_v46 = vmax.f32 %v6401_v42, %v6405_v43  ;;  %v3396_v43 = vld [vmem:[%s5665_s4 + $0xa8] sm:$0xff] }
 0x1dc   : > { %v6410_v50 = vpop.f32.mrf.mxu0 }
 0x1dd   : > { %8881 = vst [vmem:[#allocation33_spill] sm:$0xff] %v6410_v50  ;;  %1396 = vmax.xlane.f32.xlu1 %v1395_v46  ;;  %v5597_v46 = vmov 0.0  }
 0x1de   : > { %v6414_v53 = vpop.f32.mrf.mxu0  ;;  %3407 = vmatprep.subr.mxu1 %v5597_v46 }
 0x1df   : > { %8882 = vst [vmem:[#allocation34_spill] sm:$0xff] %v6414_v53  ;;  %v1398_v56 = vmax.f32 %v6410_v50, %v6414_v53  ;;  %3408 = vmatpush1.msra.mxu1 %v3390_v47  ;;  %v3387_v47 = vld [vmem:[%s5665_s4 + $0x60] sm:$0xff] }
 0x1e0   : > { %v6418_v59 = vpop.f32.mrf.mxu0  ;;  %3409 = vmatprep.subr.mxu1 %v5597_v46  ;;  %v3403_v53 = vld [vmem:[%s5665_s4 + $0xe0] sm:$0xff] }
 0x1e1   : > { %8883 = vst [vmem:[#allocation35_spill] sm:$0xff] %v6418_v59  ;;  %1399 = vmax.xlane.f32.xlu0 %v1398_v56  ;;  %v6562_v50 = vld [vmem:[#allocation2 + $0x20] sm:$0xff] }
 0x1e2   : > { %v6420_v62 = vpop.f32.mrf.mxu0 }
 0x1e3   : > { %8884 = vst [vmem:[#allocation36_spill] sm:$0xff] %v6420_v62  ;;  %v1401_v1 = vmax.f32 %v6418_v59, %v6420_v62  ;;  %v6546_v59 = vld [vmem:[#allocation2 + $0x18] sm:$0xff]  ;;  %v3400_v62 = vld [vmem:[%s5665_s4 + $0xc8] sm:$0xff] }
 0x1e4   : > { %v6424_v4 = vpop.f32.mrf.mxu0 }
 0x1e5   : > { %8885 = vst [vmem:[#allocation37_spill] sm:$0xff] %v6424_v4  ;;  %1402 = vmax.xlane.f32.xlu1 %v1401_v1 }
 0x1e6   : > { %v6426_v7 = vpop.f32.mrf.mxu0 }
 0x1e7   : > { %8886 = vst [vmem:[#allocation38_spill] sm:$0xff] %v6426_v7  ;;  %v1404_v10 = vmax.f32 %v6424_v4, %v6426_v7 }
 0x1e8   : > { %v6430_v13 = vpop.f32.mrf.mxu0 }
 0x1e9   : > { %8887 = vst [vmem:[#allocation39_spill] sm:$0xff] %v6430_v13  ;;  %1405 = vmax.xlane.f32.xlu0 %v1404_v10  ;;  %v3389_v10 = vld [vmem:[%s5665_s4 + $0x70] sm:$0xff] }
 0x1ea   : > { %v6432_v20 = vpop.f32.mrf.mxu0  ;;  %3410 = vmatpush1.msra.mxu1 %v3389_v10  ;;  %v3386_v10 = vld [vmem:[%s5665_s4 + $0x58] sm:$0xff] }
 0x1eb   : > { %8888 = vst [vmem:[#allocation40_spill] sm:$0xff] %v6432_v20  ;;  %v1407_v29 = vmax.f32 %v6430_v13, %v6432_v20  ;;  %3411 = vmatprep.subr.mxu1 %v5597_v46  ;;  %v3388_v13 = vld [vmem:[%s5665_s4 + $0x68] sm:$0xff] }
 0x1ec   : > { %v6436_v38 = vpop.f32.mrf.mxu0  ;;  %3412 = vmatpush1.msra.mxu1 %v3388_v13  ;;  %v3385_v13 = vld [vmem:[%s5665_s4 + $0x50] sm:$0xff] }
 0x1ed   : > { %8889 = vst [vmem:[#allocation41_spill] sm:$0xff] %v6436_v38  ;;  %1408 = vmax.xlane.f32.xlu1 %v1407_v29  ;;  %3413 = vmatprep.subr.mxu1 %v5597_v46 }
 0x1ee   : > { %v6438_v40 = vpop.f32.mrf.mxu0  ;;  %3414 = vmatpush1.msra.mxu1 %v3387_v47  ;;  %v3384_v47 = vld [vmem:[%s5665_s4 + $0x48] sm:$0xff] }
 0x1ef   : > { %8890 = vst [vmem:[#allocation42_spill] sm:$0xff] %v6438_v40  ;;  %v1410_v56 = vmax.f32 %v6436_v38, %v6438_v40  ;;  %3415 = vmatprep.subr.mxu1 %v5597_v46 }
 0x1f0   : > { %v6444_v1 = vpop.f32.mrf.mxu0  ;;  %3416 = vmatpush1.msra.mxu1 %v3386_v10  ;;  %v3383_v10 = vld [vmem:[%s5665_s4 + $0x40] sm:$0xff] }
 0x1f1   : > { %8891 = vst [vmem:[#allocation43_spill] sm:$0xff] %v6444_v1  ;;  %1411 = vmax.xlane.f32.xlu0 %v1410_v56  ;;  %3417 = vmatprep.subr.mxu1 %v5597_v46 }
 0x1f2   : > { %v6448_v29 = vpop.f32.mrf.mxu0  ;;  %3418 = vmatpush1.msra.mxu1 %v3385_v13  ;;  %v3382_v13 = vld [vmem:[%s5665_s4 + $0x38] sm:$0xff] }
 0x1f3   : > { %8892 = vst [vmem:[#allocation44_spill] sm:$0xff] %v6448_v29  ;;  %v1413_v7 = vmax.f32 %v6444_v1, %v6448_v29  ;;  %3419 = vmatprep.subr.mxu1 %v5597_v46 }
 0x1f4   : > { %v6454_v40 = vpop.f32.mrf.mxu0  ;;  %3420 = vmatpush1.msra.mxu1 %v3384_v47  ;;  %v3381_v47 = vld [vmem:[%s5665_s4 + $0x30] sm:$0xff] }
 0x1f5   : > { %8893 = vst [vmem:[#allocation45_spill] sm:$0xff] %v6454_v40  ;;  %1414 = vmax.xlane.f32.xlu1 %v1413_v7  ;;  %3421 = vmatprep.subr.mxu1 %v5597_v46 }
 0x1f6   : > { %v6458_v56 = vpop.f32.mrf.mxu0  ;;  %3422 = vmatpush1.msra.mxu1 %v3383_v10  ;;  %v3380_v10 = vld [vmem:[%s5665_s4 + $0x28] sm:$0xff] }
 0x1f7   : > { %8894 = vst [vmem:[#allocation46_spill] sm:$0xff] %v6458_v56  ;;  %v1416_v38 = vmax.f32 %v6454_v40, %v6458_v56  ;;  %3423 = vmatprep.subr.mxu1 %v5597_v46 }
 0x1f8   : > { %v6464_v1 = vpop.f32.mrf.mxu0  ;;  %3424 = vmatpush1.msra.mxu1 %v3382_v13  ;;  %v3379_v13 = vld [vmem:[%s5665_s4 + $0x20] sm:$0xff] }
 0x1f9   : > { %8895 = vst [vmem:[#allocation47_spill] sm:$0xff] %v6464_v1  ;;  %1417 = vmax.xlane.f32.xlu0 %v1416_v38  ;;  %3425 = vmatprep.subr.mxu1 %v5597_v46 }
 0x1fa   : > { %v6468_v7 = vpop.f32.mrf.mxu0  ;;  %3426 = vmatpush1.msra.mxu1 %v3381_v47  ;;  %v3378_v47 = vld [vmem:[%s5665_s4 + $0x18] sm:$0xff] }
 0x1fb   : > { %8896 = vst [vmem:[#allocation48_spill] sm:$0xff] %v6468_v7  ;;  %v1419_v29 = vmax.f32 %v6464_v1, %v6468_v7  ;;  %3427 = vmatprep.subr.mxu1 %v5597_v46 }
 0x1fc   : > { %v6474_v56 = vpop.f32.mrf.mxu0  ;;  %3428 = vmatpush1.msra.mxu1 %v3380_v10  ;;  %v6506_v10 = vld [vmem:[#allocation2] sm:$0xff] }
 0x1fd   : > { %8897 = vst [vmem:[#allocation49_spill] sm:$0xff] %v6474_v56  ;;  %1420 = vmax.xlane.f32.xlu1 %v1419_v29  ;;  %3429 = vmatprep.subr.mxu1 %v5597_v46 }
 0x1fe   : > { %v6478_v38 = vpop.f32.mrf.mxu0  ;;  %3430 = vmatpush1.msra.mxu1 %v3379_v13 }
 0x1ff   : > { %8898 = vst [vmem:[#allocation50_spill] sm:$0xff] %v6478_v38  ;;  %v1422_v40 = vmax.f32 %v6474_v56, %v6478_v38  ;;  %3431 = vmatprep.subr.mxu1 %v5597_v46 }
 0x200   : > { %v6484_v1 = vpop.f32.mrf.mxu0  ;;  %3432 = vmatpush1.msra.mxu1 %v3378_v47 }
 0x201   : > { %8899 = vst [vmem:[#allocation51_spill] sm:$0xff] %v6484_v1  ;;  %1423 = vmax.xlane.f32.xlu0 %v1422_v40  ;;  %3433 = vmatprep.subr.mxu1 %v5597_v46 }
 0x202   : > { %v6488_v29 = vpop.f32.mrf.mxu0 }
 0x203   : > { %8900 = vst [vmem:[#allocation52_spill] sm:$0xff] %v6488_v29  ;;  %v1425_v7 = vmax.f32 %v6484_v1, %v6488_v29  ;;  %v3377_v1 = vld [vmem:[%s5665_s4 + $0x10] sm:$0xff]  ;;  %v3376_v29 = vld [vmem:[%s5665_s4 + $0x8] sm:$0xff] }
 0x204   : > { %v6494_v38 = vpop.f32.mrf.mxu0  ;;  %3434 = vmatpush1.msra.mxu1 %v3377_v1  ;;  %v3375_v1 = vld [vmem:[%s5665_s4] sm:$0xff] }
 0x205   : > { %8901 = vst [vmem:[#allocation53_spill] sm:$0xff] %v6494_v38  ;;  %1426 = vmax.xlane.f32.xlu1 %v1425_v7  ;;  %3435 = vmatprep.subr.mxu1 %v5597_v46 }
 0x206   : > { %v6498_v40 = vpop.f32.mrf.mxu0  ;;  %3436 = vmatpush1.msra.mxu1 %v3376_v29  ;;  %v6530_v29 = vld [vmem:[#allocation2 + $0x10] sm:$0xff] }
 0x207   : > { %8902 = vst [vmem:[#allocation54_spill] sm:$0xff] %v6498_v40  ;;  %v1428_v56 = vmax.f32 %v6494_v38, %v6498_v40  ;;  %v6519_v38 = vld [vmem:[#allocation2 + $0x8] sm:$0xff]  ;;  %3437 = vmatprep.subr.mxu1 %v5597_v46 }
 0x208   : > { %v6504_v4 = vpop.f32.mrf.mxu0  ;;  %3438 = vmatpush1.msra.mxu1 %v3375_v1 }
 0x209   : > { %8903 = vst [vmem:[#allocation55_spill] sm:$0xff] %v6504_v4  ;;  %1429 = vmax.xlane.f32.xlu0 %v1428_v56  ;;  %3439 = vmatprep.subr.mxu1 %v5597_v46 }
 0x20a   : > { %v1328_v7 = vpop.xlane.xlu0 %1327  ;;  %v6510_v13 = vpop.f32.mrf.mxu0 }
 0x20b   : > { %8904 = vst [vmem:[#allocation56_spill] sm:$0xff] %v6510_v13  ;;  %v6515_v47 = vmax.f32 %v6506_v10, %v1328_v7  ;;  %v1431_v40 = vmax.f32 %v6504_v4, %v6510_v13  ;;  %v3406_v7 = vld [vmem:[%s5665_s4 + $0xf8] sm:$0xff]  ;;  %v477_v4 = vld [vmem:[%s5655_s24 + $0x188] sm:$0xff]  ;;  %v3405_v13 = vld [vmem:[%s5665_s4 + $0xf0] sm:$0xff] }
 0x20c   : > { %3440 = vmatpush2.msra.mxu1 %v3406_v7  ;;  %4963 = vmatprep.mubr.msk.f32.mxu0 %vm524_vm2, %v477_v4 }
 0x20d   : > { %3920 = vst.msk [vmem:[#allocation2] sm:$0xff] %vm2862_vm3, %v6515_v47  ;;  %1432 = vmax.xlane.f32.xlu1 %v1431_v40  ;;  %3441 = vmatprep.subr.mxu1 %v5597_v46  ;;  %v478_v40 = vld [vmem:[%s5655_s24 + $0x190] sm:$0xff] }
 0x20e   : > { %v1331_v56 = vpop.xlane.xlu0 %1330  ;;  %3442 = vmatpush2.msra.mxu1 %v3405_v13  ;;  %4964 = vmatmul.mubr.msk.f32.gmra.mxu0 %vm524_vm2, %v477_v4  ;;  %v3401_v13 = vld [vmem:[%s5665_s4 + $0xd0] sm:$0xff] }
 0x20f   : > { %v6528_v20 = vmax.f32 %v6519_v38, %v1331_v56  ;;  %3443 = vmatprep.subr.mxu1 %v5597_v46  ;;  %v3404_v56 = vld [vmem:[%s5665_s4 + $0xe8] sm:$0xff]  ;;  %4965 = vmatprep.mubr.msk.f32.mxu0 %vm524_vm2, %v478_v40 }
 0x210   : > { %3444 = vmatpush2.msra.mxu1 %v3404_v56 }
 0x211   : > { %3921 = vst.msk [vmem:[#allocation2 + $0x8] sm:$0xff] %vm2862_vm3, %v6528_v20  ;;  %3445 = vmatprep.subr.mxu1 %v5597_v46 }
 0x212   : > { %v1334_v1 = vpop.xlane.xlu1 %1333  ;;  %3446 = vmatpush2.msra.mxu1 %v3403_v53  ;;  %4966 = vmatmul.mubr.msk.f32.gmra.mxu0 %vm524_vm2, %v478_v40  ;;  %v6586_v53 = vld [vmem:[#allocation2 + $0x30] sm:$0xff] }
 0x213   : > { %v6544_v7 = vmax.f32 %v6530_v29, %v1334_v1  ;;  %3447 = vmatprep.subr.mxu1 %v5597_v46  ;;  %v3402_v1 = vld [vmem:[%s5665_s4 + $0xd8] sm:$0xff] }
 0x214   : > { %3448 = vmatpush2.msra.mxu1 %v3402_v1  ;;  %v6574_v1 = vld [vmem:[#allocation2 + $0x28] sm:$0xff] }
 0x215   : > { %3922 = vst.msk [vmem:[#allocation2 + $0x10] sm:$0xff] %vm2862_vm3, %v6544_v7  ;;  %3449 = vmatprep.subr.mxu1 %v5597_v46 }
 0x216   : > { %v1337_v4 = vpop.xlane.xlu1 %1336  ;;  %3450 = vmatpush2.msra.mxu1 %v3401_v13 }
 0x217   : > { %v6560_v56 = vmax.f32 %v6546_v59, %v1337_v4  ;;  %3451 = vmatprep.subr.mxu1 %v5597_v46 }
 0x218   : > { %3452 = vmatpush2.msra.mxu1 %v3400_v62 }
 0x219   : > { %3923 = vst.msk [vmem:[#allocation2 + $0x18] sm:$0xff] %vm2862_vm3, %v6560_v56  ;;  %3453 = vmatprep.subr.mxu1 %v5597_v46 }
 0x21a   : > { %v1340_v40 = vpop.xlane.xlu0 %1339 }
 0x21b   : > { %v6572_v4 = vmax.f32 %v6562_v50, %v1340_v40  ;;  %v3399_v40 = vld [vmem:[%s5665_s4 + $0xc0] sm:$0xff] }
 0x21c   : > { %3454 = vmatpush2.msra.mxu1 %v3399_v40  ;;  %v3395_v40 = vld [vmem:[%s5665_s4 + $0xa0] sm:$0xff] }
 0x21d   : > { %3924 = vst.msk [vmem:[#allocation2 + $0x20] sm:$0xff] %vm2862_vm3, %v6572_v4  ;;  %3455 = vmatprep.subr.mxu1 %v5597_v46 }
 0x21e   : > { %v1343_v42 = vpop.xlane.xlu1 %1342  ;;  %1781 = vperm.xlu1 %5039, %v6528_v20   ;;  %3456 = vmatpush2.msra.mxu1 %v3398_v35 }
 0x21f   : > { %v6581_v13 = vmax.f32 %v6574_v1, %v1343_v42  ;;  %1776 = vperm.xlu0 %5038, %v6515_v47   ;;  %v3397_v42 = vld [vmem:[%s5665_s4 + $0xb0] sm:$0xff]  ;;  %3457 = vmatprep.subr.mxu1 %v5597_v46 }
 0x220   : > { %3458 = vmatpush2.msra.mxu1 %v3397_v42  ;;  %v3393_v42 = vld [vmem:[%s5665_s4 + $0x90] sm:$0xff] }
 0x221   : > { %3925 = vst.msk [vmem:[#allocation2 + $0x28] sm:$0xff] %vm2862_vm3, %v6581_v13  ;;  %3459 = vmatprep.subr.mxu1 %v5597_v46 }
 0x222   : > { %v1346_v32 = vpop.xlane.xlu0 %1345  ;;  %3460 = vmatpush2.msra.mxu1 %v3396_v43 }
 0x223   : > { %v6594_v62 = vmax.f32 %v6586_v53, %v1346_v32  ;;  %v6607_v32 = vpop.f32.mrf.mxu0  ;;  %3461 = vmatprep.subr.mxu1 %v5597_v46 }
 0x224   : > { %8905 = vst [vmem:[#allocation57_spill] sm:$0xff] %v6607_v32  ;;  %3462 = vmatpush2.msra.mxu1 %v3395_v40  ;;  %v3391_v40 = vld [vmem:[%s5665_s4 + $0x80] sm:$0xff] }
 0x225   : > { %3926 = vst.msk [vmem:[#allocation2 + $0x30] sm:$0xff] %vm2862_vm3, %v6594_v62  ;;  %3463 = vmatprep.subr.mxu1 %v5597_v46  ;;  %v6620_v43 = vpop.f32.mrf.mxu0 }
 0x226   : > { %v1349_v17 = vpop.xlane.xlu1 %1348  ;;  %3464 = vmatpush2.msra.mxu1 %v3394_v14  ;;  %8906 = vst [vmem:[#allocation58_spill] sm:$0xff] %v6620_v43  ;;  %v1434_v0 = vmax.f32 %v6607_v32, %v6620_v43  ;;  %v1582_v43 = vsub.f32 %v6506_v10, %v6515_v47  ;;  %v6699_v10 = vld [vmem:[#allocation2 + $0x88] sm:$0xff]  ;;  %v479_v47 = vld [vmem:[%s5655_s24 + $0x198] sm:$0xff] }
 0x227   : > { %v6605_v35 = vmax.f32 %v6598_v23, %v1349_v17  ;;  %3465 = vmatprep.subr.mxu1 %v5597_v46  ;;  %8916 = vst [vmem:[#allocation68_spill] sm:$0xff] %v6699_v10  ;;  %4967 = vmatprep.mubr.msk.f32.mxu0 %vm524_vm2, %v479_v47 }
 0x228   : > { %3466 = vmatpush2.msra.mxu1 %v3393_v42  ;;  %4968 = vmatmul.mubr.msk.f32.gmra.mxu0 %vm524_vm2, %v479_v47  ;;  %v6720_v47 = vld [vmem:[#allocation2 + $0x98] sm:$0xff] }
 0x229   : > { %3927 = vst.msk [vmem:[#allocation2 + $0x38] sm:$0xff] %vm2862_vm3, %v6605_v35  ;;  %3467 = vmatprep.subr.mxu1 %v5597_v46  ;;  %8919 = vst [vmem:[#allocation71_spill] sm:$0xff] %v6720_v47 }
 0x22a   : > { %v1352_v11 = vpop.xlane.xlu0 %1351  ;;  %3468 = vmatpush2.msra.mxu1 %v3392_v9  ;;  %v6645_v9 = vld [vmem:[#allocation2 + $0x58] sm:$0xff] }
 0x22b   : > { %v6618_v17 = vmax.f32 %v6611_v26, %v1352_v11  ;;  %v6633_v11 = vpop.f32.mrf.mxu0  ;;  %3469 = vmatprep.subr.mxu1 %v5597_v46 }
 0x22c   : > { %8907 = vst [vmem:[#allocation59_spill] sm:$0xff] %v6633_v11  ;;  %3470 = vmatpush2.msra.mxu1 %v3391_v40  ;;  %v6654_v40 = vld [vmem:[#allocation2 + $0x60] sm:$0xff] }
 0x22d   : > { %3928 = vst.msk [vmem:[#allocation2 + $0x40] sm:$0xff] %vm2862_vm3, %v6618_v17  ;;  %v6643_v2 = vpop.f32.mrf.mxu0  ;;  %8910 = vst [vmem:[#allocation62_spill] sm:$0xff] %v6654_v40 }
 0x22e   : > { %v1355_v12 = vpop.xlane.xlu1 %1354  ;;  %8908 = vst [vmem:[#allocation60_spill] sm:$0xff] %v6643_v2  ;;  %v1437_v54 = vmax.f32 %v6633_v11, %v6643_v2  ;;  %v6692_v2 = vld [vmem:[#allocation2 + $0x80] sm:$0xff] }
 0x22f   : > { %v6631_v14 = vmax.f32 %v6624_v8, %v1355_v12  ;;  %v6652_v6 = vpop.f32.mrf.mxu0  ;;  %8914 = vst [vmem:[#allocation66_spill] sm:$0xff] %v6692_v2 }
 0x230   : > { %8909 = vst [vmem:[#allocation61_spill] sm:$0xff] %v6652_v6 }
 0x231   : > { %3929 = vst.msk [vmem:[#allocation2 + $0x48] sm:$0xff] %vm2862_vm3, %v6631_v14  ;;  %v6661_v61 = vpop.f32.mrf.mxu0 }
 0x232   : > { %v1358_v42 = vpop.xlane.xlu0 %1357  ;;  %8911 = vst [vmem:[#allocation63_spill] sm:$0xff] %v6661_v61  ;;  %v1440_v57 = vmax.f32 %v6652_v6, %v6661_v61  ;;  %v1646_v61 = vmul.f32 1.442695, %v1582_v43  ;;  %v6709_v43 = vld [vmem:[#allocation2 + $0x90] sm:$0xff] }
 0x233   : > { %v6641_v3 = vmax.f32 %v6636_v5, %v1358_v42  ;;  %8917 = vst [vmem:[#allocation69_spill] sm:$0xff] %v6709_v43 }
 0x234   : > { %5040 = vpow2.f32 %v1646_v61  ;;  %v480_v61 = vld [vmem:[%s5655_s24 + $0x1a0] sm:$0xff] }
 0x235   : > { %3930 = vst.msk [vmem:[#allocation2 + $0x50] sm:$0xff] %vm2862_vm3, %v6641_v3  ;;  %4969 = vmatprep.mubr.msk.f32.mxu0 %vm524_vm2, %v480_v61 }
 0x236   : > { %v1361_v12 = vpop.xlane.xlu1 %1360  ;;  %4970 = vmatmul.mubr.msk.f32.gmra.mxu0 %vm524_vm2, %v480_v61  ;;  %v6731_v61 = vld [vmem:[#allocation2 + $0xa0] sm:$0xff] }
 0x237   : > { %v6650_v46 = vmax.f32 %v6645_v9, %v1361_v12  ;;  %8922 = vst [vmem:[#allocation74_spill] sm:$0xff] %v6731_v61 }
 0x239   : > { %3931 = vst.msk [vmem:[#allocation2 + $0x58] sm:$0xff] %vm2862_vm3, %v6650_v46 }
 0x23a   : > { %v1364_v42 = vpop.xlane.xlu0 %1363 }
 0x23b   : > { %v6659_v63 = vmax.f32 %v6654_v40, %v1364_v42  ;;  %v6674_v42 = vld [vmem:[#allocation2 + $0x70] sm:$0xff] }
 0x23c   : > { %8912 = vst [vmem:[#allocation64_spill] sm:$0xff] %v6674_v42 }
 0x23d   : > { %3932 = vst.msk [vmem:[#allocation2 + $0x60] sm:$0xff] %vm2862_vm3, %v6659_v63 }
 0x23e   : > { %v1367_v12 = vpop.xlane.xlu1 %1366  ;;  %1435 = vmax.xlane.f32.xlu0 %v1434_v0 }
 0x23f   : > { %v6672_v55 = vmax.f32 %v6663_v60, %v1367_v12  ;;  %v6685_v12 = vld [vmem:[#allocation2 + $0x78] sm:$0xff] }
 0x240   : > { %8913 = vst [vmem:[#allocation65_spill] sm:$0xff] %v6685_v12 }
 0x241   : > { %3933 = vst.msk [vmem:[#allocation2 + $0x68] sm:$0xff] %vm2862_vm3, %v6672_v55 }
 0x242   : > { %v1370_v32 = vpop.xlane.xlu0 %1369  ;;  %1438 = vmax.xlane.f32.xlu1 %v1437_v54  ;;  %1441 = vmax.xlane.f32.xlu0 %v1440_v57 }
 0x243   : > { %v6683_v0 = vmax.f32 %v6674_v42, %v1370_v32  ;;  %v6724_v42 = vpop.eup %5040 }
 0x244   : > { %8920 = vst [vmem:[#allocation72_spill] sm:$0xff] %v6724_v42 }
 0x245   : > { %3934 = vst.msk [vmem:[#allocation2 + $0x70] sm:$0xff] %vm2862_vm3, %v6683_v0 }
 0x246   : > { %v1373_v6 = vpop.xlane.xlu1 %1372 }
 0x247   : > { %v6690_v11 = vmax.f32 %v6685_v12, %v1373_v6 }
 0x249   : > { %3935 = vst.msk [vmem:[#allocation2 + $0x78] sm:$0xff] %vm2862_vm3, %v6690_v11 }
 0x24a   : > { %v1376_v54 = vpop.xlane.xlu0 %1375 }
 0x24b   : > { %v6697_v57 = vmax.f32 %v6692_v2, %v1376_v54 }
 0x24d   : > { %8915 = vst [vmem:[#allocation67_spill] sm:$0xff] %v6697_v57  ;;  %3936 = vst.msk [vmem:[#allocation2 + $0x80] sm:$0xff] %vm2862_vm3, %v6697_v57 }
 0x24e   : > { %v1379_v6 = vpop.xlane.xlu1 %1378 }
 0x24f   : > { %v6707_v32 = vmax.f32 %v6699_v10, %v1379_v6 }
 0x251   : > { %3937 = vst.msk [vmem:[#allocation2 + $0x88] sm:$0xff] %vm2862_vm3, %v6707_v32 }
 0x252   : > { %v1382_v54 = vpop.xlane.xlu0 %1381 }
 0x253   : > { %v6717_v2 = vmax.f32 %v6709_v43, %v1382_v54  ;;  %1786 = vperm.xlu1 %5039, %v6544_v7   ;;  %v6733_v54 = vpop.f32.mrf.mxu0 }
 0x254   : > { %8923 = vst [vmem:[#allocation75_spill] sm:$0xff] %v6733_v54 }
 0x255   : > { %8918 = vst [vmem:[#allocation70_spill] sm:$0xff] %v6717_v2  ;;  %3938 = vst.msk [vmem:[#allocation2 + $0x90] sm:$0xff] %vm2862_vm3, %v6717_v2  ;;  %v6742_v57 = vpop.f32.mrf.mxu0 }
 0x256   : > { %v1385_v6 = vpop.xlane.xlu1 %1384  ;;  %8926 = vst [vmem:[#allocation78_spill] sm:$0xff] %v6742_v57 }
 0x257   : > { %v6727_v10 = vmax.f32 %v6720_v47, %v1385_v6  ;;  %1791 = vperm.xlu1 %5039, %v6560_v56   ;;  %v6749_v47 = vld [vmem:[#allocation2 + $0xb0] sm:$0xff]  ;;  %v6751_v40 = vpop.f32.mrf.mxu0 }
 0x258   : > { %2993 = vperm.xlu0 %5038, %v6724_v42   ;;  %8928 = vst [vmem:[#allocation80_spill] sm:$0xff] %v6749_v47  ;;  %8929 = vst [vmem:[#allocation81_spill] sm:$0xff] %v6751_v40 }
 0x259   : > { %8921 = vst [vmem:[#allocation73_spill] sm:$0xff] %v6727_v10  ;;  %3939 = vst.msk [vmem:[#allocation2 + $0x98] sm:$0xff] %vm2862_vm3, %v6727_v10  ;;  %v6758_v10 = vld [vmem:[#allocation2 + $0xb8] sm:$0xff]  ;;  %v6760_v12 = vpop.f32.mrf.mxu0 }
 0x25a   : > { %v1388_v43 = vpop.xlane.xlu0 %1387  ;;  %8931 = vst [vmem:[#allocation83_spill] sm:$0xff] %v6758_v10  ;;  %8932 = vst [vmem:[#allocation84_spill] sm:$0xff] %v6760_v12 }
 0x25b   : > { %v6738_v2 = vmax.f32 %v6731_v61, %v1388_v43  ;;  %v6769_v51 = vpop.f32.mrf.mxu0 }
 0x25c   : > { %8935 = vst [vmem:[#allocation87_spill] sm:$0xff] %v6769_v51 }
 0x25d   : > { %8924 = vst [vmem:[#allocation76_spill] sm:$0xff] %v6738_v2  ;;  %3940 = vst.msk [vmem:[#allocation2 + $0xa0] sm:$0xff] %vm2862_vm3, %v6738_v2  ;;  %v6767_v2 = vld [vmem:[#allocation2 + $0xc0] sm:$0xff]  ;;  %v6778_v49 = vpop.f32.mrf.mxu0 }
 0x25e   : > { %v1391_v6 = vpop.xlane.xlu1 %1390  ;;  %8934 = vst [vmem:[#allocation86_spill] sm:$0xff] %v6767_v2  ;;  %8938 = vst [vmem:[#allocation90_spill] sm:$0xff] %v6778_v49 }
 0x25f   : > { %v6747_v42 = vmax.f32 %v6740_v58, %v1391_v6  ;;  %v6787_v48 = vpop.f32.mrf.mxu0 }
 0x260   : > { %8940 = vst [vmem:[#allocation92_spill] sm:$0xff] %v6787_v48 }
 0x261   : > { %8927 = vst [vmem:[#allocation79_spill] sm:$0xff] %v6747_v42  ;;  %3941 = vst.msk [vmem:[#allocation2 + $0xa8] sm:$0xff] %vm2862_vm3, %v6747_v42  ;;  %v6776_v42 = vld [vmem:[#allocation2 + $0xc8] sm:$0xff] }
 0x262   : > { %v1394_v43 = vpop.xlane.xlu0 %1393  ;;  %8937 = vst [vmem:[#allocation89_spill] sm:$0xff] %v6776_v42 }
 0x263   : > { %v6756_v61 = vmax.f32 %v6749_v47, %v1394_v43 }
 0x265   : > { %8930 = vst [vmem:[#allocation82_spill] sm:$0xff] %v6756_v61  ;;  %3942 = vst.msk [vmem:[#allocation2 + $0xb0] sm:$0xff] %vm2862_vm3, %v6756_v61  ;;  %v6785_v61 = vld [vmem:[#allocation2 + $0xd0] sm:$0xff] }
 0x266   : > { %v1397_v6 = vpop.xlane.xlu1 %1396  ;;  %8939 = vst [vmem:[#allocation91_spill] sm:$0xff] %v6785_v61 }
 0x267   : > { %v6765_v58 = vmax.f32 %v6758_v10, %v1397_v6 }
 0x269   : > { %8933 = vst [vmem:[#allocation85_spill] sm:$0xff] %v6765_v58  ;;  %3943 = vst.msk [vmem:[#allocation2 + $0xb8] sm:$0xff] %vm2862_vm3, %v6765_v58  ;;  %v1446_v58 = vmax.f32 %v6751_v40, %v6760_v12  ;;  %v1443_v12 = vmax.f32 %v6733_v54, %v6742_v57  ;;  %v481_v54 = vld [vmem:[%s5655_s24 + $0x1a8] sm:$0xff]  ;;  %v6827_v57 = vld [vmem:[#allocation2 + $0xf0] sm:$0xff] }
 0x26a   : > { %v1400_v43 = vpop.xlane.xlu0 %1399  ;;  %8947 = vst [vmem:[#allocation98_spill] sm:$0xff] %v6827_v57  ;;  %4971 = vmatprep.mubr.msk.f32.mxu0 %vm524_vm2, %v481_v54 }
 0x26b   : > { %v6774_v47 = vmax.f32 %v6767_v2, %v1400_v43  ;;  %4972 = vmatmul.mubr.msk.f32.gmra.mxu0 %vm524_vm2, %v481_v54  ;;  %v6846_v54 = vld [vmem:[#allocation2 + $0x100] sm:$0xff] }
 0x26c   : > { %8951 = vst [vmem:[#allocation101_spill] sm:$0xff] %v6846_v54 }
 0x26d   : > { %8936 = vst [vmem:[#allocation88_spill] sm:$0xff] %v6774_v47  ;;  %3944 = vst.msk [vmem:[#allocation2 + $0xc0] sm:$0xff] %vm2862_vm3, %v6774_v47  ;;  %v6798_v47 = vpop.f32.mrf.mxu0 }
 0x26e   : > { %v1403_v6 = vpop.xlane.xlu1 %1402  ;;  %8943 = vst [vmem:[#allocation95_spill] sm:$0xff] %v6798_v47 }
 0x26f   : > { %v6783_v10 = vmax.f32 %v6776_v42, %v1403_v6 }
 0x271   : > { %3945 = vst.msk [vmem:[#allocation2 + $0xc8] sm:$0xff] %vm2862_vm3, %v6783_v10 }
 0x272   : > { %v1406_v43 = vpop.xlane.xlu0 %1405 }
 0x273   : > { %v6792_v2 = vmax.f32 %v6785_v61, %v1406_v43  ;;  %v1452_v43 = vmax.f32 %v6787_v48, %v6798_v47  ;;  %v6807_v61 = vld [vmem:[#allocation2 + $0xe0] sm:$0xff]  ;;  %v8946_v47 = vsub.f32 %v6546_v59, %v6560_v56 }
 0x274   : > { %8944 = vst [vmem:[#allocation96_spill] sm:$0xff] %v6807_v61 }
 0x275   : > { %8941 = vst [vmem:[#allocation93_spill] sm:$0xff] %v6792_v2  ;;  %3946 = vst.msk [vmem:[#allocation2 + $0xd0] sm:$0xff] %vm2862_vm3, %v6792_v2  ;;  %v1652_v48 = vmul.f32 1.442695, %v8946_v47  ;;  %v6839_v47 = vld [vmem:[#allocation2 + $0xf8] sm:$0xff] }
 0x276   : > { %v1409_v6 = vpop.xlane.xlu1 %1408  ;;  %8950 = vst [vmem:[#allocation100_spill] sm:$0xff] %v6839_v47 }
 0x277   : > { %v6803_v42 = vmax.f32 %v6796_v52, %v1409_v6  ;;  %1447 = vmax.xlane.f32.xlu0 %v1446_v58  ;;  %v6816_v6 = vld [vmem:[#allocation2 + $0xe8] sm:$0xff]  ;;  %5042 = vpow2.f32 %v1652_v48 }
 0x279   : > { %3947 = vst.msk [vmem:[#allocation2 + $0xd8] sm:$0xff] %vm2862_vm3, %v6803_v42 }
 0x27a   : > { %v1412_v40 = vpop.xlane.xlu0 %1411 }
 0x27b   : > { %v6814_v2 = vmax.f32 %v6807_v61, %v1412_v40  ;;  %1444 = vmax.xlane.f32.xlu1 %v1443_v12  ;;  %1453 = vmax.xlane.f32.xlu0 %v1452_v43  ;;  %v8948_v40 = vsub.f32 %v6519_v38, %v6528_v20  ;;  %v482_v20 = vld [vmem:[%s5655_s24 + $0x1b0] sm:$0xff] }
 0x27c   : > { %4973 = vmatprep.mubr.msk.f32.mxu0 %vm524_vm2, %v482_v20 }
 0x27d   : > { %8945 = vst [vmem:[#allocation97_spill] sm:$0xff] %v6814_v2  ;;  %3948 = vst.msk [vmem:[#allocation2 + $0xe0] sm:$0xff] %vm2862_vm3, %v6814_v2  ;;  %v1648_v12 = vmul.f32 1.442695, %v8948_v40  ;;  %4974 = vmatmul.mubr.msk.f32.gmra.mxu0 %vm524_vm2, %v482_v20  ;;  %v6857_v40 = vld [vmem:[#allocation2 + $0x108] sm:$0xff] }
 0x27e   : > { %v1415_v58 = vpop.xlane.xlu1 %1414  ;;  %8953 = vst [vmem:[#allocation103_spill] sm:$0xff] %v6857_v40 }
 0x27f   : > { %v6824_v52 = vmax.f32 %v6816_v6, %v1415_v58  ;;  %5044 = vpow2.f32 %v1648_v12 }
 0x281   : > { %3949 = vst.msk [vmem:[#allocation2 + $0xe8] sm:$0xff] %vm2862_vm3, %v6824_v52 }
 0x282   : > { %v1418_v59 = vpop.xlane.xlu0 %1417 }
 0x283   : > { %v6837_v56 = vmax.f32 %v6827_v57, %v1418_v59  ;;  %v6867_v57 = vld [vmem:[#allocation2 + $0x110] sm:$0xff] }
 0x284   : > { %8956 = vst [vmem:[#allocation106_spill] sm:$0xff] %v6867_v57 }
 0x285   : > { %8949 = vst [vmem:[#allocation99_spill] sm:$0xff] %v6837_v56  ;;  %3950 = vst.msk [vmem:[#allocation2 + $0xf0] sm:$0xff] %vm2862_vm3, %v6837_v56 }
 0x286   : > { %v1421_v43 = vpop.xlane.xlu1 %1420 }
 0x287   : > { %v6844_v58 = vmax.f32 %v6839_v47, %v1421_v43  ;;  %v6864_v43 = vpop.eup %5042  ;;  %v6891_v47 = vpop.f32.mrf.mxu0 }
 0x288   : > { %8955 = vst [vmem:[#allocation105_spill] sm:$0xff] %v6864_v43  ;;  %8961 = vst [vmem:[#allocation111_spill] sm:$0xff] %v6891_v47 }
 0x289   : > { %3951 = vst.msk [vmem:[#allocation2 + $0xf8] sm:$0xff] %vm2862_vm3, %v6844_v58 }
 0x28a   : > { %v1424_v48 = vpop.xlane.xlu0 %1423 }
 0x28b   : > { %v6853_v38 = vmax.f32 %v6846_v54, %v1424_v48 }
 0x28c   : > { %1796 = vperm.xlu1 %5039, %v6572_v4   ;;  %v6872_v48 = vpop.eup %5044 }
 0x28d   : > { %8952 = vst [vmem:[#allocation102_spill] sm:$0xff] %v6853_v38  ;;  %3952 = vst.msk [vmem:[#allocation2 + $0x100] sm:$0xff] %vm2862_vm3, %v6853_v38 }
 0x28e   : > { %v1427_v12 = vpop.xlane.xlu1 %1426  ;;  %8957 = vst [vmem:[#allocation107_spill] sm:$0xff] %v6872_v48 }
 0x28f   : > { %v6862_v59 = vmax.f32 %v6857_v40, %v1427_v12  ;;  %v6878_v12 = vld [vmem:[#allocation2 + $0x118] sm:$0xff] }
 0x290   : > { %1801 = vperm.xlu1 %5039, %v6581_v13   ;;  %8959 = vst [vmem:[#allocation109_spill] sm:$0xff] %v6878_v12 }
 0x291   : > { %8954 = vst [vmem:[#allocation104_spill] sm:$0xff] %v6862_v59  ;;  %3953 = vst.msk [vmem:[#allocation2 + $0x108] sm:$0xff] %vm2862_vm3, %v6862_v59  ;;  %3008 = vperm.xlu0 %5038, %v6864_v43  }
 0x292   : > { %v1430_v20 = vpop.xlane.xlu0 %1429 }
 0x293   : > { %v6875_v54 = vmax.f32 %v6867_v57, %v1430_v20 }
 0x294   : > { %2998 = vperm.xlu1 %5039, %v6872_v48  }
 0x295   : > { %8958 = vst [vmem:[#allocation108_spill] sm:$0xff] %v6875_v54  ;;  %3954 = vst.msk [vmem:[#allocation2 + $0x110] sm:$0xff] %vm2862_vm3, %v6875_v54 }
 0x296   : > { %v1433_v38 = vpop.xlane.xlu1 %1432 }
 0x297   : > { %v6883_v56 = vmax.f32 %v6878_v12, %v1433_v38  ;;  %v6893_v12 = vpop.f32.mrf.mxu0 }
 0x298   : > { %8962 = vst [vmem:[#allocation112_spill] sm:$0xff] %v6893_v12 }
 0x299   : > { %8960 = vst [vmem:[#allocation110_spill] sm:$0xff] %v6883_v56  ;;  %3955 = vst.msk [vmem:[#allocation2 + $0x118] sm:$0xff] %vm2862_vm3, %v6883_v56  ;;  %v6895_v56 = vpop.f32.mrf.mxu0 }
 0x29a   : > { %v1777_v43 = vpop.permute.xlu0 %1776  ;;  %v1782_v61 = vpop.permute.xlu1 %1781  ;;  %8963 = vst [vmem:[#allocation113_spill] sm:$0xff] %v6895_v56 }
 0x29b   : > { %v2094_v2 = vsub.f32 %v6256_v15, %v1777_v43  ;;  %v2095_v20 = vsub.f32 %v6258_v16, %v1777_v43  ;;  %v2096_v48 = vsub.f32 %v6262_v18, %v1782_v61  ;;  %v2097_v57 = vsub.f32 %v6264_v19, %v1782_v61  ;;  %v6897_v15 = vpop.f32.mrf.mxu0 }
 0x29c   : > { %8964 = vst [vmem:[#allocation114_spill] sm:$0xff] %v6897_v15  ;;  %v1458_v18 = vmax.f32 %v6895_v56, %v6897_v15 }
 0x29d   : > { %v2222_v40 = vmul.f32 1.442695, %v2094_v2  ;;  %v2224_v59 = vmul.f32 1.442695, %v2095_v20  ;;  %v2226_v54 = vmul.f32 1.442695, %v2096_v48  ;;  %v8965_v20 = vsub.f32 %v6530_v29, %v6544_v7 }
 0x29e   : > { %v2228_v38 = vmul.f32 1.442695, %v2097_v57  ;;  %v483_v48 = vld [vmem:[%s5655_s24 + $0x1b8] sm:$0xff]  ;;  %v6927_v29 = vld [vmem:[#allocation2 + $0x128] sm:$0xff]  ;;  %v6929_v7 = vld [vmem:[#allocation2 + $0x130] sm:$0xff] }
 0x29f   : > { %5046 = vpow2.f32 %v2222_v40  ;;  %v1587_v40 = vsub.f32 %v6574_v1, %v6581_v13  ;;  %4975 = vmatprep.mubr.msk.f32.mxu0 %vm524_vm2, %v483_v48  ;;  %v6918_v1 = vld [vmem:[#allocation2 + $0x120] sm:$0xff] }
 0x2a0   : > { %5048 = vpow2.f32 %v2224_v59  ;;  %v1449_v59 = vmax.f32 %v6769_v51, %v6778_v49  ;;  %4976 = vmatmul.mubr.msk.f32.gmra.mxu0 %vm524_vm2, %v483_v48  ;;  %v6952_v51 = vpop.f32.mrf.mxu0 }
 0x2a1   : > { %5050 = vpow2.f32 %v2226_v54  ;;  %v1656_v43 = vmul.f32 1.442695, %v1587_v40  ;;  %8967 = vst [vmem:[#allocation116_spill] sm:$0xff] %v6952_v51 }
 0x2a2   : > { %5052 = vpow2.f32 %v2228_v38  ;;  %v1650_v38 = vmul.f32 1.442695, %v8965_v20 }
 0x2a3   : > { %5054 = vpow2.f32 %v1656_v43 }
 0x2a4   : > { %5056 = vpow2.f32 %v1650_v38 }
 0x2ac   : > { %v5047_v16 = vpop.eup %5046 }
 0x2ad   : > { %v5049_v19 = vpop.eup %5048 }
 0x2ae   : > { %v5051_v2 = vpop.eup %5050  ;;  %3471 = vmatprep.mubr.f32.mxu1 %v5049_v19  ;;  %v6901_v61 = vadd.f32 %v5049_v19, %v5047_v16 }
 0x2af   : > { %v5053_v57 = vpop.eup %5052  ;;  %3472 = vmatmul.mubr.f32.vlgmr.msra.gmra.mxu1 %v5047_v16  ;;  %v484_v16 = vld [vmem:[%s5655_s24 + $0x1c0] sm:$0xff] }
 0x2b0   : > { %3476 = vmatprep.mubr.f32.mxu1 %v5053_v57  ;;  %1459 = vmax.xlane.f32.xlu0 %v1458_v18  ;;  %v6903_v54 = vadd.f32 %v5053_v57, %v5051_v2  ;;  %v6924_v19 = vpop.eup %5054 }
 0x2b1   : > { %4977 = vmatprep.mubr.msk.f32.mxu0 %vm524_vm2, %v484_v16  ;;  %8966 = vst [vmem:[#allocation115_spill] sm:$0xff] %v6924_v19  ;;  %v6934_v40 = vpop.eup %5056 }
 0x2b2   : > { %4978 = vmatmul.mubr.msk.f32.gmra.mxu0 %vm524_vm2, %v484_v16 }
 0x2b3   : > { %3477 = vmatmul.mubr.f32.gmra.mxu1 %v5051_v2 }
 0x2b8   : > { %1450 = vmax.xlane.f32.xlu1 %v1449_v59 }
 0x2c6   : > { %1821 = vperm.xlu0 %5038, %v6631_v14  }
 0x2c7   : > { %v1436_v13 = vpop.xlane.xlu0 %1435 }
 0x2c8   : > { %v6922_v18 = vmax.f32 %v6918_v1, %v1436_v13 }
 0x2c9   : > { %1806 = vperm.xlu1 %5039, %v6594_v62  }
 0x2ca   : > { %3956 = vst.msk [vmem:[#allocation2 + $0x120] sm:$0xff] %vm2862_vm3, %v6922_v18  ;;  %3018 = vperm.xlu0 %5038, %v6924_v19  }
 0x2cb   : > { %v1439_v2 = vpop.xlane.xlu1 %1438  ;;  %v1442_v57 = vpop.xlane.xlu0 %1441 }
 0x2cc   : > { %v6937_v59 = vmax.f32 %v6927_v29, %v1439_v2  ;;  %v6940_v43 = vmax.f32 %v6929_v7, %v1442_v57 }
 0x2cd   : > { %3003 = vperm.xlu1 %5039, %v6934_v40  }
 0x2ce   : > { %3957 = vst.msk [vmem:[#allocation2 + $0x128] sm:$0xff] %vm2862_vm3, %v6937_v59  ;;  %3958 = vst.msk [vmem:[#allocation2 + $0x130] sm:$0xff] %vm2862_vm3, %v6940_v43 }
 0x2cf   : > { %v1787_v48 = vpop.permute.xlu1 %1786 }
 0x2d0   : > { %v2098_v20 = vsub.f32 %v6268_v21, %v1787_v48  ;;  %v2099_v38 = vsub.f32 %v6270_v22, %v1787_v48  ;;  %v6954_v21 = vpop.f32.mrf.mxu0 }
 0x2d1   : > { %1811 = vperm.xlu1 %5039, %v6605_v35   ;;  %8968 = vst [vmem:[#allocation117_spill] sm:$0xff] %v6954_v21 }
 0x2d2   : > { %v2230_v16 = vmul.f32 1.442695, %v2098_v20  ;;  %v2232_v13 = vmul.f32 1.442695, %v2099_v38  ;;  %v6956_v22 = vpop.f32.mrf.mxu0 }
 0x2d3   : > { %v1792_v2 = vpop.permute.xlu1 %1791  ;;  %8969 = vst [vmem:[#allocation118_spill] sm:$0xff] %v6956_v22 }
 0x2d4   : > { %5058 = vpow2.f32 %v2230_v16  ;;  %v2100_v57 = vsub.f32 %v6274_v24, %v1792_v2  ;;  %v2101_v15 = vsub.f32 %v6276_v25, %v1792_v2  ;;  %v6958_v38 = vpop.f32.mrf.mxu0  ;;  %v1589_v16 = vsub.f32 %v6598_v23, %v6605_v35  ;;  %v6977_v23 = vpop.permute.xlu0 %2993  ;;  %v6980_v35 = vld [vmem:[#allocation2 + $0x140] sm:$0xff] }
 0x2d5   : > { %5060 = vpow2.f32 %v2232_v13  ;;  %8970 = vst [vmem:[#allocation119_spill] sm:$0xff] %v6958_v38  ;;  %v1455_v2 = vmax.f32 %v6891_v47, %v6893_v12  ;;  %8971 = vst [vmem:[#allocation120_spill] sm:$0xff] %v6980_v35 }
 0x2d6   : > { %v2234_v56 = vmul.f32 1.442695, %v2100_v57  ;;  %v2236_v19 = vmul.f32 1.442695, %v2101_v15  ;;  %v1464_v15 = vmax.f32 %v6956_v22, %v6958_v38  ;;  %v1660_v13 = vmul.f32 1.442695, %v1589_v16  ;;  %v7013_v12 = vpop.f32.mrf.mxu0 }
 0x2d7   : > { %v1586_v57 = vsub.f32 %v6562_v50, %v6572_v4  ;;  %v6990_v16 = vld [vmem:[#allocation2 + $0x150] sm:$0xff]  ;;  %8974 = vst [vmem:[#allocation123_spill] sm:$0xff] %v7013_v12 }
 0x2d8   : > { %5062 = vpow2.f32 %v2234_v56  ;;  %8973 = vst [vmem:[#allocation122_spill] sm:$0xff] %v6990_v16 }
 0x2d9   : > { %5064 = vpow2.f32 %v2236_v19 }
 0x2da   : > { %5066 = vpow2.f32 %v1660_v13 }
 0x2e1   : > { %v5059_v48 = vpop.eup %5058 }
 0x2e2   : > { %v5061_v20 = vpop.eup %5060 }
 0x2e3   : > { %3481 = vmatprep.mubr.f32.mxu1 %v5061_v20  ;;  %v6960_v24 = vadd.f32 %v5061_v20, %v5059_v48  ;;  %v1654_v20 = vmul.f32 1.442695, %v1586_v57 }
 0x2e4   : > { %3482 = vmatmul.mubr.f32.gmra.mxu1 %v5059_v48  ;;  %v485_v48 = vld [vmem:[%s5655_s24 + $0x1c8] sm:$0xff] }
 0x2e5   : > { %v5063_v25 = vpop.eup %5062  ;;  %4979 = vmatprep.mubr.msk.f32.mxu0 %vm524_vm2, %v485_v48  ;;  %5068 = vpow2.f32 %v1654_v20 }
 0x2e6   : > { %v5065_v56 = vpop.eup %5064  ;;  %4980 = vmatmul.mubr.msk.f32.gmra.mxu0 %vm524_vm2, %v485_v48 }
 0x2e7   : > { %3486 = vmatprep.mubr.f32.mxu1 %v5065_v56  ;;  %v6964_v19 = vadd.f32 %v5065_v56, %v5063_v25  ;;  %v6988_v56 = vld [vmem:[#allocation2 + $0x138] sm:$0xff] }
 0x2e8   : > { %3487 = vmatmul.mubr.f32.gmra.mxu1 %v5063_v25  ;;  %v486_v25 = vld [vmem:[%s5655_s24 + $0x1d0] sm:$0xff] }
 0x2e9   : > { %1465 = vmax.xlane.f32.xlu0 %v1464_v15  ;;  %4981 = vmatprep.mubr.msk.f32.mxu0 %vm524_vm2, %v486_v25  ;;  %v6986_v15 = vpop.eup %5066 }
 0x2ea   : > { %4982 = vmatmul.mubr.msk.f32.gmra.mxu0 %vm524_vm2, %v486_v25  ;;  %8972 = vst [vmem:[#allocation121_spill] sm:$0xff] %v6986_v15 }
 0x2f2   : > { %v7006_v25 = vpop.eup %5068 }
 0x2f5   : > { %1456 = vmax.xlane.f32.xlu1 %v1455_v2 }
 0x2ff   : > { %1831 = vperm.xlu0 %5038, %v6650_v46  }
 0x300   : > { %v1448_v50 = vpop.xlane.xlu0 %1447 }
 0x301   : > { %v6984_v4 = vmax.f32 %v6980_v35, %v1448_v50 }
 0x303   : > { %3028 = vperm.xlu0 %5038, %v6986_v15   ;;  %3960 = vst.msk [vmem:[#allocation2 + $0x140] sm:$0xff] %vm2862_vm3, %v6984_v4 }
 0x304   : > { %v1445_v13 = vpop.xlane.xlu1 %1444  ;;  %v1454_v2 = vpop.xlane.xlu0 %1453 }
 0x305   : > { %v6996_v57 = vmax.f32 %v6988_v56, %v1445_v13  ;;  %v6999_v48 = vmax.f32 %v6990_v16, %v1454_v2 }
 0x306   : > { %1816 = vperm.xlu1 %5039, %v6618_v17  }
 0x307   : > { %3959 = vst.msk [vmem:[#allocation2 + $0x138] sm:$0xff] %vm2862_vm3, %v6996_v57  ;;  %3962 = vst.msk [vmem:[#allocation2 + $0x150] sm:$0xff] %vm2862_vm3, %v6999_v48 }
 0x308   : > { %v1797_v20 = vpop.permute.xlu1 %1796 }
 0x309   : > { %v2102_v50 = vsub.f32 %v6280_v27, %v1797_v20  ;;  %v2103_v35 = vsub.f32 %v6282_v28, %v1797_v20  ;;  %v7015_v27 = vpop.f32.mrf.mxu0 }
 0x30a   : > { %3013 = vperm.xlu1 %5039, %v7006_v25   ;;  %8975 = vst [vmem:[#allocation124_spill] sm:$0xff] %v7015_v27 }
 0x30b   : > { %v2238_v13 = vmul.f32 1.442695, %v2102_v50  ;;  %v2240_v2 = vmul.f32 1.442695, %v2103_v35  ;;  %v7017_v28 = vpop.f32.mrf.mxu0 }
 0x30c   : > { %v1802_v16 = vpop.permute.xlu1 %1801  ;;  %8976 = vst [vmem:[#allocation125_spill] sm:$0xff] %v7017_v28 }
 0x30d   : > { %5070 = vpow2.f32 %v2238_v13  ;;  %v2104_v38 = vsub.f32 %v6286_v30, %v1802_v16  ;;  %v2105_v22 = vsub.f32 %v6288_v31, %v1802_v16  ;;  %v7019_v50 = vpop.f32.mrf.mxu0  ;;  %v487_v13 = vld [vmem:[%s5655_s24 + $0x1d8] sm:$0xff] }
 0x30e   : > { %5072 = vpow2.f32 %v2240_v2  ;;  %8977 = vst [vmem:[#allocation126_spill] sm:$0xff] %v7019_v50  ;;  %v1461_v2 = vmax.f32 %v6952_v51, %v6954_v21  ;;  %4983 = vmatprep.mubr.msk.f32.mxu0 %vm524_vm2, %v487_v13 }
 0x30f   : > { %v2242_v15 = vmul.f32 1.442695, %v2104_v38  ;;  %v2244_v47 = vmul.f32 1.442695, %v2105_v22  ;;  %v1470_v22 = vmax.f32 %v7017_v28, %v7019_v50  ;;  %4984 = vmatmul.mubr.msk.f32.gmra.mxu0 %vm524_vm2, %v487_v13  ;;  %v7067_v50 = vpop.f32.mrf.mxu0 }
 0x310   : > { %8981 = vst [vmem:[#allocation130_spill] sm:$0xff] %v7067_v50 }
 0x311   : > { %5074 = vpow2.f32 %v2242_v15  ;;  %v1591_v15 = vsub.f32 %v6624_v8, %v6631_v14  ;;  %v7039_v8 = vpop.permute.xlu0 %3008  ;;  %v7041_v14 = vld [vmem:[#allocation2 + $0x160] sm:$0xff] }
 0x312   : > { %5076 = vpow2.f32 %v2244_v47  ;;  %8978 = vst [vmem:[#allocation127_spill] sm:$0xff] %v7041_v14 }
 0x313   : > { %v1664_v16 = vmul.f32 1.442695, %v1591_v15  ;;  %v7055_v15 = vld [vmem:[#allocation2 + $0x148] sm:$0xff] }
 0x314   : > { %8980 = vst [vmem:[#allocation129_spill] sm:$0xff] %v7055_v15 }
 0x315   : > { %5078 = vpow2.f32 %v1664_v16 }
 0x31a   : > { %v5071_v20 = vpop.eup %5070 }
 0x31b   : > { %v5073_v35 = vpop.eup %5072 }
 0x31c   : > { %3491 = vmatprep.mubr.f32.mxu1 %v5073_v35  ;;  %v7021_v30 = vadd.f32 %v5073_v35, %v5071_v20 }
 0x31d   : > { %3492 = vmatmul.mubr.f32.gmra.mxu1 %v5071_v20  ;;  %v1588_v20 = vsub.f32 %v6586_v53, %v6594_v62 }
 0x31e   : > { %v5075_v31 = vpop.eup %5074 }
 0x31f   : > { %v5077_v38 = vpop.eup %5076  ;;  %v1658_v35 = vmul.f32 1.442695, %v1588_v20 }
 0x320   : > { %3496 = vmatprep.mubr.f32.mxu1 %v5077_v38  ;;  %v7025_v47 = vadd.f32 %v5077_v38, %v5075_v31  ;;  %v7052_v38 = vpop.permute.xlu1 %2998 }
 0x321   : > { %3497 = vmatmul.mubr.f32.gmra.mxu1 %v5075_v31  ;;  %v488_v31 = vld [vmem:[%s5655_s24 + $0x1e0] sm:$0xff]  ;;  %5080 = vpow2.f32 %v1658_v35 }
 0x322   : > { %1471 = vmax.xlane.f32.xlu0 %v1470_v22  ;;  %4985 = vmatprep.mubr.msk.f32.mxu0 %vm524_vm2, %v488_v31  ;;  %v7047_v62 = vpop.eup %5078 }
 0x323   : > { %4986 = vmatmul.mubr.msk.f32.gmra.mxu0 %vm524_vm2, %v488_v31  ;;  %8979 = vst [vmem:[#allocation128_spill] sm:$0xff] %v7047_v62 }
 0x32e   : > { %1462 = vmax.xlane.f32.xlu1 %v1461_v2  ;;  %v7057_v13 = vpop.eup %5080 }
 0x338   : > { %1841 = vperm.xlu0 %5038, %v6672_v55  }
 0x339   : > { %v1460_v22 = vpop.xlane.xlu0 %1459 }
 0x33a   : > { %v7045_v53 = vmax.f32 %v7041_v14, %v1460_v22 }
 0x33c   : > { %3038 = vperm.xlu0 %5038, %v7047_v62   ;;  %3964 = vst.msk [vmem:[#allocation2 + $0x160] sm:$0xff] %vm2862_vm3, %v7045_v53 }
 0x33f   : > { %1826 = vperm.xlu1 %5039, %v6641_v3  }
 0x341   : > { %v1451_v16 = vpop.xlane.xlu1 %1450 }
 0x342   : > { %v7060_v2 = vmax.f32 %v7055_v15, %v1451_v16  ;;  %v7071_v16 = vpop.f32.mrf.mxu0 }
 0x343   : > { %3023 = vperm.xlu1 %5039, %v7057_v13   ;;  %8982 = vst [vmem:[#allocation131_spill] sm:$0xff] %v7071_v16 }
 0x344   : > { %3961 = vst.msk [vmem:[#allocation2 + $0x148] sm:$0xff] %vm2862_vm3, %v7060_v2 }
 0x345   : > { %v1807_v20 = vpop.permute.xlu1 %1806 }
 0x346   : > { %v2106_v35 = vsub.f32 %v6292_v33, %v1807_v20  ;;  %v2107_v31 = vsub.f32 %v6294_v34, %v1807_v20  ;;  %v7075_v33 = vpop.f32.mrf.mxu0 }
 0x347   : > { %8983 = vst [vmem:[#allocation132_spill] sm:$0xff] %v7075_v33 }
 0x348   : > { %v2246_v22 = vmul.f32 1.442695, %v2106_v35  ;;  %v2248_v14 = vmul.f32 1.442695, %v2107_v31  ;;  %v7077_v34 = vpop.f32.mrf.mxu0 }
 0x349   : > { %v7069_v28 = vpop.permute.xlu1 %3003  ;;  %8984 = vst [vmem:[#allocation133_spill] sm:$0xff] %v7077_v34 }
 0x34a   : > { %5082 = vpow2.f32 %v2246_v22  ;;  %v1590_v22 = vsub.f32 %v6611_v26, %v6618_v17  ;;  %v7100_v17 = vld [vmem:[#allocation2 + $0x170] sm:$0xff] }
 0x34b   : > { %5084 = vpow2.f32 %v2248_v14  ;;  %v1476_v14 = vmax.f32 %v7075_v33, %v7077_v34  ;;  %8985 = vst [vmem:[#allocation134_spill] sm:$0xff] %v7100_v17 }
 0x34d   : > { %v1812_v15 = vpop.permute.xlu1 %1811 }
 0x34e   : > { %v2108_v62 = vsub.f32 %v6298_v36, %v1812_v15  ;;  %v2109_v51 = vsub.f32 %v6300_v37, %v1812_v15  ;;  %v1593_v37 = vsub.f32 %v6645_v9, %v6650_v46  ;;  %v1467_v15 = vmax.f32 %v7013_v12, %v7015_v27  ;;  %v1822_v9 = vpop.permute.xlu0 %1821 }
 0x34f   : > { %v1662_v46 = vmul.f32 1.442695, %v1590_v22 }
 0x350   : > { %v2250_v21 = vmul.f32 1.442695, %v2108_v62  ;;  %v2252_v49 = vmul.f32 1.442695, %v2109_v51  ;;  %v489_v62 = vld [vmem:[%s5655_s24 + $0x1e8] sm:$0xff] }
 0x351   : > { %4987 = vmatprep.mubr.msk.f32.mxu0 %vm524_vm2, %v489_v62 }
 0x352   : > { %5086 = vpow2.f32 %v2250_v21  ;;  %v1668_v21 = vmul.f32 1.442695, %v1593_v37  ;;  %4988 = vmatmul.mubr.msk.f32.gmra.mxu0 %vm524_vm2, %v489_v62  ;;  %v2928_v37 = vld [vmem:[#allocation4 + $0x8] sm:$0xff] }
 0x353   : > { %5088 = vpow2.f32 %v2252_v49  ;;  %v3312_v62 = vmul.f32 %v7052_v38, %v2928_v37 }
 0x354   : > { %5090 = vpow2.f32 %v1668_v21 }
 0x355   : > { %5092 = vpow2.f32 %v1662_v46 }
 0x357   : > { %v5083_v20 = vpop.eup %5082 }
 0x358   : > { %v5085_v35 = vpop.eup %5084 }
 0x359   : > { %3501 = vmatprep.mubr.f32.mxu1 %v5085_v35  ;;  %v7081_v31 = vadd.f32 %v5085_v35, %v5083_v20 }
 0x35a   : > { %3502 = vmatmul.mubr.f32.gmra.mxu1 %v5083_v20  ;;  %v2927_v20 = vld [vmem:[#allocation4] sm:$0xff] }
 0x35b   : > { %1477 = vmax.xlane.f32.xlu0 %v1476_v14  ;;  %v490_v14 = vld [vmem:[%s5655_s24 + $0x1f0] sm:$0xff]  ;;  %v3311_v35 = vmul.f32 %v6977_v23, %v2927_v20 }
 0x35c   : > { %4989 = vmatprep.mubr.msk.f32.mxu0 %vm524_vm2, %v490_v14 }
 0x35d   : > { %4990 = vmatmul.mubr.msk.f32.gmra.mxu0 %vm524_vm2, %v490_v14 }
 0x35f   : > { %v5087_v36 = vpop.eup %5086 }
 0x360   : > { %v5089_v51 = vpop.eup %5088 }
 0x361   : > { %3506 = vmatprep.mubr.f32.mxu1 %v5089_v51  ;;  %v7085_v49 = vadd.f32 %v5089_v51, %v5087_v36  ;;  %v7108_v23 = vpop.eup %5090 }
 0x362   : > { %3507 = vmatmul.mubr.f32.gmra.mxu1 %v5087_v36  ;;  %v7098_v36 = vpop.permute.xlu0 %3018  ;;  %8987 = vst [vmem:[#allocation136_spill] sm:$0xff] %v7108_v23  ;;  %v7115_v38 = vpop.eup %5092 }
 0x367   : > { %1468 = vmax.xlane.f32.xlu1 %v1467_v15 }
 0x36f   : > { %v3473_v51 = vpop.f32.mrf.mxu1 }
 0x370   : > { %v3792_v26 = vadd.f32 %v3473_v51, %v3311_v35  ;;  %v7118_v35 = vld [vmem:[#allocation2 + $0x158] sm:$0xff] }
 0x371   : > { %v3475_v21 = vpop.f32.mrf.mxu1  ;;  %1851 = vperm.xlu0 %5038, %v6690_v11   ;;  %8988 = vst [vmem:[#allocation137_spill] sm:$0xff] %v7118_v35 }
 0x372   : > { %3856 = vst.msk [vmem:[#allocation4] sm:$0xff] %vm524_vm2, %v3792_v26  ;;  %v1466_v15 = vpop.xlane.xlu0 %1465  ;;  %v7125_v26 = vpop.f32.mrf.mxu0  ;;  %v2113_v21 = vsub.f32 %v6315_v45, %v1822_v9 }
 0x373   : > { %v3478_v22 = vpop.f32.mrf.mxu1  ;;  %v7106_v46 = vmax.f32 %v7100_v17, %v1466_v15  ;;  %8989 = vst [vmem:[#allocation138_spill] sm:$0xff] %v7125_v26 }
 0x374   : > { %v3793_v20 = vadd.f32 %v3478_v22, %v3312_v62  ;;  %v7131_v34 = vpop.f32.mrf.mxu0 }
 0x375   : > { %8986 = vst [vmem:[#allocation135_spill] sm:$0xff] %v7106_v46  ;;  %v3480_v14 = vpop.f32.mrf.mxu1  ;;  %3048 = vperm.xlu0 %5038, %v7108_v23   ;;  %3966 = vst.msk [vmem:[#allocation2 + $0x170] sm:$0xff] %vm2862_vm3, %v7106_v46 }
 0x376   : > { %3857 = vst.msk [vmem:[#allocation4 + $0x8] sm:$0xff] %vm524_vm2, %v3793_v20  ;;  %v2112_v20 = vsub.f32 %v6312_v44, %v1822_v9  ;;  %8990 = vst [vmem:[#allocation139_spill] sm:$0xff] %v7131_v34  ;;  %v7133_v33 = vpop.f32.mrf.mxu0 }
 0x377   : > { %8991 = vst [vmem:[#allocation140_spill] sm:$0xff] %v7133_v33 }
 0x378   : > { %1836 = vperm.xlu1 %5039, %v6659_v63   ;;  %v7135_v45 = vpop.f32.mrf.mxu0 }
 0x379   : > { %8992 = vst [vmem:[#allocation141_spill] sm:$0xff] %v7135_v45 }
 0x37c   : > { %3033 = vperm.xlu1 %5039, %v7115_v38  }
 0x37e   : > { %v1457_v37 = vpop.xlane.xlu1 %1456 }
 0x37f   : > { %v7121_v51 = vmax.f32 %v7118_v35, %v1457_v37  ;;  %v2260_v37 = vmul.f32 1.442695, %v2113_v21  ;;  %v2258_v35 = vmul.f32 1.442695, %v2112_v20  ;;  %v2929_v20 = vld [vmem:[#allocation4 + $0x10] sm:$0xff] }
 0x381   : > { %3963 = vst.msk [vmem:[#allocation2 + $0x158] sm:$0xff] %vm2862_vm3, %v7121_v51 }
 0x382   : > { %v1817_v62 = vpop.permute.xlu1 %1816 }
 0x383   : > { %v2110_v15 = vsub.f32 %v6304_v39, %v1817_v62  ;;  %v2111_v22 = vsub.f32 %v6306_v41, %v1817_v62  ;;  %v1482_v39 = vmax.f32 %v7133_v33, %v7135_v45 }
 0x385   : > { %v2254_v14 = vmul.f32 1.442695, %v2110_v15  ;;  %v2256_v17 = vmul.f32 1.442695, %v2111_v22  ;;  %v1473_v15 = vmax.f32 %v7067_v50, %v7071_v16  ;;  %v1592_v22 = vsub.f32 %v6636_v5, %v6641_v3  ;;  %v7158_v5 = vld [vmem:[#allocation2 + $0x180] sm:$0xff] }
 0x386   : > { %8993 = vst [vmem:[#allocation142_spill] sm:$0xff] %v7158_v5 }
 0x387   : > { %5094 = vpow2.f32 %v2254_v14  ;;  %v1832_v14 = vpop.permute.xlu0 %1831 }
 0x388   : > { %5096 = vpow2.f32 %v2256_v17  ;;  %v1595_v17 = vsub.f32 %v6663_v60, %v6672_v55  ;;  %v3313_v55 = vmul.f32 %v7069_v28, %v2929_v20  ;;  %v2930_v60 = vld [vmem:[#allocation4 + $0x18] sm:$0xff]  ;;  %v7174_v20 = vld [vmem:[#allocation2 + $0x168] sm:$0xff] }
 0x389   : > { %5098 = vpow2.f32 %v2260_v37  ;;  %v1666_v37 = vmul.f32 1.442695, %v1592_v22  ;;  %8997 = vst [vmem:[#allocation146_spill] sm:$0xff] %v7174_v20 }
 0x38a   : > { %5100 = vpow2.f32 %v2258_v35  ;;  %v1672_v21 = vmul.f32 1.442695, %v1595_v17  ;;  %v3314_v17 = vmul.f32 %v7039_v8, %v2930_v60  ;;  %v3014_v8 = vpop.permute.xlu1 %3013  ;;  %v7181_v60 = vpop.f32.mrf.mxu0 }
 0x38b   : > { %v7155_v45 = vpop.permute.xlu0 %3028  ;;  %8998 = vst [vmem:[#allocation147_spill] sm:$0xff] %v7181_v60 }
 0x38c   : > { %5102 = vpow2.f32 %v1672_v21  ;;  %v7187_v23 = vpop.f32.mrf.mxu0 }
 0x38d   : > { %5104 = vpow2.f32 %v1666_v37 }
 0x38e   : > { %v7189_v12 = vpop.f32.mrf.mxu0 }
 0x394   : > { %v5095_v41 = vpop.eup %5094  ;;  %1483 = vmax.xlane.f32.xlu0 %v1482_v39 }
 0x395   : > { %v5097_v44 = vpop.eup %5096 }
 0x396   : > { %3511 = vmatprep.mubr.f32.mxu1 %v5097_v44  ;;  %v7139_v9 = vadd.f32 %v5097_v44, %v5095_v41  ;;  %v7141_v62 = vpop.eup %5098 }
 0x397   : > { %3512 = vmatmul.mubr.f32.gmra.mxu1 %v5095_v41  ;;  %v7146_v35 = vpop.eup %5100 }
 0x398   : > { %3516 = vmatprep.mubr.f32.mxu1 %v7141_v62 }
 0x399   : > { %v7165_v22 = vpop.eup %5102 }
 0x39a   : > { %8995 = vst [vmem:[#allocation144_spill] sm:$0xff] %v7165_v22 }
 0x39b   : > { %3517 = vmatmul.mubr.f32.gmra.mxu1 %v7146_v35 }
 0x3a0   : > { %1474 = vmax.xlane.f32.xlu1 %v1473_v15 }
 0x3a4   : > { %v3483_v39 = vpop.f32.mrf.mxu1 }
 0x3a5   : > { %v3794_v41 = vadd.f32 %v3483_v39, %v3313_v55  ;;  %v8999_v39 = vld [vmem:[#allocation8_spill] sm:$0xff] }
 0x3a6   : > { %v3485_v44 = vpop.f32.mrf.mxu1  ;;  %9003 = vst [vmem:[#allocation8_spill] sm:$0xff] %v7187_v23 }
 0x3a7   : > { %3858 = vst.msk [vmem:[#allocation4 + $0x10] sm:$0xff] %vm524_vm2, %v3794_v41  ;;  %v2117_v41 = vsub.f32 %v8999_v39, %v1832_v14  ;;  %v7191_v39 = vpop.f32.mrf.mxu0 }
 0x3a8   : > { %v3488_v33 = vpop.f32.mrf.mxu1 }
 0x3a9   : > { %v3795_v3 = vadd.f32 %v3488_v33, %v3314_v17  ;;  %v7171_v33 = vpop.eup %5104  ;;  %v9000_v17 = vld [vmem:[#allocation5_spill] sm:$0xff] }
 0x3aa   : > { %v3490_v21 = vpop.f32.mrf.mxu1  ;;  %1861 = vperm.xlu0 %5038, %v6707_v32   ;;  %8996 = vst [vmem:[#allocation145_spill] sm:$0xff] %v7171_v33  ;;  %9004 = vst [vmem:[#allocation5_spill] sm:$0xff] %v7189_v12 }
 0x3ab   : > { %3859 = vst.msk [vmem:[#allocation4 + $0x18] sm:$0xff] %vm524_vm2, %v3795_v3  ;;  %v1472_v28 = vpop.xlane.xlu0 %1471  ;;  %v9001_v21 = vld [vmem:[#allocation6_spill] sm:$0xff] }
 0x3ac   : > { %v7163_v15 = vmax.f32 %v7158_v5, %v1472_v28  ;;  %v9002_v5 = vld [vmem:[#allocation7_spill] sm:$0xff]  ;;  %9005 = vst [vmem:[#allocation6_spill] sm:$0xff] %v7191_v39 }
 0x3ae   : > { %8994 = vst [vmem:[#allocation143_spill] sm:$0xff] %v7163_v15  ;;  %3058 = vperm.xlu0 %5038, %v7165_v22   ;;  %3968 = vst.msk [vmem:[#allocation2 + $0x180] sm:$0xff] %vm2862_vm3, %v7163_v15  ;;  %v2116_v22 = vsub.f32 %v9002_v5, %v1832_v14 }
 0x3b1   : > { %1846 = vperm.xlu1 %5039, %v6683_v0  }
 0x3b5   : > { %3043 = vperm.xlu1 %5039, %v7171_v33  }
 0x3b7   : > { %v1463_v37 = vpop.xlane.xlu1 %1462 }
 0x3b8   : > { %v7177_v55 = vmax.f32 %v7174_v20, %v1463_v37  ;;  %v2268_v37 = vmul.f32 1.442695, %v2117_v41  ;;  %v2266_v20 = vmul.f32 1.442695, %v2116_v22  ;;  %v1479_v41 = vmax.f32 %v7125_v26, %v7131_v34  ;;  %v9021_v34 = vld [vmem:[#allocation11_spill] sm:$0xff] }
 0x3ba   : > { %3965 = vst.msk [vmem:[#allocation2 + $0x168] sm:$0xff] %vm2862_vm3, %v7177_v55 }
 0x3bb   : > { %v1827_v44 = vpop.permute.xlu1 %1826 }
 0x3bc   : > { %v2114_v3 = vsub.f32 %v9000_v17, %v1827_v44  ;;  %v2115_v28 = vsub.f32 %v9001_v21, %v1827_v44  ;;  %v1488_v17 = vmax.f32 %v7189_v12, %v7191_v39  ;;  %v9009_v21 = vld [vmem:[#allocation62_spill] sm:$0xff] }
 0x3be   : > { %v2262_v50 = vmul.f32 1.442695, %v2114_v3  ;;  %v2264_v16 = vmul.f32 1.442695, %v2115_v28  ;;  %v1594_v28 = vsub.f32 %v9009_v21, %v6659_v63  ;;  %v9011_v21 = vld [vmem:[#allocation73_spill] sm:$0xff] }
 0x3c0   : > { %5106 = vpow2.f32 %v2262_v50  ;;  %v9007_v50 = vld [vmem:[#allocation65_spill] sm:$0xff] }
 0x3c1   : > { %5108 = vpow2.f32 %v2264_v16  ;;  %v1597_v16 = vsub.f32 %v9007_v50, %v6690_v11  ;;  %v2932_v11 = vld [vmem:[#allocation4 + $0x28] sm:$0xff] }
 0x3c2   : > { %5110 = vpow2.f32 %v2268_v37  ;;  %v2931_v37 = vld [vmem:[#allocation4 + $0x20] sm:$0xff] }
 0x3c3   : > { %5112 = vpow2.f32 %v2266_v20  ;;  %v1676_v20 = vmul.f32 1.442695, %v1597_v16  ;;  %v3316_v16 = vmul.f32 %v7098_v36, %v2932_v11  ;;  %v491_v36 = vld [vmem:[%s5655_s24 + $0x1f8] sm:$0xff] }
 0x3c4   : > { %4991 = vmatprep.mubr.msk.f32.mxu0 %vm524_vm2, %v491_v36 }
 0x3c5   : > { %5114 = vpow2.f32 %v1676_v20  ;;  %v7213_v20 = vld [vmem:[#allocation2 + $0x190] sm:$0xff]  ;;  %4992 = vmatmul.mubr.msk.f32.gmra.mxu0 %vm524_vm2, %v491_v36 }
 0x3c6   : > { %9010 = vst [vmem:[#allocation62_spill] sm:$0xff] %v7213_v20 }
 0x3cd   : > { %v5107_v44 = vpop.eup %5106  ;;  %1489 = vmax.xlane.f32.xlu0 %v1488_v17  ;;  %v1842_v17 = vpop.permute.xlu0 %1841 }
 0x3ce   : > { %v5109_v14 = vpop.eup %5108 }
 0x3cf   : > { %3521 = vmatprep.mubr.f32.mxu1 %v5109_v14  ;;  %v7195_v5 = vadd.f32 %v5109_v14, %v5107_v44  ;;  %v7197_v3 = vpop.eup %5110  ;;  %v3315_v14 = vmul.f32 %v3014_v8, %v2931_v37 }
 0x3d0   : > { %9006 = vst [vmem:[#allocation7_spill] sm:$0xff] %v7197_v3  ;;  %3522 = vmatmul.mubr.f32.gmra.mxu1 %v5107_v44  ;;  %v7202_v22 = vpop.eup %5112  ;;  %v1670_v44 = vmul.f32 1.442695, %v1594_v28 }
 0x3d1   : > { %3526 = vmatprep.mubr.f32.mxu1 %v7197_v3  ;;  %9008 = vst [vmem:[#allocation65_spill] sm:$0xff] %v7202_v22  ;;  %v7210_v27 = vpop.permute.xlu0 %3038 }
 0x3d2   : > { %5116 = vpow2.f32 %v1670_v44  ;;  %v7220_v28 = vpop.eup %5114  ;;  %v7232_v44 = vld [vmem:[#allocation2 + $0x178] sm:$0xff] }
 0x3d3   : > { %9013 = vst [vmem:[#allocation148_spill] sm:$0xff] %v7220_v28  ;;  %9016 = vst [vmem:[#allocation149_spill] sm:$0xff] %v7232_v44 }
 0x3d4   : > { %3527 = vmatmul.mubr.f32.gmra.mxu1 %v7202_v22 }
 0x3d9   : > { %1480 = vmax.xlane.f32.xlu1 %v1479_v41 }
 0x3dd   : > { %v3493_v50 = vpop.f32.mrf.mxu1 }
 0x3de   : > { %v3796_v39 = vadd.f32 %v3493_v50, %v3315_v14  ;;  %v7239_v50 = vpop.f32.mrf.mxu0 }
 0x3df   : > { %v3495_v12 = vpop.f32.mrf.mxu1  ;;  %v7229_v37 = vpop.eup %5116  ;;  %9017 = vst [vmem:[#allocation150_spill] sm:$0xff] %v7239_v50 }
 0x3e0   : > { %3860 = vst.msk [vmem:[#allocation4 + $0x20] sm:$0xff] %vm524_vm2, %v3796_v39  ;;  %v3024_v39 = vpop.permute.xlu1 %3023  ;;  %v7245_v33 = vpop.f32.mrf.mxu0 }
 0x3e1   : > { %v3498_v26 = vpop.f32.mrf.mxu1 }
 0x3e2   : > { %v3797_v63 = vadd.f32 %v3498_v26, %v3316_v16  ;;  %v9014_v26 = vld [vmem:[#allocation67_spill] sm:$0xff]  ;;  %v9018_v16 = vld [vmem:[#allocation12_spill] sm:$0xff]  ;;  %v7247_v22 = vpop.f32.mrf.mxu0 }
 0x3e3   : > { %v3500_v41 = vpop.f32.mrf.mxu1  ;;  %1871 = vperm.xlu0 %5038, %v9011_v21   ;;  %9015 = vst [vmem:[#allocation67_spill] sm:$0xff] %v7229_v37  ;;  %9022 = vst [vmem:[#allocation12_spill] sm:$0xff] %v7245_v33 }
 0x3e4   : > { %3861 = vst.msk [vmem:[#allocation4 + $0x28] sm:$0xff] %vm524_vm2, %v3797_v63  ;;  %v1478_v8 = vpop.xlane.xlu0 %1477  ;;  %v2121_v63 = vsub.f32 %v9018_v16, %v1842_v17  ;;  %v7249_v16 = vpop.f32.mrf.mxu0 }
 0x3e5   : > { %v7218_v12 = vmax.f32 %v7213_v20, %v1478_v8  ;;  %v9019_v8 = vld [vmem:[#allocation9_spill] sm:$0xff]  ;;  %v9020_v20 = vld [vmem:[#allocation10_spill] sm:$0xff] }
 0x3e6   : > { %9023 = vst [vmem:[#allocation9_spill] sm:$0xff] %v7247_v22  ;;  %9024 = vst [vmem:[#allocation10_spill] sm:$0xff] %v7249_v16 }
 0x3e7   : > { %9012 = vst [vmem:[#allocation73_spill] sm:$0xff] %v7218_v12  ;;  %3068 = vperm.xlu0 %5038, %v7220_v28   ;;  %3970 = vst.msk [vmem:[#allocation2 + $0x190] sm:$0xff] %vm2862_vm3, %v7218_v12  ;;  %v2120_v12 = vsub.f32 %v9021_v34, %v1842_v17 }
 0x3ea   : > { %1856 = vperm.xlu1 %5039, %v9014_v26  }
 0x3ee   : > { %3053 = vperm.xlu1 %5039, %v7229_v37  }
 0x3f0   : > { %v1469_v14 = vpop.xlane.xlu1 %1468 }
 0x3f1   : > { %v7235_v11 = vmax.f32 %v7232_v44, %v1469_v14  ;;  %v2276_v14 = vmul.f32 1.442695, %v2121_v63  ;;  %v2274_v44 = vmul.f32 1.442695, %v2120_v12  ;;  %v1485_v63 = vmax.f32 %v7181_v60, %v7187_v23  ;;  %v9040_v23 = vld [vmem:[#allocation15_spill] sm:$0xff] }
 0x3f3   : > { %3967 = vst.msk [vmem:[#allocation2 + $0x178] sm:$0xff] %vm2862_vm3, %v7235_v11 }
 0x3f4   : > { %v1837_v41 = vpop.permute.xlu1 %1836 }
 0x3f5   : > { %v2118_v36 = vsub.f32 %v9019_v8, %v1837_v41  ;;  %v2119_v28 = vsub.f32 %v9020_v20, %v1837_v41  ;;  %v1494_v8 = vmax.f32 %v7247_v22, %v7249_v16  ;;  %v9028_v41 = vld [vmem:[#allocation64_spill] sm:$0xff]  ;;  %v7269_v22 = vld [vmem:[#allocation2 + $0x1a0] sm:$0xff] }
 0x3f6   : > { %9029 = vst [vmem:[#allocation64_spill] sm:$0xff] %v7269_v22 }
 0x3f7   : > { %v2270_v37 = vmul.f32 1.442695, %v2118_v36  ;;  %v2272_v15 = vmul.f32 1.442695, %v2119_v28  ;;  %v1596_v36 = vsub.f32 %v9028_v41, %v6683_v0  ;;  %v2934_v0 = vld [vmem:[#allocation4 + $0x38] sm:$0xff] }
 0x3f9   : > { %5118 = vpow2.f32 %v2270_v37 }
 0x3fa   : > { %5120 = vpow2.f32 %v2272_v15  ;;  %v9026_v15 = vld [vmem:[#allocation68_spill] sm:$0xff] }
 0x3fb   : > { %5122 = vpow2.f32 %v2276_v14  ;;  %v1599_v12 = vsub.f32 %v9026_v15, %v6707_v32  ;;  %v1852_v14 = vpop.permute.xlu0 %1851 }
 0x3fc   : > { %5124 = vpow2.f32 %v2274_v44 }
 0x3fd   : > { %v1680_v44 = vmul.f32 1.442695, %v1599_v12 }
 0x3ff   : > { %5126 = vpow2.f32 %v1680_v44 }
 0x406   : > { %v5119_v20 = vpop.eup %5118  ;;  %1495 = vmax.xlane.f32.xlu0 %v1494_v8  ;;  %v1674_v8 = vmul.f32 1.442695, %v1596_v36 }
 0x407   : > { %v5121_v34 = vpop.eup %5120 }
 0x408   : > { %3531 = vmatprep.mubr.f32.mxu1 %v5121_v34  ;;  %v7253_v17 = vadd.f32 %v5121_v34, %v5119_v20  ;;  %v7255_v28 = vpop.eup %5122  ;;  %5128 = vpow2.f32 %v1674_v8  ;;  %v7267_v34 = vpop.permute.xlu0 %3048  ;;  %v9033_v8 = vld [vmem:[#allocation70_spill] sm:$0xff] }
 0x409   : > { %9025 = vst [vmem:[#allocation11_spill] sm:$0xff] %v7255_v28  ;;  %3532 = vmatmul.mubr.f32.gmra.mxu1 %v5119_v20  ;;  %v7260_v37 = vpop.eup %5124  ;;  %v2933_v20 = vld [vmem:[#allocation4 + $0x30] sm:$0xff] }
 0x40a   : > { %3536 = vmatprep.mubr.f32.mxu1 %v7255_v28  ;;  %9027 = vst [vmem:[#allocation68_spill] sm:$0xff] %v7260_v37  ;;  %v3317_v32 = vmul.f32 %v3024_v39, %v2933_v20  ;;  %v3318_v39 = vmul.f32 %v7155_v45, %v2934_v0  ;;  %v7294_v45 = vpop.f32.mrf.mxu0  ;;  %v9037_v0 = vld [vmem:[#allocation16_spill] sm:$0xff] }
 0x40b   : > { %9036 = vst [vmem:[#allocation153_spill] sm:$0xff] %v7294_v45 }
 0x40c   : > { %v7300_v3 = vpop.f32.mrf.mxu0 }
 0x40d   : > { %3537 = vmatmul.mubr.f32.gmra.mxu1 %v7260_v37  ;;  %v9030_v37 = vld [vmem:[#allocation79_spill] sm:$0xff]  ;;  %9041 = vst [vmem:[#allocation16_spill] sm:$0xff] %v7300_v3 }
 0x40e   : > { %v7302_v46 = vpop.f32.mrf.mxu0 }
 0x412   : > { %1486 = vmax.xlane.f32.xlu1 %v1485_v63  ;;  %v7276_v63 = vpop.eup %5126 }
 0x413   : > { %9032 = vst [vmem:[#allocation151_spill] sm:$0xff] %v7276_v63 }
 0x41a   : > { %v3503_v15 = vpop.f32.mrf.mxu1 }
 0x41b   : > { %v3798_v16 = vadd.f32 %v3503_v15, %v3317_v32  ;;  %v7284_v32 = vpop.eup %5128 }
 0x41c   : > { %v3505_v12 = vpop.f32.mrf.mxu1  ;;  %1881 = vperm.xlu0 %5038, %v9030_v37   ;;  %9034 = vst [vmem:[#allocation70_spill] sm:$0xff] %v7284_v32 }
 0x41d   : > { %3862 = vst.msk [vmem:[#allocation4 + $0x30] sm:$0xff] %vm524_vm2, %v3798_v16  ;;  %v1484_v60 = vpop.xlane.xlu0 %1483  ;;  %v3034_v16 = vpop.permute.xlu1 %3033 }
 0x41e   : > { %v7274_v44 = vmax.f32 %v7269_v22, %v1484_v60  ;;  %v7287_v60 = vld [vmem:[#allocation2 + $0x188] sm:$0xff] }
 0x41f   : > { %9035 = vst [vmem:[#allocation152_spill] sm:$0xff] %v7287_v60  ;;  %v9039_v22 = vld [vmem:[#allocation14_spill] sm:$0xff] }
 0x420   : > { %9031 = vst [vmem:[#allocation79_spill] sm:$0xff] %v7274_v44  ;;  %3078 = vperm.xlu0 %5038, %v7276_v63   ;;  %3972 = vst.msk [vmem:[#allocation2 + $0x1a0] sm:$0xff] %vm2862_vm3, %v7274_v44  ;;  %v2124_v44 = vsub.f32 %v9040_v23, %v1852_v14 }
 0x422   : > { %v3508_v41 = vpop.f32.mrf.mxu1 }
 0x423   : > { %v3799_v36 = vadd.f32 %v3508_v41, %v3318_v39  ;;  %1866 = vperm.xlu1 %5039, %v9033_v8   ;;  %v2125_v39 = vsub.f32 %v9037_v0, %v1852_v14  ;;  %v7304_v0 = vpop.f32.mrf.mxu0 }
 0x424   : > { %v3510_v20 = vpop.f32.mrf.mxu1  ;;  %9043 = vst [vmem:[#allocation14_spill] sm:$0xff] %v7304_v0 }
 0x425   : > { %3863 = vst.msk [vmem:[#allocation4 + $0x38] sm:$0xff] %vm524_vm2, %v3799_v36  ;;  %v9038_v20 = vld [vmem:[#allocation13_spill] sm:$0xff] }
 0x426   : > { %9042 = vst [vmem:[#allocation13_spill] sm:$0xff] %v7302_v46 }
 0x427   : > { %3063 = vperm.xlu1 %5039, %v7284_v32  }
 0x429   : > { %v1475_v15 = vpop.xlane.xlu1 %1474 }
 0x42a   : > { %v7290_v12 = vmax.f32 %v7287_v60, %v1475_v15  ;;  %v2284_v15 = vmul.f32 1.442695, %v2125_v39  ;;  %v2282_v60 = vmul.f32 1.442695, %v2124_v44  ;;  %v1491_v39 = vmax.f32 %v7239_v50, %v7245_v33  ;;  %v9061_v33 = vld [vmem:[#allocation19_spill] sm:$0xff] }
 0x42c   : > { %3969 = vst.msk [vmem:[#allocation2 + $0x188] sm:$0xff] %vm2862_vm3, %v7290_v12 }
 0x42d   : > { %v1847_v41 = vpop.permute.xlu1 %1846 }
 0x42e   : > { %v2122_v36 = vsub.f32 %v9038_v20, %v1847_v41  ;;  %v2123_v63 = vsub.f32 %v9039_v22, %v1847_v41  ;;  %v1500_v20 = vmax.f32 %v7302_v46, %v7304_v0  ;;  %v9048_v41 = vld [vmem:[#allocation66_spill] sm:$0xff] }
 0x42f   : > { %v2936_v46 = vld [vmem:[#allocation4 + $0x48] sm:$0xff] }
 0x430   : > { %v2278_v32 = vmul.f32 1.442695, %v2122_v36  ;;  %v2280_v28 = vmul.f32 1.442695, %v2123_v63  ;;  %v1598_v36 = vsub.f32 %v9048_v41, %v9014_v26  ;;  %v3320_v41 = vmul.f32 %v7210_v27, %v2936_v46  ;;  %v7349_v27 = vpop.f32.mrf.mxu0  ;;  %v9058_v46 = vld [vmem:[#allocation20_spill] sm:$0xff] }
 0x431   : > { %9057 = vst [vmem:[#allocation158_spill] sm:$0xff] %v7349_v27 }
 0x432   : > { %5130 = vpow2.f32 %v2278_v32 }
 0x433   : > { %5132 = vpow2.f32 %v2280_v28  ;;  %v9046_v28 = vld [vmem:[#allocation71_spill] sm:$0xff] }
 0x434   : > { %5134 = vpow2.f32 %v2284_v15  ;;  %v1601_v44 = vsub.f32 %v9046_v28, %v9011_v21  ;;  %v1862_v15 = vpop.permute.xlu0 %1861  ;;  %v2935_v21 = vld [vmem:[#allocation4 + $0x40] sm:$0xff] }
 0x435   : > { %5136 = vpow2.f32 %v2282_v60  ;;  %v9050_v28 = vld [vmem:[#allocation85_spill] sm:$0xff]  ;;  %v3319_v0 = vmul.f32 %v3034_v16, %v2935_v21 }
 0x436   : > { %v1684_v60 = vmul.f32 1.442695, %v1601_v44 }
 0x438   : > { %5138 = vpow2.f32 %v1684_v60 }
 0x43f   : > { %v5131_v22 = vpop.eup %5130  ;;  %1501 = vmax.xlane.f32.xlu0 %v1500_v20  ;;  %v1678_v20 = vmul.f32 1.442695, %v1598_v36 }
 0x440   : > { %v5133_v23 = vpop.eup %5132 }
 0x441   : > { %3541 = vmatprep.mubr.f32.mxu1 %v5133_v23  ;;  %v7308_v14 = vadd.f32 %v5133_v23, %v5131_v22  ;;  %v7310_v63 = vpop.eup %5134  ;;  %5140 = vpow2.f32 %v1678_v20  ;;  %v7324_v23 = vld [vmem:[#allocation2 + $0x1b0] sm:$0xff]  ;;  %v9053_v20 = vld [vmem:[#allocation76_spill] sm:$0xff] }
 0x442   : > { %9045 = vst [vmem:[#allocation154_spill] sm:$0xff] %v7310_v63  ;;  %3542 = vmatmul.mubr.f32.gmra.mxu1 %v5131_v22  ;;  %v7315_v32 = vpop.eup %5136  ;;  %v7322_v22 = vpop.permute.xlu0 %3058  ;;  %9049 = vst [vmem:[#allocation66_spill] sm:$0xff] %v7324_v23 }
 0x443   : > { %9044 = vst [vmem:[#allocation15_spill] sm:$0xff] %v7308_v14  ;;  %3546 = vmatprep.mubr.f32.mxu1 %v7310_v63  ;;  %9047 = vst [vmem:[#allocation71_spill] sm:$0xff] %v7315_v32  ;;  %v7355_v14 = vpop.f32.mrf.mxu0 }
 0x444   : > { %9062 = vst [vmem:[#allocation20_spill] sm:$0xff] %v7355_v14 }
 0x445   : > { %v7330_v26 = vpop.eup %5138 }
 0x446   : > { %3547 = vmatmul.mubr.f32.gmra.mxu1 %v7315_v32  ;;  %9052 = vst [vmem:[#allocation155_spill] sm:$0xff] %v7330_v26 }
 0x44b   : > { %1492 = vmax.xlane.f32.xlu1 %v1491_v39 }
 0x455   : > { %1891 = vperm.xlu0 %5038, %v9050_v28  }
 0x456   : > { %v1490_v44 = vpop.xlane.xlu0 %1489 }
 0x457   : > { %v3513_v32 = vpop.f32.mrf.mxu1  ;;  %v7328_v50 = vmax.f32 %v7324_v23, %v1490_v44  ;;  %v3044_v44 = vpop.permute.xlu1 %3043 }
 0x458   : > { %v3800_v60 = vadd.f32 %v3513_v32, %v3319_v0  ;;  %v7339_v23 = vpop.eup %5140  ;;  %v7342_v0 = vld [vmem:[#allocation2 + $0x198] sm:$0xff] }
 0x459   : > { %9051 = vst [vmem:[#allocation85_spill] sm:$0xff] %v7328_v50  ;;  %v3515_v39 = vpop.f32.mrf.mxu1  ;;  %3088 = vperm.xlu0 %5038, %v7330_v26   ;;  %3974 = vst.msk [vmem:[#allocation2 + $0x1b0] sm:$0xff] %vm2862_vm3, %v7328_v50  ;;  %v2128_v50 = vsub.f32 %v9061_v33, %v1862_v15 }
 0x45a   : > { %3864 = vst.msk [vmem:[#allocation4 + $0x40] sm:$0xff] %vm524_vm2, %v3800_v60  ;;  %9054 = vst [vmem:[#allocation76_spill] sm:$0xff] %v7339_v23  ;;  %v2129_v60 = vsub.f32 %v9058_v46, %v1862_v15 }
 0x45b   : > { %v3518_v16 = vpop.f32.mrf.mxu1  ;;  %9055 = vst [vmem:[#allocation156_spill] sm:$0xff] %v7342_v0 }
 0x45c   : > { %v3801_v36 = vadd.f32 %v3518_v16, %v3320_v41  ;;  %1876 = vperm.xlu1 %5039, %v9053_v20   ;;  %v9059_v16 = vld [vmem:[#allocation17_spill] sm:$0xff] }
 0x45d   : > { %v3520_v21 = vpop.f32.mrf.mxu1 }
 0x45e   : > { %3865 = vst.msk [vmem:[#allocation4 + $0x48] sm:$0xff] %vm524_vm2, %v3801_v36  ;;  %v9060_v21 = vld [vmem:[#allocation18_spill] sm:$0xff] }
 0x460   : > { %3073 = vperm.xlu1 %5039, %v7339_v23  }
 0x462   : > { %v1481_v32 = vpop.xlane.xlu1 %1480 }
 0x463   : > { %v7345_v39 = vmax.f32 %v7342_v0, %v1481_v32  ;;  %v2292_v32 = vmul.f32 1.442695, %v2129_v60  ;;  %v2290_v0 = vmul.f32 1.442695, %v2128_v50  ;;  %v9066_v50 = vld [vmem:[#allocation77_spill] sm:$0xff]  ;;  %v1497_v60 = vmax.f32 %v7294_v45, %v7300_v3  ;;  %v9080_v3 = vld [vmem:[#allocation23_spill] sm:$0xff] }
 0x465   : > { %9056 = vst [vmem:[#allocation157_spill] sm:$0xff] %v7345_v39  ;;  %3971 = vst.msk [vmem:[#allocation2 + $0x198] sm:$0xff] %vm2862_vm3, %v7345_v39  ;;  %v7357_v39 = vpop.f32.mrf.mxu0 }
 0x466   : > { %v1857_v41 = vpop.permute.xlu1 %1856  ;;  %9063 = vst [vmem:[#allocation17_spill] sm:$0xff] %v7357_v39 }
 0x467   : > { %v2126_v36 = vsub.f32 %v9059_v16, %v1857_v41  ;;  %v2127_v26 = vsub.f32 %v9060_v21, %v1857_v41  ;;  %v7359_v46 = vpop.f32.mrf.mxu0 }
 0x468   : > { %9064 = vst [vmem:[#allocation18_spill] sm:$0xff] %v7359_v46  ;;  %v1506_v16 = vmax.f32 %v7357_v39, %v7359_v46  ;;  %v2938_v46 = vld [vmem:[#allocation4 + $0x58] sm:$0xff] }
 0x469   : > { %v2286_v23 = vmul.f32 1.442695, %v2126_v36  ;;  %v2288_v63 = vmul.f32 1.442695, %v2127_v26  ;;  %v9068_v36 = vld [vmem:[#allocation69_spill] sm:$0xff] }
 0x46a   : > { %v1600_v21 = vsub.f32 %v9068_v36, %v9033_v8  ;;  %v3322_v36 = vmul.f32 %v7267_v34, %v2938_v46  ;;  %v7404_v34 = vpop.f32.mrf.mxu0  ;;  %v9077_v46 = vld [vmem:[#allocation24_spill] sm:$0xff] }
 0x46b   : > { %5142 = vpow2.f32 %v2286_v23  ;;  %9076 = vst [vmem:[#allocation163_spill] sm:$0xff] %v7404_v34 }
 0x46c   : > { %5144 = vpow2.f32 %v2288_v63  ;;  %v1603_v63 = vsub.f32 %v9066_v50, %v9030_v37  ;;  %v2937_v37 = vld [vmem:[#allocation4 + $0x50] sm:$0xff] }
 0x46d   : > { %5146 = vpow2.f32 %v2292_v32  ;;  %v1872_v32 = vpop.permute.xlu0 %1871  ;;  %v3321_v50 = vmul.f32 %v3044_v44, %v2937_v37 }
 0x46e   : > { %5148 = vpow2.f32 %v2290_v0  ;;  %v1688_v0 = vmul.f32 1.442695, %v1603_v63 }
 0x470   : > { %5150 = vpow2.f32 %v1688_v0 }
 0x478   : > { %v5143_v41 = vpop.eup %5142  ;;  %1507 = vmax.xlane.f32.xlu0 %v1506_v16  ;;  %v1682_v16 = vmul.f32 1.442695, %v1600_v21 }
 0x479   : > { %v5145_v33 = vpop.eup %5144 }
 0x47a   : > { %3551 = vmatprep.mubr.f32.mxu1 %v5145_v33  ;;  %v7363_v15 = vadd.f32 %v5145_v33, %v5143_v41  ;;  %v7365_v26 = vpop.eup %5146  ;;  %5152 = vpow2.f32 %v1682_v16  ;;  %v7379_v33 = vld [vmem:[#allocation2 + $0x1c0] sm:$0xff]  ;;  %v9072_v16 = vld [vmem:[#allocation82_spill] sm:$0xff] }
 0x47b   : > { %9065 = vst [vmem:[#allocation19_spill] sm:$0xff] %v7365_v26  ;;  %3552 = vmatmul.mubr.f32.gmra.mxu1 %v5143_v41  ;;  %v7370_v23 = vpop.eup %5148  ;;  %v7377_v41 = vpop.permute.xlu0 %3068  ;;  %9069 = vst [vmem:[#allocation69_spill] sm:$0xff] %v7379_v33 }
 0x47c   : > { %3556 = vmatprep.mubr.f32.mxu1 %v7365_v26  ;;  %9067 = vst [vmem:[#allocation77_spill] sm:$0xff] %v7370_v23  ;;  %v7410_v26 = vpop.f32.mrf.mxu0 }
 0x47d   : > { %v7385_v8 = vpop.eup %5150  ;;  %9081 = vst [vmem:[#allocation24_spill] sm:$0xff] %v7410_v26 }
 0x47e   : > { %9071 = vst [vmem:[#allocation160_spill] sm:$0xff] %v7385_v8 }
 0x47f   : > { %3557 = vmatmul.mubr.f32.gmra.mxu1 %v7370_v23 }
 0x484   : > { %1498 = vmax.xlane.f32.xlu1 %v1497_v60 }
 0x48e   : > { %1901 = vperm.xlu0 %5038, %v6783_v10  }
 0x48f   : > { %v1496_v63 = vpop.xlane.xlu0 %1495 }
 0x490   : > { %v3523_v39 = vpop.f32.mrf.mxu1  ;;  %v7383_v45 = vmax.f32 %v7379_v33, %v1496_v63  ;;  %v3054_v63 = vpop.permute.xlu1 %3053 }
 0x491   : > { %v3802_v0 = vadd.f32 %v3523_v39, %v3321_v50  ;;  %v7394_v33 = vpop.eup %5152  ;;  %v7397_v39 = vld [vmem:[#allocation2 + $0x1a8] sm:$0xff] }
 0x492   : > { %9070 = vst [vmem:[#allocation159_spill] sm:$0xff] %v7383_v45  ;;  %v3525_v60 = vpop.f32.mrf.mxu1  ;;  %3098 = vperm.xlu0 %5038, %v7385_v8   ;;  %3976 = vst.msk [vmem:[#allocation2 + $0x1c0] sm:$0xff] %vm2862_vm3, %v7383_v45  ;;  %v2132_v45 = vsub.f32 %v9080_v3, %v1872_v32 }
 0x493   : > { %3866 = vst.msk [vmem:[#allocation4 + $0x50] sm:$0xff] %vm524_vm2, %v3802_v0  ;;  %9073 = vst [vmem:[#allocation82_spill] sm:$0xff] %v7394_v33  ;;  %v2133_v0 = vsub.f32 %v9077_v46, %v1872_v32 }
 0x494   : > { %v3528_v44 = vpop.f32.mrf.mxu1  ;;  %9074 = vst [vmem:[#allocation161_spill] sm:$0xff] %v7397_v39 }
 0x495   : > { %v3803_v21 = vadd.f32 %v3528_v44, %v3322_v36  ;;  %1886 = vperm.xlu1 %5039, %v9072_v16   ;;  %v9078_v44 = vld [vmem:[#allocation21_spill] sm:$0xff] }
 0x496   : > { %v3530_v37 = vpop.f32.mrf.mxu1 }
 0x497   : > { %3867 = vst.msk [vmem:[#allocation4 + $0x58] sm:$0xff] %vm524_vm2, %v3803_v21  ;;  %v9079_v37 = vld [vmem:[#allocation22_spill] sm:$0xff] }
 0x499   : > { %3083 = vperm.xlu1 %5039, %v7394_v33  }
 0x49b   : > { %v1487_v50 = vpop.xlane.xlu1 %1486 }
 0x49c   : > { %v7400_v60 = vmax.f32 %v7397_v39, %v1487_v50  ;;  %v2300_v50 = vmul.f32 1.442695, %v2133_v0  ;;  %v2298_v39 = vmul.f32 1.442695, %v2132_v45  ;;  %v9084_v45 = vld [vmem:[#allocation83_spill] sm:$0xff]  ;;  %v1503_v0 = vmax.f32 %v7349_v27, %v7355_v14 }
 0x49d   : > { %v7438_v27 = vld [vmem:[#allocation2 + $0x1d0] sm:$0xff] }
 0x49e   : > { %9075 = vst [vmem:[#allocation162_spill] sm:$0xff] %v7400_v60  ;;  %3973 = vst.msk [vmem:[#allocation2 + $0x1a8] sm:$0xff] %vm2862_vm3, %v7400_v60  ;;  %v7412_v60 = vpop.f32.mrf.mxu0 }
 0x49f   : > { %v1867_v36 = vpop.permute.xlu1 %1866  ;;  %9082 = vst [vmem:[#allocation21_spill] sm:$0xff] %v7412_v60  ;;  %9088 = vst [vmem:[#allocation23_spill] sm:$0xff] %v7438_v27 }
 0x4a0   : > { %v2130_v21 = vsub.f32 %v9078_v44, %v1867_v36  ;;  %v2131_v8 = vsub.f32 %v9079_v37, %v1867_v36  ;;  %v7414_v46 = vpop.f32.mrf.mxu0 }
 0x4a1   : > { %9083 = vst [vmem:[#allocation22_spill] sm:$0xff] %v7414_v46  ;;  %v1512_v44 = vmax.f32 %v7412_v60, %v7414_v46  ;;  %v2939_v60 = vld [vmem:[#allocation4 + $0x60] sm:$0xff] }
 0x4a2   : > { %v2294_v33 = vmul.f32 1.442695, %v2130_v21  ;;  %v2296_v23 = vmul.f32 1.442695, %v2131_v8  ;;  %v9085_v21 = vld [vmem:[#allocation74_spill] sm:$0xff] }
 0x4a3   : > { %v1602_v37 = vsub.f32 %v9085_v21, %v9053_v20  ;;  %v3323_v20 = vmul.f32 %v3054_v63, %v2939_v60 }
 0x4a4   : > { %5154 = vpow2.f32 %v2294_v33 }
 0x4a5   : > { %5156 = vpow2.f32 %v2296_v23  ;;  %v1605_v23 = vsub.f32 %v9084_v45, %v9050_v28  ;;  %v1686_v28 = vmul.f32 1.442695, %v1602_v37 }
 0x4a6   : > { %5158 = vpow2.f32 %v2300_v50  ;;  %v9086_v50 = vld [vmem:[#allocation89_spill] sm:$0xff] }
 0x4a7   : > { %5160 = vpow2.f32 %v2298_v39  ;;  %v1692_v39 = vmul.f32 1.442695, %v1605_v23  ;;  %v9087_v23 = vld [vmem:[#allocation94_spill] sm:$0xff] }
 0x4a8   : > { %v1609_v46 = vsub.f32 %v9087_v23, %v6803_v42 }
 0x4a9   : > { %5162 = vpow2.f32 %v1692_v39 }
 0x4aa   : > { %5164 = vpow2.f32 %v1686_v28  ;;  %v1700_v21 = vmul.f32 1.442695, %v1609_v46  ;;  %v9091_v46 = vld [vmem:[#allocation88_spill] sm:$0xff] }
 0x4b1   : > { %v5155_v36 = vpop.eup %5154  ;;  %1513 = vmax.xlane.f32.xlu0 %v1512_v44  ;;  %v1607_v44 = vsub.f32 %v9086_v50, %v6783_v10  ;;  %v2940_v10 = vld [vmem:[#allocation4 + $0x68] sm:$0xff] }
 0x4b2   : > { %v5157_v3 = vpop.eup %5156 }
 0x4b3   : > { %3561 = vmatprep.mubr.f32.mxu1 %v5157_v3  ;;  %v7418_v32 = vadd.f32 %v5157_v3, %v5155_v36  ;;  %v7420_v8 = vpop.eup %5158  ;;  %v1696_v3 = vmul.f32 1.442695, %v1607_v44 }
 0x4b4   : > { %3562 = vmatmul.mubr.f32.gmra.mxu1 %v5155_v36  ;;  %v7425_v33 = vpop.eup %5160  ;;  %v1882_v36 = vpop.permute.xlu0 %1881 }
 0x4b5   : > { %3566 = vmatprep.mubr.f32.mxu1 %v7420_v8  ;;  %5166 = vpow2.f32 %v1696_v3  ;;  %v3324_v3 = vmul.f32 %v7322_v22, %v2940_v10 }
 0x4b6   : > { %v7444_v50 = vpop.eup %5162  ;;  %5168 = vpow2.f32 %v1700_v21  ;;  %v7461_v21 = vld [vmem:[#allocation2 + $0x1b8] sm:$0xff] }
 0x4b7   : > { %9090 = vst [vmem:[#allocation74_spill] sm:$0xff] %v7444_v50  ;;  %9094 = vst [vmem:[#allocation88_spill] sm:$0xff] %v7461_v21 }
 0x4b8   : > { %3567 = vmatmul.mubr.f32.gmra.mxu1 %v7425_v33  ;;  %v7434_v45 = vpop.permute.xlu0 %3078 }
 0x4bd   : > { %1504 = vmax.xlane.f32.xlu1 %v1503_v0 }
 0x4c7   : > { %1911 = vperm.xlu0 %5038, %v6803_v42   ;;  %v1611_v42 = vsub.f32 %v6816_v6, %v6824_v52  ;;  %v9095_v6 = vld [vmem:[#allocation100_spill] sm:$0xff] }
 0x4c8   : > { %v1502_v39 = vpop.xlane.xlu0 %1501  ;;  %v1613_v10 = vsub.f32 %v9095_v6, %v6844_v58  ;;  %v9100_v6 = vld [vmem:[#allocation27_spill] sm:$0xff] }
 0x4c9   : > { %v3533_v0 = vpop.f32.mrf.mxu1  ;;  %v7442_v37 = vmax.f32 %v7438_v27, %v1502_v39  ;;  %v7456_v39 = vpop.eup %5164 }
 0x4ca   : > { %v3804_v44 = vadd.f32 %v3533_v0, %v3323_v20  ;;  %v3064_v20 = vpop.permute.xlu1 %3063  ;;  %9092 = vst [vmem:[#allocation89_spill] sm:$0xff] %v7456_v39  ;;  %v1704_v0 = vmul.f32 1.442695, %v1611_v42  ;;  %v7458_v22 = vpop.eup %5166 }
 0x4cb   : > { %9089 = vst [vmem:[#allocation83_spill] sm:$0xff] %v7442_v37  ;;  %v3535_v28 = vpop.f32.mrf.mxu1  ;;  %3108 = vperm.xlu0 %5038, %v7444_v50   ;;  %3978 = vst.msk [vmem:[#allocation2 + $0x1d0] sm:$0xff] %vm2862_vm3, %v7442_v37  ;;  %v7475_v14 = vpop.eup %5168 }
 0x4cc   : > { %3868 = vst.msk [vmem:[#allocation4 + $0x60] sm:$0xff] %vm524_vm2, %v3804_v44  ;;  %9093 = vst [vmem:[#allocation94_spill] sm:$0xff] %v7458_v22  ;;  %5170 = vpow2.f32 %v1704_v0  ;;  %v1708_v28 = vmul.f32 1.442695, %v1613_v10  ;;  %v2136_v0 = vsub.f32 %v9100_v6, %v1882_v36  ;;  %v9101_v10 = vld [vmem:[#allocation104_spill] sm:$0xff] }
 0x4cd   : > { %v3538_v63 = vpop.f32.mrf.mxu1  ;;  %9099 = vst [vmem:[#allocation100_spill] sm:$0xff] %v7475_v14 }
 0x4ce   : > { %v3805_v60 = vadd.f32 %v3538_v63, %v3324_v3  ;;  %1896 = vperm.xlu1 %5039, %v9091_v46   ;;  %v9096_v3 = vld [vmem:[#allocation28_spill] sm:$0xff]  ;;  %5172 = vpow2.f32 %v1708_v28 }
 0x4cf   : > { %v3540_v23 = vpop.f32.mrf.mxu1  ;;  %1921 = vperm.xlu0 %5038, %v6824_v52   ;;  %v2137_v42 = vsub.f32 %v9096_v3, %v1882_v36 }
 0x4d0   : > { %3869 = vst.msk [vmem:[#allocation4 + $0x68] sm:$0xff] %vm524_vm2, %v3805_v60  ;;  %v9097_v60 = vld [vmem:[#allocation25_spill] sm:$0xff]  ;;  %v1892_v6 = vpop.permute.xlu0 %1891 }
 0x4d2   : > { %3093 = vperm.xlu1 %5039, %v7456_v39  }
 0x4d3   : > { %3118 = vperm.xlu0 %5038, %v7458_v22   ;;  %v9098_v22 = vld [vmem:[#allocation26_spill] sm:$0xff] }
 0x4d4   : > { %v1493_v44 = vpop.xlane.xlu1 %1492 }
 0x4d5   : > { %v7467_v52 = vmax.f32 %v7461_v21, %v1493_v44  ;;  %v2308_v21 = vmul.f32 1.442695, %v2137_v42  ;;  %v1509_v42 = vmax.f32 %v7404_v34, %v7410_v26 }
 0x4d7   : > { %3975 = vst.msk [vmem:[#allocation2 + $0x1b8] sm:$0xff] %vm2862_vm3, %v7467_v52  ;;  %1931 = vperm.xlu0 %5038, %v6844_v58   ;;  %v2306_v58 = vmul.f32 1.442695, %v2136_v0 }
 0x4d8   : > { %v1877_v63 = vpop.permute.xlu1 %1876 }
 0x4d9   : > { %v2134_v23 = vsub.f32 %v9097_v60, %v1877_v63  ;;  %v2135_v50 = vsub.f32 %v9098_v22, %v1877_v63  ;;  %v7480_v3 = vpop.eup %5170  ;;  %v9103_v22 = vld [vmem:[#allocation110_spill] sm:$0xff]  ;;  %v9107_v60 = vld [vmem:[#allocation80_spill] sm:$0xff] }
 0x4da   : > { %9102 = vst [vmem:[#allocation28_spill] sm:$0xff] %v7480_v3 }
 0x4db   : > { %v2302_v27 = vmul.f32 1.442695, %v2134_v23  ;;  %v2304_v44 = vmul.f32 1.442695, %v2135_v50  ;;  %3128 = vperm.xlu0 %5038, %v7475_v14   ;;  %v7484_v36 = vpop.eup %5172  ;;  %v1604_v23 = vsub.f32 %v9107_v60, %v9072_v16 }
 0x4dc   : > { %9104 = vst [vmem:[#allocation25_spill] sm:$0xff] %v7484_v36 }
 0x4dd   : > { %5174 = vpow2.f32 %v2302_v27  ;;  %v1690_v0 = vmul.f32 1.442695, %v1604_v23  ;;  %v9110_v23 = vld [vmem:[#allocation93_spill] sm:$0xff] }
 0x4de   : > { %5176 = vpow2.f32 %v2304_v44  ;;  %v7500_v44 = vpop.permute.xlu0 %3088 }
 0x4df   : > { %1941 = vperm.xlu0 %5038, %v9101_v10   ;;  %5178 = vpow2.f32 %v2308_v21 }
 0x4e0   : > { %5180 = vpow2.f32 %v2306_v58  ;;  %v2941_v58 = vld [vmem:[#allocation4 + $0x70] sm:$0xff] }
 0x4e1   : > { %5182 = vpow2.f32 %v1690_v0  ;;  %v3074_v0 = vpop.permute.xlu1 %3073 }
 0x4e3   : > { %3138 = vperm.xlu0 %5038, %v7480_v3   ;;  %v2942_v3 = vld [vmem:[#allocation4 + $0x78] sm:$0xff] }
 0x4e4   : > { %v3326_v16 = vmul.f32 %v7377_v41, %v2942_v3 }
 0x4e7   : > { %1951 = vperm.xlu0 %5038, %v9103_v22  }
 0x4ea   : > { %v5175_v50 = vpop.eup %5174 }
 0x4eb   : > { %v5177_v63 = vpop.eup %5176  ;;  %3148 = vperm.xlu0 %5038, %v7484_v36  }
 0x4ec   : > { %3571 = vmatprep.mubr.f32.mxu1 %v5177_v63  ;;  %v7487_v27 = vadd.f32 %v5177_v63, %v5175_v50  ;;  %v7489_v28 = vpop.eup %5178  ;;  %v3325_v63 = vmul.f32 %v3064_v20, %v2941_v58 }
 0x4ed   : > { %9105 = vst [vmem:[#allocation26_spill] sm:$0xff] %v7489_v28  ;;  %3572 = vmatmul.mubr.f32.gmra.mxu1 %v5175_v50  ;;  %v7493_v21 = vpop.eup %5180  ;;  %v7502_v50 = vld [vmem:[#allocation2 + $0x1e0] sm:$0xff] }
 0x4ee   : > { %3576 = vmatprep.mubr.f32.mxu1 %v7489_v28  ;;  %9106 = vst [vmem:[#allocation27_spill] sm:$0xff] %v7493_v21  ;;  %9108 = vst [vmem:[#allocation104_spill] sm:$0xff] %v7502_v50  ;;  %v7513_v58 = vpop.eup %5182 }
 0x4ef   : > { %1961 = vperm.xlu0 %5038, %v6937_v59   ;;  %9111 = vst [vmem:[#allocation80_spill] sm:$0xff] %v7513_v58 }
 0x4f1   : > { %3577 = vmatmul.mubr.f32.gmra.mxu1 %v7493_v21 }
 0x4f6   : > { %1510 = vmax.xlane.f32.xlu1 %v1509_v42 }
 0x501   : > { %v1508_v36 = vpop.xlane.xlu0 %1507 }
 0x502   : > { %v3543_v14 = vpop.f32.mrf.mxu1  ;;  %v7505_v37 = vmax.f32 %v7502_v50, %v1508_v36  ;;  %v9116_v50 = vld [vmem:[#allocation30_spill] sm:$0xff] }
 0x503   : > { %v3806_v34 = vadd.f32 %v3543_v14, %v3325_v63  ;;  %v7516_v14 = vld [vmem:[#allocation2 + $0x1c8] sm:$0xff]  ;;  %v9114_v63 = vld [vmem:[#allocation32_spill] sm:$0xff] }
 0x504   : > { %9109 = vst [vmem:[#allocation110_spill] sm:$0xff] %v7505_v37  ;;  %v3545_v26 = vpop.f32.mrf.mxu1  ;;  %3980 = vst.msk [vmem:[#allocation2 + $0x1e0] sm:$0xff] %vm2862_vm3, %v7505_v37 }
 0x505   : > { %3870 = vst.msk [vmem:[#allocation4 + $0x70] sm:$0xff] %vm524_vm2, %v3806_v34  ;;  %9112 = vst [vmem:[#allocation93_spill] sm:$0xff] %v7516_v14  ;;  %v9113_v26 = vld [vmem:[#allocation103_spill] sm:$0xff] }
 0x506   : > { %v3548_v42 = vpop.f32.mrf.mxu1  ;;  %v1615_v36 = vsub.f32 %v9113_v26, %v9101_v10 }
 0x507   : > { %v3807_v60 = vadd.f32 %v3548_v42, %v3326_v16  ;;  %1906 = vperm.xlu1 %5039, %v9110_v23   ;;  %v2141_v16 = vsub.f32 %v9114_v63, %v1892_v6 }
 0x508   : > { %v3550_v20 = vpop.f32.mrf.mxu1  ;;  %v1712_v3 = vmul.f32 1.442695, %v1615_v36 }
 0x509   : > { %3871 = vst.msk [vmem:[#allocation4 + $0x78] sm:$0xff] %vm524_vm2, %v3807_v60  ;;  %v9115_v60 = vld [vmem:[#allocation29_spill] sm:$0xff] }
 0x50a   : > { %5184 = vpow2.f32 %v1712_v3  ;;  %v9123_v3 = vld [vmem:[#allocation86_spill] sm:$0xff] }
 0x50b   : > { %3103 = vperm.xlu1 %5039, %v7513_v58   ;;  %v9117_v58 = vld [vmem:[#allocation31_spill] sm:$0xff] }
 0x50c   : > { %v2140_v39 = vsub.f32 %v9117_v58, %v1892_v6 }
 0x50d   : > { %v1499_v41 = vpop.xlane.xlu1 %1498 }
 0x50e   : > { %v7521_v34 = vmax.f32 %v7516_v14, %v1499_v41  ;;  %2610 = vadd.xlane.f32.xlu0 %v6903_v54  ;;  %v2316_v41 = vmul.f32 1.442695, %v2141_v16  ;;  %v2314_v54 = vmul.f32 1.442695, %v2140_v39  ;;  %v1606_v16 = vsub.f32 %v9123_v3, %v9091_v46  ;;  %v9128_v3 = vld [vmem:[#allocation96_spill] sm:$0xff] }
 0x510   : > { %3977 = vst.msk [vmem:[#allocation2 + $0x1c8] sm:$0xff] %vm2862_vm3, %v7521_v34 }
 0x511   : > { %v1887_v42 = vpop.permute.xlu1 %1886 }
 0x512   : > { %v2138_v20 = vsub.f32 %v9115_v60, %v1887_v42  ;;  %v2139_v37 = vsub.f32 %v9116_v50, %v1887_v42  ;;  %v1902_v42 = vpop.permute.xlu0 %1901 }
 0x514   : > { %v2310_v10 = vmul.f32 1.442695, %v2138_v20  ;;  %v2312_v26 = vmul.f32 1.442695, %v2139_v37  ;;  %v7537_v37 = vpop.f32.mrf.mxu0  ;;  %v1694_v20 = vmul.f32 1.442695, %v1606_v16 }
 0x515   : > { %9120 = vst [vmem:[#allocation29_spill] sm:$0xff] %v7537_v37 }
 0x516   : > { %5186 = vpow2.f32 %v2310_v10  ;;  %v7543_v39 = vpop.f32.mrf.mxu0  ;;  %v9124_v10 = vld [vmem:[#allocation91_spill] sm:$0xff] }
 0x517   : > { %5188 = vpow2.f32 %v2312_v26  ;;  %v7530_v14 = vpop.eup %5184  ;;  %9122 = vst [vmem:[#allocation31_spill] sm:$0xff] %v7543_v39  ;;  %v1515_v58 = vmax.f32 %v7537_v37, %v7543_v39  ;;  %v1608_v26 = vsub.f32 %v9124_v10, %v9110_v23  ;;  %v9127_v23 = vld [vmem:[#allocation97_spill] sm:$0xff] }
 0x518   : > { %5190 = vpow2.f32 %v2316_v41  ;;  %9118 = vst [vmem:[#allocation103_spill] sm:$0xff] %v7530_v14  ;;  %v7551_v41 = vpop.permute.xlu0 %3098  ;;  %v1610_v16 = vsub.f32 %v9128_v3, %v9127_v23 }
 0x519   : > { %5192 = vpow2.f32 %v2314_v54  ;;  %v2943_v54 = vld [vmem:[#allocation4 + $0x80] sm:$0xff] }
 0x51a   : > { %5194 = vpow2.f32 %v1694_v20 }
 0x523   : > { %v5187_v36 = vpop.eup %5186 }
 0x524   : > { %v5189_v63 = vpop.eup %5188  ;;  %3158 = vperm.xlu0 %5038, %v7530_v14   ;;  %v3327_v14 = vmul.f32 %v3074_v0, %v2943_v54  ;;  %v3084_v54 = vpop.permute.xlu1 %3083 }
 0x525   : > { %3581 = vmatprep.mubr.f32.mxu1 %v5189_v63  ;;  %v7533_v60 = vadd.f32 %v5189_v63, %v5187_v36  ;;  %v7535_v50 = vpop.eup %5190  ;;  %v1698_v63 = vmul.f32 1.442695, %v1608_v26 }
 0x526   : > { %9119 = vst [vmem:[#allocation32_spill] sm:$0xff] %v7535_v50  ;;  %3582 = vmatmul.mubr.f32.gmra.mxu1 %v5187_v36  ;;  %v7540_v6 = vpop.eup %5192  ;;  %v7553_v36 = vld [vmem:[#allocation2 + $0x1f0] sm:$0xff] }
 0x527   : > { %3586 = vmatprep.mubr.f32.mxu1 %v7535_v50  ;;  %9121 = vst [vmem:[#allocation30_spill] sm:$0xff] %v7540_v6  ;;  %9125 = vst [vmem:[#allocation86_spill] sm:$0xff] %v7553_v36  ;;  %v2944_v50 = vld [vmem:[#allocation4 + $0x88] sm:$0xff]  ;;  %5196 = vpow2.f32 %v1698_v63 }
 0x528   : > { %v3328_v20 = vmul.f32 %v7434_v45, %v2944_v50  ;;  %v9131_v45 = vld [vmem:[#allocation99_spill] sm:$0xff]  ;;  %v9132_v50 = vld [vmem:[#allocation98_spill] sm:$0xff] }
 0x529   : > { %v1612_v63 = vsub.f32 %v9132_v50, %v9131_v45 }
 0x52a   : > { %3587 = vmatmul.mubr.f32.gmra.mxu1 %v7540_v6 }
 0x52f   : > { %1516 = vmax.xlane.f32.xlu1 %v1515_v58 }
 0x53a   : > { %v1514_v6 = vpop.xlane.xlu0 %1513 }
 0x53b   : > { %v3553_v37 = vpop.f32.mrf.mxu1  ;;  %v7556_v39 = vmax.f32 %v7553_v36, %v1514_v6  ;;  %v1702_v6 = vmul.f32 1.442695, %v1610_v16  ;;  %v1706_v16 = vmul.f32 1.442695, %v1612_v63  ;;  %v9138_v36 = vld [vmem:[#allocation34_spill] sm:$0xff] }
 0x53c   : > { %v3808_v46 = vadd.f32 %v3553_v37, %v3327_v14  ;;  %v7566_v14 = vpop.eup %5194  ;;  %v7570_v37 = vld [vmem:[#allocation2 + $0x1d8] sm:$0xff] }
 0x53d   : > { %9126 = vst [vmem:[#allocation91_spill] sm:$0xff] %v7556_v39  ;;  %v3555_v58 = vpop.f32.mrf.mxu1  ;;  %3982 = vst.msk [vmem:[#allocation2 + $0x1f0] sm:$0xff] %vm2862_vm3, %v7556_v39  ;;  %5198 = vpow2.f32 %v1702_v6  ;;  %v9137_v6 = vld [vmem:[#allocation33_spill] sm:$0xff] }
 0x53e   : > { %3872 = vst.msk [vmem:[#allocation4 + $0x80] sm:$0xff] %vm524_vm2, %v3808_v46  ;;  %9129 = vst [vmem:[#allocation97_spill] sm:$0xff] %v7566_v14  ;;  %v9133_v46 = vld [vmem:[#allocation109_spill] sm:$0xff]  ;;  %5200 = vpow2.f32 %v1706_v16 }
 0x53f   : > { %v3558_v0 = vpop.f32.mrf.mxu1  ;;  %9130 = vst [vmem:[#allocation96_spill] sm:$0xff] %v7570_v37  ;;  %v1617_v58 = vsub.f32 %v9133_v46, %v9103_v22  ;;  %v9139_v46 = vld [vmem:[#allocation35_spill] sm:$0xff] }
 0x540   : > { %v3809_v10 = vadd.f32 %v3558_v0, %v3328_v20  ;;  %1916 = vperm.xlu1 %5039, %v9127_v23   ;;  %v9135_v20 = vld [vmem:[#allocation36_spill] sm:$0xff] }
 0x541   : > { %v3560_v26 = vpop.f32.mrf.mxu1  ;;  %v2145_v0 = vsub.f32 %v9135_v20, %v1902_v42 }
 0x542   : > { %3873 = vst.msk [vmem:[#allocation4 + $0x88] sm:$0xff] %vm524_vm2, %v3809_v10  ;;  %v7583_v26 = vpop.eup %5196 }
 0x543   : > { %2613 = vadd.xlane.f32.xlu0 %v6960_v24  ;;  %v1716_v24 = vmul.f32 1.442695, %v1617_v58  ;;  %9136 = vst [vmem:[#allocation98_spill] sm:$0xff] %v7583_v26  ;;  %v2324_v39 = vmul.f32 1.442695, %v2145_v0  ;;  %v9140_v58 = vld [vmem:[#allocation102_spill] sm:$0xff] }
 0x544   : > { %3113 = vperm.xlu1 %5039, %v7566_v14  }
 0x545   : > { %5202 = vpow2.f32 %v1716_v24 }
 0x546   : > { %v1505_v23 = vpop.xlane.xlu1 %1504 }
 0x547   : > { %v7577_v3 = vmax.f32 %v7570_v37, %v1505_v23  ;;  %v2144_v23 = vsub.f32 %v9139_v46, %v1902_v42 }
 0x548   : > { %1926 = vperm.xlu1 %5039, %v9131_v45  }
 0x549   : > { %9134 = vst [vmem:[#allocation99_spill] sm:$0xff] %v7577_v3  ;;  %3979 = vst.msk [vmem:[#allocation2 + $0x1d8] sm:$0xff] %vm2862_vm3, %v7577_v3  ;;  %v2322_v20 = vmul.f32 1.442695, %v2144_v23 }
 0x54a   : > { %v1897_v10 = vpop.permute.xlu1 %1896  ;;  %v7590_v14 = vpop.eup %5198 }
 0x54b   : > { %v2142_v50 = vsub.f32 %v9137_v6, %v1897_v10  ;;  %v2143_v22 = vsub.f32 %v9138_v36, %v1897_v10  ;;  %9141 = vst [vmem:[#allocation109_spill] sm:$0xff] %v7590_v14  ;;  %v1912_v36 = vpop.permute.xlu0 %1911  ;;  %v9142_v10 = vld [vmem:[#allocation108_spill] sm:$0xff]  ;;  %v7595_v42 = vpop.eup %5200 }
 0x54c   : > { %3123 = vperm.xlu1 %5039, %v7583_v26   ;;  %9143 = vst [vmem:[#allocation36_spill] sm:$0xff] %v7595_v42 }
 0x54d   : > { %v2318_v45 = vmul.f32 1.442695, %v2142_v50  ;;  %v2320_v63 = vmul.f32 1.442695, %v2143_v22 }
 0x54f   : > { %5204 = vpow2.f32 %v2318_v45  ;;  %v7600_v6 = vpop.permute.xlu0 %3108 }
 0x550   : > { %5206 = vpow2.f32 %v2320_v63  ;;  %1936 = vperm.xlu1 %5039, %v9140_v58   ;;  %v2945_v63 = vld [vmem:[#allocation4 + $0x90] sm:$0xff] }
 0x551   : > { %5208 = vpow2.f32 %v2324_v39 }
 0x552   : > { %5210 = vpow2.f32 %v2322_v20  ;;  %v7597_v16 = vpop.eup %5202  ;;  %v3329_v20 = vmul.f32 %v3084_v54, %v2945_v63  ;;  %v7626_v54 = vld [vmem:[#allocation2 + $0x1e8] sm:$0xff]  ;;  %v9149_v63 = vld [vmem:[#allocation101_spill] sm:$0xff] }
 0x553   : > { %9144 = vst [vmem:[#allocation33_spill] sm:$0xff] %v7597_v16  ;;  %v7611_v46 = vpop.permute.xlu0 %1921  ;;  %9148 = vst [vmem:[#allocation108_spill] sm:$0xff] %v7626_v54 }
 0x554   : > { %3133 = vperm.xlu1 %5039, %v7590_v14  }
 0x557   : > { %v7614_v23 = vpop.permute.xlu0 %3118 }
 0x558   : > { %1946 = vperm.xlu1 %5039, %v9142_v10  }
 0x559   : > { %1971 = vperm.xlu0 %5038, %v6996_v57  }
 0x55b   : > { %v7616_v45 = vpop.permute.xlu0 %1931 }
 0x55c   : > { %v5205_v24 = vpop.eup %5204  ;;  %3143 = vperm.xlu1 %5039, %v7595_v42  }
 0x55d   : > { %v5207_v0 = vpop.eup %5206  ;;  %3168 = vperm.xlu0 %5038, %v7597_v16  }
 0x55e   : > { %3591 = vmatprep.mubr.f32.mxu1 %v5207_v0  ;;  %v7603_v39 = vadd.f32 %v5207_v0, %v5205_v24  ;;  %v7605_v50 = vpop.eup %5208  ;;  %v2946_v0 = vld [vmem:[#allocation4 + $0x98] sm:$0xff] }
 0x55f   : > { %9146 = vst [vmem:[#allocation35_spill] sm:$0xff] %v7605_v50  ;;  %3592 = vmatmul.mubr.f32.gmra.mxu1 %v5205_v24  ;;  %v7609_v22 = vpop.eup %5210  ;;  %v7618_v42 = vpop.permute.xlu0 %3128  ;;  %v3330_v26 = vmul.f32 %v7500_v44, %v2946_v0  ;;  %v1619_v44 = vsub.f32 %v6927_v29, %v6937_v59  ;;  %v9154_v29 = vld [vmem:[#allocation39_spill] sm:$0xff] }
 0x560   : > { %9145 = vst [vmem:[#allocation34_spill] sm:$0xff] %v7603_v39  ;;  %3596 = vmatprep.mubr.f32.mxu1 %v7605_v50  ;;  %1956 = vperm.xlu1 %5039, %v6922_v18   ;;  %9147 = vst [vmem:[#allocation102_spill] sm:$0xff] %v7609_v22  ;;  %v2148_v59 = vsub.f32 %v9154_v29, %v1912_v36 }
 0x563   : > { %3597 = vmatmul.mubr.f32.gmra.mxu1 %v7609_v22  ;;  %v3094_v22 = vpop.permute.xlu1 %3093  ;;  %v7622_v28 = vpop.permute.xlu0 %1941 }
 0x574   : > { %v3563_v16 = vpop.f32.mrf.mxu1 }
 0x575   : > { %v3810_v24 = vadd.f32 %v3563_v16, %v3329_v20  ;;  %v1614_v16 = vsub.f32 %v9149_v63, %v9140_v58  ;;  %v9153_v58 = vld [vmem:[#allocation38_spill] sm:$0xff] }
 0x576   : > { %v3565_v14 = vpop.f32.mrf.mxu1 }
 0x577   : > { %3874 = vst.msk [vmem:[#allocation4 + $0x90] sm:$0xff] %vm524_vm2, %v3810_v24  ;;  %v9152_v24 = vld [vmem:[#allocation37_spill] sm:$0xff] }
 0x578   : > { %v3568_v50 = vpop.f32.mrf.mxu1 }
 0x579   : > { %v3811_v37 = vadd.f32 %v3568_v50, %v3330_v26  ;;  %v1710_v26 = vmul.f32 1.442695, %v1614_v16  ;;  %v9155_v16 = vld [vmem:[#allocation106_spill] sm:$0xff] }
 0x57a   : > { %v3570_v21 = vpop.f32.mrf.mxu1  ;;  %v1616_v3 = vsub.f32 %v9155_v16, %v9142_v10  ;;  %v2479_v10 = vld [vmem:[#allocation3 + $0x8] sm:$0xff] }
 0x57b   : > { %3875 = vst.msk [vmem:[#allocation4 + $0x98] sm:$0xff] %vm524_vm2, %v3811_v37  ;;  %v7635_v21 = vpop.permute.xlu0 %3138  ;;  %v1720_v37 = vmul.f32 1.442695, %v1619_v44  ;;  %5212 = vpow2.f32 %v1710_v26 }
 0x57c   : > { %2619 = vadd.xlane.f32.xlu0 %v7021_v30  ;;  %v9151_v30 = vld [vmem:[#allocation40_spill] sm:$0xff] }
 0x57d   : > { %v2149_v50 = vsub.f32 %v9151_v30, %v1912_v36  ;;  %5214 = vpow2.f32 %v1720_v37  ;;  %v2330_v30 = vmul.f32 1.442695, %v2148_v59 }
 0x57f   : > { %v1511_v14 = vpop.xlane.xlu1 %1510  ;;  %v7646_v44 = vpop.permute.xlu0 %1951 }
 0x580   : > { %v7633_v20 = vmax.f32 %v7626_v54, %v1511_v14 }
 0x582   : > { %9150 = vst [vmem:[#allocation101_spill] sm:$0xff] %v7633_v20  ;;  %3981 = vst.msk [vmem:[#allocation2 + $0x1e8] sm:$0xff] %vm2862_vm3, %v7633_v20  ;;  %v2332_v20 = vmul.f32 1.442695, %v2149_v50 }
 0x583   : > { %v1907_v0 = vpop.permute.xlu1 %1906 }
 0x584   : > { %v2146_v39 = vsub.f32 %v9152_v24, %v1907_v0  ;;  %v2147_v63 = vsub.f32 %v9153_v58, %v1907_v0  ;;  %2607 = vadd.xlane.f32.xlu1 %v6901_v61  ;;  %v1714_v24 = vmul.f32 1.442695, %v1616_v3  ;;  %v7648_v0 = vpop.permute.xlu0 %3148  ;;  %v9158_v3 = vld [vmem:[#allocation107_spill] sm:$0xff] }
 0x586   : > { %v2326_v14 = vmul.f32 1.442695, %v2146_v39  ;;  %v2328_v54 = vmul.f32 1.442695, %v2147_v63 }
 0x588   : > { %5216 = vpow2.f32 %v2326_v14  ;;  %v7651_v61 = vpop.eup %5212  ;;  %v7653_v36 = vpop.permute.xlu0 %1961  ;;  %v2947_v14 = vld [vmem:[#allocation4 + $0xa0] sm:$0xff] }
 0x589   : > { %5218 = vpow2.f32 %v2328_v54  ;;  %9156 = vst [vmem:[#allocation40_spill] sm:$0xff] %v7651_v61  ;;  %v3331_v16 = vmul.f32 %v3094_v22, %v2947_v14  ;;  %v1621_v22 = vsub.f32 %v6988_v56, %v6996_v57 }
 0x58a   : > { %5220 = vpow2.f32 %v2332_v20  ;;  %v7655_v39 = vpop.eup %5214  ;;  %v2543_v20 = vmul.f32 %v9158_v3, %v2479_v10 }
 0x58b   : > { %5222 = vpow2.f32 %v2330_v30  ;;  %9157 = vst [vmem:[#allocation37_spill] sm:$0xff] %v7655_v39  ;;  %v2948_v30 = vld [vmem:[#allocation4 + $0xa8] sm:$0xff] }
 0x58c   : > { %5224 = vpow2.f32 %v1714_v24 }
 0x592   : > { %1981 = vperm.xlu0 %5038, %v7060_v2  }
 0x595   : > { %v5217_v26 = vpop.eup %5216  ;;  %3153 = vperm.xlu1 %5039, %v7651_v61  }
 0x596   : > { %v5219_v54 = vpop.eup %5218  ;;  %3178 = vperm.xlu0 %5038, %v7655_v39   ;;  %v7679_v39 = vld [vmem:[#allocation2 + $0x1f8] sm:$0xff] }
 0x597   : > { %3601 = vmatprep.mubr.f32.mxu1 %v5219_v54  ;;  %v2611_v37 = vpop.xlane.xlu0 %2610  ;;  %v7660_v50 = vadd.f32 %v5219_v54, %v5217_v26  ;;  %v7662_v58 = vpop.eup %5220  ;;  %v3332_v54 = vmul.f32 %v7551_v41, %v2948_v30  ;;  %9160 = vst [vmem:[#allocation39_spill] sm:$0xff] %v7679_v39  ;;  %v1724_v41 = vmul.f32 1.442695, %v1621_v22  ;;  %v9161_v30 = vld [vmem:[#allocation44_spill] sm:$0xff] }
 0x598   : > { %3602 = vmatmul.mubr.f32.gmra.mxu1 %v5217_v26  ;;  %v2799_v63 = vadd.f32 %v2611_v37, %v2543_v20  ;;  %v7667_v29 = vpop.eup %5222 }
 0x599   : > { %3606 = vmatprep.mubr.f32.mxu1 %v7662_v58  ;;  %1966 = vperm.xlu1 %5039, %v6940_v43   ;;  %v7669_v59 = vpop.eup %5224  ;;  %5226 = vpow2.f32 %v1724_v41 }
 0x59a   : > { %2864 = vst.msk [vmem:[#allocation3 + $0x8] sm:$0xff] %vm2862_vm3, %v2799_v63  ;;  %9159 = vst [vmem:[#allocation38_spill] sm:$0xff] %v7669_v59  ;;  %v7675_v63 = vpop.permute.xlu1 %3103 }
 0x59c   : > { %3607 = vmatmul.mubr.f32.gmra.mxu1 %v7667_v29 }
 0x59d   : > { %3163 = vperm.xlu1 %5039, %v7669_v59  }
 0x5ad   : > { %v3573_v24 = vpop.f32.mrf.mxu1 }
 0x5ae   : > { %v3812_v10 = vadd.f32 %v3573_v24, %v3331_v16  ;;  %v2153_v24 = vsub.f32 %v9161_v30, %v7611_v46 }
 0x5af   : > { %v3575_v26 = vpop.f32.mrf.mxu1 }
 0x5b0   : > { %3876 = vst.msk [vmem:[#allocation4 + $0xa0] sm:$0xff] %vm524_vm2, %v3812_v10  ;;  %v9162_v26 = vld [vmem:[#allocation41_spill] sm:$0xff]  ;;  %v2340_v59 = vmul.f32 1.442695, %v2153_v24 }
 0x5b1   : > { %v3578_v3 = vpop.f32.mrf.mxu1 }
 0x5b2   : > { %v3813_v20 = vadd.f32 %v3578_v3, %v3332_v54 }
 0x5b3   : > { %v3580_v37 = vpop.f32.mrf.mxu1 }
 0x5b4   : > { %3877 = vst.msk [vmem:[#allocation4 + $0xa8] sm:$0xff] %vm524_vm2, %v3813_v20  ;;  %v9164_v20 = vld [vmem:[#allocation43_spill] sm:$0xff] }
 0x5b5   : > { %2625 = vadd.xlane.f32.xlu0 %v7081_v31  ;;  %v9163_v31 = vld [vmem:[#allocation42_spill] sm:$0xff]  ;;  %v2152_v37 = vsub.f32 %v9164_v20, %v7611_v46 }
 0x5b7   : > { %v2338_v22 = vmul.f32 1.442695, %v2152_v37 }
 0x5b8   : > { %v1517_v14 = vpop.xlane.xlu1 %1516 }
 0x5b9   : > { %v7684_v16 = vmax.f32 %v7679_v39, %v1517_v14  ;;  %v1618_v14 = vsub.f32 %v6918_v1, %v6922_v18  ;;  %v9168_v1 = vld [vmem:[#allocation47_spill] sm:$0xff] }
 0x5ba   : > { %v2156_v18 = vsub.f32 %v9168_v1, %v7616_v45 }
 0x5bb   : > { %3983 = vst.msk [vmem:[#allocation2 + $0x1f8] sm:$0xff] %vm2862_vm3, %v7684_v16  ;;  %v1718_v30 = vmul.f32 1.442695, %v1618_v14 }
 0x5bc   : > { %v1917_v10 = vpop.permute.xlu1 %1916 }
 0x5bd   : > { %v2150_v54 = vsub.f32 %v9162_v26, %v1917_v10  ;;  %v2151_v3 = vsub.f32 %v9163_v31, %v1917_v10  ;;  %v9165_v10 = vld [vmem:[#allocation48_spill] sm:$0xff] }
 0x5be   : > { %v2157_v26 = vsub.f32 %v9165_v10, %v7616_v45 }
 0x5bf   : > { %v2334_v56 = vmul.f32 1.442695, %v2150_v54  ;;  %v2336_v57 = vmul.f32 1.442695, %v2151_v3  ;;  %v9166_v54 = vld [vmem:[#allocation45_spill] sm:$0xff]  ;;  %v9167_v3 = vld [vmem:[#allocation46_spill] sm:$0xff] }
 0x5c0   : > { %v7696_v61 = vpop.permute.xlu1 %3113 }
 0x5c1   : > { %5228 = vpow2.f32 %v2334_v56  ;;  %2616 = vadd.xlane.f32.xlu1 %v6964_v19  ;;  %v2348_v19 = vmul.f32 1.442695, %v2157_v26  ;;  %v7705_v56 = vpop.permute.xlu0 %3158 }
 0x5c2   : > { %5230 = vpow2.f32 %v2336_v57  ;;  %v2346_v57 = vmul.f32 1.442695, %v2156_v18  ;;  %v9173_v18 = vld [vmem:[#allocation51_spill] sm:$0xff] }
 0x5c3   : > { %5232 = vpow2.f32 %v2340_v59  ;;  %v2480_v59 = vld [vmem:[#allocation3 + $0x10] sm:$0xff] }
 0x5c4   : > { %v1927_v46 = vpop.permute.xlu1 %1926  ;;  %5234 = vpow2.f32 %v2338_v22  ;;  %v2544_v14 = vmul.f32 %v6934_v40, %v2480_v59  ;;  %v9169_v22 = vld [vmem:[#allocation52_spill] sm:$0xff] }
 0x5c5   : > { %v2154_v31 = vsub.f32 %v9166_v54, %v1927_v46  ;;  %v2155_v20 = vsub.f32 %v9167_v3, %v1927_v46  ;;  %5236 = vpow2.f32 %v1718_v30  ;;  %v2161_v45 = vsub.f32 %v9169_v22, %v7622_v28  ;;  %v7713_v30 = vpop.eup %5226  ;;  %v9171_v54 = vld [vmem:[#allocation49_spill] sm:$0xff]  ;;  %v9172_v3 = vld [vmem:[#allocation50_spill] sm:$0xff] }
 0x5c6   : > { %9170 = vst [vmem:[#allocation106_spill] sm:$0xff] %v7713_v30 }
 0x5c7   : > { %v2342_v41 = vmul.f32 1.442695, %v2154_v31  ;;  %v2344_v24 = vmul.f32 1.442695, %v2155_v20  ;;  %v2356_v59 = vmul.f32 1.442695, %v2161_v45 }
 0x5c8   : > { %v7707_v37 = vpop.permute.xlu1 %3123 }
 0x5c9   : > { %5238 = vpow2.f32 %v2342_v41 }
 0x5ca   : > { %5240 = vpow2.f32 %v2344_v24  ;;  %v2160_v24 = vsub.f32 %v9173_v18, %v7622_v28 }
 0x5cb   : > { %1991 = vperm.xlu0 %5038, %v7121_v51   ;;  %5242 = vpow2.f32 %v2348_v19 }
 0x5cc   : > { %v2614_v10 = vpop.xlane.xlu0 %2613  ;;  %v1937_v46 = vpop.permute.xlu1 %1936  ;;  %5244 = vpow2.f32 %v2346_v57  ;;  %v2354_v28 = vmul.f32 1.442695, %v2160_v24 }
 0x5cd   : > { %v2800_v26 = vadd.f32 %v2614_v10, %v2544_v14  ;;  %v2158_v31 = vsub.f32 %v9171_v54, %v1937_v46  ;;  %v2159_v20 = vsub.f32 %v9172_v3, %v1937_v46 }
 0x5ce   : > { %v5229_v1 = vpop.eup %5228 }
 0x5cf   : > { %v5231_v41 = vpop.eup %5230  ;;  %2865 = vst.msk [vmem:[#allocation3 + $0x10] sm:$0xff] %vm2862_vm3, %v2800_v26  ;;  %v2350_v40 = vmul.f32 1.442695, %v2158_v31  ;;  %v2352_v19 = vmul.f32 1.442695, %v2159_v20  ;;  %3188 = vperm.xlu0 %5038, %v7713_v30   ;;  %v9176_v26 = vld [vmem:[#allocation53_spill] sm:$0xff] }
 0x5d0   : > { %3611 = vmatprep.mubr.f32.mxu1 %v5231_v41  ;;  %v7721_v22 = vpop.permute.xlu1 %3133  ;;  %v7723_v14 = vadd.f32 %v5231_v41, %v5229_v1  ;;  %v7725_v10 = vpop.eup %5232  ;;  %v9177_v31 = vld [vmem:[#allocation54_spill] sm:$0xff] }
 0x5d1   : > { %5246 = vpow2.f32 %v2350_v40  ;;  %3612 = vmatmul.mubr.f32.gmra.mxu1 %v5229_v1  ;;  %v7729_v57 = vpop.eup %5234  ;;  %v9178_v1 = vld [vmem:[#allocation56_spill] sm:$0xff]  ;;  %v9179_v40 = vld [vmem:[#allocation55_spill] sm:$0xff] }
 0x5d2   : > { %5248 = vpow2.f32 %v2352_v19  ;;  %3616 = vmatprep.mubr.f32.mxu1 %v7725_v10  ;;  %1976 = vperm.xlu1 %5039, %v6984_v4   ;;  %9174 = vst [vmem:[#allocation107_spill] sm:$0xff] %v7729_v57  ;;  %v7731_v45 = vpop.eup %5236  ;;  %v2165_v41 = vsub.f32 %v9178_v1, %v7646_v44  ;;  %v2164_v19 = vsub.f32 %v9179_v40, %v7646_v44  ;;  %v9182_v44 = vld [vmem:[#allocation57_spill] sm:$0xff]  ;;  %v9183_v1 = vld [vmem:[#allocation58_spill] sm:$0xff] }
 0x5d3   : > { %5250 = vpow2.f32 %v2356_v59  ;;  %9175 = vst [vmem:[#allocation44_spill] sm:$0xff] %v7731_v45 }
 0x5d4   : > { %v1947_v46 = vpop.permute.xlu1 %1946  ;;  %5252 = vpow2.f32 %v2354_v28  ;;  %v2362_v28 = vmul.f32 1.442695, %v2164_v19 }
 0x5d5   : > { %3617 = vmatmul.mubr.f32.gmra.mxu1 %v7729_v57  ;;  %v2162_v54 = vsub.f32 %v9176_v26, %v1947_v46  ;;  %v2163_v3 = vsub.f32 %v9177_v31, %v1947_v46  ;;  %v2364_v46 = vmul.f32 1.442695, %v2165_v41 }
 0x5d6   : > { %v5239_v20 = vpop.eup %5238  ;;  %3173 = vperm.xlu1 %5039, %v7731_v45   ;;  %v9184_v45 = vld [vmem:[#allocation60_spill] sm:$0xff] }
 0x5d7   : > { %v5241_v18 = vpop.eup %5240  ;;  %v2358_v24 = vmul.f32 1.442695, %v2162_v54  ;;  %v2360_v59 = vmul.f32 1.442695, %v2163_v3 }
 0x5d8   : > { %3621 = vmatprep.mubr.f32.mxu1 %v5241_v18  ;;  %v7741_v30 = vpop.permute.xlu1 %3143  ;;  %v7743_v39 = vadd.f32 %v5241_v18, %v5239_v20  ;;  %v7745_v26 = vpop.eup %5242 }
 0x5d9   : > { %9180 = vst [vmem:[#allocation41_spill] sm:$0xff] %v7745_v26  ;;  %3622 = vmatmul.mubr.f32.gmra.mxu1 %v5239_v20  ;;  %5254 = vpow2.f32 %v2358_v24  ;;  %v7748_v31 = vpop.eup %5244  ;;  %v2169_v20 = vsub.f32 %v9184_v45, %v7653_v36 }
 0x5da   : > { %3626 = vmatprep.mubr.f32.mxu1 %v7745_v26  ;;  %9181 = vst [vmem:[#allocation42_spill] sm:$0xff] %v7748_v31  ;;  %5256 = vpow2.f32 %v2360_v59  ;;  %v9185_v59 = vld [vmem:[#allocation59_spill] sm:$0xff] }
 0x5db   : > { %5258 = vpow2.f32 %v2364_v46 }
 0x5dc   : > { %v1957_v54 = vpop.permute.xlu1 %1956  ;;  %5260 = vpow2.f32 %v2362_v28 }
 0x5dd   : > { %3627 = vmatmul.mubr.f32.gmra.mxu1 %v7748_v31  ;;  %v2166_v3 = vsub.f32 %v9182_v44, %v1957_v54  ;;  %v2167_v40 = vsub.f32 %v9183_v1, %v1957_v54  ;;  %v2168_v31 = vsub.f32 %v9185_v59, %v7653_v36  ;;  %v2372_v54 = vmul.f32 1.442695, %v2169_v20  ;;  %v2949_v44 = vld [vmem:[#allocation4 + $0xb0] sm:$0xff] }
 0x5de   : > { %v5247_v18 = vpop.eup %5246  ;;  %v3333_v28 = vmul.f32 %v7675_v63, %v2949_v44 }
 0x5df   : > { %v5249_v41 = vpop.eup %5248  ;;  %v2366_v57 = vmul.f32 1.442695, %v2166_v3  ;;  %v2368_v26 = vmul.f32 1.442695, %v2167_v40  ;;  %v2370_v46 = vmul.f32 1.442695, %v2168_v31 }
 0x5e0   : > { %3631 = vmatprep.mubr.f32.mxu1 %v5249_v41  ;;  %v7755_v24 = vadd.f32 %v5249_v41, %v5247_v18  ;;  %v7757_v19 = vpop.eup %5250  ;;  %v2950_v3 = vld [vmem:[#allocation4 + $0xb8] sm:$0xff] }
 0x5e1   : > { %5262 = vpow2.f32 %v2366_v57  ;;  %3632 = vmatmul.mubr.f32.gmra.mxu1 %v5247_v18  ;;  %v7762_v45 = vpop.eup %5252  ;;  %v3334_v18 = vmul.f32 %v7600_v6, %v2950_v3 }
 0x5e2   : > { %5264 = vpow2.f32 %v2368_v26  ;;  %3636 = vmatprep.mubr.f32.mxu1 %v7757_v19  ;;  %9186 = vst [vmem:[#allocation43_spill] sm:$0xff] %v7762_v45 }
 0x5e3   : > { %5266 = vpow2.f32 %v2372_v54 }
 0x5e4   : > { %5268 = vpow2.f32 %v2370_v46 }
 0x5e5   : > { %3637 = vmatmul.mubr.f32.gmra.mxu1 %v7762_v45 }
 0x5e6   : > { %v3583_v1 = vpop.f32.mrf.mxu1  ;;  %v5255_v41 = vpop.eup %5254 }
 0x5e7   : > { %v3814_v40 = vadd.f32 %v3583_v1, %v3333_v28  ;;  %v5257_v57 = vpop.eup %5256  ;;  %v1620_v1 = vsub.f32 %v6929_v7, %v6940_v43  ;;  %v9191_v7 = vld [vmem:[#allocation72_spill] sm:$0xff] }
 0x5e8   : > { %v3585_v36 = vpop.f32.mrf.mxu1  ;;  %3641 = vmatprep.mubr.f32.mxu1 %v5257_v57  ;;  %v7768_v20 = vadd.f32 %v5257_v57, %v5255_v41  ;;  %v7770_v31 = vpop.eup %5258 }
 0x5e9   : > { %3878 = vst.msk [vmem:[#allocation4 + $0xb0] sm:$0xff] %vm524_vm2, %v3814_v40  ;;  %9187 = vst [vmem:[#allocation48_spill] sm:$0xff] %v7770_v31  ;;  %3642 = vmatmul.mubr.f32.gmra.mxu1 %v5255_v41  ;;  %v7773_v54 = vpop.eup %5260  ;;  %v1722_v40 = vmul.f32 1.442695, %v1620_v1  ;;  %v2482_v36 = vld [vmem:[#allocation3 + $0x20] sm:$0xff] }
 0x5ea   : > { %v3588_v26 = vpop.f32.mrf.mxu1  ;;  %3646 = vmatprep.mubr.f32.mxu1 %v7770_v31  ;;  %9188 = vst [vmem:[#allocation45_spill] sm:$0xff] %v7773_v54  ;;  %v2546_v57 = vmul.f32 %v7006_v25, %v2482_v36  ;;  %v9193_v25 = vld [vmem:[#allocation78_spill] sm:$0xff]  ;;  %v9194_v36 = vld [vmem:[#allocation61_spill] sm:$0xff] }
 0x5eb   : > { %v3815_v63 = vadd.f32 %v3588_v26, %v3334_v18  ;;  %5270 = vpow2.f32 %v1722_v40 }
 0x5ec   : > { %v3590_v59 = vpop.f32.mrf.mxu1 }
 0x5ed   : > { %3879 = vst.msk [vmem:[#allocation4 + $0xb8] sm:$0xff] %vm524_vm2, %v3815_v63  ;;  %3647 = vmatmul.mubr.f32.gmra.mxu1 %v7773_v54  ;;  %v2478_v63 = vld [vmem:[#allocation3] sm:$0xff] }
 0x5ee   : > { %v5263_v44 = vpop.eup %5262  ;;  %2631 = vadd.xlane.f32.xlu0 %v7139_v9  ;;  %v1972_v9 = vpop.permute.xlu0 %1971  ;;  %v2542_v43 = vmul.f32 %v9191_v7, %v2478_v63 }
 0x5ef   : > { %v5265_v6 = vpop.eup %5264  ;;  %v2173_v1 = vsub.f32 %v9193_v25, %v1972_v9 }
 0x5f0   : > { %3651 = vmatprep.mubr.f32.mxu1 %v5265_v6  ;;  %v7778_v46 = vadd.f32 %v5265_v6, %v5263_v44  ;;  %v7780_v28 = vpop.eup %5266 }
 0x5f1   : > { %9189 = vst [vmem:[#allocation46_spill] sm:$0xff] %v7780_v28  ;;  %3652 = vmatmul.mubr.f32.gmra.mxu1 %v5263_v44  ;;  %v7783_v3 = vpop.eup %5268  ;;  %v2380_v54 = vmul.f32 1.442695, %v2173_v1 }
 0x5f2   : > { %3656 = vmatprep.mubr.f32.mxu1 %v7780_v28  ;;  %9190 = vst [vmem:[#allocation47_spill] sm:$0xff] %v7783_v3  ;;  %v7789_v41 = vpop.permute.xlu0 %3168 }
 0x5f5   : > { %3657 = vmatmul.mubr.f32.gmra.mxu1 %v7783_v3  ;;  %v9196_v3 = vld [vmem:[#allocation75_spill] sm:$0xff] }
 0x5f6   : > { %v2172_v28 = vsub.f32 %v9196_v3, %v1972_v9 }
 0x5f8   : > { %v7796_v59 = vpop.eup %5270 }
 0x5f9   : > { %9192 = vst [vmem:[#allocation52_spill] sm:$0xff] %v7796_v59 }
 0x5fa   : > { %2622 = vadd.xlane.f32.xlu1 %v7025_v47 }
 0x604   : > { %2001 = vperm.xlu0 %5038, %v7177_v55  }
 0x605   : > { %v2620_v18 = vpop.xlane.xlu0 %2619 }
 0x606   : > { %v2802_v26 = vadd.f32 %v2620_v18, %v2546_v57  ;;  %v9195_v18 = vld [vmem:[#allocation63_spill] sm:$0xff] }
 0x608   : > { %2867 = vst.msk [vmem:[#allocation3 + $0x20] sm:$0xff] %vm2862_vm3, %v2802_v26 }
 0x60b   : > { %1986 = vperm.xlu1 %5039, %v6999_v48  }
 0x60d   : > { %v2608_v47 = vpop.xlane.xlu1 %2607 }
 0x60e   : > { %v2798_v44 = vadd.f32 %v2608_v47, %v2542_v43  ;;  %v2951_v43 = vld [vmem:[#allocation4 + $0xc0] sm:$0xff]  ;;  %v2378_v47 = vmul.f32 1.442695, %v2172_v28 }
 0x60f   : > { %3183 = vperm.xlu1 %5039, %v7796_v59   ;;  %v2952_v59 = vld [vmem:[#allocation4 + $0xc8] sm:$0xff] }
 0x610   : > { %2863 = vst.msk [vmem:[#allocation3] sm:$0xff] %vm2862_vm3, %v2798_v44  ;;  %v3335_v44 = vmul.f32 %v7696_v61, %v2951_v43 }
 0x611   : > { %v7800_v6 = vpop.permute.xlu1 %3153 }
 0x615   : > { %v1967_v40 = vpop.permute.xlu1 %1966 }
 0x616   : > { %v2170_v57 = vsub.f32 %v9194_v36, %v1967_v40  ;;  %v2171_v26 = vsub.f32 %v9195_v18, %v1967_v40  ;;  %v3336_v36 = vmul.f32 %v7614_v23, %v2952_v59 }
 0x618   : > { %v2374_v63 = vmul.f32 1.442695, %v2170_v57  ;;  %v2376_v7 = vmul.f32 1.442695, %v2171_v26 }
 0x619   : > { %v7826_v26 = vpop.permute.xlu1 %3163 }
 0x61a   : > { %5272 = vpow2.f32 %v2374_v63  ;;  %v2481_v63 = vld [vmem:[#allocation3 + $0x18] sm:$0xff] }
 0x61b   : > { %5274 = vpow2.f32 %v2376_v7  ;;  %v9199_v7 = vld [vmem:[#allocation105_spill] sm:$0xff] }
 0x61c   : > { %5276 = vpow2.f32 %v2380_v54  ;;  %v2545_v43 = vmul.f32 %v9199_v7, %v2481_v63 }
 0x61d   : > { %5278 = vpow2.f32 %v2378_v47 }
 0x61f   : > { %v3593_v31 = vpop.f32.mrf.mxu1 }
 0x620   : > { %v3816_v25 = vadd.f32 %v3593_v31, %v3335_v44  ;;  %v2484_v31 = vld [vmem:[#allocation3 + $0x30] sm:$0xff]  ;;  %v9200_v44 = vld [vmem:[#allocation90_spill] sm:$0xff] }
 0x621   : > { %v3595_v45 = vpop.f32.mrf.mxu1  ;;  %v2548_v59 = vmul.f32 %v7057_v13, %v2484_v31 }
 0x622   : > { %3880 = vst.msk [vmem:[#allocation4 + $0xc0] sm:$0xff] %vm524_vm2, %v3816_v25 }
 0x623   : > { %v3598_v3 = vpop.f32.mrf.mxu1  ;;  %2637 = vadd.xlane.f32.xlu0 %v7195_v5  ;;  %v1982_v5 = vpop.permute.xlu0 %1981 }
 0x624   : > { %v3817_v9 = vadd.f32 %v3598_v3, %v3336_v36  ;;  %v2177_v25 = vsub.f32 %v9200_v44, %v1982_v5  ;;  %v9201_v3 = vld [vmem:[#allocation81_spill] sm:$0xff] }
 0x625   : > { %v3600_v1 = vpop.f32.mrf.mxu1 }
 0x626   : > { %3881 = vst.msk [vmem:[#allocation4 + $0xc8] sm:$0xff] %vm524_vm2, %v3817_v9  ;;  %v9202_v9 = vld [vmem:[#allocation84_spill] sm:$0xff] }
 0x627   : > { %v5273_v28 = vpop.eup %5272  ;;  %v7821_v45 = vpop.permute.xlu0 %3178 }
 0x628   : > { %v5275_v54 = vpop.eup %5274 }
 0x629   : > { %3661 = vmatprep.mubr.f32.mxu1 %v5275_v54  ;;  %v7811_v61 = vadd.f32 %v5275_v54, %v5273_v28  ;;  %v7813_v40 = vpop.eup %5276 }
 0x62a   : > { %9197 = vst [vmem:[#allocation49_spill] sm:$0xff] %v7813_v40  ;;  %3662 = vmatmul.mubr.f32.gmra.mxu1 %v5273_v28  ;;  %v7816_v23 = vpop.eup %5278  ;;  %v9203_v28 = vld [vmem:[#allocation87_spill] sm:$0xff] }
 0x62b   : > { %3666 = vmatprep.mubr.f32.mxu1 %v7813_v40  ;;  %9198 = vst [vmem:[#allocation50_spill] sm:$0xff] %v7816_v23  ;;  %v2176_v54 = vsub.f32 %v9203_v28, %v1982_v5 }
 0x62d   : > { %v2386_v63 = vmul.f32 1.442695, %v2176_v54 }
 0x62e   : > { %3667 = vmatmul.mubr.f32.gmra.mxu1 %v7816_v23 }
 0x633   : > { %2628 = vadd.xlane.f32.xlu1 %v7085_v49 }
 0x639   : > { %2011 = vperm.xlu0 %5038, %v7235_v11  }
 0x63e   : > { %v2626_v57 = vpop.xlane.xlu0 %2625 }
 0x63f   : > { %v2804_v18 = vadd.f32 %v2626_v57, %v2548_v59  ;;  %v2388_v57 = vmul.f32 1.442695, %v2177_v25 }
 0x641   : > { %2869 = vst.msk [vmem:[#allocation3 + $0x30] sm:$0xff] %vm2862_vm3, %v2804_v18  ;;  %v2953_v18 = vld [vmem:[#allocation4 + $0xd0] sm:$0xff] }
 0x642   : > { %v3337_v7 = vmul.f32 %v7707_v37, %v2953_v18 }
 0x644   : > { %1996 = vperm.xlu1 %5039, %v7045_v53  }
 0x646   : > { %v1992_v28 = vpop.permute.xlu0 %1991 }
 0x64a   : > { %v2617_v49 = vpop.xlane.xlu1 %2616  ;;  %v7850_v54 = vpop.permute.xlu0 %3188 }
 0x64b   : > { %v2801_v47 = vadd.f32 %v2617_v49, %v2545_v43  ;;  %v2954_v43 = vld [vmem:[#allocation4 + $0xd8] sm:$0xff] }
 0x64d   : > { %2866 = vst.msk [vmem:[#allocation3 + $0x18] sm:$0xff] %vm2862_vm3, %v2801_v47 }
 0x64e   : > { %v1977_v36 = vpop.permute.xlu1 %1976 }
 0x64f   : > { %v2174_v13 = vsub.f32 %v9201_v3, %v1977_v36  ;;  %v2175_v1 = vsub.f32 %v9202_v9, %v1977_v36  ;;  %v3338_v36 = vmul.f32 %v7618_v42, %v2954_v43  ;;  %v2633_v42 = vadd.f32 %v7146_v35, %v7141_v62  ;;  %v2483_v62 = vld [vmem:[#allocation3 + $0x28] sm:$0xff]  ;;  %v9207_v35 = vld [vmem:[#allocation115_spill] sm:$0xff] }
 0x650   : > { %v2547_v43 = vmul.f32 %v9207_v35, %v2483_v62  ;;  %v9212_v62 = vld [vmem:[#allocation15_spill] sm:$0xff] }
 0x651   : > { %v2382_v31 = vmul.f32 1.442695, %v2174_v13  ;;  %v2384_v59 = vmul.f32 1.442695, %v2175_v1 }
 0x653   : > { %5280 = vpow2.f32 %v2382_v31  ;;  %v2486_v31 = vld [vmem:[#allocation3 + $0x40] sm:$0xff] }
 0x654   : > { %5282 = vpow2.f32 %v2384_v59  ;;  %v2550_v59 = vmul.f32 %v7115_v38, %v2486_v31 }
 0x655   : > { %5284 = vpow2.f32 %v2388_v57 }
 0x656   : > { %5286 = vpow2.f32 %v2386_v63  ;;  %v9206_v63 = vld [vmem:[#allocation135_spill] sm:$0xff] }
 0x658   : > { %v3603_v49 = vpop.f32.mrf.mxu1  ;;  %2643 = vadd.xlane.f32.xlu0 %v7253_v17 }
 0x659   : > { %v3818_v47 = vadd.f32 %v3603_v49, %v3337_v7  ;;  %v7855_v7 = vpop.permute.xlu1 %3173 }
 0x65a   : > { %v3605_v44 = vpop.f32.mrf.mxu1 }
 0x65b   : > { %3882 = vst.msk [vmem:[#allocation4 + $0xd0] sm:$0xff] %vm524_vm2, %v3818_v47  ;;  %v9208_v44 = vld [vmem:[#allocation112_spill] sm:$0xff] }
 0x65c   : > { %v3608_v5 = vpop.f32.mrf.mxu1 }
 0x65d   : > { %v3819_v25 = vadd.f32 %v3608_v5, %v3338_v36  ;;  %v2181_v36 = vsub.f32 %v9208_v44, %v1992_v28 }
 0x65e   : > { %v3610_v3 = vpop.f32.mrf.mxu1 }
 0x65f   : > { %3883 = vst.msk [vmem:[#allocation4 + $0xd8] sm:$0xff] %vm524_vm2, %v3819_v25  ;;  %v9209_v25 = vld [vmem:[#allocation92_spill] sm:$0xff]  ;;  %v9210_v3 = vld [vmem:[#allocation95_spill] sm:$0xff] }
 0x660   : > { %v5281_v13 = vpop.eup %5280 }
 0x661   : > { %v5283_v9 = vpop.eup %5282 }
 0x662   : > { %3671 = vmatprep.mubr.f32.mxu1 %v5283_v9  ;;  %v7839_v37 = vadd.f32 %v5283_v9, %v5281_v13  ;;  %v7841_v1 = vpop.eup %5284  ;;  %v9211_v9 = vld [vmem:[#allocation111_spill] sm:$0xff] }
 0x663   : > { %9204 = vst [vmem:[#allocation51_spill] sm:$0xff] %v7841_v1  ;;  %3672 = vmatmul.mubr.f32.gmra.mxu1 %v5281_v13  ;;  %v7844_v17 = vpop.eup %5286 }
 0x664   : > { %3676 = vmatprep.mubr.f32.mxu1 %v7841_v1  ;;  %9205 = vst [vmem:[#allocation53_spill] sm:$0xff] %v7844_v17  ;;  %v9280_v1 = vld [vmem:[#allocation5_spill] sm:$0xff] }
 0x667   : > { %3677 = vmatmul.mubr.f32.gmra.mxu1 %v7844_v17 }
 0x668   : > { %2634 = vadd.xlane.f32.xlu1 %v2633_v42  ;;  %v2180_v42 = vsub.f32 %v9211_v9, %v1992_v28  ;;  %v2957_v28 = vld [vmem:[#allocation4 + $0xf0] sm:$0xff] }
 0x66a   : > { %v2394_v35 = vmul.f32 1.442695, %v2180_v42  ;;  %v2958_v42 = vld [vmem:[#allocation4 + $0xf8] sm:$0xff] }
 0x66e   : > { %2021 = vperm.xlu0 %5038, %v7290_v12  }
 0x677   : > { %v2632_v57 = vpop.xlane.xlu0 %2631 }
 0x678   : > { %v2806_v18 = vadd.f32 %v2632_v57, %v2550_v59  ;;  %v2396_v57 = vmul.f32 1.442695, %v2181_v36 }
 0x679   : > { %2006 = vperm.xlu1 %5039, %v9206_v63  }
 0x67a   : > { %2871 = vst.msk [vmem:[#allocation3 + $0x40] sm:$0xff] %vm2862_vm3, %v2806_v18  ;;  %v2955_v18 = vld [vmem:[#allocation4 + $0xe0] sm:$0xff] }
 0x683   : > { %v2623_v49 = vpop.xlane.xlu1 %2622 }
 0x684   : > { %v2803_v47 = vadd.f32 %v2623_v49, %v2547_v43  ;;  %v3339_v43 = vmul.f32 %v7721_v22, %v2955_v18  ;;  %v2956_v49 = vld [vmem:[#allocation4 + $0xe8] sm:$0xff]  ;;  %v9213_v18 = vld [vmem:[#allocation7_spill] sm:$0xff] }
 0x686   : > { %2868 = vst.msk [vmem:[#allocation3 + $0x28] sm:$0xff] %vm2862_vm3, %v2803_v47 }
 0x687   : > { %v1987_v5 = vpop.permute.xlu1 %1986 }
 0x688   : > { %v2178_v38 = vsub.f32 %v9209_v25, %v1987_v5  ;;  %v2179_v13 = vsub.f32 %v9210_v3, %v1987_v5  ;;  %v3340_v5 = vmul.f32 %v7635_v21, %v2956_v49  ;;  %v3342_v49 = vmul.f32 %v7648_v0, %v2958_v42 }
 0x68a   : > { %v2390_v31 = vmul.f32 1.442695, %v2178_v38  ;;  %v2392_v59 = vmul.f32 1.442695, %v2179_v13  ;;  %v3341_v13 = vmul.f32 %v7741_v30, %v2957_v28  ;;  %v2959_v30 = vld [vmem:[#allocation4 + $0x100] sm:$0xff] }
 0x68b   : > { %v3343_v28 = vmul.f32 %v7800_v6, %v2959_v30  ;;  %v2488_v6 = vld [vmem:[#allocation3 + $0x50] sm:$0xff] }
 0x68c   : > { %5288 = vpow2.f32 %v2390_v31 }
 0x68d   : > { %5290 = vpow2.f32 %v2392_v59  ;;  %2649 = vadd.xlane.f32.xlu0 %v9212_v62  ;;  %v9214_v62 = vld [vmem:[#allocation65_spill] sm:$0xff] }
 0x68e   : > { %5292 = vpow2.f32 %v2396_v57  ;;  %v2639_v21 = vadd.f32 %v9214_v62, %v9213_v18  ;;  %v2962_v62 = vld [vmem:[#allocation4 + $0x118] sm:$0xff] }
 0x68f   : > { %5294 = vpow2.f32 %v2394_v35 }
 0x691   : > { %v3613_v47 = vpop.f32.mrf.mxu1 }
 0x692   : > { %v3820_v44 = vadd.f32 %v3613_v47, %v3339_v43 }
 0x693   : > { %v3615_v25 = vpop.f32.mrf.mxu1 }
 0x694   : > { %3884 = vst.msk [vmem:[#allocation4 + $0xe0] sm:$0xff] %vm524_vm2, %v3820_v44 }
 0x695   : > { %v3618_v36 = vpop.f32.mrf.mxu1 }
 0x696   : > { %v3821_v38 = vadd.f32 %v3618_v36, %v3340_v5  ;;  %v2960_v36 = vld [vmem:[#allocation4 + $0x108] sm:$0xff] }
 0x697   : > { %v3620_v3 = vpop.f32.mrf.mxu1 }
 0x698   : > { %3885 = vst.msk [vmem:[#allocation4 + $0xe8] sm:$0xff] %vm524_vm2, %v3821_v38 }
 0x699   : > { %v5289_v9 = vpop.eup %5288  ;;  %v3623_v22 = vpop.f32.mrf.mxu1 }
 0x69a   : > { %v5291_v31 = vpop.eup %5290  ;;  %v3822_v59 = vadd.f32 %v3623_v22, %v3341_v13  ;;  %v9217_v13 = vld [vmem:[#allocation157_spill] sm:$0xff] }
 0x69b   : > { %v3625_v57 = vpop.f32.mrf.mxu1  ;;  %3681 = vmatprep.mubr.f32.mxu1 %v5291_v31  ;;  %v7871_v35 = vadd.f32 %v5291_v31, %v5289_v9  ;;  %v7873_v43 = vpop.eup %5292  ;;  %v2961_v31 = vld [vmem:[#allocation4 + $0x110] sm:$0xff] }
 0x69c   : > { %9215 = vst [vmem:[#allocation54_spill] sm:$0xff] %v7873_v43  ;;  %3886 = vst.msk [vmem:[#allocation4 + $0xf0] sm:$0xff] %vm524_vm2, %v3822_v59  ;;  %3682 = vmatmul.mubr.f32.gmra.mxu1 %v5289_v9  ;;  %v7878_v25 = vpop.eup %5294  ;;  %v3344_v9 = vmul.f32 %v7705_v56, %v2960_v36  ;;  %v2002_v57 = vpop.permute.xlu0 %2001  ;;  %v3345_v18 = vmul.f32 %v7826_v26, %v2961_v31  ;;  %v9219_v36 = vld [vmem:[#allocation143_spill] sm:$0xff] }
 0x69d   : > { %v3628_v47 = vpop.f32.mrf.mxu1  ;;  %3686 = vmatprep.mubr.f32.mxu1 %v7873_v43  ;;  %2640 = vadd.xlane.f32.xlu1 %v2639_v21  ;;  %9216 = vst [vmem:[#allocation56_spill] sm:$0xff] %v7878_v25 }
 0x69e   : > { %v3823_v44 = vadd.f32 %v3628_v47, %v3342_v49  ;;  %v9218_v49 = vld [vmem:[#allocation145_spill] sm:$0xff] }
 0x69f   : > { %v3630_v5 = vpop.f32.mrf.mxu1  ;;  %v2552_v30 = vmul.f32 %v9218_v49, %v2488_v6 }
 0x6a0   : > { %3887 = vst.msk [vmem:[#allocation4 + $0xf8] sm:$0xff] %vm524_vm2, %v3823_v44  ;;  %3687 = vmatmul.mubr.f32.gmra.mxu1 %v7878_v25 }
 0x6a1   : > { %v3633_v0 = vpop.f32.mrf.mxu1 }
 0x6a2   : > { %v3824_v38 = vadd.f32 %v3633_v0, %v3343_v28  ;;  %v3346_v28 = vmul.f32 %v7789_v41, %v2962_v62  ;;  %v2963_v0 = vld [vmem:[#allocation4 + $0x120] sm:$0xff] }
 0x6a3   : > { %v3635_v3 = vpop.f32.mrf.mxu1  ;;  %2031 = vperm.xlu0 %5038, %v9217_v13  }
 0x6a4   : > { %3888 = vst.msk [vmem:[#allocation4 + $0x100] sm:$0xff] %vm524_vm2, %v3824_v38 }
 0x6a5   : > { %v3638_v42 = vpop.f32.mrf.mxu1 }
 0x6a6   : > { %v3825_v22 = vadd.f32 %v3638_v42, %v3344_v9  ;;  %v3347_v9 = vmul.f32 %v7855_v7, %v2963_v0  ;;  %v2964_v42 = vld [vmem:[#allocation4 + $0x128] sm:$0xff]  ;;  %v9222_v0 = vld [vmem:[#allocation113_spill] sm:$0xff] }
 0x6a7   : > { %v3640_v59 = vpop.f32.mrf.mxu1  ;;  %v3348_v41 = vmul.f32 %v7821_v45, %v2964_v42 }
 0x6a8   : > { %3889 = vst.msk [vmem:[#allocation4 + $0x108] sm:$0xff] %vm524_vm2, %v3825_v22 }
 0x6a9   : > { %v3643_v21 = vpop.f32.mrf.mxu1 }
 0x6aa   : > { %v3826_v47 = vadd.f32 %v3643_v21, %v3345_v18  ;;  %v3184_v18 = vpop.permute.xlu1 %3183  ;;  %v2485_v21 = vld [vmem:[#allocation3 + $0x38] sm:$0xff] }
 0x6ab   : > { %v3645_v5 = vpop.f32.mrf.mxu1 }
 0x6ac   : > { %v2638_v44 = vpop.xlane.xlu0 %2637  ;;  %3890 = vst.msk [vmem:[#allocation4 + $0x110] sm:$0xff] %vm524_vm2, %v3826_v47  ;;  %v9221_v5 = vld [vmem:[#allocation117_spill] sm:$0xff] }
 0x6ad   : > { %v2808_v56 = vadd.f32 %v2638_v44, %v2552_v30  ;;  %v3648_v38 = vpop.f32.mrf.mxu1  ;;  %v9220_v30 = vld [vmem:[#allocation121_spill] sm:$0xff] }
 0x6ae   : > { %2016 = vperm.xlu1 %5039, %v9219_v36   ;;  %v3827_v3 = vadd.f32 %v3648_v38, %v3346_v28  ;;  %v2549_v47 = vmul.f32 %v9220_v30, %v2485_v21  ;;  %v9223_v38 = vld [vmem:[#allocation114_spill] sm:$0xff] }
 0x6af   : > { %2873 = vst.msk [vmem:[#allocation3 + $0x50] sm:$0xff] %vm2862_vm3, %v2808_v56  ;;  %v3650_v26 = vpop.f32.mrf.mxu1  ;;  %v2185_v56 = vsub.f32 %v9221_v5, %v2002_v57  ;;  %v9230_v5 = vld [vmem:[#allocation67_spill] sm:$0xff] }
 0x6b0   : > { %3891 = vst.msk [vmem:[#allocation4 + $0x118] sm:$0xff] %vm524_vm2, %v3827_v3  ;;  %v9224_v26 = vld [vmem:[#allocation116_spill] sm:$0xff] }
 0x6b1   : > { %v3653_v22 = vpop.f32.mrf.mxu1 }
 0x6b2   : > { %v3828_v31 = vadd.f32 %v3653_v22, %v3347_v9  ;;  %v2184_v9 = vsub.f32 %v9224_v26, %v2002_v57  ;;  %v2966_v26 = vld [vmem:[#allocation4 + $0x138] sm:$0xff] }
 0x6b3   : > { %v3655_v59 = vpop.f32.mrf.mxu1 }
 0x6b4   : > { %3892 = vst.msk [vmem:[#allocation4 + $0x120] sm:$0xff] %vm524_vm2, %v3828_v31  ;;  %v2404_v31 = vmul.f32 1.442695, %v2185_v56  ;;  %v2402_v59 = vmul.f32 1.442695, %v2184_v9 }
 0x6b5   : > { %v3658_v6 = vpop.f32.mrf.mxu1 }
 0x6b6   : > { %v3829_v62 = vadd.f32 %v3658_v6, %v3348_v41  ;;  %v9225_v41 = vld [vmem:[#allocation11_spill] sm:$0xff]  ;;  %v9226_v6 = vld [vmem:[#allocation68_spill] sm:$0xff] }
 0x6b7   : > { %v3660_v49 = vpop.f32.mrf.mxu1 }
 0x6b8   : > { %3893 = vst.msk [vmem:[#allocation4 + $0x128] sm:$0xff] %vm524_vm2, %v3829_v62  ;;  %v2645_v62 = vadd.f32 %v9226_v6, %v9225_v41 }
 0x6bc   : > { %v2629_v7 = vpop.xlane.xlu1 %2628 }
 0x6bd   : > { %v2805_v44 = vadd.f32 %v2629_v7, %v2549_v47  ;;  %v9229_v47 = vld [vmem:[#allocation162_spill] sm:$0xff]  ;;  %v2012_v7 = vpop.permute.xlu0 %2011 }
 0x6bf   : > { %2870 = vst.msk [vmem:[#allocation3 + $0x38] sm:$0xff] %vm2862_vm3, %v2805_v44  ;;  %v2490_v44 = vld [vmem:[#allocation3 + $0x60] sm:$0xff] }
 0x6c0   : > { %v1997_v28 = vpop.permute.xlu1 %1996  ;;  %v2554_v56 = vmul.f32 %v9230_v5, %v2490_v44 }
 0x6c1   : > { %v2182_v45 = vsub.f32 %v9222_v0, %v1997_v28  ;;  %v2183_v3 = vsub.f32 %v9223_v38, %v1997_v28  ;;  %v2965_v38 = vld [vmem:[#allocation4 + $0x130] sm:$0xff] }
 0x6c2   : > { %2655 = vadd.xlane.f32.xlu0 %v7363_v15 }
 0x6c3   : > { %v2398_v42 = vmul.f32 1.442695, %v2182_v45  ;;  %v2400_v22 = vmul.f32 1.442695, %v2183_v3  ;;  %v9231_v45 = vld [vmem:[#allocation73_spill] sm:$0xff]  ;;  %v3349_v3 = vmul.f32 %v3184_v18, %v2965_v38  ;;  %v9233_v18 = vld [vmem:[#allocation124_spill] sm:$0xff] }
 0x6c5   : > { %5296 = vpow2.f32 %v2398_v42 }
 0x6c6   : > { %5298 = vpow2.f32 %v2400_v22 }
 0x6c7   : > { %5300 = vpow2.f32 %v2404_v31  ;;  %v3350_v31 = vmul.f32 %v7850_v54, %v2966_v26  ;;  %v9235_v54 = vld [vmem:[#allocation119_spill] sm:$0xff] }
 0x6c8   : > { %5302 = vpow2.f32 %v2402_v59  ;;  %v2487_v59 = vld [vmem:[#allocation3 + $0x48] sm:$0xff]  ;;  %v9236_v26 = vld [vmem:[#allocation123_spill] sm:$0xff] }
 0x6d2   : > { %v5297_v21 = vpop.eup %5296  ;;  %2646 = vadd.xlane.f32.xlu1 %v2645_v62 }
 0x6d3   : > { %v5299_v49 = vpop.eup %5298 }
 0x6d4   : > { %3691 = vmatprep.mubr.f32.mxu1 %v5299_v49  ;;  %v7907_v30 = vadd.f32 %v5299_v49, %v5297_v21  ;;  %v7909_v15 = vpop.eup %5300 }
 0x6d5   : > { %9227 = vst [vmem:[#allocation55_spill] sm:$0xff] %v7909_v15  ;;  %3692 = vmatmul.mubr.f32.gmra.mxu1 %v5297_v21  ;;  %v7912_v57 = vpop.eup %5302  ;;  %v9232_v21 = vld [vmem:[#allocation128_spill] sm:$0xff] }
 0x6d6   : > { %3696 = vmatprep.mubr.f32.mxu1 %v7909_v15  ;;  %9228 = vst [vmem:[#allocation57_spill] sm:$0xff] %v7912_v57  ;;  %v2551_v49 = vmul.f32 %v9232_v21, %v2487_v59 }
 0x6d8   : > { %2041 = vperm.xlu0 %5038, %v9229_v47  }
 0x6d9   : > { %3697 = vmatmul.mubr.f32.gmra.mxu1 %v7912_v57 }
 0x6e1   : > { %v2644_v28 = vpop.xlane.xlu0 %2643 }
 0x6e2   : > { %v2810_v0 = vadd.f32 %v2644_v28, %v2554_v56  ;;  %v2189_v56 = vsub.f32 %v9233_v18, %v2012_v7  ;;  %v2492_v18 = vld [vmem:[#allocation3 + $0x70] sm:$0xff] }
 0x6e3   : > { %2026 = vperm.xlu1 %5039, %v9231_v45  }
 0x6e4   : > { %2875 = vst.msk [vmem:[#allocation3 + $0x60] sm:$0xff] %vm2862_vm3, %v2810_v0  ;;  %v9234_v0 = vld [vmem:[#allocation118_spill] sm:$0xff] }
 0x6ea   : > { %v3663_v9 = vpop.f32.mrf.mxu1 }
 0x6eb   : > { %v3830_v42 = vadd.f32 %v3663_v9, %v3349_v3  ;;  %v2188_v9 = vsub.f32 %v9236_v26, %v2012_v7 }
 0x6ec   : > { %v3665_v22 = vpop.f32.mrf.mxu1 }
 0x6ed   : > { %3894 = vst.msk [vmem:[#allocation4 + $0x130] sm:$0xff] %vm524_vm2, %v3830_v42  ;;  %v2410_v59 = vmul.f32 1.442695, %v2188_v9 }
 0x6ee   : > { %v3668_v41 = vpop.f32.mrf.mxu1 }
 0x6ef   : > { %v3831_v6 = vadd.f32 %v3668_v41, %v3350_v31  ;;  %v2412_v31 = vmul.f32 1.442695, %v2189_v56  ;;  %v9237_v41 = vld [vmem:[#allocation154_spill] sm:$0xff] }
 0x6f0   : > { %v3670_v62 = vpop.f32.mrf.mxu1  ;;  %v9241_v56 = vld [vmem:[#allocation70_spill] sm:$0xff] }
 0x6f1   : > { %3895 = vst.msk [vmem:[#allocation4 + $0x138] sm:$0xff] %vm524_vm2, %v3831_v6  ;;  %v2635_v44 = vpop.xlane.xlu1 %2634  ;;  %v9238_v6 = vld [vmem:[#allocation71_spill] sm:$0xff] }
 0x6f2   : > { %v2807_v5 = vadd.f32 %v2635_v44, %v2551_v49  ;;  %v2651_v62 = vadd.f32 %v9238_v6, %v9237_v41 }
 0x6f4   : > { %2872 = vst.msk [vmem:[#allocation3 + $0x48] sm:$0xff] %vm2862_vm3, %v2807_v5  ;;  %v2022_v5 = vpop.permute.xlu0 %2021 }
 0x6f5   : > { %v2007_v28 = vpop.permute.xlu1 %2006 }
 0x6f6   : > { %v2186_v38 = vsub.f32 %v9234_v0, %v2007_v28  ;;  %v2187_v3 = vsub.f32 %v9235_v54, %v2007_v28  ;;  %v2556_v28 = vmul.f32 %v9241_v56, %v2492_v18  ;;  %v9242_v54 = vld [vmem:[#allocation79_spill] sm:$0xff]  ;;  %v9245_v18 = vld [vmem:[#allocation125_spill] sm:$0xff] }
 0x6f7   : > { %2661 = vadd.xlane.f32.xlu0 %v7418_v32 }
 0x6f8   : > { %v2406_v42 = vmul.f32 1.442695, %v2186_v38  ;;  %v2408_v22 = vmul.f32 1.442695, %v2187_v3  ;;  %v2489_v3 = vld [vmem:[#allocation3 + $0x58] sm:$0xff] }
 0x6fa   : > { %5304 = vpow2.f32 %v2406_v42  ;;  %v9243_v42 = vld [vmem:[#allocation136_spill] sm:$0xff] }
 0x6fb   : > { %5306 = vpow2.f32 %v2408_v22  ;;  %v2553_v22 = vmul.f32 %v9243_v42, %v2489_v3 }
 0x6fc   : > { %5308 = vpow2.f32 %v2412_v31 }
 0x6fd   : > { %5310 = vpow2.f32 %v2410_v59 }
 0x707   : > { %v5305_v21 = vpop.eup %5304  ;;  %2652 = vadd.xlane.f32.xlu1 %v2651_v62  ;;  %v9244_v62 = vld [vmem:[#allocation131_spill] sm:$0xff] }
 0x708   : > { %v5307_v49 = vpop.eup %5306 }
 0x709   : > { %3701 = vmatprep.mubr.f32.mxu1 %v5307_v49  ;;  %v7931_v44 = vadd.f32 %v5307_v49, %v5305_v21  ;;  %v7933_v32 = vpop.eup %5308 }
 0x70a   : > { %9239 = vst [vmem:[#allocation58_spill] sm:$0xff] %v7933_v32  ;;  %3702 = vmatmul.mubr.f32.gmra.mxu1 %v5305_v21  ;;  %v7936_v7 = vpop.eup %5310  ;;  %v2193_v21 = vsub.f32 %v9244_v62, %v2022_v5 }
 0x70b   : > { %3706 = vmatprep.mubr.f32.mxu1 %v7933_v32  ;;  %9240 = vst [vmem:[#allocation60_spill] sm:$0xff] %v7936_v7 }
 0x70c   : > { %v2420_v42 = vmul.f32 1.442695, %v2193_v21  ;;  %v2494_v21 = vld [vmem:[#allocation3 + $0x80] sm:$0xff] }
 0x70d   : > { %2051 = vperm.xlu0 %5038, %v7467_v52  }
 0x70e   : > { %3707 = vmatmul.mubr.f32.gmra.mxu1 %v7936_v7 }
 0x716   : > { %v2650_v0 = vpop.xlane.xlu0 %2649 }
 0x717   : > { %v2812_v38 = vadd.f32 %v2650_v0, %v2556_v28  ;;  %v9246_v28 = vld [vmem:[#allocation126_spill] sm:$0xff] }
 0x718   : > { %2036 = vperm.xlu1 %5039, %v9242_v54  }
 0x719   : > { %2877 = vst.msk [vmem:[#allocation3 + $0x70] sm:$0xff] %vm2862_vm3, %v2812_v38  ;;  %v9247_v38 = vld [vmem:[#allocation130_spill] sm:$0xff] }
 0x723   : > { %v7943_v26 = vpop.f32.mrf.mxu1 }
 0x725   : > { %v3675_v9 = vpop.f32.mrf.mxu1 }
 0x726   : > { %v2641_v31 = vpop.xlane.xlu1 %2640  ;;  %v2192_v9 = vsub.f32 %v9247_v38, %v2022_v5 }
 0x727   : > { %v7946_v59 = vpop.f32.mrf.mxu1  ;;  %v2809_v41 = vadd.f32 %v2641_v31, %v2553_v22  ;;  %v9248_v31 = vld [vmem:[#allocation19_spill] sm:$0xff] }
 0x728   : > { %v2418_v22 = vmul.f32 1.442695, %v2192_v9  ;;  %v9253_v9 = vld [vmem:[#allocation85_spill] sm:$0xff] }
 0x729   : > { %2874 = vst.msk [vmem:[#allocation3 + $0x58] sm:$0xff] %vm2862_vm3, %v2809_v41  ;;  %v3680_v6 = vpop.f32.mrf.mxu1  ;;  %v9249_v41 = vld [vmem:[#allocation77_spill] sm:$0xff] }
 0x72a   : > { %v2017_v49 = vpop.permute.xlu1 %2016  ;;  %v2657_v6 = vadd.f32 %v9249_v41, %v9248_v31 }
 0x72b   : > { %v2190_v56 = vsub.f32 %v9245_v18, %v2017_v49  ;;  %v2191_v0 = vsub.f32 %v9246_v28, %v2017_v49 }
 0x72c   : > { %2667 = vadd.xlane.f32.xlu0 %v7487_v27 }
 0x72d   : > { %v2414_v7 = vmul.f32 1.442695, %v2190_v56  ;;  %v2416_v3 = vmul.f32 1.442695, %v2191_v0  ;;  %v9252_v56 = vld [vmem:[#allocation76_spill] sm:$0xff] }
 0x72e   : > { %v2558_v28 = vmul.f32 %v9252_v56, %v2494_v21  ;;  %v9256_v56 = vld [vmem:[#allocation132_spill] sm:$0xff] }
 0x72f   : > { %5312 = vpow2.f32 %v2414_v7  ;;  %v2032_v7 = vpop.permute.xlu0 %2031 }
 0x730   : > { %5314 = vpow2.f32 %v2416_v3  ;;  %v2491_v3 = vld [vmem:[#allocation3 + $0x68] sm:$0xff] }
 0x731   : > { %5316 = vpow2.f32 %v2420_v42  ;;  %v9254_v42 = vld [vmem:[#allocation144_spill] sm:$0xff] }
 0x732   : > { %5318 = vpow2.f32 %v2418_v22  ;;  %v2555_v22 = vmul.f32 %v9254_v42, %v2491_v3 }
 0x73c   : > { %v5313_v62 = vpop.eup %5312  ;;  %2658 = vadd.xlane.f32.xlu1 %v2657_v6 }
 0x73d   : > { %v5315_v18 = vpop.eup %5314 }
 0x73e   : > { %3711 = vmatprep.mubr.f32.mxu1 %v5315_v18  ;;  %v7956_v49 = vadd.f32 %v5315_v18, %v5313_v62  ;;  %v7958_v27 = vpop.eup %5316  ;;  %v9255_v18 = vld [vmem:[#allocation139_spill] sm:$0xff] }
 0x73f   : > { %9250 = vst [vmem:[#allocation59_spill] sm:$0xff] %v7958_v27  ;;  %3712 = vmatmul.mubr.f32.gmra.mxu1 %v5313_v62  ;;  %v7961_v5 = vpop.eup %5318 }
 0x740   : > { %3716 = vmatprep.mubr.f32.mxu1 %v7958_v27  ;;  %9251 = vst [vmem:[#allocation72_spill] sm:$0xff] %v7961_v5 }
 0x742   : > { %2061 = vperm.xlu0 %5038, %v7521_v34  }
 0x743   : > { %3717 = vmatmul.mubr.f32.gmra.mxu1 %v7961_v5  ;;  %v2197_v5 = vsub.f32 %v9255_v18, %v2032_v7 }
 0x74b   : > { %v2656_v0 = vpop.xlane.xlu0 %2655 }
 0x74c   : > { %v2814_v38 = vadd.f32 %v2656_v0, %v2558_v28  ;;  %v9257_v0 = vld [vmem:[#allocation133_spill] sm:$0xff] }
 0x74d   : > { %2046 = vperm.xlu1 %5039, %v9253_v9  }
 0x74e   : > { %2879 = vst.msk [vmem:[#allocation3 + $0x80] sm:$0xff] %vm2862_vm3, %v2814_v38  ;;  %v9258_v38 = vld [vmem:[#allocation138_spill] sm:$0xff] }
 0x74f   : > { %v2196_v3 = vsub.f32 %v9258_v38, %v2032_v7  ;;  %v9264_v38 = vld [vmem:[#allocation148_spill] sm:$0xff] }
 0x75b   : > { %v2647_v31 = vpop.xlane.xlu1 %2646 }
 0x75c   : > { %v7969_v41 = vpop.f32.mrf.mxu1  ;;  %v2811_v6 = vadd.f32 %v2647_v31, %v2555_v22  ;;  %v2428_v22 = vmul.f32 1.442695, %v2197_v5  ;;  %v2426_v31 = vmul.f32 1.442695, %v2196_v3  ;;  %v2496_v5 = vld [vmem:[#allocation3 + $0x90] sm:$0xff] }
 0x75e   : > { %2876 = vst.msk [vmem:[#allocation3 + $0x68] sm:$0xff] %vm2862_vm3, %v2811_v6  ;;  %v3685_v62 = vpop.f32.mrf.mxu1  ;;  %v2663_v6 = vadd.f32 %v7425_v33, %v7420_v8  ;;  %v9262_v8 = vld [vmem:[#allocation82_spill] sm:$0xff] }
 0x75f   : > { %v2027_v27 = vpop.permute.xlu1 %2026  ;;  %v2560_v33 = vmul.f32 %v9262_v8, %v2496_v5  ;;  %v9267_v8 = vld [vmem:[#allocation141_spill] sm:$0xff] }
 0x760   : > { %v7973_v21 = vpop.f32.mrf.mxu1  ;;  %v2194_v28 = vsub.f32 %v9256_v56, %v2027_v27  ;;  %v2195_v32 = vsub.f32 %v9257_v0, %v2027_v27  ;;  %v2493_v0 = vld [vmem:[#allocation3 + $0x78] sm:$0xff] }
 0x761   : > { %2673 = vadd.xlane.f32.xlu0 %v7533_v60  ;;  %v2557_v3 = vmul.f32 %v9264_v38, %v2493_v0 }
 0x762   : > { %v2422_v42 = vmul.f32 1.442695, %v2194_v28  ;;  %v2424_v57 = vmul.f32 1.442695, %v2195_v32  ;;  %v3690_v15 = vpop.f32.mrf.mxu1  ;;  %v2042_v32 = vpop.permute.xlu0 %2041  ;;  %v9263_v28 = vld [vmem:[#allocation159_spill] sm:$0xff] }
 0x764   : > { %5320 = vpow2.f32 %v2422_v42 }
 0x765   : > { %5322 = vpow2.f32 %v2424_v57  ;;  %v9261_v57 = vld [vmem:[#allocation99_spill] sm:$0xff] }
 0x766   : > { %5324 = vpow2.f32 %v2428_v22 }
 0x767   : > { %5326 = vpow2.f32 %v2426_v31  ;;  %v9265_v31 = vld [vmem:[#allocation8_spill] sm:$0xff] }
 0x771   : > { %v5321_v62 = vpop.eup %5320  ;;  %2664 = vadd.xlane.f32.xlu1 %v2663_v6  ;;  %v2201_v6 = vsub.f32 %v9265_v31, %v2042_v32  ;;  %v9270_v31 = vld [vmem:[#allocation26_spill] sm:$0xff] }
 0x772   : > { %v5323_v18 = vpop.eup %5322 }
 0x773   : > { %3721 = vmatprep.mubr.f32.mxu1 %v5323_v18  ;;  %v7981_v27 = vadd.f32 %v5323_v18, %v5321_v62  ;;  %v7983_v60 = vpop.eup %5324  ;;  %v2436_v38 = vmul.f32 1.442695, %v2201_v6 }
 0x774   : > { %9259 = vst [vmem:[#allocation78_spill] sm:$0xff] %v7983_v60  ;;  %3722 = vmatmul.mubr.f32.gmra.mxu1 %v5321_v62  ;;  %v7986_v15 = vpop.eup %5326 }
 0x775   : > { %3726 = vmatprep.mubr.f32.mxu1 %v7983_v60  ;;  %9260 = vst [vmem:[#allocation61_spill] sm:$0xff] %v7986_v15  ;;  %v9269_v60 = vld [vmem:[#allocation147_spill] sm:$0xff] }
 0x777   : > { %2071 = vperm.xlu0 %5038, %v9261_v57  }
 0x778   : > { %3727 = vmatmul.mubr.f32.gmra.mxu1 %v7986_v15  ;;  %v9266_v15 = vld [vmem:[#allocation140_spill] sm:$0xff] }
 0x780   : > { %v2662_v7 = vpop.xlane.xlu0 %2661 }
 0x781   : > { %v2816_v56 = vadd.f32 %v2662_v7, %v2560_v33  ;;  %v9268_v7 = vld [vmem:[#allocation34_spill] sm:$0xff] }
 0x782   : > { %2056 = vperm.xlu1 %5039, %v9263_v28  }
 0x783   : > { %2881 = vst.msk [vmem:[#allocation3 + $0x90] sm:$0xff] %vm2862_vm3, %v2816_v56  ;;  %v2200_v56 = vsub.f32 %v9269_v60, %v2042_v32 }
 0x788   : > { %v2052_v6 = vpop.permute.xlu0 %2051 }
 0x790   : > { %v2653_v42 = vpop.xlane.xlu1 %2652 }
 0x791   : > { %v2813_v22 = vadd.f32 %v2653_v42, %v2557_v3  ;;  %v2434_v42 = vmul.f32 1.442695, %v2200_v56 }
 0x793   : > { %2878 = vst.msk [vmem:[#allocation3 + $0x78] sm:$0xff] %vm2862_vm3, %v2813_v22 }
 0x794   : > { %v2037_v62 = vpop.permute.xlu1 %2036 }
 0x795   : > { %v7996_v18 = vpop.f32.mrf.mxu1  ;;  %v2198_v5 = vsub.f32 %v9266_v15, %v2037_v62  ;;  %v2199_v33 = vsub.f32 %v9267_v8, %v2037_v62  ;;  %v9271_v15 = vld [vmem:[#allocation27_spill] sm:$0xff] }
 0x796   : > { %2679 = vadd.xlane.f32.xlu0 %v9268_v7  ;;  %v2669_v17 = vadd.f32 %v9271_v15, %v9270_v31 }
 0x797   : > { %v2430_v25 = vmul.f32 1.442695, %v2198_v5  ;;  %v2432_v43 = vmul.f32 1.442695, %v2199_v33  ;;  %v3695_v0 = vpop.f32.mrf.mxu1  ;;  %v2498_v5 = vld [vmem:[#allocation3 + $0xa0] sm:$0xff] }
 0x798   : > { %v9275_v33 = vld [vmem:[#allocation89_spill] sm:$0xff]  ;;  %v9276_v0 = vld [vmem:[#allocation83_spill] sm:$0xff] }
 0x799   : > { %5328 = vpow2.f32 %v2430_v25  ;;  %v8002_v3 = vpop.f32.mrf.mxu1  ;;  %v2562_v7 = vmul.f32 %v9275_v33, %v2498_v5  ;;  %v9281_v33 = vld [vmem:[#allocation6_spill] sm:$0xff] }
 0x79a   : > { %5330 = vpow2.f32 %v2432_v43  ;;  %v9274_v43 = vld [vmem:[#allocation101_spill] sm:$0xff] }
 0x79b   : > { %v3700_v22 = vpop.f32.mrf.mxu1  ;;  %5332 = vpow2.f32 %v2436_v38  ;;  %v2495_v38 = vld [vmem:[#allocation3 + $0x88] sm:$0xff] }
 0x79c   : > { %5334 = vpow2.f32 %v2434_v42  ;;  %v9277_v42 = vld [vmem:[#allocation151_spill] sm:$0xff] }
 0x79d   : > { %v2559_v22 = vmul.f32 %v9277_v42, %v2495_v38 }
 0x7a6   : > { %v5329_v62 = vpop.eup %5328  ;;  %2670 = vadd.xlane.f32.xlu1 %v2669_v17 }
 0x7a7   : > { %v5331_v8 = vpop.eup %5330 }
 0x7a8   : > { %3731 = vmatprep.mubr.f32.mxu1 %v5331_v8  ;;  %v8006_v60 = vadd.f32 %v5331_v8, %v5329_v62  ;;  %v8008_v32 = vpop.eup %5332 }
 0x7a9   : > { %9272 = vst [vmem:[#allocation63_spill] sm:$0xff] %v8008_v32  ;;  %3732 = vmatmul.mubr.f32.gmra.mxu1 %v5329_v62  ;;  %v8011_v25 = vpop.eup %5334  ;;  %v9278_v62 = vld [vmem:[#allocation12_spill] sm:$0xff] }
 0x7aa   : > { %3736 = vmatprep.mubr.f32.mxu1 %v8008_v32  ;;  %9273 = vst [vmem:[#allocation75_spill] sm:$0xff] %v8011_v25  ;;  %v2205_v8 = vsub.f32 %v9278_v62, %v2052_v6 }
 0x7ac   : > { %2081 = vperm.xlu0 %5038, %v9274_v43   ;;  %v2444_v42 = vmul.f32 1.442695, %v2205_v8 }
 0x7ad   : > { %3737 = vmatmul.mubr.f32.gmra.mxu1 %v8011_v25 }
 0x7b5   : > { %v2668_v17 = vpop.xlane.xlu0 %2667 }
 0x7b6   : > { %v2818_v56 = vadd.f32 %v2668_v17, %v2562_v7  ;;  %v9282_v17 = vld [vmem:[#allocation150_spill] sm:$0xff] }
 0x7b7   : > { %2066 = vperm.xlu1 %5039, %v9276_v0  }
 0x7b8   : > { %2883 = vst.msk [vmem:[#allocation3 + $0xa0] sm:$0xff] %vm2862_vm3, %v2818_v56  ;;  %v2204_v56 = vsub.f32 %v9282_v17, %v2052_v6 }
 0x7ba   : > { %v2442_v62 = vmul.f32 1.442695, %v2204_v56 }
 0x7c5   : > { %v2659_v31 = vpop.xlane.xlu1 %2658 }
 0x7c6   : > { %v2815_v15 = vadd.f32 %v2659_v31, %v2559_v22  ;;  %v9283_v31 = vld [vmem:[#allocation129_spill] sm:$0xff] }
 0x7c8   : > { %2880 = vst.msk [vmem:[#allocation3 + $0x88] sm:$0xff] %vm2862_vm3, %v2815_v15  ;;  %v1623_v15 = vsub.f32 %v9283_v31, %v7060_v2 }
 0x7c9   : > { %v2047_v25 = vpop.permute.xlu1 %2046 }
 0x7ca   : > { %v8021_v32 = vpop.f32.mrf.mxu1  ;;  %v2202_v5 = vsub.f32 %v9280_v1, %v2047_v25  ;;  %v2203_v7 = vsub.f32 %v9281_v33, %v2047_v25  ;;  %v1728_v1 = vmul.f32 1.442695, %v1623_v15  ;;  %v9284_v25 = vld [vmem:[#allocation137_spill] sm:$0xff]  ;;  %v9287_v33 = vld [vmem:[#allocation30_spill] sm:$0xff] }
 0x7cb   : > { %9279 = vst [vmem:[#allocation105_spill] sm:$0xff] %v8021_v32  ;;  %2685 = vadd.xlane.f32.xlu0 %v7660_v50  ;;  %v1625_v50 = vsub.f32 %v9284_v25, %v7121_v51 }
 0x7cc   : > { %v2438_v23 = vmul.f32 1.442695, %v2202_v5  ;;  %v2440_v40 = vmul.f32 1.442695, %v2203_v7  ;;  %v3705_v38 = vpop.f32.mrf.mxu1  ;;  %v9285_v5 = vld [vmem:[#allocation146_spill] sm:$0xff] }
 0x7cd   : > { %v1732_v6 = vmul.f32 1.442695, %v1625_v50  ;;  %v1627_v8 = vsub.f32 %v9285_v5, %v7177_v55  ;;  %v9289_v55 = vld [vmem:[#allocation152_spill] sm:$0xff]  ;;  %v2062_v50 = vpop.permute.xlu0 %2061  ;;  %v9292_v5 = vld [vmem:[#allocation161_spill] sm:$0xff] }
 0x7ce   : > { %5336 = vpow2.f32 %v2438_v23  ;;  %v8027_v22 = vpop.f32.mrf.mxu1  ;;  %v9286_v23 = vld [vmem:[#allocation32_spill] sm:$0xff]  ;;  %v1631_v31 = vsub.f32 %v9289_v55, %v7290_v12  ;;  %v9298_v55 = vld [vmem:[#allocation93_spill] sm:$0xff] }
 0x7cf   : > { %5338 = vpow2.f32 %v2440_v40  ;;  %v2675_v7 = vadd.f32 %v9287_v33, %v9286_v23  ;;  %v1736_v2 = vmul.f32 1.442695, %v1627_v8  ;;  %v9288_v40 = vld [vmem:[#allocation149_spill] sm:$0xff]  ;;  %v1635_v8 = vsub.f32 %v9292_v5, %v9229_v47  ;;  %v9294_v33 = vld [vmem:[#allocation80_spill] sm:$0xff] }
 0x7d0   : > { %v3710_v32 = vpop.f32.mrf.mxu1  ;;  %5340 = vpow2.f32 %v2444_v42 }
 0x7d1   : > { %5342 = vpow2.f32 %v2442_v62  ;;  %v1629_v32 = vsub.f32 %v9288_v40, %v7235_v11  ;;  %v1744_v11 = vmul.f32 1.442695, %v1631_v31  ;;  %v9290_v62 = vld [vmem:[#allocation156_spill] sm:$0xff]  ;;  %v1639_v31 = vsub.f32 %v9298_v55, %v7521_v34  ;;  %v9303_v34 = vld [vmem:[#allocation155_spill] sm:$0xff] }
 0x7d2   : > { %5344 = vpow2.f32 %v1728_v1  ;;  %v1633_v1 = vsub.f32 %v9290_v62, %v9217_v13  ;;  %v1752_v13 = vmul.f32 1.442695, %v1635_v8  ;;  %v9300_v62 = vld [vmem:[#allocation96_spill] sm:$0xff] }
 0x7d3   : > { %5346 = vpow2.f32 %v1732_v6  ;;  %v1740_v42 = vmul.f32 1.442695, %v1629_v32  ;;  %v2500_v6 = vld [vmem:[#allocation3 + $0xb0] sm:$0xff] }
 0x7d4   : > { %5348 = vpow2.f32 %v1736_v2  ;;  %v1748_v12 = vmul.f32 1.442695, %v1633_v1  ;;  %v9295_v2 = vld [vmem:[#allocation88_spill] sm:$0xff]  ;;  %v1641_v1 = vsub.f32 %v9300_v62, %v9261_v57 }
 0x7d5   : > { %5350 = vpow2.f32 %v1740_v42  ;;  %v1637_v40 = vsub.f32 %v9295_v2, %v7467_v52  ;;  %v9297_v42 = vld [vmem:[#allocation110_spill] sm:$0xff]  ;;  %v1760_v52 = vmul.f32 1.442695, %v1639_v31  ;;  %v9305_v57 = vld [vmem:[#allocation16_spill] sm:$0xff] }
 0x7d6   : > { %5352 = vpow2.f32 %v1744_v11  ;;  %v1764_v5 = vmul.f32 1.442695, %v1641_v1  ;;  %v2209_v2 = vsub.f32 %v9305_v57, %v2062_v50  ;;  %v9307_v31 = vld [vmem:[#allocation10_spill] sm:$0xff]  ;;  %v9309_v1 = vld [vmem:[#allocation153_spill] sm:$0xff] }
 0x7d7   : > { %5354 = vpow2.f32 %v1748_v12  ;;  %v1756_v47 = vmul.f32 1.442695, %v1637_v40  ;;  %v2497_v12 = vld [vmem:[#allocation3 + $0x98] sm:$0xff] }
 0x7d8   : > { %5356 = vpow2.f32 %v1752_v13 }
 0x7d9   : > { %5358 = vpow2.f32 %v1756_v47  ;;  %v9306_v47 = vld [vmem:[#allocation9_spill] sm:$0xff] }
 0x7da   : > { %5360 = vpow2.f32 %v1760_v52 }
 0x7db   : > { %v5337_v17 = vpop.eup %5336  ;;  %2676 = vadd.xlane.f32.xlu1 %v2675_v7  ;;  %v2564_v7 = vmul.f32 %v9294_v33, %v2500_v6  ;;  %v2561_v33 = vmul.f32 %v9303_v34, %v2497_v12  ;;  %5362 = vpow2.f32 %v1764_v5  ;;  %v2208_v12 = vsub.f32 %v9309_v1, %v2062_v50  ;;  %v9312_v50 = vld [vmem:[#allocation35_spill] sm:$0xff] }
 0x7dc   : > { %v5339_v56 = vpop.eup %5338 }
 0x7dd   : > { %3741 = vmatprep.mubr.f32.mxu1 %v5339_v56  ;;  %v8039_v38 = vadd.f32 %v5339_v56, %v5337_v17  ;;  %v8041_v51 = vpop.eup %5340 }
 0x7de   : > { %3742 = vmatmul.mubr.f32.gmra.mxu1 %v5337_v17  ;;  %v8046_v15 = vpop.eup %5342 }
 0x7df   : > { %3746 = vmatprep.mubr.f32.mxu1 %v8041_v51  ;;  %v8052_v25 = vpop.eup %5344 }
 0x7e0   : > { %9291 = vst [vmem:[#allocation90_spill] sm:$0xff] %v8052_v25  ;;  %v8057_v23 = vpop.eup %5346 }
 0x7e1   : > { %2091 = vperm.xlu0 %5038, %v7684_v16   ;;  %9293 = vst [vmem:[#allocation81_spill] sm:$0xff] %v8057_v23  ;;  %v8063_v56 = vpop.eup %5348 }
 0x7e2   : > { %3747 = vmatmul.mubr.f32.gmra.mxu1 %v8046_v15  ;;  %9296 = vst [vmem:[#allocation84_spill] sm:$0xff] %v8063_v56  ;;  %v8070_v11 = vpop.eup %5350 }
 0x7e3   : > { %9299 = vst [vmem:[#allocation87_spill] sm:$0xff] %v8070_v11  ;;  %v8075_v6 = vpop.eup %5352 }
 0x7e4   : > { %9301 = vst [vmem:[#allocation135_spill] sm:$0xff] %v8075_v6  ;;  %v8078_v8 = vpop.eup %5354 }
 0x7e5   : > { %3198 = vperm.xlu0 %5038, %v8052_v25   ;;  %9302 = vst [vmem:[#allocation115_spill] sm:$0xff] %v8078_v8  ;;  %v8082_v13 = vpop.eup %5356 }
 0x7e6   : > { %9304 = vst [vmem:[#allocation112_spill] sm:$0xff] %v8082_v13  ;;  %v8091_v62 = vpop.eup %5358 }
 0x7e7   : > { %9308 = vst [vmem:[#allocation92_spill] sm:$0xff] %v8091_v62  ;;  %v8097_v57 = vpop.eup %5360 }
 0x7e8   : > { %9310 = vst [vmem:[#allocation95_spill] sm:$0xff] %v8097_v57 }
 0x7e9   : > { %3208 = vperm.xlu0 %5038, %v8057_v23   ;;  %v9335_v23 = vld [vmem:[#allocation74_spill] sm:$0xff] }
 0x7ea   : > { %v2674_v17 = vpop.xlane.xlu0 %2673 }
 0x7eb   : > { %v2820_v32 = vadd.f32 %v2674_v17, %v2564_v7 }
 0x7ec   : > { %2076 = vperm.xlu1 %5039, %v9297_v42  }
 0x7ed   : > { %2885 = vst.msk [vmem:[#allocation3 + $0xb0] sm:$0xff] %vm2862_vm3, %v2820_v32  ;;  %3218 = vperm.xlu0 %5038, %v8063_v56  }
 0x7f1   : > { %3228 = vperm.xlu0 %5038, %v8070_v11   ;;  %v2970_v11 = vld [vmem:[#allocation4 + $0x158] sm:$0xff] }
 0x7f5   : > { %3238 = vperm.xlu0 %5038, %v8075_v6  }
 0x7f9   : > { %3248 = vperm.xlu0 %5038, %v8078_v8   ;;  %v9320_v8 = vld [vmem:[#allocation91_spill] sm:$0xff] }
 0x7fa   : > { %v2665_v7 = vpop.xlane.xlu1 %2664 }
 0x7fb   : > { %v2817_v17 = vadd.f32 %v2665_v7, %v2561_v33  ;;  %v2452_v7 = vmul.f32 1.442695, %v2209_v2  ;;  %v9314_v2 = vld [vmem:[#allocation120_spill] sm:$0xff] }
 0x7fd   : > { %2882 = vst.msk [vmem:[#allocation3 + $0x98] sm:$0xff] %vm2862_vm3, %v2817_v17  ;;  %3258 = vperm.xlu0 %5038, %v8082_v13   ;;  %v2450_v13 = vmul.f32 1.442695, %v2208_v12 }
 0x7fe   : > { %v2057_v40 = vpop.permute.xlu1 %2056 }
 0x7ff   : > { %v8087_v32 = vpop.f32.mrf.mxu1  ;;  %v2206_v55 = vsub.f32 %v9306_v47, %v2057_v40  ;;  %v2207_v52 = vsub.f32 %v9307_v31, %v2057_v40  ;;  %v8100_v40 = vpop.eup %5362 }
 0x800   : > { %9311 = vst [vmem:[#allocation111_spill] sm:$0xff] %v8100_v40 }
 0x801   : > { %v2446_v5 = vmul.f32 1.442695, %v2206_v55  ;;  %v2448_v34 = vmul.f32 1.442695, %v2207_v52  ;;  %v3715_v33 = vpop.f32.mrf.mxu1  ;;  %3268 = vperm.xlu0 %5038, %v8091_v62   ;;  %v9313_v55 = vld [vmem:[#allocation102_spill] sm:$0xff]  ;;  %v1622_v52 = vsub.f32 %v9314_v2, %v6984_v4  ;;  %v9316_v4 = vld [vmem:[#allocation127_spill] sm:$0xff] }
 0x802   : > { %v2681_v31 = vadd.f32 %v9313_v55, %v9312_v50  ;;  %v1626_v55 = vsub.f32 %v9316_v4, %v7045_v53  ;;  %v9317_v2 = vld [vmem:[#allocation134_spill] sm:$0xff] }
 0x803   : > { %5364 = vpow2.f32 %v2446_v5  ;;  %v8095_v17 = vpop.f32.mrf.mxu1  ;;  %v1726_v33 = vmul.f32 1.442695, %v1622_v52  ;;  %v1628_v52 = vsub.f32 %v9317_v2, %v9206_v63 }
 0x804   : > { %5366 = vpow2.f32 %v2448_v34 }
 0x805   : > { %v3720_v47 = vpop.f32.mrf.mxu1  ;;  %3278 = vperm.xlu0 %5038, %v8097_v57   ;;  %5368 = vpow2.f32 %v2452_v7  ;;  %v9315_v7 = vld [vmem:[#allocation122_spill] sm:$0xff] }
 0x806   : > { %5370 = vpow2.f32 %v2450_v13  ;;  %v1624_v13 = vsub.f32 %v9315_v7, %v6999_v48  ;;  %v9318_v48 = vld [vmem:[#allocation97_spill] sm:$0xff]  ;;  %v1738_v7 = vmul.f32 1.442695, %v1628_v52  ;;  %v9319_v57 = vld [vmem:[#allocation142_spill] sm:$0xff] }
 0x807   : > { %5372 = vpow2.f32 %v1726_v33  ;;  %v1630_v33 = vsub.f32 %v9319_v57, %v9219_v36 }
 0x808   : > { %v1730_v50 = vmul.f32 1.442695, %v1624_v13 }
 0x809   : > { %3288 = vperm.xlu0 %5038, %v8100_v40   ;;  %v2502_v40 = vld [vmem:[#allocation3 + $0xc0] sm:$0xff]  ;;  %v1742_v53 = vmul.f32 1.442695, %v1630_v33 }
 0x80a   : > { %5374 = vpow2.f32 %v1730_v50  ;;  %v9321_v50 = vld [vmem:[#allocation62_spill] sm:$0xff] }
 0x80b   : > { %v1632_v63 = vsub.f32 %v9321_v50, %v9231_v45 }
 0x810   : > { %v5365_v1 = vpop.eup %5364  ;;  %2682 = vadd.xlane.f32.xlu1 %v2681_v31  ;;  %v1734_v31 = vmul.f32 1.442695, %v1626_v55  ;;  %v9322_v55 = vld [vmem:[#allocation64_spill] sm:$0xff] }
 0x811   : > { %v5367_v5 = vpop.eup %5366  ;;  %v1634_v36 = vsub.f32 %v9322_v55, %v9242_v54  ;;  %v9325_v54 = vld [vmem:[#allocation160_spill] sm:$0xff] }
 0x812   : > { %3751 = vmatprep.mubr.f32.mxu1 %v5367_v5  ;;  %v8107_v12 = vadd.f32 %v5367_v5, %v5365_v1  ;;  %v8109_v34 = vpop.eup %5368  ;;  %v2072_v5 = vpop.permute.xlu0 %2071  ;;  %5376 = vpow2.f32 %v1734_v31  ;;  %v9323_v31 = vld [vmem:[#allocation108_spill] sm:$0xff] }
 0x813   : > { %3752 = vmatmul.mubr.f32.gmra.mxu1 %v5365_v1  ;;  %v8114_v47 = vpop.eup %5370  ;;  %v2566_v1 = vmul.f32 %v9318_v48, %v2502_v40  ;;  %5378 = vpow2.f32 %v1738_v7  ;;  %v1746_v40 = vmul.f32 1.442695, %v1632_v63  ;;  %v1643_v2 = vsub.f32 %v9323_v31, %v9274_v43  ;;  %v2499_v48 = vld [vmem:[#allocation3 + $0xa8] sm:$0xff]  ;;  %v9326_v43 = vld [vmem:[#allocation69_spill] sm:$0xff] }
 0x814   : > { %3756 = vmatprep.mubr.f32.mxu1 %v8109_v34  ;;  %v8128_v4 = vpop.eup %5372  ;;  %5380 = vpow2.f32 %v1742_v53  ;;  %v1750_v45 = vmul.f32 1.442695, %v1634_v36  ;;  %v2563_v33 = vmul.f32 %v9325_v54, %v2499_v48  ;;  %v9328_v36 = vld [vmem:[#allocation20_spill] sm:$0xff]  ;;  %v9330_v48 = vld [vmem:[#allocation14_spill] sm:$0xff] }
 0x815   : > { %5382 = vpow2.f32 %v1746_v40  ;;  %v1768_v7 = vmul.f32 1.442695, %v1643_v2  ;;  %v2213_v31 = vsub.f32 %v9328_v36, %v2072_v5 }
 0x816   : > { %5384 = vpow2.f32 %v1750_v45 }
 0x817   : > { %3757 = vmatmul.mubr.f32.gmra.mxu1 %v8114_v47  ;;  %v8133_v57 = vpop.eup %5374  ;;  %5386 = vpow2.f32 %v1768_v7 }
 0x81f   : > { %v2680_v13 = vpop.xlane.xlu0 %2679 }
 0x820   : > { %v2822_v62 = vadd.f32 %v2680_v13, %v2566_v1  ;;  %v8141_v1 = vpop.eup %5376 }
 0x821   : > { %2086 = vperm.xlu1 %5039, %v9320_v8   ;;  %v8147_v50 = vpop.eup %5378 }
 0x822   : > { %2887 = vst.msk [vmem:[#allocation3 + $0xc0] sm:$0xff] %vm2862_vm3, %v2822_v62  ;;  %v9324_v62 = vld [vmem:[#allocation66_spill] sm:$0xff]  ;;  %v8154_v45 = vpop.eup %5380 }
 0x823   : > { %v1636_v52 = vsub.f32 %v9324_v62, %v9253_v9  ;;  %v9327_v9 = vld [vmem:[#allocation23_spill] sm:$0xff]  ;;  %v9329_v62 = vld [vmem:[#allocation13_spill] sm:$0xff] }
 0x824   : > { %v1640_v40 = vsub.f32 %v9327_v9, %v9276_v0 }
 0x825   : > { %3193 = vperm.xlu1 %5039, %v8128_v4   ;;  %v1754_v13 = vmul.f32 1.442695, %v1636_v52 }
 0x826   : > { %v1762_v54 = vmul.f32 1.442695, %v1640_v40 }
 0x827   : > { %5388 = vpow2.f32 %v1754_v13 }
 0x828   : > { %2691 = vadd.xlane.f32.xlu0 %v7723_v14  ;;  %v1638_v14 = vsub.f32 %v9326_v43, %v9263_v28 }
 0x829   : > { %3203 = vperm.xlu1 %5039, %v8133_v57  }
 0x82a   : > { %v1758_v55 = vmul.f32 1.442695, %v1638_v14  ;;  %v2460_v14 = vmul.f32 1.442695, %v2213_v31 }
 0x82c   : > { %5390 = vpow2.f32 %v1758_v55 }
 0x82d   : > { %3213 = vperm.xlu1 %5039, %v8141_v1  }
 0x82f   : > { %v2671_v53 = vpop.xlane.xlu1 %2670 }
 0x830   : > { %v2819_v63 = vadd.f32 %v2671_v53, %v2563_v33  ;;  %v9331_v33 = vld [vmem:[#allocation158_spill] sm:$0xff] }
 0x831   : > { %3223 = vperm.xlu1 %5039, %v8147_v50   ;;  %v2212_v0 = vsub.f32 %v9331_v33, %v2072_v5 }
 0x832   : > { %2884 = vst.msk [vmem:[#allocation3 + $0xa8] sm:$0xff] %vm2862_vm3, %v2819_v63  ;;  %v8162_v63 = vpop.eup %5382 }
 0x833   : > { %v2067_v2 = vpop.permute.xlu1 %2066  ;;  %v2458_v36 = vmul.f32 1.442695, %v2212_v0  ;;  %v8167_v40 = vpop.eup %5384 }
 0x834   : > { %v8156_v28 = vpop.f32.mrf.mxu1  ;;  %v2210_v52 = vsub.f32 %v9329_v62, %v2067_v2  ;;  %v2211_v7 = vsub.f32 %v9330_v48, %v2067_v2  ;;  %v8169_v5 = vpop.eup %5386 }
 0x835   : > { %3233 = vperm.xlu1 %5039, %v8154_v45   ;;  %9332 = vst [vmem:[#allocation15_spill] sm:$0xff] %v8169_v5  ;;  %v8173_v55 = vpop.eup %5388  ;;  %v2082_v0 = vpop.permute.xlu0 %2081 }
 0x836   : > { %v2454_v43 = vmul.f32 1.442695, %v2210_v52  ;;  %v2456_v53 = vmul.f32 1.442695, %v2211_v7  ;;  %v3725_v13 = vpop.f32.mrf.mxu1 }
 0x838   : > { %5392 = vpow2.f32 %v2454_v43  ;;  %v8164_v9 = vpop.f32.mrf.mxu1  ;;  %v2504_v43 = vld [vmem:[#allocation3 + $0xd0] sm:$0xff] }
 0x839   : > { %5394 = vpow2.f32 %v2456_v53  ;;  %3243 = vperm.xlu1 %5039, %v8162_v63   ;;  %v8176_v31 = vpop.eup %5390  ;;  %v9334_v53 = vld [vmem:[#allocation98_spill] sm:$0xff] }
 0x83a   : > { %5396 = vpow2.f32 %v1762_v54  ;;  %v3730_v2 = vpop.f32.mrf.mxu1  ;;  %v2568_v13 = vmul.f32 %v9334_v53, %v2504_v43 }
 0x83b   : > { %5398 = vpow2.f32 %v2460_v14 }
 0x83c   : > { %5400 = vpow2.f32 %v2458_v36 }
 0x83d   : > { %3253 = vperm.xlu1 %5039, %v8167_v40  }
 0x83e   : > { %3298 = vperm.xlu0 %5038, %v8169_v5   ;;  %v2501_v5 = vld [vmem:[#allocation3 + $0xb8] sm:$0xff] }
 0x83f   : > { %v2565_v25 = vmul.f32 %v9335_v23, %v2501_v5 }
 0x841   : > { %3263 = vperm.xlu1 %5039, %v8173_v55  }
 0x845   : > { %v5393_v62 = vpop.eup %5392  ;;  %3273 = vperm.xlu1 %5039, %v8176_v31  }
 0x846   : > { %v5395_v52 = vpop.eup %5394 }
 0x847   : > { %v8179_v48 = vpop.eup %5396  ;;  %3761 = vmatprep.mubr.f32.mxu1 %v5395_v52  ;;  %v8181_v7 = vadd.f32 %v5395_v52, %v5393_v62 }
 0x848   : > { %9333 = vst [vmem:[#allocation7_spill] sm:$0xff] %v8179_v48  ;;  %v8183_v54 = vpop.eup %5398  ;;  %3762 = vmatmul.mubr.f32.gmra.mxu1 %v5393_v62  ;;  %v2968_v62 = vld [vmem:[#allocation4 + $0x148] sm:$0xff] }
 0x849   : > { %3766 = vmatprep.mubr.f32.mxu1 %v8183_v54  ;;  %3283 = vperm.xlu1 %5039, %v8179_v48   ;;  %v8187_v33 = vpop.eup %5400  ;;  %v2972_v48 = vld [vmem:[#allocation4 + $0x168] sm:$0xff] }
 0x84c   : > { %3767 = vmatmul.mubr.f32.gmra.mxu1 %v8187_v33 }
 0x854   : > { %v2686_v14 = vpop.xlane.xlu0 %2685 }
 0x855   : > { %v2824_v36 = vadd.f32 %v2686_v14, %v2568_v13 }
 0x857   : > { %2889 = vst.msk [vmem:[#allocation3 + $0xd0] sm:$0xff] %vm2862_vm3, %v2824_v36 }
 0x85c   : > { %v8192_v2 = vpop.permute.xlu0 %2091 }
 0x85d   : > { %2697 = vadd.xlane.f32.xlu0 %v7743_v39  ;;  %v9336_v39 = vld [vmem:[#allocation104_spill] sm:$0xff] }
 0x85e   : > { %v1642_v36 = vsub.f32 %v9336_v39, %v9297_v42 }
 0x860   : > { %v3199_v52 = vpop.permute.xlu0 %3198  ;;  %v1766_v42 = vmul.f32 1.442695, %v1642_v36 }
 0x861   : > { %v3352_v6 = vmul.f32 %v3199_v52, %v2968_v62  ;;  %2703 = vadd.xlane.f32.xlu0 %v7755_v24  ;;  %v9337_v24 = vld [vmem:[#allocation24_spill] sm:$0xff] }
 0x863   : > { %v3833_v56 = vadd.f32 %v7946_v59, %v3352_v6  ;;  %v2217_v59 = vsub.f32 %v9337_v24, %v2082_v0 }
 0x864   : > { %v3209_v43 = vpop.permute.xlu0 %3208  ;;  %v2677_v53 = vpop.xlane.xlu1 %2676 }
 0x865   : > { %3897 = vst.msk [vmem:[#allocation4 + $0x148] sm:$0xff] %vm524_vm2, %v3833_v56  ;;  %v3354_v13 = vmul.f32 %v3209_v43, %v2970_v11  ;;  %v2821_v14 = vadd.f32 %v2677_v53, %v2565_v25  ;;  %2709 = vadd.xlane.f32.xlu0 %v7768_v20  ;;  %v9338_v25 = vld [vmem:[#allocation17_spill] sm:$0xff]  ;;  %v9339_v20 = vld [vmem:[#allocation18_spill] sm:$0xff]  ;;  %v2974_v43 = vld [vmem:[#allocation4 + $0x178] sm:$0xff]  ;;  %v2468_v24 = vmul.f32 1.442695, %v2217_v59 }
 0x866   : > { %v9340_v53 = vld [vmem:[#allocation163_spill] sm:$0xff]  ;;  %v2978_v59 = vld [vmem:[#allocation4 + $0x198] sm:$0xff] }
 0x867   : > { %v3835_v62 = vadd.f32 %v7973_v21, %v3354_v13  ;;  %2886 = vst.msk [vmem:[#allocation3 + $0xb8] sm:$0xff] %vm2862_vm3, %v2821_v14  ;;  %v2687_v21 = vadd.f32 %v7667_v29, %v7662_v58  ;;  %v2216_v13 = vsub.f32 %v9340_v53, %v2082_v0 }
 0x868   : > { %v3219_v6 = vpop.permute.xlu0 %3218  ;;  %v2077_v23 = vpop.permute.xlu1 %2076 }
 0x869   : > { %3899 = vst.msk [vmem:[#allocation4 + $0x158] sm:$0xff] %vm524_vm2, %v3835_v62  ;;  %v3356_v5 = vmul.f32 %v3219_v6, %v2972_v48  ;;  %v8206_v56 = vpop.f32.mrf.mxu1  ;;  %v2214_v11 = vsub.f32 %v9338_v25, %v2077_v23  ;;  %v2215_v52 = vsub.f32 %v9339_v20, %v2077_v23  ;;  %2715 = vadd.xlane.f32.xlu0 %v7778_v46  ;;  %v2976_v46 = vld [vmem:[#allocation4 + $0x188] sm:$0xff]  ;;  %v2466_v58 = vmul.f32 1.442695, %v2216_v13 }
 0x86a   : > { %v2980_v20 = vld [vmem:[#allocation4 + $0x1a8] sm:$0xff] }
 0x86b   : > { %v3837_v14 = vadd.f32 %v8002_v3, %v3356_v5  ;;  %v2462_v39 = vmul.f32 1.442695, %v2214_v11  ;;  %v2464_v62 = vmul.f32 1.442695, %v2215_v52  ;;  %v3735_v48 = vpop.f32.mrf.mxu1 }
 0x86c   : > { %v3229_v6 = vpop.permute.xlu0 %3228 }
 0x86d   : > { %3901 = vst.msk [vmem:[#allocation4 + $0x168] sm:$0xff] %vm524_vm2, %v3837_v14  ;;  %5402 = vpow2.f32 %v2462_v39  ;;  %v3358_v23 = vmul.f32 %v3229_v6, %v2974_v43  ;;  %v3738_v25 = vpop.f32.mrf.mxu1  ;;  %2688 = vadd.xlane.f32.xlu1 %v2687_v21  ;;  %2721 = vadd.xlane.f32.xlu0 %v7811_v61 }
 0x86e   : > { %5404 = vpow2.f32 %v2464_v62 }
 0x86f   : > { %5406 = vpow2.f32 %v1766_v42  ;;  %v3839_v29 = vadd.f32 %v8027_v22, %v3358_v23  ;;  %v3740_v3 = vpop.f32.mrf.mxu1  ;;  %v2967_v23 = vld [vmem:[#allocation4 + $0x140] sm:$0xff] }
 0x870   : > { %5408 = vpow2.f32 %v2468_v24  ;;  %v3239_v0 = vpop.permute.xlu0 %3238 }
 0x871   : > { %3903 = vst.msk [vmem:[#allocation4 + $0x178] sm:$0xff] %vm524_vm2, %v3839_v29  ;;  %v3360_v36 = vmul.f32 %v3239_v0, %v2976_v46  ;;  %2727 = vadd.xlane.f32.xlu0 %v7839_v37  ;;  %5410 = vpow2.f32 %v2466_v58  ;;  %v9346_v0 = vld [vmem:[#allocation107_spill] sm:$0xff] }
 0x873   : > { %v3841_v5 = vadd.f32 %v8095_v17, %v3360_v36  ;;  %v2693_v36 = vadd.f32 %v9346_v0, %v7725_v10 }
 0x874   : > { %v3249_v11 = vpop.permute.xlu0 %3248 }
 0x875   : > { %3905 = vst.msk [vmem:[#allocation4 + $0x188] sm:$0xff] %vm524_vm2, %v3841_v5  ;;  %v3362_v61 = vmul.f32 %v3249_v11, %v2978_v59  ;;  %2733 = vadd.xlane.f32.xlu0 %v7871_v35 }
 0x877   : > { %v3843_v22 = vadd.f32 %v8164_v9, %v3362_v61  ;;  %v9341_v9 = vld [vmem:[#allocation94_spill] sm:$0xff] }
 0x878   : > { %v3259_v52 = vpop.permute.xlu0 %3258 }
 0x879   : > { %3907 = vst.msk [vmem:[#allocation4 + $0x198] sm:$0xff] %vm524_vm2, %v3843_v22  ;;  %v3364_v42 = vmul.f32 %v3259_v52, %v2980_v20  ;;  %2739 = vadd.xlane.f32.xlu0 %v7907_v30  ;;  %v2503_v30 = vld [vmem:[#allocation3 + $0xc8] sm:$0xff]  ;;  %v2969_v52 = vld [vmem:[#allocation4 + $0x150] sm:$0xff] }
 0x87a   : > { %v5403_v37 = vpop.eup %5402  ;;  %v2567_v13 = vmul.f32 %v9341_v9, %v2503_v30 }
 0x87b   : > { %v5405_v43 = vpop.eup %5404  ;;  %v3845_v21 = vadd.f32 %v3738_v25, %v3364_v42  ;;  %v9345_v25 = vld [vmem:[#allocation29_spill] sm:$0xff] }
 0x87c   : > { %v8226_v53 = vpop.eup %5406  ;;  %3771 = vmatprep.mubr.f32.mxu1 %v5405_v43  ;;  %v3269_v48 = vpop.permute.xlu0 %3268  ;;  %v2220_v46 = vsub.f32 %v9345_v25, %v8192_v2  ;;  %v2975_v25 = vld [vmem:[#allocation4 + $0x180] sm:$0xff] }
 0x87d   : > { %v8228_v17 = vpop.eup %5408  ;;  %3909 = vst.msk [vmem:[#allocation4 + $0x1a8] sm:$0xff] %vm524_vm2, %v3845_v21  ;;  %3772 = vmatmul.mubr.f32.gmra.mxu1 %v5403_v37  ;;  %2745 = vadd.xlane.f32.xlu0 %v7931_v44  ;;  %v2786_v44 = vadd.f32 %v5405_v43, %v5403_v37  ;;  %v9347_v43 = vld [vmem:[#allocation41_spill] sm:$0xff]  ;;  %v9348_v21 = vld [vmem:[#allocation42_spill] sm:$0xff] }
 0x87e   : > { %3776 = vmatprep.mubr.f32.mxu1 %v8228_v17  ;;  %3293 = vperm.xlu1 %5039, %v8226_v53   ;;  %v8234_v35 = vpop.eup %5410  ;;  %v2474_v42 = vmul.f32 1.442695, %v2220_v46  ;;  %v2699_v30 = vadd.f32 %v9348_v21, %v9347_v43  ;;  %v9357_v21 = vld [vmem:[#allocation49_spill] sm:$0xff] }
 0x880   : > { %v8260_v9 = vpop.permute.xlu0 %3278 }
 0x881   : > { %3777 = vmatmul.mubr.f32.gmra.mxu1 %v8234_v35  ;;  %2751 = vadd.xlane.f32.xlu0 %v7956_v49  ;;  %v9342_v49 = vld [vmem:[#allocation31_spill] sm:$0xff] }
 0x885   : > { %2757 = vadd.xlane.f32.xlu0 %v7981_v27  ;;  %v2221_v27 = vsub.f32 %v9342_v49, %v8192_v2 }
 0x887   : > { %v2476_v59 = vmul.f32 1.442695, %v2221_v27 }
 0x889   : > { %2763 = vadd.xlane.f32.xlu0 %v8006_v60  ;;  %v2982_v60 = vld [vmem:[#allocation4 + $0x1b8] sm:$0xff] }
 0x88a   : > { %v3366_v5 = vmul.f32 %v3269_v48, %v2982_v60  ;;  %v9350_v48 = vld [vmem:[#allocation48_spill] sm:$0xff] }
 0x88d   : > { %2769 = vadd.xlane.f32.xlu0 %v8039_v38 }
 0x891   : > { %2775 = vadd.xlane.f32.xlu0 %v8107_v12  ;;  %v9343_v12 = vld [vmem:[#allocation21_spill] sm:$0xff] }
 0x895   : > { %2781 = vadd.xlane.f32.xlu0 %v8181_v7  ;;  %v9344_v7 = vld [vmem:[#allocation22_spill] sm:$0xff] }
 0x899   : > { %2787 = vadd.xlane.f32.xlu0 %v2786_v44  ;;  %v2683_v14 = vpop.xlane.xlu1 %2682 }
 0x89a   : > { %v2823_v39 = vadd.f32 %v2683_v14, %v2567_v13  ;;  %v2971_v13 = vld [vmem:[#allocation4 + $0x160] sm:$0xff] }
 0x89c   : > { %2888 = vst.msk [vmem:[#allocation3 + $0xc8] sm:$0xff] %vm2862_vm3, %v2823_v39 }
 0x89d   : > { %v2087_v62 = vpop.permute.xlu1 %2086 }
 0x89e   : > { %v8247_v38 = vpop.f32.mrf.mxu1  ;;  %v2218_v24 = vsub.f32 %v9343_v12, %v2087_v62  ;;  %v2219_v6 = vsub.f32 %v9344_v7, %v2087_v62  ;;  %v2973_v62 = vld [vmem:[#allocation4 + $0x170] sm:$0xff]  ;;  %v9351_v12 = vld [vmem:[#allocation45_spill] sm:$0xff]  ;;  %v8269_v7 = vpop.permute.xlu0 %3288 }
 0x8a0   : > { %v2470_v58 = vmul.f32 1.442695, %v2218_v24  ;;  %v2472_v29 = vmul.f32 1.442695, %v2219_v6  ;;  %v3745_v3 = vpop.f32.mrf.mxu1  ;;  %v2711_v24 = vadd.f32 %v9351_v12, %v9350_v48  ;;  %v2981_v48 = vld [vmem:[#allocation4 + $0x1b0] sm:$0xff] }
 0x8a1   : > { %v3194_v11 = vpop.permute.xlu1 %3193  ;;  %v9353_v3 = vld [vmem:[#allocation109_spill] sm:$0xff] }
 0x8a2   : > { %5412 = vpow2.f32 %v2470_v58  ;;  %v3748_v61 = vpop.f32.mrf.mxu1  ;;  %v3351_v20 = vmul.f32 %v3194_v11, %v2967_v23  ;;  %2694 = vadd.xlane.f32.xlu1 %v2693_v36  ;;  %v2506_v23 = vld [vmem:[#allocation3 + $0xe0] sm:$0xff]  ;;  %v9354_v36 = vld [vmem:[#allocation46_spill] sm:$0xff] }
 0x8a3   : > { %5414 = vpow2.f32 %v2472_v29  ;;  %v3847_v22 = vadd.f32 %v3748_v61, %v3366_v5  ;;  %v9352_v58 = vld [vmem:[#allocation105_spill] sm:$0xff]  ;;  %v2570_v0 = vmul.f32 %v9353_v3, %v2506_v23  ;;  %v9366_v3 = vld [vmem:[#allocation60_spill] sm:$0xff] }
 0x8a4   : > { %v3832_v37 = vadd.f32 %v7943_v26, %v3351_v20  ;;  %v3750_v2 = vpop.f32.mrf.mxu1  ;;  %5416 = vpow2.f32 %v2476_v59  ;;  %v9349_v26 = vld [vmem:[#allocation43_spill] sm:$0xff] }
 0x8a5   : > { %3911 = vst.msk [vmem:[#allocation4 + $0x1b8] sm:$0xff] %vm524_vm2, %v3847_v22  ;;  %v3204_v10 = vpop.permute.xlu1 %3203  ;;  %5418 = vpow2.f32 %v2474_v42  ;;  %v2705_v39 = vadd.f32 %v9349_v26, %v7757_v19  ;;  %v9356_v42 = vld [vmem:[#allocation39_spill] sm:$0xff] }
 0x8a6   : > { %3896 = vst.msk [vmem:[#allocation4 + $0x140] sm:$0xff] %vm524_vm2, %v3832_v37  ;;  %v3353_v44 = vmul.f32 %v3204_v10, %v2969_v52  ;;  %2700 = vadd.xlane.f32.xlu1 %v2699_v30  ;;  %v1645_v37 = vsub.f32 %v9356_v42, %v7684_v16  ;;  %v2977_v2 = vld [vmem:[#allocation4 + $0x190] sm:$0xff]  ;;  %v9358_v30 = vld [vmem:[#allocation50_spill] sm:$0xff]  ;;  %v2979_v16 = vld [vmem:[#allocation4 + $0x1a0] sm:$0xff] }
 0x8a7   : > { %v2723_v10 = vadd.f32 %v9358_v30, %v9357_v21  ;;  %v9372_v42 = vld [vmem:[#allocation75_spill] sm:$0xff] }
 0x8a8   : > { %v3834_v14 = vadd.f32 %v7969_v41, %v3353_v44  ;;  %v1772_v26 = vmul.f32 1.442695, %v1645_v37 }
 0x8a9   : > { %v3214_v49 = vpop.permute.xlu1 %3213 }
 0x8aa   : > { %3898 = vst.msk [vmem:[#allocation4 + $0x150] sm:$0xff] %vm524_vm2, %v3834_v14  ;;  %v3355_v27 = vmul.f32 %v3214_v49, %v2971_v13  ;;  %2706 = vadd.xlane.f32.xlu1 %v2705_v39  ;;  %v9359_v49 = vld [vmem:[#allocation51_spill] sm:$0xff]  ;;  %5420 = vpow2.f32 %v1772_v26 }
 0x8ac   : > { %v3836_v60 = vadd.f32 %v7996_v18, %v3355_v27  ;;  %v9355_v18 = vld [vmem:[#allocation47_spill] sm:$0xff]  ;;  %v9360_v27 = vld [vmem:[#allocation53_spill] sm:$0xff] }
 0x8ad   : > { %v3224_v6 = vpop.permute.xlu1 %3223  ;;  %v2717_v59 = vadd.f32 %v9355_v18, %v9354_v36  ;;  %v9367_v36 = vld [vmem:[#allocation59_spill] sm:$0xff]  ;;  %v9368_v18 = vld [vmem:[#allocation72_spill] sm:$0xff] }
 0x8ae   : > { %3900 = vst.msk [vmem:[#allocation4 + $0x160] sm:$0xff] %vm524_vm2, %v3836_v60  ;;  %v3357_v41 = vmul.f32 %v3224_v6, %v2973_v62  ;;  %2712 = vadd.xlane.f32.xlu1 %v2711_v24  ;;  %v2729_v62 = vadd.f32 %v9360_v27, %v9359_v49  ;;  %v9361_v24 = vld [vmem:[#allocation54_spill] sm:$0xff]  ;;  %v9362_v6 = vld [vmem:[#allocation56_spill] sm:$0xff]  ;;  %v2783_v27 = vadd.f32 %v8187_v33, %v8183_v54 }
 0x8af   : > { %v5413_v19 = vpop.eup %5412  ;;  %v2735_v23 = vadd.f32 %v9362_v6, %v9361_v24  ;;  %v2510_v24 = vld [vmem:[#allocation3 + $0x100] sm:$0xff]  ;;  %v9375_v33 = vld [vmem:[#allocation40_spill] sm:$0xff] }
 0x8b0   : > { %v5415_v46 = vpop.eup %5414  ;;  %v3838_v29 = vadd.f32 %v9352_v58, %v3357_v41 }
 0x8b1   : > { %3781 = vmatprep.mubr.f32.mxu1 %v5415_v46  ;;  %v2692_v5 = vpop.xlane.xlu0 %2691  ;;  %v3234_v11 = vpop.permute.xlu1 %3233  ;;  %v2792_v61 = vadd.f32 %v5415_v46, %v5413_v19  ;;  %v9364_v46 = vld [vmem:[#allocation57_spill] sm:$0xff] }
 0x8b2   : > { %v8276_v20 = vpop.eup %5416  ;;  %3902 = vst.msk [vmem:[#allocation4 + $0x170] sm:$0xff] %vm524_vm2, %v3838_v29  ;;  %v2826_v22 = vadd.f32 %v2692_v5, %v2570_v0  ;;  %3782 = vmatmul.mubr.f32.gmra.mxu1 %v5413_v19  ;;  %v3359_v52 = vmul.f32 %v3234_v11, %v2975_v25  ;;  %2718 = vadd.xlane.f32.xlu1 %v2717_v59  ;;  %v9363_v25 = vld [vmem:[#allocation55_spill] sm:$0xff]  ;;  %v9365_v29 = vld [vmem:[#allocation58_spill] sm:$0xff] }
 0x8b3   : > { %3786 = vmatprep.mubr.f32.mxu1 %v8276_v20  ;;  %2793 = vadd.xlane.f32.xlu0 %v2792_v61  ;;  %v5419_v44 = vpop.eup %5418  ;;  %v2741_v58 = vadd.f32 %v9364_v46, %v9363_v25  ;;  %v2747_v0 = vadd.f32 %v9366_v3, %v9365_v29  ;;  %v2753_v59 = vadd.f32 %v9368_v18, %v9367_v36  ;;  %v9369_v5 = vld [vmem:[#allocation78_spill] sm:$0xff]  ;;  %v2983_v61 = vld [vmem:[#allocation4 + $0x1c0] sm:$0xff]  ;;  %v2516_v29 = vld [vmem:[#allocation3 + $0x130] sm:$0xff] }
 0x8b4   : > { %2891 = vst.msk [vmem:[#allocation3 + $0xe0] sm:$0xff] %vm2862_vm3, %v2826_v22  ;;  %v3840_v43 = vadd.f32 %v8087_v32, %v3359_v52  ;;  %v9371_v52 = vld [vmem:[#allocation63_spill] sm:$0xff]  ;;  %v2505_v3 = vld [vmem:[#allocation3 + $0xd8] sm:$0xff] }
 0x8b5   : > { %v3244_v13 = vpop.permute.xlu1 %3243  ;;  %v2765_v37 = vadd.f32 %v9372_v42, %v9371_v52  ;;  %v9378_v36 = vld [vmem:[#allocation52_spill] sm:$0xff] }
 0x8b6   : > { %3904 = vst.msk [vmem:[#allocation4 + $0x180] sm:$0xff] %vm524_vm2, %v3840_v43  ;;  %3787 = vmatmul.mubr.f32.gmra.mxu1 %v5419_v44  ;;  %v3361_v14 = vmul.f32 %v3244_v13, %v2977_v2  ;;  %2724 = vadd.xlane.f32.xlu1 %v2723_v10  ;;  %v2984_v43 = vld [vmem:[#allocation4 + $0x1c8] sm:$0xff]  ;;  %v2771_v10 = vadd.f32 %v8046_v15, %v8041_v51 }
 0x8b7   : > { %v2789_v51 = vadd.f32 %v8234_v35, %v8228_v17  ;;  %v9373_v15 = vld [vmem:[#allocation86_spill] sm:$0xff]  ;;  %v2574_v17 = vmul.f32 %v9375_v33, %v2510_v24  ;;  %v2580_v18 = vmul.f32 %v9378_v36, %v2516_v29  ;;  %v2538_v36 = vld [vmem:[#allocation3 + $0x1e0] sm:$0xff] }
 0x8b8   : > { %v3842_v39 = vadd.f32 %v8156_v28, %v3361_v14  ;;  %v3368_v14 = vmul.f32 %v8260_v9, %v2984_v43  ;;  %v1644_v9 = vsub.f32 %v9373_v15, %v9320_v8  ;;  %v2512_v8 = vld [vmem:[#allocation3 + $0x110] sm:$0xff]  ;;  %v2526_v15 = vld [vmem:[#allocation3 + $0x180] sm:$0xff] }
 0x8b9   : > { %v3254_v60 = vpop.permute.xlu1 %3253  ;;  %v2520_v43 = vld [vmem:[#allocation3 + $0x150] sm:$0xff] }
 0x8ba   : > { %3906 = vst.msk [vmem:[#allocation4 + $0x190] sm:$0xff] %vm524_vm2, %v3842_v39  ;;  %v3363_v32 = vmul.f32 %v3254_v60, %v2979_v16  ;;  %2730 = vadd.xlane.f32.xlu1 %v2729_v62  ;;  %v2777_v39 = vadd.f32 %v8114_v47, %v8109_v34  ;;  %v8323_v62 = vpop.permute.xlu0 %3298  ;;  %v2508_v60 = vld [vmem:[#allocation3 + $0xf0] sm:$0xff]  ;;  %v2795_v34 = vadd.f32 %v5419_v44, %v8276_v20  ;;  %v1770_v47 = vmul.f32 1.442695, %v1644_v9  ;;  %v2514_v44 = vld [vmem:[#allocation3 + $0x120] sm:$0xff] }
 0x8bc   : > { %v3844_v12 = vadd.f32 %v8206_v56, %v3363_v32  ;;  %v8301_v56 = vpop.eup %5420  ;;  %v9374_v32 = vld [vmem:[#allocation36_spill] sm:$0xff]  ;;  %5422 = vpow2.f32 %v1770_v47 }
 0x8bd   : > { %v3264_v41 = vpop.permute.xlu1 %3263 }
 0x8be   : > { %3908 = vst.msk [vmem:[#allocation4 + $0x1a0] sm:$0xff] %vm524_vm2, %v3844_v12  ;;  %v3365_v19 = vmul.f32 %v3264_v41, %v2981_v48  ;;  %2736 = vadd.xlane.f32.xlu1 %v2735_v23  ;;  %v2572_v48 = vmul.f32 %v9374_v32, %v2508_v60  ;;  %v9376_v23 = vld [vmem:[#allocation38_spill] sm:$0xff]  ;;  %v2590_v32 = vmul.f32 %v8154_v45, %v2526_v15  ;;  %v2540_v15 = vld [vmem:[#allocation3 + $0x1f0] sm:$0xff] }
 0x8bf   : > { %v2576_v41 = vmul.f32 %v9376_v23, %v2512_v8 }
 0x8c0   : > { %v3846_v28 = vadd.f32 %v8247_v38, %v3365_v19  ;;  %v9370_v38 = vld [vmem:[#allocation61_spill] sm:$0xff] }
 0x8c1   : > { %v2759_v11 = vadd.f32 %v9370_v38, %v9369_v5  ;;  %v3274_v22 = vpop.permute.xlu1 %3273 }
 0x8c2   : > { %3910 = vst.msk [vmem:[#allocation4 + $0x1b0] sm:$0xff] %vm524_vm2, %v3846_v28  ;;  %2742 = vadd.xlane.f32.xlu1 %v2741_v58  ;;  %v3367_v2 = vmul.f32 %v3274_v22, %v2983_v61  ;;  %v9377_v28 = vld [vmem:[#allocation44_spill] sm:$0xff]  ;;  %v2518_v22 = vld [vmem:[#allocation3 + $0x140] sm:$0xff] }
 0x8c3   : > { %v2578_v25 = vmul.f32 %v9377_v28, %v2514_v44  ;;  %v2534_v28 = vld [vmem:[#allocation3 + $0x1c0] sm:$0xff] }
 0x8c5   : > { %v3284_v46 = vpop.permute.xlu1 %3283 }
 0x8c6   : > { %2748 = vadd.xlane.f32.xlu1 %v2747_v0 }
 0x8c9   : > { %3308 = vperm.xlu0 %5038, %v8301_v56   ;;  %v8336_v38 = vpop.eup %5422 }
 0x8ca   : > { %2754 = vadd.xlane.f32.xlu1 %v2753_v59  ;;  %v9379_v59 = vld [vmem:[#allocation100_spill] sm:$0xff] }
 0x8cb   : > { %v2569_v5 = vmul.f32 %v9379_v59, %v2505_v3 }
 0x8ce   : > { %2760 = vadd.xlane.f32.xlu1 %v2759_v11 }
 0x8d2   : > { %2766 = vadd.xlane.f32.xlu1 %v2765_v37  ;;  %v2582_v37 = vmul.f32 %v8128_v4, %v2518_v22 }
 0x8d3   : > { %v3753_v21 = vpop.f32.mrf.mxu1 }
 0x8d4   : > { %v3848_v30 = vadd.f32 %v3753_v21, %v3367_v2 }
 0x8d5   : > { %v3755_v13 = vpop.f32.mrf.mxu1 }
 0x8d6   : > { %3912 = vst.msk [vmem:[#allocation4 + $0x1c0] sm:$0xff] %vm524_vm2, %v3848_v30  ;;  %2772 = vadd.xlane.f32.xlu1 %v2771_v10  ;;  %v2584_v30 = vmul.f32 %v8133_v57, %v2520_v43  ;;  %v2522_v13 = vld [vmem:[#allocation3 + $0x160] sm:$0xff]  ;;  %v2986_v57 = vld [vmem:[#allocation4 + $0x1d8] sm:$0xff] }
 0x8d7   : > { %v3758_v26 = vpop.f32.mrf.mxu1  ;;  %v3370_v24 = vmul.f32 %v8269_v7, %v2986_v57 }
 0x8d8   : > { %v3849_v16 = vadd.f32 %v3758_v26, %v3368_v14  ;;  %v2586_v26 = vmul.f32 %v8141_v1, %v2522_v13 }
 0x8d9   : > { %v3760_v49 = vpop.f32.mrf.mxu1 }
 0x8da   : > { %3913 = vst.msk [vmem:[#allocation4 + $0x1c8] sm:$0xff] %vm524_vm2, %v3849_v16  ;;  %2778 = vadd.xlane.f32.xlu1 %v2777_v39  ;;  %v2524_v39 = vld [vmem:[#allocation3 + $0x170] sm:$0xff] }
 0x8db   : > { %v2588_v4 = vmul.f32 %v8147_v50, %v2524_v39  ;;  %v9384_v39 = vld [vmem:[#allocation33_spill] sm:$0xff] }
 0x8de   : > { %2784 = vadd.xlane.f32.xlu1 %v2783_v27  ;;  %v2985_v27 = vld [vmem:[#allocation4 + $0x1d0] sm:$0xff] }
 0x8df   : > { %v3369_v9 = vmul.f32 %v3284_v46, %v2985_v27 }
 0x8e2   : > { %2790 = vadd.xlane.f32.xlu1 %v2789_v51 }
 0x8e6   : > { %v2698_v12 = vpop.xlane.xlu0 %2697  ;;  %2796 = vadd.xlane.f32.xlu1 %v2795_v34 }
 0x8e7   : > { %v2828_v54 = vadd.f32 %v2698_v12, %v2572_v48  ;;  %v2528_v12 = vld [vmem:[#allocation3 + $0x190] sm:$0xff] }
 0x8e9   : > { %2893 = vst.msk [vmem:[#allocation3 + $0xf0] sm:$0xff] %vm2862_vm3, %v2828_v54 }
 0x8ea   : > { %v2704_v35 = vpop.xlane.xlu0 %2703 }
 0x8eb   : > { %v2830_v6 = vadd.f32 %v2704_v35, %v2574_v17  ;;  %v2592_v17 = vmul.f32 %v8162_v63, %v2528_v12 }
 0x8ed   : > { %2895 = vst.msk [vmem:[#allocation3 + $0x100] sm:$0xff] %vm2862_vm3, %v2830_v6  ;;  %v2530_v6 = vld [vmem:[#allocation3 + $0x1a0] sm:$0xff] }
 0x8ee   : > { %v2710_v20 = vpop.xlane.xlu0 %2709  ;;  %v2594_v23 = vmul.f32 %v8167_v40, %v2530_v6  ;;  %v9380_v40 = vld [vmem:[#allocation7_spill] sm:$0xff] }
 0x8ef   : > { %v2832_v19 = vadd.f32 %v2710_v20, %v2576_v41  ;;  %v2532_v41 = vld [vmem:[#allocation3 + $0x1b0] sm:$0xff] }
 0x8f0   : > { %v2596_v44 = vmul.f32 %v8173_v55, %v2532_v41  ;;  %v2602_v55 = vmul.f32 %v8226_v53, %v2538_v36  ;;  %v9383_v53 = vld [vmem:[#allocation103_spill] sm:$0xff] }
 0x8f1   : > { %2897 = vst.msk [vmem:[#allocation3 + $0x110] sm:$0xff] %vm2862_vm3, %v2832_v19 }
 0x8f2   : > { %v2716_v58 = vpop.xlane.xlu0 %2715 }
 0x8f3   : > { %v2834_v0 = vadd.f32 %v2716_v58, %v2578_v25  ;;  %v2598_v25 = vmul.f32 %v8176_v31, %v2534_v28  ;;  %v2536_v58 = vld [vmem:[#allocation3 + $0x1d0] sm:$0xff]  ;;  %v2507_v31 = vld [vmem:[#allocation3 + $0xe8] sm:$0xff] }
 0x8f4   : > { %v2600_v3 = vmul.f32 %v9380_v40, %v2536_v58 }
 0x8f5   : > { %2899 = vst.msk [vmem:[#allocation3 + $0x120] sm:$0xff] %vm2862_vm3, %v2834_v0 }
 0x8f6   : > { %v2722_v11 = vpop.xlane.xlu0 %2721  ;;  %v2689_v61 = vpop.xlane.xlu1 %2688 }
 0x8f7   : > { %v2836_v52 = vadd.f32 %v2722_v11, %v2580_v18  ;;  %v2825_v42 = vadd.f32 %v2689_v61, %v2569_v5  ;;  %3303 = vperm.xlu1 %5039, %v8336_v38   ;;  %v9381_v61 = vld [vmem:[#allocation28_spill] sm:$0xff] }
 0x8f8   : > { %v2571_v22 = vmul.f32 %v9381_v61, %v2507_v31  ;;  %v2527_v31 = vld [vmem:[#allocation3 + $0x188] sm:$0xff] }
 0x8f9   : > { %2901 = vst.msk [vmem:[#allocation3 + $0x130] sm:$0xff] %vm2862_vm3, %v2836_v52  ;;  %2890 = vst.msk [vmem:[#allocation3 + $0xd8] sm:$0xff] %vm2862_vm3, %v2825_v42  ;;  %v2509_v42 = vld [vmem:[#allocation3 + $0xf8] sm:$0xff] }
 0x8fa   : > { %v2728_v2 = vpop.xlane.xlu0 %2727  ;;  %v3294_v11 = vpop.permute.xlu1 %3293 }
 0x8fb   : > { %v2838_v21 = vadd.f32 %v2728_v2, %v2582_v37  ;;  %v9382_v2 = vld [vmem:[#allocation25_spill] sm:$0xff] }
 0x8fc   : > { %v2573_v43 = vmul.f32 %v9382_v2, %v2509_v42 }
 0x8fd   : > { %2903 = vst.msk [vmem:[#allocation3 + $0x140] sm:$0xff] %vm2862_vm3, %v2838_v21 }
 0x8fe   : > { %v2734_v10 = vpop.xlane.xlu0 %2733 }
 0x8ff   : > { %v2840_v14 = vadd.f32 %v2734_v10, %v2584_v30  ;;  %v2511_v30 = vld [vmem:[#allocation3 + $0x108] sm:$0xff] }
 0x900   : > { %v2575_v13 = vmul.f32 %v9383_v53, %v2511_v30 }
 0x901   : > { %2905 = vst.msk [vmem:[#allocation3 + $0x150] sm:$0xff] %vm2862_vm3, %v2840_v14 }
 0x902   : > { %v2740_v16 = vpop.xlane.xlu0 %2739 }
 0x903   : > { %v2842_v49 = vadd.f32 %v2740_v16, %v2586_v26  ;;  %v2513_v26 = vld [vmem:[#allocation3 + $0x118] sm:$0xff] }
 0x905   : > { %2907 = vst.msk [vmem:[#allocation3 + $0x160] sm:$0xff] %vm2862_vm3, %v2842_v49  ;;  %v2577_v49 = vmul.f32 %v9384_v39, %v2513_v26 }
 0x906   : > { %v2746_v51 = vpop.xlane.xlu0 %2745 }
 0x907   : > { %v2844_v60 = vadd.f32 %v2746_v51, %v2588_v4  ;;  %v2515_v4 = vld [vmem:[#allocation3 + $0x128] sm:$0xff] }
 0x908   : > { %v3763_v34 = vpop.f32.mrf.mxu1 }
 0x909   : > { %2909 = vst.msk [vmem:[#allocation3 + $0x170] sm:$0xff] %vm2862_vm3, %v2844_v60  ;;  %v3850_v47 = vadd.f32 %v3763_v34, %v3369_v9  ;;  %v2987_v9 = vld [vmem:[#allocation4 + $0x1e0] sm:$0xff]  ;;  %v2604_v34 = vmul.f32 %v8336_v38, %v2540_v15 }
 0x90a   : > { %v3765_v1 = vpop.f32.mrf.mxu1  ;;  %v2752_v48 = vpop.xlane.xlu0 %2751  ;;  %v9385_v60 = vld [vmem:[#allocation37_spill] sm:$0xff] }
 0x90b   : > { %3914 = vst.msk [vmem:[#allocation4 + $0x1d0] sm:$0xff] %vm524_vm2, %v3850_v47  ;;  %v2846_v54 = vadd.f32 %v2752_v48, %v2590_v32  ;;  %v2579_v57 = vmul.f32 %v9385_v60, %v2515_v4  ;;  %v2517_v32 = vld [vmem:[#allocation3 + $0x138] sm:$0xff]  ;;  %v3371_v1 = vmul.f32 %v3294_v11, %v2987_v9  ;;  %v9395_v9 = vld [vmem:[#allocation95_spill] sm:$0xff] }
 0x90c   : > { %v3768_v50 = vpop.f32.mrf.mxu1 }
 0x90d   : > { %2911 = vst.msk [vmem:[#allocation3 + $0x180] sm:$0xff] %vm2862_vm3, %v2846_v54  ;;  %v3851_v33 = vadd.f32 %v3768_v50, %v3370_v24  ;;  %v2988_v24 = vld [vmem:[#allocation4 + $0x1e8] sm:$0xff] }
 0x90e   : > { %v3770_v35 = vpop.f32.mrf.mxu1  ;;  %v2758_v8 = vpop.xlane.xlu0 %2757  ;;  %v3372_v38 = vmul.f32 %v8323_v62, %v2988_v24 }
 0x90f   : > { %3915 = vst.msk [vmem:[#allocation4 + $0x1d8] sm:$0xff] %vm524_vm2, %v3851_v33  ;;  %v2848_v45 = vadd.f32 %v2758_v8, %v2592_v17  ;;  %v9386_v17 = vld [vmem:[#allocation106_spill] sm:$0xff] }
 0x910   : > { %v2581_v35 = vmul.f32 %v9386_v17, %v2517_v32  ;;  %v9396_v32 = vld [vmem:[#allocation111_spill] sm:$0xff]  ;;  %v2541_v17 = vld [vmem:[#allocation3 + $0x1f8] sm:$0xff] }
 0x911   : > { %2913 = vst.msk [vmem:[#allocation3 + $0x190] sm:$0xff] %vm2862_vm3, %v2848_v45  ;;  %v2519_v45 = vld [vmem:[#allocation3 + $0x148] sm:$0xff] }
 0x912   : > { %v2764_v7 = vpop.xlane.xlu0 %2763 }
 0x913   : > { %v2850_v20 = vadd.f32 %v2764_v7, %v2594_v23 }
 0x915   : > { %2915 = vst.msk [vmem:[#allocation3 + $0x1a0] sm:$0xff] %vm2862_vm3, %v2850_v20  ;;  %v9387_v20 = vld [vmem:[#allocation90_spill] sm:$0xff] }
 0x916   : > { %v2770_v19 = vpop.xlane.xlu0 %2769 }
 0x917   : > { %v2852_v63 = vadd.f32 %v2770_v19, %v2596_v44  ;;  %v2583_v44 = vmul.f32 %v9387_v20, %v2519_v45 }
 0x919   : > { %2917 = vst.msk [vmem:[#allocation3 + $0x1b0] sm:$0xff] %vm2862_vm3, %v2852_v63  ;;  %v2521_v63 = vld [vmem:[#allocation3 + $0x158] sm:$0xff] }
 0x91a   : > { %v2776_v46 = vpop.xlane.xlu0 %2775 }
 0x91b   : > { %v2854_v29 = vadd.f32 %v2776_v46, %v2598_v25  ;;  %v9388_v46 = vld [vmem:[#allocation81_spill] sm:$0xff] }
 0x91c   : > { %v2585_v58 = vmul.f32 %v9388_v46, %v2521_v63 }
 0x91d   : > { %2919 = vst.msk [vmem:[#allocation3 + $0x1c0] sm:$0xff] %vm2862_vm3, %v2854_v29  ;;  %v2523_v29 = vld [vmem:[#allocation3 + $0x168] sm:$0xff] }
 0x91e   : > { %v2782_v0 = vpop.xlane.xlu0 %2781 }
 0x91f   : > { %v2856_v18 = vadd.f32 %v2782_v0, %v2600_v3  ;;  %v9389_v3 = vld [vmem:[#allocation84_spill] sm:$0xff] }
 0x920   : > { %v2587_v0 = vmul.f32 %v9389_v3, %v2523_v29 }
 0x921   : > { %2921 = vst.msk [vmem:[#allocation3 + $0x1d0] sm:$0xff] %vm2862_vm3, %v2856_v18  ;;  %v2525_v18 = vld [vmem:[#allocation3 + $0x178] sm:$0xff] }
 0x922   : > { %v2788_v59 = vpop.xlane.xlu0 %2787 }
 0x923   : > { %v2858_v5 = vadd.f32 %v2788_v59, %v2602_v55  ;;  %v9390_v59 = vld [vmem:[#allocation87_spill] sm:$0xff] }
 0x925   : > { %2923 = vst.msk [vmem:[#allocation3 + $0x1e0] sm:$0xff] %vm2862_vm3, %v2858_v5  ;;  %v2589_v5 = vmul.f32 %v9390_v59, %v2525_v18 }
 0x92b   : > { %v2695_v52 = vpop.xlane.xlu1 %2694 }
 0x92c   : > { %v2827_v37 = vadd.f32 %v2695_v52, %v2571_v22  ;;  %v9391_v22 = vld [vmem:[#allocation135_spill] sm:$0xff] }
 0x92d   : > { %v2591_v52 = vmul.f32 %v9391_v22, %v2527_v31 }
 0x92e   : > { %2892 = vst.msk [vmem:[#allocation3 + $0xe8] sm:$0xff] %vm2862_vm3, %v2827_v37  ;;  %v2529_v37 = vld [vmem:[#allocation3 + $0x198] sm:$0xff] }
 0x92f   : > { %v2701_v21 = vpop.xlane.xlu1 %2700 }
 0x930   : > { %v2829_v10 = vadd.f32 %v2701_v21, %v2573_v43  ;;  %v9392_v43 = vld [vmem:[#allocation115_spill] sm:$0xff] }
 0x931   : > { %v2593_v21 = vmul.f32 %v9392_v43, %v2529_v37 }
 0x932   : > { %2894 = vst.msk [vmem:[#allocation3 + $0xf8] sm:$0xff] %vm2862_vm3, %v2829_v10  ;;  %v2531_v10 = vld [vmem:[#allocation3 + $0x1a8] sm:$0xff] }
 0x933   : > { %v2707_v14 = vpop.xlane.xlu1 %2706 }
 0x934   : > { %v2831_v16 = vadd.f32 %v2707_v14, %v2575_v13  ;;  %v9393_v13 = vld [vmem:[#allocation112_spill] sm:$0xff] }
 0x935   : > { %v2595_v14 = vmul.f32 %v9393_v13, %v2531_v10 }
 0x936   : > { %2896 = vst.msk [vmem:[#allocation3 + $0x108] sm:$0xff] %vm2862_vm3, %v2831_v16  ;;  %v2533_v16 = vld [vmem:[#allocation3 + $0x1b8] sm:$0xff] }
 0x937   : > { %v2713_v27 = vpop.xlane.xlu1 %2712 }
 0x938   : > { %v2833_v51 = vadd.f32 %v2713_v27, %v2577_v49  ;;  %v9394_v49 = vld [vmem:[#allocation92_spill] sm:$0xff] }
 0x939   : > { %v2597_v27 = vmul.f32 %v9394_v49, %v2533_v16 }
 0x93a   : > { %2898 = vst.msk [vmem:[#allocation3 + $0x118] sm:$0xff] %vm2862_vm3, %v2833_v51  ;;  %v2535_v51 = vld [vmem:[#allocation3 + $0x1c8] sm:$0xff] }
 0x93b   : > { %v2719_v47 = vpop.xlane.xlu1 %2718  ;;  %v2599_v60 = vmul.f32 %v9395_v9, %v2535_v51 }
 0x93c   : > { %v2794_v48 = vpop.xlane.xlu0 %2793  ;;  %v2835_v12 = vadd.f32 %v2719_v47, %v2579_v57 }
 0x93d   : > { %v2860_v54 = vadd.f32 %v2794_v48, %v2604_v34  ;;  %v3773_v50 = vpop.f32.mrf.mxu1  ;;  %v2537_v34 = vld [vmem:[#allocation3 + $0x1d8] sm:$0xff] }
 0x93e   : > { %2900 = vst.msk [vmem:[#allocation3 + $0x128] sm:$0xff] %vm2862_vm3, %v2835_v12  ;;  %v3852_v33 = vadd.f32 %v3773_v50, %v3371_v1  ;;  %v2601_v1 = vmul.f32 %v9396_v32, %v2537_v34  ;;  %v2539_v12 = vld [vmem:[#allocation3 + $0x1e8] sm:$0xff] }
 0x93f   : > { %2925 = vst.msk [vmem:[#allocation3 + $0x1f0] sm:$0xff] %vm2862_vm3, %v2860_v54  ;;  %v3775_v8 = vpop.f32.mrf.mxu1  ;;  %v2725_v6 = vpop.xlane.xlu1 %2724  ;;  %v9397_v54 = vld [vmem:[#allocation15_spill] sm:$0xff] }
 0x940   : > { %3916 = vst.msk [vmem:[#allocation4 + $0x1e0] sm:$0xff] %vm524_vm2, %v3852_v33  ;;  %v2837_v23 = vadd.f32 %v2725_v6, %v2581_v35  ;;  %v2603_v50 = vmul.f32 %v9397_v54, %v2539_v12  ;;  %v2605_v8 = vmul.f32 %v8301_v56, %v2541_v17 }
 0x941   : > { %v3778_v7 = vpop.f32.mrf.mxu1 }
 0x942   : > { %2902 = vst.msk [vmem:[#allocation3 + $0x138] sm:$0xff] %vm2862_vm3, %v2837_v23  ;;  %v3853_v41 = vadd.f32 %v3778_v7, %v3372_v38  ;;  %v2989_v38 = vld [vmem:[#allocation4 + $0x1f0] sm:$0xff]  ;;  %v2990_v23 = vld [vmem:[#allocation4 + $0x1f8] sm:$0xff] }
 0x943   : > { %v3780_v19 = vpop.f32.mrf.mxu1  ;;  %v2731_v28 = vpop.xlane.xlu1 %2730 }
 0x944   : > { %3917 = vst.msk [vmem:[#allocation4 + $0x1e8] sm:$0xff] %vm524_vm2, %v3853_v41  ;;  %v2839_v25 = vadd.f32 %v2731_v28, %v2583_v44  ;;  %v3309_v7 = vpop.permute.xlu0 %3308 }
 0x945   : > { %v3374_v28 = vmul.f32 %v3309_v7, %v2990_v23 }
 0x946   : > { %2904 = vst.msk [vmem:[#allocation3 + $0x148] sm:$0xff] %vm2862_vm3, %v2839_v25 }
 0x947   : > { %v2737_v62 = vpop.xlane.xlu1 %2736 }
 0x948   : > { %v2841_v40 = vadd.f32 %v2737_v62, %v2585_v58 }
 0x94a   : > { %2906 = vst.msk [vmem:[#allocation3 + $0x158] sm:$0xff] %vm2862_vm3, %v2841_v40 }
 0x94b   : > { %v2743_v36 = vpop.xlane.xlu1 %2742 }
 0x94c   : > { %v2843_v55 = vadd.f32 %v2743_v36, %v2587_v0 }
 0x94e   : > { %2908 = vst.msk [vmem:[#allocation3 + $0x168] sm:$0xff] %vm2862_vm3, %v2843_v55 }
 0x94f   : > { %v2749_v11 = vpop.xlane.xlu1 %2748 }
 0x950   : > { %v2845_v61 = vadd.f32 %v2749_v11, %v2589_v5 }
 0x952   : > { %2910 = vst.msk [vmem:[#allocation3 + $0x178] sm:$0xff] %vm2862_vm3, %v2845_v61 }
 0x953   : > { %v2755_v42 = vpop.xlane.xlu1 %2754 }
 0x954   : > { %v2847_v2 = vadd.f32 %v2755_v42, %v2591_v52 }
 0x956   : > { %2912 = vst.msk [vmem:[#allocation3 + $0x188] sm:$0xff] %vm2862_vm3, %v2847_v2 }
 0x957   : > { %v2761_v30 = vpop.xlane.xlu1 %2760 }
 0x958   : > { %v2849_v53 = vadd.f32 %v2761_v30, %v2593_v21 }
 0x95a   : > { %2914 = vst.msk [vmem:[#allocation3 + $0x198] sm:$0xff] %vm2862_vm3, %v2849_v53 }
 0x95b   : > { %v2767_v26 = vpop.xlane.xlu1 %2766 }
 0x95c   : > { %v2851_v39 = vadd.f32 %v2767_v26, %v2595_v14 }
 0x95e   : > { %2916 = vst.msk [vmem:[#allocation3 + $0x1a8] sm:$0xff] %vm2862_vm3, %v2851_v39 }
 0x95f   : > { %v2773_v4 = vpop.xlane.xlu1 %2772 }
 0x960   : > { %v2853_v15 = vadd.f32 %v2773_v4, %v2597_v27 }
 0x962   : > { %2918 = vst.msk [vmem:[#allocation3 + $0x1b8] sm:$0xff] %vm2862_vm3, %v2853_v15 }
 0x963   : > { %v2779_v57 = vpop.xlane.xlu1 %2778 }
 0x964   : > { %v2855_v47 = vadd.f32 %v2779_v57, %v2599_v60 }
 0x966   : > { %2920 = vst.msk [vmem:[#allocation3 + $0x1c8] sm:$0xff] %vm2862_vm3, %v2855_v47 }
 0x967   : > { %v2785_v48 = vpop.xlane.xlu1 %2784 }
 0x968   : > { %v2857_v24 = vadd.f32 %v2785_v48, %v2601_v1 }
 0x96a   : > { %2922 = vst.msk [vmem:[#allocation3 + $0x1d8] sm:$0xff] %vm2862_vm3, %v2857_v24 }
 0x96b   : > { %v2791_v33 = vpop.xlane.xlu1 %2790 }
 0x96c   : > { %v2859_v35 = vadd.f32 %v2791_v33, %v2603_v50 }
 0x96e   : > { %2924 = vst.msk [vmem:[#allocation3 + $0x1e8] sm:$0xff] %vm2862_vm3, %v2859_v35 }
 0x96f   : > { %v2797_v6 = vpop.xlane.xlu1 %2796 }
 0x970   : > { %v2861_v45 = vadd.f32 %v2797_v6, %v2605_v8 }
 0x972   : > { %2926 = vst.msk [vmem:[#allocation3 + $0x1f8] sm:$0xff] %vm2862_vm3, %v2861_v45  ;;  %v3783_v41 = vpop.f32.mrf.mxu1 }
 0x973   : > { %v3304_v20 = vpop.permute.xlu1 %3303 }
 0x974   : > { %v3785_v44 = vpop.f32.mrf.mxu1  ;;  %v3373_v19 = vmul.f32 %v3304_v20, %v2989_v38 }
 0x975   : > { %3987 = sbr.rel (%p4830_p8) target bundleno = 2693 (0xa85), region = 40 }
 0x976   : > { %v3854_v63 = vadd.f32 %v3783_v41, %v3373_v19  ;;  %v3788_v25 = vpop.f32.mrf.mxu1 }
 0x977   : > { %v3855_v46 = vadd.f32 %v3788_v25, %v3374_v28 }
 0x978   : > { %3918 = vst.msk [vmem:[#allocation4 + $0x1f0] sm:$0xff] %vm524_vm2, %v3854_v63  ;;  %v3790_v58 = vpop.f32.mrf.mxu1 }
 0x979   : > { %3919 = vst.msk [vmem:[#allocation4 + $0x1f8] sm:$0xff] %vm524_vm2, %v3855_v46 }
 0x97a   : > { %v4054_v56 = vld [vmem:[#allocation3 + $0x10] sm:$0xff]  ;;  %v4052_v62 = vld [vmem:[#allocation3] sm:$0xff]  ;;  %v4055_v29 = vld [vmem:[#allocation3 + $0x18] sm:$0xff]  ;;  %v5598_v40 = vmov 0  }
 0x97b   : > { %5425 = vset.pattern.permute.xlu1 %v5598_v40  ;;  %5424 = vset.pattern.permute.xlu0 %v5598_v40  ;;  %5426 = vrcp.f32 %v4054_v56  ;;  %v4053_v3 = vld [vmem:[#allocation3 + $0x8] sm:$0xff]  ;;  %v4056_v36 = vld [vmem:[#allocation3 + $0x20] sm:$0xff]  ;;  %v4059_v18 = vld [vmem:[#allocation3 + $0x38] sm:$0xff] }
 0x97c   : > { %5428 = vrcp.f32 %v4052_v62  ;;  %v4057_v0 = vld [vmem:[#allocation3 + $0x28] sm:$0xff]  ;;  %v4058_v55 = vld [vmem:[#allocation3 + $0x30] sm:$0xff]  ;;  %v4060_v5 = vld [vmem:[#allocation3 + $0x40] sm:$0xff] }
 0x97d   : > { %5430 = vrcp.f32 %v4055_v29  ;;  %v4061_v59 = vld [vmem:[#allocation3 + $0x48] sm:$0xff]  ;;  %v4063_v22 = vld [vmem:[#allocation3 + $0x58] sm:$0xff]  ;;  %v4062_v42 = vld [vmem:[#allocation3 + $0x50] sm:$0xff] }
 0x97e   : > { %5432 = vrcp.f32 %v4053_v3  ;;  %v4065_v2 = vld [vmem:[#allocation3 + $0x68] sm:$0xff]  ;;  %v4064_v21 = vld [vmem:[#allocation3 + $0x60] sm:$0xff]  ;;  %v4067_v10 = vld [vmem:[#allocation3 + $0x78] sm:$0xff] }
 0x97f   : > { %5434 = vrcp.f32 %v4057_v0  ;;  %v4066_v13 = vld [vmem:[#allocation3 + $0x70] sm:$0xff]  ;;  %v4069_v26 = vld [vmem:[#allocation3 + $0x88] sm:$0xff]  ;;  %v4068_v39 = vld [vmem:[#allocation3 + $0x80] sm:$0xff] }
 0x980   : > { %5436 = vrcp.f32 %v4056_v36  ;;  %v4071_v27 = vld [vmem:[#allocation3 + $0x98] sm:$0xff]  ;;  %v4070_v51 = vld [vmem:[#allocation3 + $0x90] sm:$0xff]  ;;  %v4073_v9 = vld [vmem:[#allocation3 + $0xa8] sm:$0xff] }
 0x981   : > { %5438 = vrcp.f32 %v4059_v18  ;;  %v4072_v57 = vld [vmem:[#allocation3 + $0xa0] sm:$0xff]  ;;  %v4075_v47 = vld [vmem:[#allocation3 + $0xb8] sm:$0xff]  ;;  %v4074_v1 = vld [vmem:[#allocation3 + $0xb0] sm:$0xff] }
 0x982   : > { %5440 = vrcp.f32 %v4058_v55  ;;  %v4077_v12 = vld [vmem:[#allocation3 + $0xc8] sm:$0xff]  ;;  %v4076_v54 = vld [vmem:[#allocation3 + $0xc0] sm:$0xff]  ;;  %v4079_v33 = vld [vmem:[#allocation3 + $0xd8] sm:$0xff] }
 0x983   : > { %5442 = vrcp.f32 %v4061_v59  ;;  %v4078_v35 = vld [vmem:[#allocation3 + $0xd0] sm:$0xff]  ;;  %v4081_v6 = vld [vmem:[#allocation3 + $0xe8] sm:$0xff]  ;;  %v4080_v38 = vld [vmem:[#allocation3 + $0xe0] sm:$0xff] }
 0x984   : > { %5444 = vrcp.f32 %v4060_v5  ;;  %v4083_v7 = vld [vmem:[#allocation3 + $0xf8] sm:$0xff]  ;;  %v4082_v20 = vld [vmem:[#allocation3 + $0xf0] sm:$0xff]  ;;  %v4085_v19 = vld [vmem:[#allocation3 + $0x108] sm:$0xff] }
 0x985   : > { %5446 = vrcp.f32 %v4063_v22  ;;  %v4084_v63 = vld [vmem:[#allocation3 + $0x100] sm:$0xff]  ;;  %v4087_v46 = vld [vmem:[#allocation3 + $0x118] sm:$0xff]  ;;  %v4086_v56 = vld [vmem:[#allocation3 + $0x110] sm:$0xff] }
 0x986   : > { %5448 = vrcp.f32 %v4062_v42  ;;  %v4089_v29 = vld [vmem:[#allocation3 + $0x128] sm:$0xff]  ;;  %v4088_v3 = vld [vmem:[#allocation3 + $0x120] sm:$0xff]  ;;  %v4091_v36 = vld [vmem:[#allocation3 + $0x138] sm:$0xff] }
 0x987   : > { %5450 = vrcp.f32 %v4065_v2  ;;  %v4090_v55 = vld [vmem:[#allocation3 + $0x130] sm:$0xff]  ;;  %v4093_v5 = vld [vmem:[#allocation3 + $0x148] sm:$0xff]  ;;  %v4095_v22 = vld [vmem:[#allocation3 + $0x158] sm:$0xff] }
 0x988   : > { %v5427_v11 = vpop.eup %5426  ;;  %5452 = vrcp.f32 %v4064_v21  ;;  %v4094_v42 = vld [vmem:[#allocation3 + $0x150] sm:$0xff]  ;;  %v4097_v2 = vld [vmem:[#allocation3 + $0x168] sm:$0xff]  ;;  %v4096_v21 = vld [vmem:[#allocation3 + $0x160] sm:$0xff] }
 0x989   : > { %v5429_v31 = vpop.eup %5428  ;;  %4192 = vperm.xlu1 %5425, %v5427_v11   ;;  %5454 = vrcp.f32 %v4067_v10  ;;  %v4099_v10 = vld [vmem:[#allocation3 + $0x178] sm:$0xff] }
 0x98a   : > { %v5431_v61 = vpop.eup %5430  ;;  %4182 = vperm.xlu0 %5424, %v5429_v31   ;;  %5456 = vrcp.f32 %v4066_v13  ;;  %v4092_v31 = vld [vmem:[#allocation3 + $0x140] sm:$0xff]  ;;  %v4098_v13 = vld [vmem:[#allocation3 + $0x170] sm:$0xff] }
 0x98b   : > { %v5433_v52 = vpop.eup %5432  ;;  %5458 = vrcp.f32 %v4069_v26  ;;  %v4101_v26 = vld [vmem:[#allocation3 + $0x188] sm:$0xff] }
 0x98c   : > { %v5435_v37 = vpop.eup %5434  ;;  %5460 = vrcp.f32 %v4068_v39  ;;  %v4100_v39 = vld [vmem:[#allocation3 + $0x180] sm:$0xff] }
 0x98d   : > { %4197 = vperm.xlu1 %5425, %v5431_v61   ;;  %v5437_v43 = vpop.eup %5436  ;;  %5462 = vrcp.f32 %v4071_v27  ;;  %v4103_v27 = vld [vmem:[#allocation3 + $0x198] sm:$0xff] }
 0x98e   : > { %4187 = vperm.xlu0 %5424, %v5433_v52   ;;  %v5439_v30 = vpop.eup %5438  ;;  %5464 = vrcp.f32 %v4070_v51  ;;  %v4102_v51 = vld [vmem:[#allocation3 + $0x190] sm:$0xff] }
 0x98f   : > { %v5441_v53 = vpop.eup %5440  ;;  %5466 = vrcp.f32 %v4073_v9  ;;  %v4105_v9 = vld [vmem:[#allocation3 + $0x1a8] sm:$0xff] }
 0x990   : > { %v5443_v14 = vpop.eup %5442  ;;  %5468 = vrcp.f32 %v4072_v57  ;;  %v4104_v57 = vld [vmem:[#allocation3 + $0x1a0] sm:$0xff] }
 0x991   : > { %4207 = vperm.xlu1 %5425, %v5435_v37   ;;  %v5445_v16 = vpop.eup %5444  ;;  %5470 = vrcp.f32 %v4075_v47  ;;  %v4107_v47 = vld [vmem:[#allocation3 + $0x1b8] sm:$0xff] }
 0x992   : > { %4202 = vperm.xlu0 %5424, %v5437_v43   ;;  %v5447_v49 = vpop.eup %5446  ;;  %5472 = vrcp.f32 %v4074_v1  ;;  %v4106_v1 = vld [vmem:[#allocation3 + $0x1b0] sm:$0xff] }
 0x993   : > { %v5449_v4 = vpop.eup %5448  ;;  %5474 = vrcp.f32 %v4077_v12  ;;  %v4109_v12 = vld [vmem:[#allocation3 + $0x1c8] sm:$0xff] }
 0x994   : > { %v5451_v15 = vpop.eup %5450  ;;  %5476 = vrcp.f32 %v4076_v54  ;;  %v4108_v54 = vld [vmem:[#allocation3 + $0x1c0] sm:$0xff] }
 0x995   : > { %4217 = vperm.xlu1 %5425, %v5439_v30   ;;  %v5453_v60 = vpop.eup %5452  ;;  %5478 = vrcp.f32 %v4079_v33  ;;  %v4111_v33 = vld [vmem:[#allocation3 + $0x1d8] sm:$0xff] }
 0x996   : > { %4212 = vperm.xlu0 %5424, %v5441_v53   ;;  %v5455_v34 = vpop.eup %5454  ;;  %5480 = vrcp.f32 %v4078_v35  ;;  %v4110_v35 = vld [vmem:[#allocation3 + $0x1d0] sm:$0xff] }
 0x997   : > { %v5457_v32 = vpop.eup %5456  ;;  %5482 = vrcp.f32 %v4081_v6  ;;  %v4113_v6 = vld [vmem:[#allocation3 + $0x1e8] sm:$0xff] }
 0x998   : > { %v5459_v48 = vpop.eup %5458  ;;  %5484 = vrcp.f32 %v4080_v38  ;;  %v4112_v38 = vld [vmem:[#allocation3 + $0x1e0] sm:$0xff] }
 0x999   : > { %4227 = vperm.xlu1 %5425, %v5443_v14   ;;  %v5461_v24 = vpop.eup %5460  ;;  %5486 = vrcp.f32 %v4083_v7  ;;  %v4115_v7 = vld [vmem:[#allocation3 + $0x1f8] sm:$0xff] }
 0x99a   : > { %4222 = vperm.xlu0 %5424, %v5445_v16   ;;  %v5463_v50 = vpop.eup %5462  ;;  %5488 = vrcp.f32 %v4082_v20  ;;  %v4114_v20 = vld [vmem:[#allocation3 + $0x1f0] sm:$0xff] }
 0x99b   : > { %v5465_v17 = vpop.eup %5464  ;;  %5490 = vrcp.f32 %v4085_v19 }
 0x99c   : > { %v5467_v8 = vpop.eup %5466  ;;  %5492 = vrcp.f32 %v4084_v63 }
 0x99d   : > { %4237 = vperm.xlu1 %5425, %v5447_v49   ;;  %v5469_v45 = vpop.eup %5468  ;;  %5494 = vrcp.f32 %v4087_v46 }
 0x99e   : > { %4232 = vperm.xlu0 %5424, %v5449_v4   ;;  %v5471_v23 = vpop.eup %5470  ;;  %5496 = vrcp.f32 %v4086_v56  ;;  %v3990_v56 = vld [vmem:[#allocation4 + $0x10] sm:$0xff] }
 0x99f   : > { %v5473_v41 = vpop.eup %5472  ;;  %5498 = vrcp.f32 %v4089_v29  ;;  %v3988_v29 = vld [vmem:[#allocation4] sm:$0xff] }
 0x9a0   : > { %v5475_v44 = vpop.eup %5474  ;;  %5500 = vrcp.f32 %v4088_v3 }
 0x9a1   : > { %4247 = vperm.xlu1 %5425, %v5451_v15   ;;  %v5477_v28 = vpop.eup %5476  ;;  %5502 = vrcp.f32 %v4091_v36 }
 0x9a2   : > { %4242 = vperm.xlu0 %5424, %v5453_v60   ;;  %v5479_v25 = vpop.eup %5478  ;;  %5504 = vrcp.f32 %v4090_v55  ;;  %v3989_v55 = vld [vmem:[#allocation4 + $0x8] sm:$0xff] }
 0x9a3   : > { %v5481_v58 = vpop.eup %5480  ;;  %5506 = vrcp.f32 %v4093_v5 }
 0x9a4   : > { %v5483_v62 = vpop.eup %5482  ;;  %5508 = vrcp.f32 %v4092_v31 }
 0x9a5   : > { %4257 = vperm.xlu1 %5425, %v5455_v34   ;;  %v5485_v40 = vpop.eup %5484  ;;  %5510 = vrcp.f32 %v4095_v22  ;;  %v3992_v22 = vld [vmem:[#allocation4 + $0x20] sm:$0xff] }
 0x9a6   : > { %4252 = vperm.xlu0 %5424, %v5457_v32   ;;  %v5487_v0 = vpop.eup %5486  ;;  %5512 = vrcp.f32 %v4094_v42 }
 0x9a7   : > { %v5489_v18 = vpop.eup %5488  ;;  %5514 = vrcp.f32 %v4097_v2 }
 0x9a8   : > { %v5491_v59 = vpop.eup %5490  ;;  %5516 = vrcp.f32 %v4096_v21  ;;  %v3994_v21 = vld [vmem:[#allocation4 + $0x30] sm:$0xff] }
 0x9a9   : > { %4267 = vperm.xlu1 %5425, %v5459_v48   ;;  %v5493_v11 = vpop.eup %5492  ;;  %5518 = vrcp.f32 %v4099_v10 }
 0x9aa   : > { %4262 = vperm.xlu0 %5424, %v5461_v24   ;;  %v5495_v61 = vpop.eup %5494  ;;  %5520 = vrcp.f32 %v4098_v13 }
 0x9ab   : > { %v5497_v52 = vpop.eup %5496  ;;  %5522 = vrcp.f32 %v4101_v26  ;;  %v3996_v26 = vld [vmem:[#allocation4 + $0x40] sm:$0xff] }
 0x9ac   : > { %v5499_v37 = vpop.eup %5498  ;;  %5524 = vrcp.f32 %v4100_v39 }
 0x9ad   : > { %4277 = vperm.xlu1 %5425, %v5463_v50   ;;  %v5501_v43 = vpop.eup %5500  ;;  %5526 = vrcp.f32 %v4103_v27 }
 0x9ae   : > { %4272 = vperm.xlu0 %5424, %v5465_v17   ;;  %v5503_v30 = vpop.eup %5502  ;;  %5528 = vrcp.f32 %v4102_v51  ;;  %v3998_v51 = vld [vmem:[#allocation4 + $0x50] sm:$0xff] }
 0x9af   : > { %v5505_v53 = vpop.eup %5504  ;;  %5530 = vrcp.f32 %v4105_v9 }
 0x9b0   : > { %v5507_v14 = vpop.eup %5506  ;;  %5532 = vrcp.f32 %v4104_v57 }
 0x9b1   : > { %4287 = vperm.xlu1 %5425, %v5467_v8   ;;  %v5509_v16 = vpop.eup %5508  ;;  %5534 = vrcp.f32 %v4107_v47  ;;  %v4000_v47 = vld [vmem:[#allocation4 + $0x60] sm:$0xff] }
 0x9b2   : > { %4282 = vperm.xlu0 %5424, %v5469_v45   ;;  %v5511_v49 = vpop.eup %5510  ;;  %5536 = vrcp.f32 %v4106_v1 }
 0x9b3   : > { %v5513_v4 = vpop.eup %5512  ;;  %5538 = vrcp.f32 %v4109_v12 }
 0x9b4   : > { %v5515_v15 = vpop.eup %5514  ;;  %5540 = vrcp.f32 %v4108_v54  ;;  %v4002_v54 = vld [vmem:[#allocation4 + $0x70] sm:$0xff] }
 0x9b5   : > { %4297 = vperm.xlu1 %5425, %v5471_v23   ;;  %v5517_v60 = vpop.eup %5516  ;;  %5542 = vrcp.f32 %v4111_v33 }
 0x9b6   : > { %4292 = vperm.xlu0 %5424, %v5473_v41   ;;  %v5519_v34 = vpop.eup %5518  ;;  %5544 = vrcp.f32 %v4110_v35 }
 0x9b7   : > { %v5521_v32 = vpop.eup %5520  ;;  %5546 = vrcp.f32 %v4113_v6  ;;  %v4004_v6 = vld [vmem:[#allocation4 + $0x80] sm:$0xff] }
 0x9b8   : > { %v5523_v48 = vpop.eup %5522  ;;  %5548 = vrcp.f32 %v4112_v38 }
 0x9b9   : > { %4307 = vperm.xlu1 %5425, %v5475_v44   ;;  %v5525_v24 = vpop.eup %5524  ;;  %5550 = vrcp.f32 %v4115_v7 }
 0x9ba   : > { %4302 = vperm.xlu0 %5424, %v5477_v28   ;;  %v5527_v50 = vpop.eup %5526  ;;  %5552 = vrcp.f32 %v4114_v20  ;;  %v4006_v20 = vld [vmem:[#allocation4 + $0x90] sm:$0xff] }
 0x9bb   : > { %v5529_v17 = vpop.eup %5528 }
 0x9bc   : > { %v5531_v8 = vpop.eup %5530 }
 0x9bd   : > { %4317 = vperm.xlu1 %5425, %v5479_v25   ;;  %v5533_v45 = vpop.eup %5532 }
 0x9be   : > { %4312 = vperm.xlu0 %5424, %v5481_v58   ;;  %v5535_v23 = vpop.eup %5534 }
 0x9bf   : > { %v5537_v41 = vpop.eup %5536 }
 0x9c0   : > { %v5539_v44 = vpop.eup %5538 }
 0x9c1   : > { %4327 = vperm.xlu1 %5425, %v5483_v62   ;;  %v5541_v19 = vpop.eup %5540 }
 0x9c2   : > { %4322 = vperm.xlu0 %5424, %v5485_v40   ;;  %v5543_v28 = vpop.eup %5542 }
 0x9c3   : > { %v5545_v63 = vpop.eup %5544 }
 0x9c4   : > { %v5547_v25 = vpop.eup %5546 }
 0x9c5   : > { %4337 = vperm.xlu1 %5425, %v5487_v0   ;;  %v5549_v46 = vpop.eup %5548 }
 0x9c6   : > { %4332 = vperm.xlu0 %5424, %v5489_v18   ;;  %v5551_v58 = vpop.eup %5550  ;;  %v3991_v18 = vld [vmem:[#allocation4 + $0x18] sm:$0xff] }
 0x9c7   : > { %v5553_v62 = vpop.eup %5552 }
 0x9c9   : > { %4347 = vperm.xlu1 %5425, %v5491_v59  }
 0x9ca   : > { %4342 = vperm.xlu0 %5424, %v5493_v11  }
 0x9cd   : > { %4357 = vperm.xlu1 %5425, %v5495_v61   ;;  %v3993_v61 = vld [vmem:[#allocation4 + $0x28] sm:$0xff] }
 0x9ce   : > { %4352 = vperm.xlu0 %5424, %v5497_v52  }
 0x9d1   : > { %4367 = vperm.xlu1 %5425, %v5499_v37  }
 0x9d2   : > { %4362 = vperm.xlu0 %5424, %v5501_v43   ;;  %v3995_v43 = vld [vmem:[#allocation4 + $0x38] sm:$0xff] }
 0x9d5   : > { %4377 = vperm.xlu1 %5425, %v5503_v30  }
 0x9d6   : > { %4372 = vperm.xlu0 %5424, %v5505_v53  }
 0x9d9   : > { %4387 = vperm.xlu1 %5425, %v5507_v14   ;;  %v3997_v14 = vld [vmem:[#allocation4 + $0x48] sm:$0xff] }
 0x9da   : > { %4382 = vperm.xlu0 %5424, %v5509_v16  }
 0x9dd   : > { %4397 = vperm.xlu1 %5425, %v5511_v49  }
 0x9de   : > { %4392 = vperm.xlu0 %5424, %v5513_v4   ;;  %v3999_v4 = vld [vmem:[#allocation4 + $0x58] sm:$0xff] }
 0x9e1   : > { %4407 = vperm.xlu1 %5425, %v5515_v15  }
 0x9e2   : > { %4402 = vperm.xlu0 %5424, %v5517_v60  }
 0x9e5   : > { %4417 = vperm.xlu1 %5425, %v5519_v34   ;;  %v4001_v34 = vld [vmem:[#allocation4 + $0x68] sm:$0xff] }
 0x9e6   : > { %4412 = vperm.xlu0 %5424, %v5521_v32  }
 0x9e9   : > { %4427 = vperm.xlu1 %5425, %v5523_v48  }
 0x9ea   : > { %4422 = vperm.xlu0 %5424, %v5525_v24   ;;  %v4003_v24 = vld [vmem:[#allocation4 + $0x78] sm:$0xff] }
 0x9ed   : > { %4437 = vperm.xlu1 %5425, %v5527_v50  }
 0x9ee   : > { %4432 = vperm.xlu0 %5424, %v5529_v17  }
 0x9f1   : > { %4447 = vperm.xlu1 %5425, %v5531_v8   ;;  %v4005_v8 = vld [vmem:[#allocation4 + $0x88] sm:$0xff] }
 0x9f2   : > { %4442 = vperm.xlu0 %5424, %v5533_v45  }
 0x9f5   : > { %4457 = vperm.xlu1 %5425, %v5535_v23  }
 0x9f6   : > { %4452 = vperm.xlu0 %5424, %v5537_v41   ;;  %v4007_v41 = vld [vmem:[#allocation4 + $0x98] sm:$0xff] }
 0x9f9   : > { %4467 = vperm.xlu1 %5425, %v5539_v44  }
 0x9fa   : > { %4462 = vperm.xlu0 %5424, %v5541_v19  }
 0x9fd   : > { %4477 = vperm.xlu1 %5425, %v5543_v28  }
 0x9fe   : > { %4472 = vperm.xlu0 %5424, %v5545_v63  }
 0xa01   : > { %4487 = vperm.xlu1 %5425, %v5547_v25   ;;  %v4009_v25 = vld [vmem:[#allocation4 + $0xa8] sm:$0xff] }
 0xa02   : > { %4482 = vperm.xlu0 %5424, %v5549_v46   ;;  %v4008_v46 = vld [vmem:[#allocation4 + $0xa0] sm:$0xff] }
 0xa04   : > { %v4193_v40 = vpop.permute.xlu1 %4192 }
 0xa05   : > { %v4502_v3 = vmul.f32 %v4193_v40, %v3990_v56  ;;  %v4183_v0 = vpop.permute.xlu0 %4182  ;;  %4497 = vperm.xlu1 %5425, %v5551_v58   ;;  %v4011_v40 = vld [vmem:[#allocation4 + $0xb8] sm:$0xff] }
 0xa06   : > { %v4500_v36 = vmul.f32 %v4183_v0, %v3988_v29  ;;  %4492 = vperm.xlu0 %5424, %v5553_v62  }
 0xa07   : > { %4566 = vst.msk [vmem:[%s5670_s7 + $0x10] sm:$0xff] %vm524_vm2, %v4502_v3  ;;  %v4010_v3 = vld [vmem:[#allocation4 + $0xb0] sm:$0xff] }
 0xa08   : > { %4564 = vst.msk [vmem:[%s5670_s7] sm:$0xff] %vm524_vm2, %v4500_v36  ;;  %v4198_v59 = vpop.permute.xlu1 %4197 }
 0xa09   : > { %v4503_v5 = vmul.f32 %v4198_v59, %v3991_v18  ;;  %v4188_v11 = vpop.permute.xlu0 %4187  ;;  %v4013_v59 = vld [vmem:[#allocation4 + $0xc8] sm:$0xff] }
 0xa0a   : > { %v4501_v31 = vmul.f32 %v4188_v11, %v3989_v55 }
 0xa0b   : > { %4567 = vst.msk [vmem:[%s5670_s7 + $0x18] sm:$0xff] %vm524_vm2, %v4503_v5  ;;  %v4012_v5 = vld [vmem:[#allocation4 + $0xc0] sm:$0xff] }
 0xa0c   : > { %4565 = vst.msk [vmem:[%s5670_s7 + $0x8] sm:$0xff] %vm524_vm2, %v4501_v31  ;;  %v4208_v52 = vpop.permute.xlu1 %4207 }
 0xa0d   : > { %v4505_v42 = vmul.f32 %v4208_v52, %v3993_v61  ;;  %v4203_v37 = vpop.permute.xlu0 %4202  ;;  %v4015_v52 = vld [vmem:[#allocation4 + $0xd8] sm:$0xff] }
 0xa0e   : > { %v4504_v2 = vmul.f32 %v4203_v37, %v3992_v22 }
 0xa0f   : > { %4569 = vst.msk [vmem:[%s5670_s7 + $0x28] sm:$0xff] %vm524_vm2, %v4505_v42  ;;  %v4014_v42 = vld [vmem:[#allocation4 + $0xd0] sm:$0xff] }
 0xa10   : > { %4568 = vst.msk [vmem:[%s5670_s7 + $0x20] sm:$0xff] %vm524_vm2, %v4504_v2  ;;  %v4218_v30 = vpop.permute.xlu1 %4217 }
 0xa11   : > { %v4507_v10 = vmul.f32 %v4218_v30, %v3995_v43  ;;  %v4213_v53 = vpop.permute.xlu0 %4212  ;;  %v4017_v30 = vld [vmem:[#allocation4 + $0xe8] sm:$0xff] }
 0xa12   : > { %v4506_v13 = vmul.f32 %v4213_v53, %v3994_v21 }
 0xa13   : > { %4571 = vst.msk [vmem:[%s5670_s7 + $0x38] sm:$0xff] %vm524_vm2, %v4507_v10  ;;  %v4016_v10 = vld [vmem:[#allocation4 + $0xe0] sm:$0xff] }
 0xa14   : > { %4570 = vst.msk [vmem:[%s5670_s7 + $0x30] sm:$0xff] %vm524_vm2, %v4506_v13  ;;  %v4228_v16 = vpop.permute.xlu1 %4227 }
 0xa15   : > { %v4509_v39 = vmul.f32 %v4228_v16, %v3997_v14  ;;  %v4223_v49 = vpop.permute.xlu0 %4222  ;;  %v4019_v16 = vld [vmem:[#allocation4 + $0xf8] sm:$0xff] }
 0xa16   : > { %v4508_v27 = vmul.f32 %v4223_v49, %v3996_v26 }
 0xa17   : > { %4573 = vst.msk [vmem:[%s5670_s7 + $0x48] sm:$0xff] %vm524_vm2, %v4509_v39  ;;  %v4018_v39 = vld [vmem:[#allocation4 + $0xf0] sm:$0xff] }
 0xa18   : > { %4572 = vst.msk [vmem:[%s5670_s7 + $0x40] sm:$0xff] %vm524_vm2, %v4508_v27  ;;  %v4238_v15 = vpop.permute.xlu1 %4237 }
 0xa19   : > { %v4511_v9 = vmul.f32 %v4238_v15, %v3999_v4  ;;  %v4233_v60 = vpop.permute.xlu0 %4232  ;;  %v4021_v15 = vld [vmem:[#allocation4 + $0x108] sm:$0xff] }
 0xa1a   : > { %v4510_v57 = vmul.f32 %v4233_v60, %v3998_v51 }
 0xa1b   : > { %4575 = vst.msk [vmem:[%s5670_s7 + $0x58] sm:$0xff] %vm524_vm2, %v4511_v9  ;;  %v4020_v9 = vld [vmem:[#allocation4 + $0x100] sm:$0xff] }
 0xa1c   : > { %4574 = vst.msk [vmem:[%s5670_s7 + $0x50] sm:$0xff] %vm524_vm2, %v4510_v57  ;;  %v4248_v32 = vpop.permute.xlu1 %4247 }
 0xa1d   : > { %v4513_v1 = vmul.f32 %v4248_v32, %v4001_v34  ;;  %v4243_v48 = vpop.permute.xlu0 %4242  ;;  %v4023_v32 = vld [vmem:[#allocation4 + $0x118] sm:$0xff] }
 0xa1e   : > { %v4512_v12 = vmul.f32 %v4243_v48, %v4000_v47 }
 0xa1f   : > { %4577 = vst.msk [vmem:[%s5670_s7 + $0x68] sm:$0xff] %vm524_vm2, %v4513_v1  ;;  %v4022_v1 = vld [vmem:[#allocation4 + $0x110] sm:$0xff] }
 0xa20   : > { %4576 = vst.msk [vmem:[%s5670_s7 + $0x60] sm:$0xff] %vm524_vm2, %v4512_v12  ;;  %v4258_v50 = vpop.permute.xlu1 %4257 }
 0xa21   : > { %v4515_v33 = vmul.f32 %v4258_v50, %v4003_v24  ;;  %v4253_v17 = vpop.permute.xlu0 %4252  ;;  %v4025_v50 = vld [vmem:[#allocation4 + $0x128] sm:$0xff] }
 0xa22   : > { %v4514_v35 = vmul.f32 %v4253_v17, %v4002_v54 }
 0xa23   : > { %4579 = vst.msk [vmem:[%s5670_s7 + $0x78] sm:$0xff] %vm524_vm2, %v4515_v33  ;;  %v4024_v33 = vld [vmem:[#allocation4 + $0x120] sm:$0xff] }
 0xa24   : > { %4578 = vst.msk [vmem:[%s5670_s7 + $0x70] sm:$0xff] %vm524_vm2, %v4514_v35  ;;  %v4268_v45 = vpop.permute.xlu1 %4267 }
 0xa25   : > { %v4517_v38 = vmul.f32 %v4268_v45, %v4005_v8  ;;  %v4263_v23 = vpop.permute.xlu0 %4262  ;;  %v4027_v45 = vld [vmem:[#allocation4 + $0x138] sm:$0xff] }
 0xa26   : > { %v4516_v7 = vmul.f32 %v4263_v23, %v4004_v6 }
 0xa27   : > { %4581 = vst.msk [vmem:[%s5670_s7 + $0x88] sm:$0xff] %vm524_vm2, %v4517_v38  ;;  %v4026_v38 = vld [vmem:[#allocation4 + $0x130] sm:$0xff] }
 0xa28   : > { %4580 = vst.msk [vmem:[%s5670_s7 + $0x80] sm:$0xff] %vm524_vm2, %v4516_v7  ;;  %v4278_v44 = vpop.permute.xlu1 %4277 }
 0xa29   : > { %v4519_v19 = vmul.f32 %v4278_v44, %v4007_v41  ;;  %v4273_v28 = vpop.permute.xlu0 %4272  ;;  %v4029_v44 = vld [vmem:[#allocation4 + $0x148] sm:$0xff] }
 0xa2a   : > { %v4518_v63 = vmul.f32 %v4273_v28, %v4006_v20 }
 0xa2b   : > { %4583 = vst.msk [vmem:[%s5670_s7 + $0x98] sm:$0xff] %vm524_vm2, %v4519_v19  ;;  %v4028_v19 = vld [vmem:[#allocation4 + $0x140] sm:$0xff] }
 0xa2c   : > { %4582 = vst.msk [vmem:[%s5670_s7 + $0x90] sm:$0xff] %vm524_vm2, %v4518_v63  ;;  %v4288_v58 = vpop.permute.xlu1 %4287 }
 0xa2d   : > { %v4521_v56 = vmul.f32 %v4288_v58, %v4009_v25  ;;  %v4283_v62 = vpop.permute.xlu0 %4282  ;;  %v4031_v58 = vld [vmem:[#allocation4 + $0x158] sm:$0xff] }
 0xa2e   : > { %v4520_v29 = vmul.f32 %v4283_v62, %v4008_v46 }
 0xa2f   : > { %4585 = vst.msk [vmem:[%s5670_s7 + $0xa8] sm:$0xff] %vm524_vm2, %v4521_v56  ;;  %v4030_v56 = vld [vmem:[#allocation4 + $0x150] sm:$0xff] }
 0xa30   : > { %4584 = vst.msk [vmem:[%s5670_s7 + $0xa0] sm:$0xff] %vm524_vm2, %v4520_v29  ;;  %v4298_v0 = vpop.permute.xlu1 %4297 }
 0xa31   : > { %v4523_v36 = vmul.f32 %v4298_v0, %v4011_v40  ;;  %v4293_v18 = vpop.permute.xlu0 %4292  ;;  %v4033_v0 = vld [vmem:[#allocation4 + $0x168] sm:$0xff] }
 0xa32   : > { %v4522_v55 = vmul.f32 %v4293_v18, %v4010_v3 }
 0xa33   : > { %4587 = vst.msk [vmem:[%s5670_s7 + $0xb8] sm:$0xff] %vm524_vm2, %v4523_v36  ;;  %v4032_v36 = vld [vmem:[#allocation4 + $0x160] sm:$0xff] }
 0xa34   : > { %4586 = vst.msk [vmem:[%s5670_s7 + $0xb0] sm:$0xff] %vm524_vm2, %v4522_v55  ;;  %v4308_v11 = vpop.permute.xlu1 %4307 }
 0xa35   : > { %v4525_v31 = vmul.f32 %v4308_v11, %v4013_v59  ;;  %v4303_v61 = vpop.permute.xlu0 %4302  ;;  %v4035_v11 = vld [vmem:[#allocation4 + $0x178] sm:$0xff] }
 0xa36   : > { %v4524_v22 = vmul.f32 %v4303_v61, %v4012_v5 }
 0xa37   : > { %4589 = vst.msk [vmem:[%s5670_s7 + $0xc8] sm:$0xff] %vm524_vm2, %v4525_v31  ;;  %v4034_v31 = vld [vmem:[#allocation4 + $0x170] sm:$0xff] }
 0xa38   : > { %4588 = vst.msk [vmem:[%s5670_s7 + $0xc0] sm:$0xff] %vm524_vm2, %v4524_v22  ;;  %v4318_v37 = vpop.permute.xlu1 %4317 }
 0xa39   : > { %v4527_v2 = vmul.f32 %v4318_v37, %v4015_v52  ;;  %v4313_v43 = vpop.permute.xlu0 %4312  ;;  %v4037_v37 = vld [vmem:[#allocation4 + $0x188] sm:$0xff] }
 0xa3a   : > { %v4526_v21 = vmul.f32 %v4313_v43, %v4014_v42 }
 0xa3b   : > { %4591 = vst.msk [vmem:[%s5670_s7 + $0xd8] sm:$0xff] %vm524_vm2, %v4527_v2  ;;  %v4036_v2 = vld [vmem:[#allocation4 + $0x180] sm:$0xff] }
 0xa3c   : > { %4590 = vst.msk [vmem:[%s5670_s7 + $0xd0] sm:$0xff] %vm524_vm2, %v4526_v21  ;;  %v4328_v53 = vpop.permute.xlu1 %4327 }
 0xa3d   : > { %v4529_v13 = vmul.f32 %v4328_v53, %v4017_v30  ;;  %v4323_v14 = vpop.permute.xlu0 %4322  ;;  %v4039_v53 = vld [vmem:[#allocation4 + $0x198] sm:$0xff] }
 0xa3e   : > { %v4528_v26 = vmul.f32 %v4323_v14, %v4016_v10 }
 0xa3f   : > { %4593 = vst.msk [vmem:[%s5670_s7 + $0xe8] sm:$0xff] %vm524_vm2, %v4529_v13  ;;  %v4038_v13 = vld [vmem:[#allocation4 + $0x190] sm:$0xff] }
 0xa40   : > { %4592 = vst.msk [vmem:[%s5670_s7 + $0xe0] sm:$0xff] %vm524_vm2, %v4528_v26  ;;  %v4338_v49 = vpop.permute.xlu1 %4337 }
 0xa41   : > { %v4531_v27 = vmul.f32 %v4338_v49, %v4019_v16  ;;  %v4333_v4 = vpop.permute.xlu0 %4332  ;;  %v4041_v49 = vld [vmem:[#allocation4 + $0x1a8] sm:$0xff] }
 0xa42   : > { %v4530_v51 = vmul.f32 %v4333_v4, %v4018_v39 }
 0xa43   : > { %4595 = vst.msk [vmem:[%s5670_s7 + $0xf8] sm:$0xff] %vm524_vm2, %v4531_v27  ;;  %v4040_v27 = vld [vmem:[#allocation4 + $0x1a0] sm:$0xff] }
 0xa44   : > { %4594 = vst.msk [vmem:[%s5670_s7 + $0xf0] sm:$0xff] %vm524_vm2, %v4530_v51  ;;  %v4348_v60 = vpop.permute.xlu1 %4347 }
 0xa45   : > { %v4533_v57 = vmul.f32 %v4348_v60, %v4021_v15  ;;  %v4343_v34 = vpop.permute.xlu0 %4342  ;;  %v4043_v60 = vld [vmem:[#allocation4 + $0x1b8] sm:$0xff] }
 0xa46   : > { %v4532_v47 = vmul.f32 %v4343_v34, %v4020_v9 }
 0xa47   : > { %4597 = vst.msk [vmem:[%s5670_s7 + $0x108] sm:$0xff] %vm524_vm2, %v4533_v57  ;;  %v4042_v57 = vld [vmem:[#allocation4 + $0x1b0] sm:$0xff] }
 0xa48   : > { %4596 = vst.msk [vmem:[%s5670_s7 + $0x100] sm:$0xff] %vm524_vm2, %v4532_v47  ;;  %v4358_v48 = vpop.permute.xlu1 %4357 }
 0xa49   : > { %v4535_v12 = vmul.f32 %v4358_v48, %v4023_v32  ;;  %v4353_v24 = vpop.permute.xlu0 %4352  ;;  %v4045_v48 = vld [vmem:[#allocation4 + $0x1c8] sm:$0xff] }
 0xa4a   : > { %v4534_v54 = vmul.f32 %v4353_v24, %v4022_v1 }
 0xa4b   : > { %4599 = vst.msk [vmem:[%s5670_s7 + $0x118] sm:$0xff] %vm524_vm2, %v4535_v12  ;;  %v4044_v12 = vld [vmem:[#allocation4 + $0x1c0] sm:$0xff] }
 0xa4c   : > { %4598 = vst.msk [vmem:[%s5670_s7 + $0x110] sm:$0xff] %vm524_vm2, %v4534_v54  ;;  %v4368_v17 = vpop.permute.xlu1 %4367 }
 0xa4d   : > { %v4537_v35 = vmul.f32 %v4368_v17, %v4025_v50  ;;  %v4363_v8 = vpop.permute.xlu0 %4362  ;;  %v4047_v17 = vld [vmem:[#allocation4 + $0x1d8] sm:$0xff] }
 0xa4e   : > { %v4536_v6 = vmul.f32 %v4363_v8, %v4024_v33 }
 0xa4f   : > { %4601 = vst.msk [vmem:[%s5670_s7 + $0x128] sm:$0xff] %vm524_vm2, %v4537_v35  ;;  %v4046_v35 = vld [vmem:[#allocation4 + $0x1d0] sm:$0xff] }
 0xa50   : > { %4600 = vst.msk [vmem:[%s5670_s7 + $0x120] sm:$0xff] %vm524_vm2, %v4536_v6  ;;  %v4378_v23 = vpop.permute.xlu1 %4377 }
 0xa51   : > { %v4539_v7 = vmul.f32 %v4378_v23, %v4027_v45  ;;  %v4373_v41 = vpop.permute.xlu0 %4372  ;;  %v4049_v23 = vld [vmem:[#allocation4 + $0x1e8] sm:$0xff] }
 0xa52   : > { %v4538_v20 = vmul.f32 %v4373_v41, %v4026_v38 }
 0xa53   : > { %4603 = vst.msk [vmem:[%s5670_s7 + $0x138] sm:$0xff] %vm524_vm2, %v4539_v7  ;;  %v4048_v7 = vld [vmem:[#allocation4 + $0x1e0] sm:$0xff] }
 0xa54   : > { %4602 = vst.msk [vmem:[%s5670_s7 + $0x130] sm:$0xff] %vm524_vm2, %v4538_v20  ;;  %v4388_v28 = vpop.permute.xlu1 %4387 }
 0xa55   : > { %v4541_v63 = vmul.f32 %v4388_v28, %v4029_v44  ;;  %v4383_v25 = vpop.permute.xlu0 %4382  ;;  %v4051_v28 = vld [vmem:[#allocation4 + $0x1f8] sm:$0xff] }
 0xa56   : > { %v4540_v46 = vmul.f32 %v4383_v25, %v4028_v19 }
 0xa57   : > { %4605 = vst.msk [vmem:[%s5670_s7 + $0x148] sm:$0xff] %vm524_vm2, %v4541_v63  ;;  %v4050_v63 = vld [vmem:[#allocation4 + $0x1f0] sm:$0xff] }
 0xa58   : > { %4604 = vst.msk [vmem:[%s5670_s7 + $0x140] sm:$0xff] %vm524_vm2, %v4540_v46  ;;  %v4398_v62 = vpop.permute.xlu1 %4397 }
 0xa59   : > { %v4543_v29 = vmul.f32 %v4398_v62, %v4031_v58  ;;  %v4393_v40 = vpop.permute.xlu0 %4392 }
 0xa5a   : > { %v4542_v3 = vmul.f32 %v4393_v40, %v4030_v56 }
 0xa5b   : > { %4607 = vst.msk [vmem:[%s5670_s7 + $0x158] sm:$0xff] %vm524_vm2, %v4543_v29 }
 0xa5c   : > { %4606 = vst.msk [vmem:[%s5670_s7 + $0x150] sm:$0xff] %vm524_vm2, %v4542_v3  ;;  %v4408_v18 = vpop.permute.xlu1 %4407 }
 0xa5d   : > { %v4545_v55 = vmul.f32 %v4408_v18, %v4033_v0  ;;  %v4403_v59 = vpop.permute.xlu0 %4402 }
 0xa5e   : > { %v4544_v5 = vmul.f32 %v4403_v59, %v4032_v36 }
 0xa5f   : > { %4609 = vst.msk [vmem:[%s5670_s7 + $0x168] sm:$0xff] %vm524_vm2, %v4545_v55 }
 0xa60   : > { %4608 = vst.msk [vmem:[%s5670_s7 + $0x160] sm:$0xff] %vm524_vm2, %v4544_v5  ;;  %v4418_v61 = vpop.permute.xlu1 %4417 }
 0xa61   : > { %v4547_v22 = vmul.f32 %v4418_v61, %v4035_v11  ;;  %v4413_v52 = vpop.permute.xlu0 %4412 }
 0xa62   : > { %v4546_v42 = vmul.f32 %v4413_v52, %v4034_v31 }
 0xa63   : > { %4611 = vst.msk [vmem:[%s5670_s7 + $0x178] sm:$0xff] %vm524_vm2, %v4547_v22 }
 0xa64   : > { %4610 = vst.msk [vmem:[%s5670_s7 + $0x170] sm:$0xff] %vm524_vm2, %v4546_v42  ;;  %v4428_v43 = vpop.permute.xlu1 %4427 }
 0xa65   : > { %v4549_v21 = vmul.f32 %v4428_v43, %v4037_v37  ;;  %v4423_v30 = vpop.permute.xlu0 %4422 }
 0xa66   : > { %v4548_v10 = vmul.f32 %v4423_v30, %v4036_v2 }
 0xa67   : > { %4613 = vst.msk [vmem:[%s5670_s7 + $0x188] sm:$0xff] %vm524_vm2, %v4549_v21 }
 0xa68   : > { %4612 = vst.msk [vmem:[%s5670_s7 + $0x180] sm:$0xff] %vm524_vm2, %v4548_v10  ;;  %v4438_v14 = vpop.permute.xlu1 %4437 }
 0xa69   : > { %v4551_v26 = vmul.f32 %v4438_v14, %v4039_v53  ;;  %v4433_v16 = vpop.permute.xlu0 %4432 }
 0xa6a   : > { %v4550_v39 = vmul.f32 %v4433_v16, %v4038_v13 }
 0xa6b   : > { %4615 = vst.msk [vmem:[%s5670_s7 + $0x198] sm:$0xff] %vm524_vm2, %v4551_v26 }
 0xa6c   : > { %4614 = vst.msk [vmem:[%s5670_s7 + $0x190] sm:$0xff] %vm524_vm2, %v4550_v39  ;;  %v4448_v4 = vpop.permute.xlu1 %4447 }
 0xa6d   : > { %v4553_v51 = vmul.f32 %v4448_v4, %v4041_v49  ;;  %v4443_v15 = vpop.permute.xlu0 %4442 }
 0xa6e   : > { %v4552_v9 = vmul.f32 %v4443_v15, %v4040_v27 }
 0xa6f   : > { %4617 = vst.msk [vmem:[%s5670_s7 + $0x1a8] sm:$0xff] %vm524_vm2, %v4553_v51 }
 0xa70   : > { %4616 = vst.msk [vmem:[%s5670_s7 + $0x1a0] sm:$0xff] %vm524_vm2, %v4552_v9  ;;  %v4458_v34 = vpop.permute.xlu1 %4457 }
 0xa71   : > { %v4555_v47 = vmul.f32 %v4458_v34, %v4043_v60  ;;  %v4453_v32 = vpop.permute.xlu0 %4452 }
 0xa72   : > { %v4554_v1 = vmul.f32 %v4453_v32, %v4042_v57 }
 0xa73   : > { %4619 = vst.msk [vmem:[%s5670_s7 + $0x1b8] sm:$0xff] %vm524_vm2, %v4555_v47 }
 0xa74   : > { %4618 = vst.msk [vmem:[%s5670_s7 + $0x1b0] sm:$0xff] %vm524_vm2, %v4554_v1  ;;  %v4468_v24 = vpop.permute.xlu1 %4467 }
 0xa75   : > { %v4557_v54 = vmul.f32 %v4468_v24, %v4045_v48  ;;  %v4463_v50 = vpop.permute.xlu0 %4462 }
 0xa76   : > { %v4556_v33 = vmul.f32 %v4463_v50, %v4044_v12 }
 0xa77   : > { %4621 = vst.msk [vmem:[%s5670_s7 + $0x1c8] sm:$0xff] %vm524_vm2, %v4557_v54 }
 0xa78   : > { %4620 = vst.msk [vmem:[%s5670_s7 + $0x1c0] sm:$0xff] %vm524_vm2, %v4556_v33  ;;  %v4478_v8 = vpop.permute.xlu1 %4477 }
 0xa79   : > { %v4559_v6 = vmul.f32 %v4478_v8, %v4047_v17  ;;  %v4473_v45 = vpop.permute.xlu0 %4472 }
 0xa7a   : > { %v4558_v38 = vmul.f32 %v4473_v45, %v4046_v35 }
 0xa7b   : > { %4623 = vst.msk [vmem:[%s5670_s7 + $0x1d8] sm:$0xff] %vm524_vm2, %v4559_v6 }
 0xa7c   : > { %4622 = vst.msk [vmem:[%s5670_s7 + $0x1d0] sm:$0xff] %vm524_vm2, %v4558_v38  ;;  %v4488_v41 = vpop.permute.xlu1 %4487 }
 0xa7d   : > { %v4561_v20 = vmul.f32 %v4488_v41, %v4049_v23  ;;  %v4483_v44 = vpop.permute.xlu0 %4482 }
 0xa7e   : > { %v4560_v19 = vmul.f32 %v4483_v44, %v4048_v7 }
 0xa7f   : > { %4625 = vst.msk [vmem:[%s5670_s7 + $0x1e8] sm:$0xff] %vm524_vm2, %v4561_v20 }
 0xa80   : > { %4624 = vst.msk [vmem:[%s5670_s7 + $0x1e0] sm:$0xff] %vm524_vm2, %v4560_v19  ;;  %v4498_v25 = vpop.permute.xlu1 %4497 }
 0xa81   : > { %v4563_v46 = vmul.f32 %v4498_v25, %v4051_v28  ;;  %v4493_v58 = vpop.permute.xlu0 %4492 }
 0xa82   : > { %v4562_v56 = vmul.f32 %v4493_v58, %v4050_v63 }
 0xa83   : > { %4627 = vst.msk [vmem:[%s5670_s7 + $0x1f8] sm:$0xff] %vm524_vm2, %v4563_v46 }
 0xa84   : > { %4626 = vst.msk [vmem:[%s5670_s7 + $0x1f0] sm:$0xff] %vm524_vm2, %v4562_v56 }
 0xa85 PF: > { %s13_s16 = sadd.s32 1, %s5592_s16   ;;  %s9398_s12 = smov %s5584_s14 }
 0xa86   : > { %p10_p9 = scmp.ge.s32.totalorder %s13_s16, 34   ;;  %s9399_s13 = smov %s5588_s15 }
 0xa87   : > { %s9400_s14 = smov %s9403_s17  ;;  %s9401_s15 = smov %s9407_s18 }
 0xa88   :  { %12 = sbr.rel (!%p10_p9) target bundleno = 3 (0x3), region = 76 }

</bundles_post_ra>
